<compile_context>
chip_gen: v5e
topology: v5e:2x2
jax: 0.10.0
libtpu: 0.0.40
codegen_flags: <defaults>
</compile_context>

<pallas_src>
import numpy as np
import jax
import jax.numpy as jnp
from jax.experimental import pallas as pl
from jax.experimental.pallas import tpu as pltpu

QSIZE = 16
SHF_AMT = 32 - QSIZE            # 16, as in the torch module
SCALE = 1.0
BN_EPS = 1e-5

HEAD = 8                        # zero halo rows before the first image block
TAIL = 8                        # zero halo rows after the last image block
HB = 32                         # rows per image (28 valid + 4 junk), mult of 8

L1 = 28 * 16                    # 448 valid conv1 lanes        (lane = w*16 + c)
L1P = 27 * 16                   # 432 valid dilated-pool1 lanes (lane = 32*j1 + c)
L2 = 14 * 32                    # 448 valid conv2 lanes        (lane = 32*jo + c)
L2P = 13 * 32                   # 416 valid dilated-pool2 lanes (lane = 64*j2 + c)
LPAD = 512                      # lane-padded width for all of the above
KIN = 128                       # conv1 LHS lanes: 3 * 32 row-shifted views + pad
LLIN = 7 * LPAD                 # 3584: fused-linear LHS lanes
LOUT = 128                      # lane-padded logits (10 valid)


# ----------------------------------------------------------------------------
# Fused whole-network kernel (one batch block per grid step)
# ----------------------------------------------------------------------------
def _make_kernel(nb):
    r_rows = nb * HB
    inv_q = float(1.0 / (1 << SHF_AMT))       # exact power of two

    def kernel(x_ref, b1_ref, bias1_ref, b2_ref, bias2_ref, wl_ref, biasl_ref,
               out_ref, a1_ref, q1_ref, c2_ref, lin_ref):
        f32 = jnp.float32

        # ---- minimal halo zeroing: only rows/lanes that are actually read ----
        a1_ref[HEAD + r_rows:HEAD + r_rows + 1, :] = jnp.zeros((1, LPAD), f32)
        q1_ref[HEAD - 2:HEAD, :] = jnp.zeros((2, LPAD), f32)
        q1_ref[HEAD + r_rows:HEAD + r_rows + 2, :] = jnp.zeros((2, LPAD), f32)
        c2_ref[HEAD + r_rows:HEAD + r_rows + 2, :] = jnp.zeros((2, LPAD), f32)
        lin_ref[...] = jnp.zeros((nb, LLIN), f32)

        # ---- conv1 (1->16, 3x3, pad 1) + folded BN + (>>16) + relu: 1 matmul --
        #      LHS was pre-laid-out host-side; B1 is a (128, 512) block-Toeplitz.
        acc1 = jnp.dot(x_ref[0], b1_ref[...], preferred_element_type=f32)
        acc1 = acc1 + bias1_ref[...]
        y1 = jnp.maximum(jnp.floor(acc1 * inv_q), 0.0)
        # zero the 4 junk rows per image so they act as conv2's zero padding
        row_in_img = jax.lax.broadcasted_iota(jnp.int32, (r_rows, 1), 0) & (HB - 1)
        y1 = jnp.where(row_in_img < 28, y1, 0.0)
        a1_ref[HEAD:HEAD + r_rows, :] = y1

        # ---- maxpool1 2x2, kept dilated (valid at even rows / even 16-lane blk)
        hmax = jnp.maximum(a1_ref[HEAD:HEAD + r_rows, :],
                           a1_ref[HEAD + 1:HEAD + 1 + r_rows, :])
        q1 = jnp.maximum(hmax[:, 0:L1P], hmax[:, 16:16 + L1P])
        q1_ref[HEAD:HEAD + r_rows, 0:L1P] = q1
        q1_ref[HEAD:HEAD + r_rows, L1P:LPAD] = jnp.zeros((r_rows, LPAD - L1P), f32)

        # ---- conv2 (16->32, 3x3, pad 1) + BN + (>>16) + relu ------------------
        #      3 row-shifted matmuls; pool1's stride-2 selection is encoded in B2
        acc2 = jnp.dot(q1_ref[HEAD - 2:HEAD - 2 + r_rows, :], b2_ref[0],
                       preferred_element_type=f32)
        acc2 = acc2 + jnp.dot(q1_ref[HEAD:HEAD + r_rows, :], b2_ref[1],
                              preferred_element_type=f32)
        acc2 = acc2 + jnp.dot(q1_ref[HEAD + 2:HEAD + 2 + r_rows, :], b2_ref[2],
                              preferred_element_type=f32)
        acc2 = acc2 + bias2_ref[...]
        y2 = jnp.maximum(jnp.floor(acc2 * inv_q), 0.0)
        c2_ref[HEAD:HEAD + r_rows, :] = y2

        # ---- maxpool2 2x2, dilated; keep only the 7 valid rows per image ------
        h2 = jnp.maximum(c2_ref[HEAD:HEAD + r_rows, :],
                         c2_ref[HEAD + 2:HEAD + 2 + r_rows, :])
        p2 = jnp.maximum(h2[:, 0:L2P], h2[:, 32:32 + L2P])       # (r_rows, 416)
        for n in range(nb):
            for i2 in range(7):
                r = n * HB + 4 * i2
                lin_ref[n:n + 1, i2 * LPAD:i2 * LPAD + L2P] = p2[r:r + 1, :]

        # ---- lin2 (1568 -> 10, lane-padded to 128) + (>>16): 1 matmul ---------
        accl = jnp.dot(lin_ref[...], wl_ref[...], preferred_element_type=f32)
        accl = accl + biasl_ref[...]
        out_ref[0] = (accl.astype(jnp.int32) >> SHF_AMT).astype(f32)

    return kernel


# ----------------------------------------------------------------------------
# Host-side one-time weight packing (BN folded; block-Toeplitz matrices)
# ----------------------------------------------------------------------------
def fold_bn(gamma, beta, mean, var):
    s = gamma / np.sqrt(var + BN_EPS)
    return s, beta - mean * s


def pack_params(p):
    to_np = lambda a: np.asarray(jax.device_get(a), np.float32)
    w1, b1 = to_np(p["w1"]), to_np(p["b1"])
    w2, b2 = to_np(p["w2"]), to_np(p["b2"])
    wl, bl = to_np(p["wl"]), to_np(p["bl"])
    s1, t1 = fold_bn(to_np(p["g1"]), to_np(p["be1"]), to_np(p["rm1"]), to_np(p["rv1"]))
    s2, t2 = fold_bn(to_np(p["g2"]), to_np(p["be2"]), to_np(p["rm2"]), to_np(p["rv2"]))

    w1f = w1 * s1[:, None, None, None]          # BN folded: w' = w * s
    b1f = b1 * s1 + t1                          # b' = b*s + t
    w2f = w2 * s2[:, None, None, None]
    b2f = b2 * s2 + t2

    # conv1: one (128, 512) matrix; LHS lane kh*32 + wp holds the zero-padded
    # input at (row ho+kh, padded col wp); output lane = 16*wo + c.
    B1 = np.zeros((KIN, LPAD), np.float32)
    for kh in range(3):
        for kw in range(3):
            for wo in range(28):
                B1[kh * 32 + wo + kw, 16 * wo:16 * wo + 16] = w1f[:, 0, kh, kw]
    bias1 = np.zeros((1, LPAD), np.float32)
    bias1[0, :L1] = np.tile(b1f, 28)

    # conv2: B2[kh] maps dilated-pool1 lanes (32*jp + ci) -> (32*jo + co);
    # missing jp rows implement the W zero padding AND the stride-2 pooling.
    B2 = np.zeros((3, LPAD, LPAD), np.float32)
    for kh in range(3):
        for kw in range(3):
            for jo in range(14):
                jp = jo - 1 + kw
                if 0 <= jp <= 13:
                    B2[kh, 32 * jp:32 * jp + 16, 32 * jo:32 * jo + 32] = \
                        w2f[:, :, kh, kw].T
    bias2 = np.zeros((1, LPAD), np.float32)
    bias2[0, :L2] = np.tile(b2f, 14)

    # linear: one (3584, 128) matrix; LHS lane i2*512 + 64*j2 + c is pooled
    # pixel (c, i2, j2); torch NCHW flatten order encoded in the column gather.
    WL = np.zeros((LLIN, LOUT), np.float32)
    for i2 in range(7):
        for j2 in range(7):
            cols = np.arange(32) * 49 + i2 * 7 + j2
            WL[i2 * LPAD + 64 * j2:i2 * LPAD + 64 * j2 + 32, 0:10] = wl[:, cols].T
    biasL = np.zeros((1, LOUT), np.float32)
    biasL[0, :10] = bl

    packed = dict(B1=B1, bias1=bias1, B2=B2, bias2=bias2, WL=WL, biasL=biasL)
    return {k: jnp.asarray(v) for k, v in packed.items()}


# ----------------------------------------------------------------------------
# Forward pass
# ----------------------------------------------------------------------------
def _pick_block(N):
    # One fat grid step for small N (v5e/v6e: single TC, extra steps are pure
    # overhead); 32-image blocks (MXU M = 1024) and >=2 parallel steps for
    # larger N so v7x's two TensorCores both get work.
    if N <= 32:
        return max(N, 1), 1
    nb = 32
    return nb, -(-N // nb)


def _build_conv1_lhs(x_nchw, nb, g):
    """(N,1,28,28) -> (g, nb*32, 128) conv1 LHS; layout done by XLA + DMA."""
    N = x_nchw.shape[0]
    x = jnp.round(x_nchw.astype(jnp.float32) * SCALE).reshape(N, 28, 28)
    xpad = jnp.pad(x, ((0, 0), (1, 1), (1, 1)))                # (N, 30, 30)
    pieces = [jnp.pad(xpad[:, kh:kh + 28, :], ((0, 0), (0, HB - 28), (0, 2)))
              for kh in range(3)]                              # 3 x (N, 32, 32)
    pieces.append(jnp.zeros((N, HB, 32), jnp.float32))
    lhs = jnp.concatenate(pieces, axis=2)                      # (N, 32, 128)
    npad = g * nb
    if npad != N:
        lhs = jnp.concatenate(
            [lhs, jnp.zeros((npad - N, HB, KIN), jnp.float32)], axis=0)
    return lhs.reshape(g, nb * HB, KIN)


def my_convnet_forward(x_nchw, packed):
    # TODO(synk): QuantStub/DeQuantStub are identity for the unconverted model,
    # inter_to_csv is a host file-dump side effect with no kernel equivalent,
    # and BatchNorm is folded with eval-mode running statistics.
    N = x_nchw.shape[0]
    nb, g = _pick_block(N)
    r_rows = nb * HB
    re_rows = HEAD + r_rows + TAIL
    lhs = _build_conv1_lhs(x_nchw, nb, g)

    out = pl.pallas_call(
        _make_kernel(nb),
        out_shape=jax.ShapeDtypeStruct((g, nb, LOUT), jnp.float32),
        grid_spec=pltpu.PrefetchScalarGridSpec(
            num_scalar_prefetch=0,
            grid=(g,),
            in_specs=[
                pl.BlockSpec((1, r_rows, KIN), lambda i: (i, 0, 0)),
                pl.BlockSpec((KIN, LPAD), lambda i: (0, 0)),
                pl.BlockSpec((1, LPAD), lambda i: (0, 0)),
                pl.BlockSpec((3, LPAD, LPAD), lambda i: (0, 0, 0)),
                pl.BlockSpec((1, LPAD), lambda i: (0, 0)),
                pl.BlockSpec((LLIN, LOUT), lambda i: (0, 0)),
                pl.BlockSpec((1, LOUT), lambda i: (0, 0)),
            ],
            out_specs=pl.BlockSpec((1, nb, LOUT), lambda i: (i, 0, 0)),
            scratch_shapes=[
                pltpu.VMEM((re_rows, LPAD), jnp.float32),   # conv1 activations
                pltpu.VMEM((re_rows, LPAD), jnp.float32),   # dilated pool1
                pltpu.VMEM((re_rows, LPAD), jnp.float32),   # conv2 activations
                pltpu.VMEM((nb, LLIN), jnp.float32),        # fused-linear LHS
            ],
        ),
        compiler_params=pltpu.CompilerParams(
            dimension_semantics=("parallel",),
            vmem_limit_bytes=48 * 1024 * 1024,
        ),
    )(lhs, packed["B1"], packed["bias1"], packed["B2"], packed["bias2"],
      packed["WL"], packed["biasL"])

    return out.reshape(g * nb, LOUT)[:N, :10]    # (N, 10) float32


# ----------------------------------------------------------------------------
# Parameters (random init, scaled so the >>16 fixed-point path is exercised)
# ----------------------------------------------------------------------------
def init_params(key):
    ks = jax.random.split(key, 16)
    f32 = jnp.float32
    return {
        "w1": jax.random.normal(ks[0], (16, 1, 3, 3), f32) * 60.0,
        "b1": jax.random.normal(ks[1], (16,), f32) * 10.0,
        "g1": 1.0 + 0.1 * jax.random.normal(ks[2], (16,), f32),
        "be1": 0.1 * jax.random.normal(ks[3], (16,), f32),
        "rm1": 0.1 * jax.random.normal(ks[4], (16,), f32),
        "rv1": jax.random.uniform(ks[5], (16,), f32, 0.5, 1.5),
        "w2": jax.random.normal(ks[6], (32, 16, 3, 3), f32) * 60.0,
        "b2": jax.random.normal(ks[7], (32,), f32) * 10.0,
        "g2": 1.0 + 0.1 * jax.random.normal(ks[8], (32,), f32),
        "be2": 0.1 * jax.random.normal(ks[9], (32,), f32),
        "rm2": 0.1 * jax.random.normal(ks[10], (32,), f32),
        "rv2": jax.random.uniform(ks[11], (32,), f32, 0.5, 1.5),
        "wl": jax.random.normal(ks[12], (10, 7 * 7 * 32), f32) * 200.0,
        "bl": jax.random.normal(ks[13], (10,), f32) * 10.0,
    }


if __name__ == "__main__":
    key = jax.random.PRNGKey(0)
    kx, kp = jax.random.split(key)
    # MNIST-style input implied by lin2(7*7*32, 10): batch=2, 1 channel, 28x28
    x = jax.random.uniform(kx, (2, 1, 28, 28), jnp.float32, 0.0, 255.0)
    params = init_params(kp)
    packed = pack_params(params)                 # one-time host-side packing

    fwd = jax.jit(my_convnet_forward)
    out = jax.block_until_ready(fwd(x, packed))
    assert out.shape == (2, 10) and out.dtype == jnp.float32
    assert bool(jnp.all(jnp.isfinite(out)))
    print("KERNEL_OK")
</pallas_src>

<mosaic_0001>
module attributes {stable_mosaic.version = 11 : i64} {
  func.func @kernel(%arg0: i32, %arg1: memref<1x64x128xf32, #tpu.memory_space<vmem>>, %arg2: memref<128x512xf32, #tpu.memory_space<vmem>>, %arg3: memref<1x512xf32, #tpu.memory_space<vmem>>, %arg4: memref<3x512x512xf32, #tpu.memory_space<vmem>>, %arg5: memref<1x512xf32, #tpu.memory_space<vmem>>, %arg6: memref<3584x128xf32, #tpu.memory_space<vmem>>, %arg7: memref<1x128xf32, #tpu.memory_space<vmem>>, %arg8: memref<1x2x128xf32, #tpu.memory_space<vmem>>, %arg9: memref<80x512xf32, #tpu.memory_space<vmem>>, %arg10: memref<80x512xf32, #tpu.memory_space<vmem>>, %arg11: memref<80x512xf32, #tpu.memory_space<vmem>>, %arg12: memref<2x3584xf32, #tpu.memory_space<vmem>>) attributes {dimension_semantics = [#tpu.dimension_semantics<parallel>], iteration_bounds = array<i64: 1>, scalar_prefetch = 0 : i64, scratch_operands = 4 : i64, tpu.core_type = #tpu.core_type<tc>, window_params = [{transform_indices = @transform_0, window_bounds = array<i64: 1, 64, 128>}, {pipeline_mode = #tpu.pipeline_mode<synchronous>, transform_indices = @transform_1, window_bounds = array<i64: 128, 512>}, {pipeline_mode = #tpu.pipeline_mode<synchronous>, transform_indices = @transform_2, window_bounds = array<i64: 1, 512>}, {pipeline_mode = #tpu.pipeline_mode<synchronous>, transform_indices = @transform_3, window_bounds = array<i64: 3, 512, 512>}, {pipeline_mode = #tpu.pipeline_mode<synchronous>, transform_indices = @transform_4, window_bounds = array<i64: 1, 512>}, {pipeline_mode = #tpu.pipeline_mode<synchronous>, transform_indices = @transform_5, window_bounds = array<i64: 3584, 128>}, {pipeline_mode = #tpu.pipeline_mode<synchronous>, transform_indices = @transform_6, window_bounds = array<i64: 1, 128>}, {transform_indices = @transform_7, window_bounds = array<i64: 1, 2, 128>}]} {
    %cst = arith.constant 0.000000e+00 : f32
    %0 = vector.broadcast %cst : f32 to vector<1x512xf32>
    %c72 = arith.constant 72 : index
    %c0 = arith.constant 0 : index
    %1 = vector.load %arg9[%c72, %c0] : memref<80x512xf32, #tpu.memory_space<vmem>>, vector<1x512xf32>
    tpu.vector_store %arg9[%c72, %c0], %0 {strides = array<i32>} : memref<80x512xf32, #tpu.memory_space<vmem>>, vector<1x512xf32>,
    %cst_0 = arith.constant 0.000000e+00 : f32
    %2 = vector.broadcast %cst_0 : f32 to vector<2x512xf32>
    %c6 = arith.constant 6 : index
    %c0_1 = arith.constant 0 : index
    %3 = vector.load %arg10[%c6, %c0_1] : memref<80x512xf32, #tpu.memory_space<vmem>>, vector<2x512xf32>
    tpu.vector_store %arg10[%c6, %c0_1], %2 {strides = array<i32>} : memref<80x512xf32, #tpu.memory_space<vmem>>, vector<2x512xf32>,
    %cst_2 = arith.constant 0.000000e+00 : f32
    %4 = vector.broadcast %cst_2 : f32 to vector<2x512xf32>
    %c72_3 = arith.constant 72 : index
    %c0_4 = arith.constant 0 : index
    %5 = vector.load %arg10[%c72_3, %c0_4] : memref<80x512xf32, #tpu.memory_space<vmem>>, vector<2x512xf32>
    tpu.vector_store %arg10[%c72_3, %c0_4], %4 {strides = array<i32>} : memref<80x512xf32, #tpu.memory_space<vmem>>, vector<2x512xf32>,
    %cst_5 = arith.constant 0.000000e+00 : f32
    %6 = vector.broadcast %cst_5 : f32 to vector<2x512xf32>
    %c72_6 = arith.constant 72 : index
    %c0_7 = arith.constant 0 : index
    %7 = vector.load %arg11[%c72_6, %c0_7] : memref<80x512xf32, #tpu.memory_space<vmem>>, vector<2x512xf32>
    tpu.vector_store %arg11[%c72_6, %c0_7], %6 {strides = array<i32>} : memref<80x512xf32, #tpu.memory_space<vmem>>, vector<2x512xf32>,
    %cst_8 = arith.constant 0.000000e+00 : f32
    %8 = vector.broadcast %cst_8 : f32 to vector<2x3584xf32>
    %c0_9 = arith.constant 0 : index
    %c0_10 = arith.constant 0 : index
    %9 = vector.load %arg12[%c0_9, %c0_10] : memref<2x3584xf32, #tpu.memory_space<vmem>>, vector<2x3584xf32>
    tpu.vector_store %arg12[%c0_9, %c0_10], %8 {strides = array<i32>} : memref<2x3584xf32, #tpu.memory_space<vmem>>, vector<2x3584xf32>,
    %c0_11 = arith.constant 0 : index
    %c0_12 = arith.constant 0 : index
    %c0_13 = arith.constant 0 : index
    %10 = vector.load %arg1[%c0_11, %c0_12, %c0_13] : memref<1x64x128xf32, #tpu.memory_space<vmem>>, vector<1x64x128xf32>
    %11 = vector.shape_cast %10 : vector<1x64x128xf32> to vector<64x128xf32>
    %c0_14 = arith.constant 0 : index
    %c0_15 = arith.constant 0 : index
    %12 = vector.load %arg2[%c0_14, %c0_15] : memref<128x512xf32, #tpu.memory_space<vmem>>, vector<128x512xf32>
    %cst_16 = arith.constant dense<0.000000e+00> : vector<64x512xf32>
    %13 = tpu.matmul %11, %12, %cst_16 {dimension_numbers = #tpu.dot_dimension_numbers<[1], [0], [0], [1], [0, 0, 1, 1], [], []>} : vector<64x128xf32>, vector<128x512xf32>, vector<64x512xf32> -> vector<64x512xf32>
    %c0_17 = arith.constant 0 : index
    %c0_18 = arith.constant 0 : index
    %14 = vector.load %arg3[%c0_17, %c0_18] : memref<1x512xf32, #tpu.memory_space<vmem>>, vector<1x512xf32>
    %15 = vector.broadcast %14 : vector<1x512xf32> to vector<64x512xf32>
    %16 = arith.addf %13, %15 : vector<64x512xf32>
    %cst_19 = arith.constant 1.52587891E-5 : f32
    %17 = vector.broadcast %cst_19 : f32 to vector<64x512xf32>
    %18 = arith.mulf %16, %17 : vector<64x512xf32>
    %19 = math.floor %18 : vector<64x512xf32>
    %cst_20 = arith.constant 0.000000e+00 : f32
    %20 = vector.broadcast %cst_20 : f32 to vector<64x512xf32>
    %21 = arith.maximumf %19, %20 : vector<64x512xf32>
    %22 = tpu.iota {dimensions = array<i32: 0>} : vector<64x1xi32>
    %c31_i32 = arith.constant 31 : i32
    %23 = vector.broadcast %c31_i32 : i32 to vector<64x1xi32>
    %24 = arith.andi %22, %23 : vector<64x1xi32>
    %c28_i32 = arith.constant 28 : i32
    %25 = vector.broadcast %c28_i32 : i32 to vector<64x1xi32>
    %26 = arith.cmpi slt, %24, %25 : vector<64x1xi32>
    %cst_21 = arith.constant 0.000000e+00 : f32
    %27 = vector.shape_cast %26 : vector<64x1xi1> to vector<64x1xi1>
    %28 = vector.broadcast %27 : vector<64x1xi1> to vector<64x512xi1>
    %29 = vector.broadcast %cst_21 : f32 to vector<64x512xf32>
    %30 = arith.select %28, %21, %29 : vector<64x512xi1>, vector<64x512xf32>
    %c8 = arith.constant 8 : index
    %c0_22 = arith.constant 0 : index
    %31 = vector.load %arg9[%c8, %c0_22] : memref<80x512xf32, #tpu.memory_space<vmem>>, vector<64x512xf32>
    tpu.vector_store %arg9[%c8, %c0_22], %30 {strides = array<i32>} : memref<80x512xf32, #tpu.memory_space<vmem>>, vector<64x512xf32>,
    %c8_23 = arith.constant 8 : index
    %c0_24 = arith.constant 0 : index
    %32 = vector.load %arg9[%c8_23, %c0_24] : memref<80x512xf32, #tpu.memory_space<vmem>>, vector<64x512xf32>
    %c9 = arith.constant 9 : index
    %c0_25 = arith.constant 0 : index
    %33 = vector.load %arg9[%c9, %c0_25] : memref<80x512xf32, #tpu.memory_space<vmem>>, vector<64x512xf32>
    %34 = arith.maximumf %32, %33 : vector<64x512xf32>
    %35 = vector.extract_strided_slice %34 {offsets = [0, 0], sizes = [64, 432], strides = [1, 1]} : vector<64x512xf32> to vector<64x432xf32>
    %36 = vector.extract_strided_slice %34 {offsets = [0, 16], sizes = [64, 432], strides = [1, 1]} : vector<64x512xf32> to vector<64x432xf32>
    %37 = arith.maximumf %35, %36 : vector<64x432xf32>
    %c8_26 = arith.constant 8 : index
    %c0_27 = arith.constant 0 : index
    %38 = vector.load %arg10[%c8_26, %c0_27] : memref<80x512xf32, #tpu.memory_space<vmem>>, vector<64x432xf32>
    tpu.vector_store %arg10[%c8_26, %c0_27], %37 {strides = array<i32>} : memref<80x512xf32, #tpu.memory_space<vmem>>, vector<64x432xf32>,
    %cst_28 = arith.constant 0.000000e+00 : f32
    %39 = vector.broadcast %cst_28 : f32 to vector<64x80xf32>
    %c8_29 = arith.constant 8 : index
    %c432 = arith.constant 432 : index
    %40 = vector.load %arg10[%c8_29, %c432] : memref<80x512xf32, #tpu.memory_space<vmem>>, vector<64x80xf32>
    tpu.vector_store %arg10[%c8_29, %c432], %39 {strides = array<i32>} : memref<80x512xf32, #tpu.memory_space<vmem>>, vector<64x80xf32>,
    %c6_30 = arith.constant 6 : index
    %c0_31 = arith.constant 0 : index
    %41 = vector.load %arg10[%c6_30, %c0_31] : memref<80x512xf32, #tpu.memory_space<vmem>>, vector<64x512xf32>
    %c0_32 = arith.constant 0 : index
    %c0_33 = arith.constant 0 : index
    %c0_34 = arith.constant 0 : index
    %42 = vector.load %arg4[%c0_32, %c0_33, %c0_34] : memref<3x512x512xf32, #tpu.memory_space<vmem>>, vector<1x512x512xf32>
    %43 = vector.shape_cast %42 : vector<1x512x512xf32> to vector<512x512xf32>
    %cst_35 = arith.constant dense<0.000000e+00> : vector<64x512xf32>
    %44 = tpu.matmul %41, %43, %cst_35 {dimension_numbers = #tpu.dot_dimension_numbers<[1], [0], [0], [1], [0, 0, 1, 1], [], []>} : vector<64x512xf32>, vector<512x512xf32>, vector<64x512xf32> -> vector<64x512xf32>
    %c8_36 = arith.constant 8 : index
    %c0_37 = arith.constant 0 : index
    %45 = vector.load %arg10[%c8_36, %c0_37] : memref<80x512xf32, #tpu.memory_space<vmem>>, vector<64x512xf32>
    %c1 = arith.constant 1 : index
    %c0_38 = arith.constant 0 : index
    %c0_39 = arith.constant 0 : index
    %46 = vector.load %arg4[%c1, %c0_38, %c0_39] : memref<3x512x512xf32, #tpu.memory_space<vmem>>, vector<1x512x512xf32>
    %47 = vector.shape_cast %46 : vector<1x512x512xf32> to vector<512x512xf32>
    %cst_40 = arith.constant dense<0.000000e+00> : vector<64x512xf32>
    %48 = tpu.matmul %45, %47, %cst_40 {dimension_numbers = #tpu.dot_dimension_numbers<[1], [0], [0], [1], [0, 0, 1, 1], [], []>} : vector<64x512xf32>, vector<512x512xf32>, vector<64x512xf32> -> vector<64x512xf32>
    %49 = arith.addf %44, %48 : vector<64x512xf32>
    %c10 = arith.constant 10 : index
    %c0_41 = arith.constant 0 : index
    %50 = vector.load %arg10[%c10, %c0_41] : memref<80x512xf32, #tpu.memory_space<vmem>>, vector<64x512xf32>
    %c2 = arith.constant 2 : index
    %c0_42 = arith.constant 0 : index
    %c0_43 = arith.constant 0 : index
    %51 = vector.load %arg4[%c2, %c0_42, %c0_43] : memref<3x512x512xf32, #tpu.memory_space<vmem>>, vector<1x512x512xf32>
    %52 = vector.shape_cast %51 : vector<1x512x512xf32> to vector<512x512xf32>
    %cst_44 = arith.constant dense<0.000000e+00> : vector<64x512xf32>
    %53 = tpu.matmul %50, %52, %cst_44 {dimension_numbers = #tpu.dot_dimension_numbers<[1], [0], [0], [1], [0, 0, 1, 1], [], []>} : vector<64x512xf32>, vector<512x512xf32>, vector<64x512xf32> -> vector<64x512xf32>
    %54 = arith.addf %49, %53 : vector<64x512xf32>
    %c0_45 = arith.constant 0 : index
    %c0_46 = arith.constant 0 : index
    %55 = vector.load %arg5[%c0_45, %c0_46] : memref<1x512xf32, #tpu.memory_space<vmem>>, vector<1x512xf32>
    %56 = vector.broadcast %55 : vector<1x512xf32> to vector<64x512xf32>
    %57 = arith.addf %54, %56 : vector<64x512xf32>
    %cst_47 = arith.constant 1.52587891E-5 : f32
    %58 = vector.broadcast %cst_47 : f32 to vector<64x512xf32>
    %59 = arith.mulf %57, %58 : vector<64x512xf32>
    %60 = math.floor %59 : vector<64x512xf32>
    %cst_48 = arith.constant 0.000000e+00 : f32
    %61 = vector.broadcast %cst_48 : f32 to vector<64x512xf32>
    %62 = arith.maximumf %60, %61 : vector<64x512xf32>
    %c8_49 = arith.constant 8 : index
    %c0_50 = arith.constant 0 : index
    %63 = vector.load %arg11[%c8_49, %c0_50] : memref<80x512xf32, #tpu.memory_space<vmem>>, vector<64x512xf32>
    tpu.vector_store %arg11[%c8_49, %c0_50], %62 {strides = array<i32>} : memref<80x512xf32, #tpu.memory_space<vmem>>, vector<64x512xf32>,
    %c8_51 = arith.constant 8 : index
    %c0_52 = arith.constant 0 : index
    %64 = vector.load %arg11[%c8_51, %c0_52] : memref<80x512xf32, #tpu.memory_space<vmem>>, vector<64x512xf32>
    %c10_53 = arith.constant 10 : index
    %c0_54 = arith.constant 0 : index
    %65 = vector.load %arg11[%c10_53, %c0_54] : memref<80x512xf32, #tpu.memory_space<vmem>>, vector<64x512xf32>
    %66 = arith.maximumf %64, %65 : vector<64x512xf32>
    %67 = vector.extract_strided_slice %66 {offsets = [0, 0], sizes = [64, 416], strides = [1, 1]} : vector<64x512xf32> to vector<64x416xf32>
    %68 = vector.extract_strided_slice %66 {offsets = [0, 32], sizes = [64, 416], strides = [1, 1]} : vector<64x512xf32> to vector<64x416xf32>
    %69 = arith.maximumf %67, %68 : vector<64x416xf32>
    %70 = vector.extract_strided_slice %69 {offsets = [0, 0], sizes = [1, 416], strides = [1, 1]} : vector<64x416xf32> to vector<1x416xf32>
    %c0_55 = arith.constant 0 : index
    %c0_56 = arith.constant 0 : index
    %71 = vector.load %arg12[%c0_55, %c0_56] : memref<2x3584xf32, #tpu.memory_space<vmem>>, vector<1x416xf32>
    tpu.vector_store %arg12[%c0_55, %c0_56], %70 {strides = array<i32>} : memref<2x3584xf32, #tpu.memory_space<vmem>>, vector<1x416xf32>,
    %72 = vector.extract_strided_slice %69 {offsets = [4, 0], sizes = [1, 416], strides = [1, 1]} : vector<64x416xf32> to vector<1x416xf32>
    %c0_57 = arith.constant 0 : index
    %c512 = arith.constant 512 : index
    %73 = vector.load %arg12[%c0_57, %c512] : memref<2x3584xf32, #tpu.memory_space<vmem>>, vector<1x416xf32>
    tpu.vector_store %arg12[%c0_57, %c512], %72 {strides = array<i32>} : memref<2x3584xf32, #tpu.memory_space<vmem>>, vector<1x416xf32>,
    %74 = vector.extract_strided_slice %69 {offsets = [8, 0], sizes = [1, 416], strides = [1, 1]} : vector<64x416xf32> to vector<1x416xf32>
    %c0_58 = arith.constant 0 : index
    %c1024 = arith.constant 1024 : index
    %75 = vector.load %arg12[%c0_58, %c1024] : memref<2x3584xf32, #tpu.memory_space<vmem>>, vector<1x416xf32>
    tpu.vector_store %arg12[%c0_58, %c1024], %74 {strides = array<i32>} : memref<2x3584xf32, #tpu.memory_space<vmem>>, vector<1x416xf32>,
    %76 = vector.extract_strided_slice %69 {offsets = [12, 0], sizes = [1, 416], strides = [1, 1]} : vector<64x416xf32> to vector<1x416xf32>
    %c0_59 = arith.constant 0 : index
    %c1536 = arith.constant 1536 : index
    %77 = vector.load %arg12[%c0_59, %c1536] : memref<2x3584xf32, #tpu.memory_space<vmem>>, vector<1x416xf32>
    tpu.vector_store %arg12[%c0_59, %c1536], %76 {strides = array<i32>} : memref<2x3584xf32, #tpu.memory_space<vmem>>, vector<1x416xf32>,
    %78 = vector.extract_strided_slice %69 {offsets = [16, 0], sizes = [1, 416], strides = [1, 1]} : vector<64x416xf32> to vector<1x416xf32>
    %c0_60 = arith.constant 0 : index
    %c2048 = arith.constant 2048 : index
    %79 = vector.load %arg12[%c0_60, %c2048] : memref<2x3584xf32, #tpu.memory_space<vmem>>, vector<1x416xf32>
    tpu.vector_store %arg12[%c0_60, %c2048], %78 {strides = array<i32>} : memref<2x3584xf32, #tpu.memory_space<vmem>>, vector<1x416xf32>,
    %80 = vector.extract_strided_slice %69 {offsets = [20, 0], sizes = [1, 416], strides = [1, 1]} : vector<64x416xf32> to vector<1x416xf32>
    %c0_61 = arith.constant 0 : index
    %c2560 = arith.constant 2560 : index
    %81 = vector.load %arg12[%c0_61, %c2560] : memref<2x3584xf32, #tpu.memory_space<vmem>>, vector<1x416xf32>
    tpu.vector_store %arg12[%c0_61, %c2560], %80 {strides = array<i32>} : memref<2x3584xf32, #tpu.memory_space<vmem>>, vector<1x416xf32>,
    %82 = vector.extract_strided_slice %69 {offsets = [24, 0], sizes = [1, 416], strides = [1, 1]} : vector<64x416xf32> to vector<1x416xf32>
    %c0_62 = arith.constant 0 : index
    %c3072 = arith.constant 3072 : index
    %83 = vector.load %arg12[%c0_62, %c3072] : memref<2x3584xf32, #tpu.memory_space<vmem>>, vector<1x416xf32>
    tpu.vector_store %arg12[%c0_62, %c3072], %82 {strides = array<i32>} : memref<2x3584xf32, #tpu.memory_space<vmem>>, vector<1x416xf32>,
    %84 = vector.extract_strided_slice %69 {offsets = [32, 0], sizes = [1, 416], strides = [1, 1]} : vector<64x416xf32> to vector<1x416xf32>
    %c1_63 = arith.constant 1 : index
    %c0_64 = arith.constant 0 : index
    %85 = vector.load %arg12[%c1_63, %c0_64] : memref<2x3584xf32, #tpu.memory_space<vmem>>, vector<1x416xf32>
    tpu.vector_store %arg12[%c1_63, %c0_64], %84 {strides = array<i32>} : memref<2x3584xf32, #tpu.memory_space<vmem>>, vector<1x416xf32>,
    %86 = vector.extract_strided_slice %69 {offsets = [36, 0], sizes = [1, 416], strides = [1, 1]} : vector<64x416xf32> to vector<1x416xf32>
    %c1_65 = arith.constant 1 : index
    %c512_66 = arith.constant 512 : index
    %87 = vector.load %arg12[%c1_65, %c512_66] : memref<2x3584xf32, #tpu.memory_space<vmem>>, vector<1x416xf32>
    tpu.vector_store %arg12[%c1_65, %c512_66], %86 {strides = array<i32>} : memref<2x3584xf32, #tpu.memory_space<vmem>>, vector<1x416xf32>,
    %88 = vector.extract_strided_slice %69 {offsets = [40, 0], sizes = [1, 416], strides = [1, 1]} : vector<64x416xf32> to vector<1x416xf32>
    %c1_67 = arith.constant 1 : index
    %c1024_68 = arith.constant 1024 : index
    %89 = vector.load %arg12[%c1_67, %c1024_68] : memref<2x3584xf32, #tpu.memory_space<vmem>>, vector<1x416xf32>
    tpu.vector_store %arg12[%c1_67, %c1024_68], %88 {strides = array<i32>} : memref<2x3584xf32, #tpu.memory_space<vmem>>, vector<1x416xf32>,
    %90 = vector.extract_strided_slice %69 {offsets = [44, 0], sizes = [1, 416], strides = [1, 1]} : vector<64x416xf32> to vector<1x416xf32>
    %c1_69 = arith.constant 1 : index
    %c1536_70 = arith.constant 1536 : index
    %91 = vector.load %arg12[%c1_69, %c1536_70] : memref<2x3584xf32, #tpu.memory_space<vmem>>, vector<1x416xf32>
    tpu.vector_store %arg12[%c1_69, %c1536_70], %90 {strides = array<i32>} : memref<2x3584xf32, #tpu.memory_space<vmem>>, vector<1x416xf32>,
    %92 = vector.extract_strided_slice %69 {offsets = [48, 0], sizes = [1, 416], strides = [1, 1]} : vector<64x416xf32> to vector<1x416xf32>
    %c1_71 = arith.constant 1 : index
    %c2048_72 = arith.constant 2048 : index
    %93 = vector.load %arg12[%c1_71, %c2048_72] : memref<2x3584xf32, #tpu.memory_space<vmem>>, vector<1x416xf32>
    tpu.vector_store %arg12[%c1_71, %c2048_72], %92 {strides = array<i32>} : memref<2x3584xf32, #tpu.memory_space<vmem>>, vector<1x416xf32>,
    %94 = vector.extract_strided_slice %69 {offsets = [52, 0], sizes = [1, 416], strides = [1, 1]} : vector<64x416xf32> to vector<1x416xf32>
    %c1_73 = arith.constant 1 : index
    %c2560_74 = arith.constant 2560 : index
    %95 = vector.load %arg12[%c1_73, %c2560_74] : memref<2x3584xf32, #tpu.memory_space<vmem>>, vector<1x416xf32>
    tpu.vector_store %arg12[%c1_73, %c2560_74], %94 {strides = array<i32>} : memref<2x3584xf32, #tpu.memory_space<vmem>>, vector<1x416xf32>,
    %96 = vector.extract_strided_slice %69 {offsets = [56, 0], sizes = [1, 416], strides = [1, 1]} : vector<64x416xf32> to vector<1x416xf32>
    %c1_75 = arith.constant 1 : index
    %c3072_76 = arith.constant 3072 : index
    %97 = vector.load %arg12[%c1_75, %c3072_76] : memref<2x3584xf32, #tpu.memory_space<vmem>>, vector<1x416xf32>
    tpu.vector_store %arg12[%c1_75, %c3072_76], %96 {strides = array<i32>} : memref<2x3584xf32, #tpu.memory_space<vmem>>, vector<1x416xf32>,
    %c0_77 = arith.constant 0 : index
    %c0_78 = arith.constant 0 : index
    %98 = vector.load %arg12[%c0_77, %c0_78] : memref<2x3584xf32, #tpu.memory_space<vmem>>, vector<2x3584xf32>
    %c0_79 = arith.constant 0 : index
    %c0_80 = arith.constant 0 : index
    %99 = vector.load %arg6[%c0_79, %c0_80] : memref<3584x128xf32, #tpu.memory_space<vmem>>, vector<3584x128xf32>
    %cst_81 = arith.constant dense<0.000000e+00> : vector<2x128xf32>
    %100 = tpu.matmul %98, %99, %cst_81 {dimension_numbers = #tpu.dot_dimension_numbers<[1], [0], [0], [1], [0, 0, 1, 1], [], []>} : vector<2x3584xf32>, vector<3584x128xf32>, vector<2x128xf32> -> vector<2x128xf32>
    %c0_82 = arith.constant 0 : index
    %c0_83 = arith.constant 0 : index
    %101 = vector.load %arg7[%c0_82, %c0_83] : memref<1x128xf32, #tpu.memory_space<vmem>>, vector<1x128xf32>
    %102 = vector.broadcast %101 : vector<1x128xf32> to vector<2x128xf32>
    %103 = arith.addf %100, %102 : vector<2x128xf32>
    %104 = arith.fptosi %103 : vector<2x128xf32> to vector<2x128xi32>
    %c16_i32 = arith.constant 16 : i32
    %105 = vector.broadcast %c16_i32 : i32 to vector<2x128xi32>
    %106 = arith.shrsi %104, %105 : vector<2x128xi32>
    %107 = arith.sitofp %106 : vector<2x128xi32> to vector<2x128xf32>
    %c0_84 = arith.constant 0 : index
    %c0_85 = arith.constant 0 : index
    %c0_86 = arith.constant 0 : index
    %108 = vector.load %arg8[%c0_84, %c0_85, %c0_86] : memref<1x2x128xf32, #tpu.memory_space<vmem>>, vector<1x2x128xf32>
    %109 = vector.shape_cast %108 : vector<1x2x128xf32> to vector<2x128xf32>
    %110 = vector.shape_cast %107 : vector<2x128xf32> to vector<1x2x128xf32>
    tpu.vector_store %arg8[%c0_84, %c0_85, %c0_86], %110 {strides = array<i32>} : memref<1x2x128xf32, #tpu.memory_space<vmem>>, vector<1x2x128xf32>,
    return
  }
  func.func @transform_0(%arg0: i32) -> (i32, i32, i32) {
    %c0_i32 = arith.constant 0 : i32
    %c0_i32_0 = arith.constant 0 : i32
    %c0_i32_1 = arith.constant 0 : i32
    return %arg0, %c0_i32, %c0_i32_0 : i32, i32, i32
  }
  func.func @transform_1(%arg0: i32) -> (i32, i32) {
    %c0_i32 = arith.constant 0 : i32
    %c0_i32_0 = arith.constant 0 : i32
    %c0_i32_1 = arith.constant 0 : i32
    return %c0_i32, %c0_i32_0 : i32, i32
  }
  func.func @transform_2(%arg0: i32) -> (i32, i32) {
    %c0_i32 = arith.constant 0 : i32
    %c0_i32_0 = arith.constant 0 : i32
    %c0_i32_1 = arith.constant 0 : i32
    return %c0_i32, %c0_i32_0 : i32, i32
  }
  func.func @transform_3(%arg0: i32) -> (i32, i32, i32) {
    %c0_i32 = arith.constant 0 : i32
    %c0_i32_0 = arith.constant 0 : i32
    %c0_i32_1 = arith.constant 0 : i32
    %c0_i32_2 = arith.constant 0 : i32
    return %c0_i32, %c0_i32_0, %c0_i32_1 : i32, i32, i32
  }
  func.func @transform_4(%arg0: i32) -> (i32, i32) {
    %c0_i32 = arith.constant 0 : i32
    %c0_i32_0 = arith.constant 0 : i32
    %c0_i32_1 = arith.constant 0 : i32
    return %c0_i32, %c0_i32_0 : i32, i32
  }
  func.func @transform_5(%arg0: i32) -> (i32, i32) {
    %c0_i32 = arith.constant 0 : i32
    %c0_i32_0 = arith.constant 0 : i32
    %c0_i32_1 = arith.constant 0 : i32
    return %c0_i32, %c0_i32_0 : i32, i32
  }
  func.func @transform_6(%arg0: i32) -> (i32, i32) {
    %c0_i32 = arith.constant 0 : i32
    %c0_i32_0 = arith.constant 0 : i32
    %c0_i32_1 = arith.constant 0 : i32
    return %c0_i32, %c0_i32_0 : i32, i32
  }
  func.func @transform_7(%arg0: i32) -> (i32, i32, i32) {
    %c0_i32 = arith.constant 0 : i32
    %c0_i32_0 = arith.constant 0 : i32
    %c0_i32_1 = arith.constant 0 : i32
    return %arg0, %c0_i32, %c0_i32_0 : i32, i32, i32
  }
}

</mosaic_0001>

<bundles_post_ra>
// kernel: my_convnet_forward.1
= control target key start
LH: loop header
LB: loop body
LE: loop exit
PB: predicated region body
PF: predicated region fallthrough
CT: control target
= control target key end

     0   :  { %12 = vsyncpa [#allocation7], 0  ;;  %s8534_s0 = inlined_call_operand.vmem [shape: f32[1,64,128], index: 0, kind: input, shape index: {}]   ;;  %s8535_s1 = inlined_call_operand.hbm [shape: f32[128,512], index: 1, kind: input, shape index: {}]   ;;  %s8536_s2 = inlined_call_operand.hbm [shape: f32[1,512], index: 2, kind: input, shape index: {}]   ;;  %s8537_s3 = inlined_call_operand.hbm [shape: f32[3,512,512], index: 3, kind: input, shape index: {}]   ;;  %s8538_s4 = inlined_call_operand.hbm [shape: f32[1,512], index: 4, kind: input, shape index: {}]   ;;  %s8539_s5 = inlined_call_operand.hbm [shape: f32[3584,128], index: 5, kind: input, shape index: {}]   ;;  %s8540_s6 = inlined_call_operand.hbm [shape: f32[1,128], index: 6, kind: input, shape index: {}]   ;;  %s8541_s7 = inlined_call_operand.hbm [shape: f32[1,2,128], index: 7, kind: output, shape index: {}]  }
   0x1   :  { %13 = vsyncpa [#allocation10], 0 }
   0x2   :  { %14 = vsyncpa [#allocation13], 0 }
   0x3   :  { %15 = vsyncpa [#allocation16], 0  ;;  %s37_s26 = sshll.u32 %s8536_s2, 4  ;;  %s38_s26 = int_to_ptr.hbm [resolvable:$true] %s37_s26 }
   0x4   :  { %16 = vsyncpa [#allocation8], 0  ;;  %s6270_s27 = smov [#allocation9]   ;;  %s61_s8 = sshll.u32 %s8538_s4, 4  ;;  %s62_s8 = int_to_ptr.hbm [resolvable:$true] %s61_s8 }
   0x5   :  { %s39_s28 = sshll.u32 %s6270_s27, 4  ;;  %s6271_s9 = smov [#allocation12]   ;;  %s40_s28 = int_to_ptr.vmem [resolvable:$true] %s39_s28 }
   0x6   :  { %42 = dma.hbm_to_vmem [thread:$0]  %s38_s26, 64, %s40_s28, [#allocation10]  }
   0x7   :  { %s63_s10 = sshll.u32 %s6271_s9, 4  ;;  %s23_s13 = sshll.u32 %s8535_s1, 4  ;;  %s64_s10 = int_to_ptr.vmem [resolvable:$true] %s63_s10  ;;  %s24_s13 = int_to_ptr.hbm [resolvable:$true] %s23_s13 }
   0x8   :  { %66 = dma.hbm_to_vmem [thread:$0]  %s62_s8, 64, %s64_s10, [#allocation13]  }
   0x9   :  { %s6272_s2 = smov [#allocation6]   ;;  %s47_s17 = sshll.u32 %s8537_s3, 4  ;;  %s48_s17 = int_to_ptr.hbm [resolvable:$true] %s47_s17 }
   0xa   :  { %s25_s14 = sshll.u32 %s6272_s2, 4  ;;  %s6273_s18 = smov 512   ;;  %s26_s14 = int_to_ptr.vmem [resolvable:$true] %s25_s14 }
   0xb   :  { %s6274_s4 = smov 32   ;;  %s6275_s19 = smov [#allocation11]  }
   0xc   :  { %31 = dma.hbm_to_vmem [thread:$0]  %s24_s13, 8192, %s26_s14, [#allocation7], %s6273_s18, %s6273_s18, %s6274_s4  }
   0xd   :  { %s49_s20 = sshll.u32 %s6275_s19, 4  ;;  %s71_s1 = sshll.u32 %s8539_s5, 4  ;;  %s50_s20 = int_to_ptr.vmem [resolvable:$true] %s49_s20  ;;  %s72_s1 = int_to_ptr.hbm [resolvable:$true] %s71_s1 }
   0xe   :  { %55 = dma.hbm_to_vmem [thread:$0]  %s48_s17, 98304, %s50_s20, [#allocation10], %s6273_s18, %s6273_s18, %s6274_s4  }
   0xf   :  { %s6276_s23 = smov [#allocation14]   ;;  %s85_s3 = sshll.u32 %s8540_s6, 4  ;;  %s86_s3 = int_to_ptr.hbm [resolvable:$true] %s85_s3 }
  0x10   :  { %s73_s24 = sshll.u32 %s6276_s23, 4  ;;  %s6277_s27 = smov 128   ;;  %s74_s24 = int_to_ptr.vmem [resolvable:$true] %s73_s24 }
  0x11   :  { %s6278_s28 = smov 8   ;;  %s6279_s29 = smov [#allocation15]  }
  0x12   :  { %79 = dma.hbm_to_vmem [thread:$0]  %s72_s1, 57344, %s74_s24, [#allocation13], %s6277_s27, %s6277_s27, %s6278_s28  }
  0x13   :  { %s87_s30 = sshll.u32 %s6279_s29, 4  ;;  %s88_s30 = int_to_ptr.vmem [resolvable:$true] %s87_s30 }
  0x14   :  { %90 = dma.hbm_to_vmem [thread:$0]  %s86_s3, 16, %s88_s30, [#allocation16]  }
  0x15   :  { %6260 = dma.done.wait [#allocation7], 8192  }
  0x16   :  { %6261 = vsyncadd [#allocation7], 4294959104 }
  0x17   :  { %6262 = dma.done.wait [#allocation10], 98368  }
  0x18   :  { %6263 = vsyncadd [#allocation10], 4294868928 }
  0x19   :  { %6264 = dma.done.wait [#allocation13], 57408  }
  0x1a   :  { %6265 = vsyncadd [#allocation13], 4294909888 }
  0x1b   :  { %6266 = dma.done.wait [#allocation16], 16  }
  0x1c   :  { %6267 = vsyncadd [#allocation16], 4294967280  ;;  %v209_v0 = vld [vmem:[#allocation6 + $0x1e0] sm:$0xff]  ;;  %v211_v1 = vld [vmem:[#allocation6 + $0x1f0] sm:$0xff]  ;;  %vm692_vm1 = vcmask 1046528   ;;  %vm921_vm4 = vcmask 916480  }
  0x1d   :  { %v212_v2 = vld [vmem:[#allocation6 + $0x1f8] sm:$0xff]  ;;  %223 = vmatpush.msra.mxu0 %v209_v0  ;;  %305 = vmatpush.msra.mxu2 %v211_v1  ;;  %v205_v3 = vld [vmem:[#allocation6 + $0x1c0] sm:$0xff]  ;;  %v210_v4 = vld [vmem:[#allocation6 + $0x1e8] sm:$0xff]  ;;  %vm1013_vm5 = vcmask 392192   ;;  %vm1043_vm6 = vcmask 1047936   ;;  %vm2297_vm7 = vcmask 1041408  }
  0x1e   :  { %v207_v5 = vld [vmem:[#allocation6 + $0x1d0] sm:$0xff]  ;;  %346 = vmatpush.msra.mxu3 %v212_v2  ;;  %264 = vmatpush.msra.mxu1 %v210_v4  ;;  %v208_v6 = vld [vmem:[#allocation6 + $0x1d8] sm:$0xff]  ;;  %v201_v7 = vld [vmem:[#allocation6 + $0x1a0] sm:$0xff]  ;;  %vm3383_vm8 = vcmask 1045504   ;;  %s6282_s20 = smov 96   ;;  %vm4674_vm9 = vcmask 785408  }
  0x1f   :  { %v206_v8 = vld [vmem:[#allocation6 + $0x1c8] sm:$0xff]  ;;  %224 = vmatpush.msra.mxu0 %v205_v3  ;;  %306 = vmatpush.msra.mxu2 %v207_v5  ;;  %v203_v9 = vld [vmem:[#allocation6 + $0x1b0] sm:$0xff]  ;;  %v204_v10 = vld [vmem:[#allocation6 + $0x1b8] sm:$0xff]  ;;  %vm4772_vm10 = vcmask 1042434   ;;  %vm4770_vm12 = vcmask 1040384   ;;  %s6283_s21 = smov [#allocation17]  }
  0x20   :  { %347 = vmatpush.msra.mxu3 %v208_v6  ;;  %265 = vmatpush.msra.mxu1 %v206_v8  ;;  %v197_v11 = vld [vmem:[#allocation6 + $0x180] sm:$0xff]  ;;  %v202_v12 = vld [vmem:[#allocation6 + $0x1a8] sm:$0xff]  ;;  %v199_v13 = vld [vmem:[#allocation6 + $0x190] sm:$0xff]  ;;  %s6023_s22 = sshll.u32 %s6283_s21, 4  ;;  %s6025_s24 = sshll.u32 %s8541_s7, 4  ;;  %s6024_s22 = int_to_ptr.vmem [resolvable:$true] %s6023_s22  ;;  %s6026_s24 = int_to_ptr.hbm [resolvable:$true] %s6025_s24 }
  0x21   :  { %225 = vmatpush.msra.mxu0 %v201_v7  ;;  %307 = vmatpush.msra.mxu2 %v203_v9  ;;  %v200_v14 = vld [vmem:[#allocation6 + $0x198] sm:$0xff]  ;;  %v198_v15 = vld [vmem:[#allocation6 + $0x188] sm:$0xff]  ;;  %v193_v16 = vld [vmem:[#allocation6 + $0x160] sm:$0xff] }
  0x22   :  { %348 = vmatpush.msra.mxu3 %v204_v10  ;;  %266 = vmatpush.msra.mxu1 %v202_v12  ;;  %v195_v17 = vld [vmem:[#allocation6 + $0x170] sm:$0xff]  ;;  %v196_v18 = vld [vmem:[#allocation6 + $0x178] sm:$0xff]  ;;  %v194_v19 = vld [vmem:[#allocation6 + $0x168] sm:$0xff]  ;;  %v8542_v10 = vlaneseq }
  0x23   :  { %226 = vmatpush.msra.mxu0 %v197_v11  ;;  %308 = vmatpush.msra.mxu2 %v199_v13  ;;  %v189_v20 = vld [vmem:[#allocation6 + $0x140] sm:$0xff]  ;;  %v191_v21 = vld [vmem:[#allocation6 + $0x150] sm:$0xff]  ;;  %v192_v22 = vld [vmem:[#allocation6 + $0x158] sm:$0xff] }
  0x24   :  { %349 = vmatpush.msra.mxu3 %v200_v14  ;;  %267 = vmatpush.msra.mxu1 %v198_v15  ;;  %v190_v23 = vld [vmem:[#allocation6 + $0x148] sm:$0xff]  ;;  %v185_v24 = vld [vmem:[#allocation6 + $0x120] sm:$0xff]  ;;  %v187_v25 = vld [vmem:[#allocation6 + $0x130] sm:$0xff]  ;;  %vm117_vm0 = vcmp.lt.s32.totalorder %v8542_v10, 512  ;;  %v6280_v14 = vmov 0.0  }
  0x25   :  { %227 = vmatpush.msra.mxu0 %v193_v16  ;;  %309 = vmatpush.msra.mxu2 %v195_v17  ;;  %v188_v26 = vld [vmem:[#allocation6 + $0x138] sm:$0xff]  ;;  %v186_v27 = vld [vmem:[#allocation6 + $0x128] sm:$0xff]  ;;  %v181_v28 = vld [vmem:[#allocation6 + $0x100] sm:$0xff]  ;;  %120 = vst.msk [vmem:[#allocation2 + $0x120] ss:$8 sm:$0xf] %vm117_vm0, %v6280_v14 }
  0x26   :  { %350 = vmatpush.msra.mxu3 %v196_v18  ;;  %268 = vmatpush.msra.mxu1 %v194_v19  ;;  %v183_v29 = vld [vmem:[#allocation6 + $0x110] sm:$0xff]  ;;  %v184_v30 = vld [vmem:[#allocation6 + $0x118] sm:$0xff]  ;;  %v182_v31 = vld [vmem:[#allocation6 + $0x108] sm:$0xff]  ;;  %122 = vst [vmem:[#allocation3] sm:$0xc0] %v6280_v14 }
  0x27   :  { %228 = vmatpush.msra.mxu0 %v189_v20  ;;  %310 = vmatpush.msra.mxu2 %v191_v21  ;;  %v177_v32 = vld [vmem:[#allocation6 + $0xe0] sm:$0xff]  ;;  %v179_v33 = vld [vmem:[#allocation6 + $0xf0] sm:$0xff]  ;;  %v180_v34 = vld [vmem:[#allocation6 + $0xf8] sm:$0xff]  ;;  %123 = vst [vmem:[#allocation3 + $0x8] sm:$0xc0] %v6280_v14 }
  0x28   :  { %351 = vmatpush.msra.mxu3 %v192_v22  ;;  %269 = vmatpush.msra.mxu1 %v190_v23  ;;  %v178_v35 = vld [vmem:[#allocation6 + $0xe8] sm:$0xff]  ;;  %v173_v36 = vld [vmem:[#allocation6 + $0xc0] sm:$0xff]  ;;  %v175_v37 = vld [vmem:[#allocation6 + $0xd0] sm:$0xff]  ;;  %124 = vst [vmem:[#allocation3 + $0x10] sm:$0xc0] %v6280_v14 }
  0x29   :  { %229 = vmatpush.msra.mxu0 %v185_v24  ;;  %311 = vmatpush.msra.mxu2 %v187_v25  ;;  %v176_v38 = vld [vmem:[#allocation6 + $0xd8] sm:$0xff]  ;;  %v174_v39 = vld [vmem:[#allocation6 + $0xc8] sm:$0xff]  ;;  %v169_v40 = vld [vmem:[#allocation6 + $0xa0] sm:$0xff]  ;;  %125 = vst [vmem:[#allocation3 + $0x18] sm:$0xc0] %v6280_v14 }
  0x2a   :  { %352 = vmatpush.msra.mxu3 %v188_v26  ;;  %270 = vmatpush.msra.mxu1 %v186_v27  ;;  %v171_v41 = vld [vmem:[#allocation6 + $0xb0] sm:$0xff]  ;;  %v172_v42 = vld [vmem:[#allocation6 + $0xb8] sm:$0xff]  ;;  %v170_v43 = vld [vmem:[#allocation6 + $0xa8] sm:$0xff]  ;;  %126 = vst [vmem:[#allocation3 + $0x120] sm:$0x3] %v6280_v14 }
  0x2b   :  { %230 = vmatpush.msra.mxu0 %v181_v28  ;;  %312 = vmatpush.msra.mxu2 %v183_v29  ;;  %v165_v44 = vld [vmem:[#allocation6 + $0x80] sm:$0xff]  ;;  %v167_v45 = vld [vmem:[#allocation6 + $0x90] sm:$0xff]  ;;  %v168_v46 = vld [vmem:[#allocation6 + $0x98] sm:$0xff]  ;;  %127 = vst [vmem:[#allocation3 + $0x128] sm:$0x3] %v6280_v14 }
  0x2c   :  { %353 = vmatpush.msra.mxu3 %v184_v30  ;;  %271 = vmatpush.msra.mxu1 %v182_v31  ;;  %v166_v47 = vld [vmem:[#allocation6 + $0x88] sm:$0xff]  ;;  %v161_v48 = vld [vmem:[#allocation6 + $0x60] sm:$0xff]  ;;  %v163_v49 = vld [vmem:[#allocation6 + $0x70] sm:$0xff]  ;;  %128 = vst [vmem:[#allocation3 + $0x130] sm:$0x3] %v6280_v14 }
  0x2d   :  { %231 = vmatpush.msra.mxu0 %v177_v32  ;;  %313 = vmatpush.msra.mxu2 %v179_v33  ;;  %v164_v50 = vld [vmem:[#allocation6 + $0x78] sm:$0xff]  ;;  %v162_v51 = vld [vmem:[#allocation6 + $0x68] sm:$0xff]  ;;  %v157_v52 = vld [vmem:[#allocation6 + $0x40] sm:$0xff]  ;;  %129 = vst [vmem:[#allocation3 + $0x138] sm:$0x3] %v6280_v14 }
  0x2e   :  { %354 = vmatpush.msra.mxu3 %v180_v34  ;;  %272 = vmatpush.msra.mxu1 %v178_v35  ;;  %v159_v53 = vld [vmem:[#allocation6 + $0x50] sm:$0xff]  ;;  %v160_v54 = vld [vmem:[#allocation6 + $0x58] sm:$0xff]  ;;  %v158_v55 = vld [vmem:[#allocation6 + $0x48] sm:$0xff]  ;;  %130 = vst [vmem:[#allocation4 + $0xb0] sm:$0x3] %v6280_v14 }
  0x2f   :  { %232 = vmatpush.msra.mxu0 %v173_v36  ;;  %314 = vmatpush.msra.mxu2 %v175_v37  ;;  %v153_v56 = vld [vmem:[#allocation6 + $0x20] sm:$0xff]  ;;  %v155_v57 = vld [vmem:[#allocation6 + $0x30] sm:$0xff]  ;;  %v156_v58 = vld [vmem:[#allocation6 + $0x38] sm:$0xff]  ;;  %131 = vst [vmem:[#allocation4 + $0xd0] sm:$0x3] %v6280_v14 }
  0x30   :  { %355 = vmatpush.msra.mxu3 %v176_v38  ;;  %273 = vmatpush.msra.mxu1 %v174_v39  ;;  %v154_v59 = vld [vmem:[#allocation6 + $0x28] sm:$0xff]  ;;  %v149_v60 = vld [vmem:[#allocation6] sm:$0xff]  ;;  %v151_v61 = vld [vmem:[#allocation6 + $0x10] sm:$0xff]  ;;  %132 = vst [vmem:[#allocation4 + $0x130] sm:$0x3] %v6280_v14 }
  0x31   :  { %233 = vmatpush.msra.mxu0 %v169_v40  ;;  %315 = vmatpush.msra.mxu2 %v171_v41  ;;  %v152_v62 = vld [vmem:[#allocation6 + $0x18] sm:$0xff]  ;;  %v141_v63 = vld [vmem:[%s8534_s0] sm:$0xff]  ;;  %v150_v0 = vld [vmem:[#allocation6 + $0x8] sm:$0xff]  ;;  %133 = vst [vmem:[#allocation4 + $0x48] sm:$0x3] %v6280_v14 }
  0x32   :  { %356 = vmatpush.msra.mxu3 %v172_v42  ;;  %274 = vmatpush.msra.mxu1 %v170_v43  ;;  %v142_v1 = vld [vmem:[%s8534_s0 + $0x8] sm:$0xff]  ;;  %v143_v2 = vld [vmem:[%s8534_s0 + $0x10] sm:$0xff]  ;;  %v144_v3 = vld [vmem:[%s8534_s0 + $0x18] sm:$0xff]  ;;  %134 = vst [vmem:[#allocation5] sm:$0xff] %v6280_v14 }
  0x33   :  { %234 = vmatpush.msra.mxu0 %v165_v44  ;;  %316 = vmatpush.msra.mxu2 %v167_v45  ;;  %v145_v4 = vld [vmem:[%s8534_s0 + $0x20] sm:$0xff]  ;;  %v146_v5 = vld [vmem:[%s8534_s0 + $0x28] sm:$0xff]  ;;  %v147_v6 = vld [vmem:[%s8534_s0 + $0x30] sm:$0xff]  ;;  %135 = vst [vmem:[#allocation5 + $0x8] sm:$0xff] %v6280_v14 }
  0x34   :  { %357 = vmatpush.msra.mxu3 %v168_v46  ;;  %275 = vmatpush.msra.mxu1 %v166_v47  ;;  %v148_v7 = vld [vmem:[%s8534_s0 + $0x38] sm:$0xff]  ;;  %v213_v8 = vld [vmem:[#allocation9] sm:$0xf]  ;;  %s6281_s0 = smov 112   ;;  %136 = vst [vmem:[#allocation5 + $0x10] sm:$0xff] %v6280_v14 }
  0x35   :  { %235 = vmatpush.msra.mxu0 %v161_v48  ;;  %317 = vmatpush.msra.mxu2 %v163_v49  ;;  %v6366_v9 = vperm.slane %v213_v8, 0  ;;  %v6368_v12 = vperm.slane %v213_v8, 1  ;;  %v6375_v18 = vperm.slane %v213_v8, 2  ;;  %v6377_v19 = vperm.slane %v213_v8, 3  ;;  %137 = vst [vmem:[#allocation5 + $0x18] sm:$0xff] %v6280_v14 }
  0x36   :  { %358 = vmatpush.msra.mxu3 %v164_v50  ;;  %276 = vmatpush.msra.mxu1 %v162_v51  ;;  %v6408_v51 = vshrl.u32 %v8542_v10, 7  ;;  %138 = vst [vmem:[#allocation5 + $0x20] sm:$0xff] %v6280_v14 }
  0x37   :  { %236 = vmatpush.msra.mxu0 %v157_v52  ;;  %318 = vmatpush.msra.mxu2 %v159_v53  ;;  %139 = vst [vmem:[#allocation5 + $0x28] sm:$0xff] %v6280_v14 }
  0x38   :  { %359 = vmatpush.msra.mxu3 %v160_v54  ;;  %277 = vmatpush.msra.mxu1 %v158_v55  ;;  %140 = vst [vmem:[#allocation5 + $0x30] sm:$0xff] %v6280_v14 }
  0x39   :  { %237 = vmatpush.msra.mxu0 %v153_v56  ;;  %319 = vmatpush.msra.mxu2 %v155_v57 }
  0x3a   :  { %360 = vmatpush.msra.mxu3 %v156_v58  ;;  %278 = vmatpush.msra.mxu1 %v154_v59 }
  0x3b   :  { %238 = vmatpush.msra.mxu0 %v149_v60  ;;  %320 = vmatpush.msra.mxu2 %v151_v61 }
  0x3c   :  { %361 = vmatpush.msra.mxu3 %v152_v62  ;;  %239 = vmatmul.f32.vlgmr.msra.gmra.mxu0 %v141_v63 }
  0x3d   :  { %321 = vmatmul.f32.vlgmr.msra.gmra.mxu2 %v141_v63  ;;  %362 = vmatmul.f32.vlgmr.msra.gmra.mxu3 %v141_v63 }
  0x3e   :  { %279 = vmatpush.msra.mxu1 %v150_v0 }
  0x3f   :  { %280 = vmatmul.f32.vlgmr.msra.gmra.mxu1 %v141_v63 }
  0x44   :  { %242 = vmatmul.f32.gmra.mxu0 %v142_v1 }
  0x45   :  { %324 = vmatmul.f32.gmra.mxu2 %v142_v1  ;;  %365 = vmatmul.f32.gmra.mxu3 %v142_v1 }
  0x47   :  { %283 = vmatmul.f32.gmra.mxu1 %v142_v1 }
  0x4c   :  { %245 = vmatmul.f32.gmra.mxu0 %v143_v2 }
  0x4d   :  { %327 = vmatmul.f32.gmra.mxu2 %v143_v2  ;;  %368 = vmatmul.f32.gmra.mxu3 %v143_v2 }
  0x4f   :  { %286 = vmatmul.f32.gmra.mxu1 %v143_v2  ;;  %v487_v2 = vadd.s32 24, %v6408_v51 }
  0x54   :  { %248 = vmatmul.f32.gmra.mxu0 %v144_v3 }
  0x55   :  { %371 = vmatmul.f32.gmra.mxu3 %v144_v3  ;;  %330 = vmatmul.f32.gmra.mxu2 %v144_v3 }
  0x57   :  { %289 = vmatmul.f32.gmra.mxu1 %v144_v3 }
  0x5c   :  { %251 = vmatmul.f32.gmra.mxu0 %v145_v4 }
  0x5d   :  { %374 = vmatmul.f32.gmra.mxu3 %v145_v4  ;;  %333 = vmatmul.f32.gmra.mxu2 %v145_v4 }
  0x5f   :  { %292 = vmatmul.f32.gmra.mxu1 %v145_v4 }
  0x64   :  { %254 = vmatmul.f32.gmra.mxu0 %v146_v5 }
  0x65   :  { %377 = vmatmul.f32.gmra.mxu3 %v146_v5  ;;  %336 = vmatmul.f32.gmra.mxu2 %v146_v5 }
  0x67   :  { %295 = vmatmul.f32.gmra.mxu1 %v146_v5 }
  0x6c   :  { %257 = vmatmul.f32.gmra.mxu0 %v147_v6 }
  0x6d   :  { %339 = vmatmul.f32.gmra.mxu2 %v147_v6  ;;  %380 = vmatmul.f32.gmra.mxu3 %v147_v6 }
  0x6f   :  { %298 = vmatmul.f32.gmra.mxu1 %v147_v6 }
  0x74   :  { %260 = vmatmul.f32.gmra.mxu0 %v148_v7 }
  0x75   :  { %342 = vmatmul.f32.gmra.mxu2 %v148_v7  ;;  %383 = vmatmul.f32.gmra.mxu3 %v148_v7 }
  0x77   :  { %301 = vmatmul.f32.gmra.mxu1 %v148_v7 }
  0xb9   :  { %v240_v11 = vpop.f32.mrf.mxu0 }
  0xba   :  { %v241_v13 = vadd.f32 %v240_v11, %v6366_v9 }
  0xbc   :  { %v387_v15 = vmul.f32 1.5258789e-05, %v241_v13  ;;  %v281_v16 = vpop.f32.mrf.mxu1 }
  0xbd   :  { %v282_v17 = vadd.f32 %v281_v16, %v6368_v12 }
  0xbe   :  { %v419_v20 = vfloor.f32 %v387_v15 }
  0xbf   :  { %v388_v21 = vmul.f32 1.5258789e-05, %v282_v17 }
  0xc0   :  { %v451_v22 = vmax.f32 %v419_v20, 0.0  ;;  %v322_v23 = vpop.f32.mrf.mxu2  ;;  %v363_v24 = vpop.f32.mrf.mxu3 }
  0xc1   :  { %v420_v25 = vfloor.f32 %v388_v21  ;;  %v323_v26 = vadd.f32 %v322_v23, %v6375_v18  ;;  %v364_v27 = vadd.f32 %v363_v24, %v6377_v19  ;;  %v243_v28 = vpop.f32.mrf.mxu0 }
  0xc2   :  { %556 = vst [vmem:[#allocation2 + $0x20] sm:$0xff] %v451_v22  ;;  %v244_v29 = vadd.f32 %v243_v28, %v6366_v9 }
  0xc3   :  { %v6387_v30 = vmax.f32 %v420_v25, 0.0  ;;  %v389_v31 = vmul.f32 1.5258789e-05, %v323_v26  ;;  %v390_v32 = vmul.f32 1.5258789e-05, %v364_v27  ;;  %v495_v26 = vand.u32 31, %v487_v2 }
  0xc4   :  { %v391_v33 = vmul.f32 1.5258789e-05, %v244_v29  ;;  %v284_v34 = vpop.f32.mrf.mxu1 }
  0xc5   :  { %557 = vst [vmem:[#allocation2 + $0x28] sm:$0xff] %v6387_v30  ;;  %v421_v35 = vfloor.f32 %v389_v31  ;;  %v422_v36 = vfloor.f32 %v390_v32  ;;  %v285_v37 = vadd.f32 %v284_v34, %v6368_v12  ;;  %vm6454_vm2 = vcmp.lt.s32.totalorder %v495_v26, 28 }
  0xc6   :  { %v423_v38 = vfloor.f32 %v391_v33 }
  0xc7   :  { %v6394_v39 = vmax.f32 %v421_v35, 0.0  ;;  %v6396_v40 = vmax.f32 %v422_v36, 0.0  ;;  %v392_v41 = vmul.f32 1.5258789e-05, %v285_v37 }
  0xc8   :  { %v6399_v42 = vmax.f32 %v423_v38, 0.0  ;;  %v325_v43 = vpop.f32.mrf.mxu2  ;;  %v366_v44 = vpop.f32.mrf.mxu3 }
  0xc9   :  { %558 = vst [vmem:[#allocation2 + $0x30] sm:$0xff] %v6394_v39  ;;  %v424_v45 = vfloor.f32 %v392_v41  ;;  %v326_v46 = vadd.f32 %v325_v43, %v6375_v18  ;;  %v367_v47 = vadd.f32 %v366_v44, %v6377_v19  ;;  %v246_v48 = vpop.f32.mrf.mxu0  ;;  %v620_v49 = vld [vmem:[#allocation2 + $0x20] sm:$0xfe] }
  0xca   :  { %559 = vst [vmem:[#allocation2 + $0x38] sm:$0xff] %v6396_v40  ;;  %v247_v50 = vadd.f32 %v246_v48, %v6366_v9  ;;  %v693_v52 = vrot.slane %v620_v49, 1  ;;  %v694_v53 = vrot.slane %v6399_v42, 1 }
  0xcb   :  { %v6411_v54 = vmax.f32 %v424_v45, 0.0  ;;  %v393_v55 = vmul.f32 1.5258789e-05, %v326_v46  ;;  %v394_v56 = vmul.f32 1.5258789e-05, %v367_v47 }
  0xcc   :  { %v395_v57 = vmul.f32 1.5258789e-05, %v247_v50  ;;  %v287_v58 = vpop.f32.mrf.mxu1  ;;  %v695_v59 = vsel %vm692_vm1, %v693_v52, %v694_v53  ;;  %v621_v60 = vld [vmem:[#allocation2 + $0x28] sm:$0xfe] }
  0xcd   :  { %v425_v61 = vfloor.f32 %v393_v55  ;;  %v426_v62 = vfloor.f32 %v394_v56  ;;  %v288_v63 = vadd.f32 %v287_v58, %v6368_v12  ;;  %v6418_v0 = vmax.f32 %v451_v22, %v695_v59 }
  0xce   :  { %v427_v1 = vfloor.f32 %v395_v57  ;;  %v696_v3 = vrot.slane %v621_v60, 1  ;;  %v697_v4 = vrot.slane %v6411_v54, 1 }
  0xcf   :  { %v6423_v5 = vmax.f32 %v425_v61, 0.0  ;;  %v6425_v6 = vmax.f32 %v426_v62, 0.0  ;;  %v396_v7 = vmul.f32 1.5258789e-05, %v288_v63  ;;  %857 = vrot.lane.b32.xlu1 %v6418_v0, %s6281_s0 }
  0xd0   :  { %v6430_v8 = vmax.f32 %v427_v1, 0.0  ;;  %v328_v11 = vpop.f32.mrf.mxu2  ;;  %v369_v13 = vpop.f32.mrf.mxu3  ;;  %v622_v15 = vld [vmem:[#allocation2 + $0x30] sm:$0xfe]  ;;  %v698_v16 = vsel %vm692_vm1, %v696_v3, %v697_v4 }
  0xd1   :  { %v428_v17 = vfloor.f32 %v396_v7  ;;  %v329_v20 = vadd.f32 %v328_v11, %v6375_v18  ;;  %v370_v21 = vadd.f32 %v369_v13, %v6377_v19  ;;  %v249_v22 = vpop.f32.mrf.mxu0  ;;  %v699_v23 = vrot.slane %v622_v15, 1  ;;  %v623_v24 = vld [vmem:[#allocation2 + $0x38] sm:$0xfe] }
  0xd2   :  { %v250_v25 = vadd.f32 %v249_v22, %v6366_v9  ;;  %v700_v27 = vrot.slane %v6423_v5, 1  ;;  %v702_v28 = vrot.slane %v623_v24, 1  ;;  %v703_v33 = vrot.slane %v6425_v6, 1 }
  0xd3   :  { %v6438_v29 = vmax.f32 %v428_v17, 0.0  ;;  %v397_v31 = vmul.f32 1.5258789e-05, %v329_v20  ;;  %v398_v32 = vmul.f32 1.5258789e-05, %v370_v21  ;;  %v6444_v37 = vmax.f32 %v6387_v30, %v698_v16 }
  0xd4   :  { %v399_v34 = vmul.f32 1.5258789e-05, %v250_v25  ;;  %v290_v35 = vpop.f32.mrf.mxu1  ;;  %v701_v36 = vsel %vm692_vm1, %v699_v23, %v700_v27  ;;  %v705_v57 = vrot.slane %v6430_v8, 1 }
  0xd5   :  { %v429_v38 = vfloor.f32 %v397_v31  ;;  %v430_v41 = vfloor.f32 %v398_v32  ;;  %v291_v43 = vadd.f32 %v290_v35, %v6368_v12  ;;  %v6448_v44 = vmax.f32 %v6394_v39, %v701_v36 }
  0xd6   :  { %v431_v45 = vfloor.f32 %v399_v34  ;;  %v707_v46 = vrot.slane %v6438_v29, 1  ;;  %v704_v39 = vsel %vm692_vm1, %v702_v28, %v703_v33  ;;  %v706_v32 = vsel %vm692_vm1, %v694_v53, %v705_v57 }
  0xd7   :  { %v6452_v47 = vmax.f32 %v429_v38, 0.0  ;;  %v400_v30 = vmul.f32 1.5258789e-05, %v291_v43  ;;  %861 = vrot.lane.b32.xlu0 %v6448_v44, %s6281_s0  ;;  %859 = vrot.lane.b32.xlu1 %v6444_v37, %s6281_s0  ;;  %v6464_v49 = vmax.f32 %v430_v41, 0.0  ;;  %v6480_v2 = vmax.f32 %v6396_v40, %v704_v39 }
  0xd8   :  { %v463_v50 = vmax.f32 %v431_v45, 0.0  ;;  %v372_v52 = vpop.f32.mrf.mxu3  ;;  %v331_v55 = vpop.f32.mrf.mxu2  ;;  %v708_v56 = vsel %vm692_vm1, %v697_v4, %v707_v46 }
  0xd9   :  { %v432_v58 = vfloor.f32 %v400_v30  ;;  %v373_v59 = vadd.f32 %v372_v52, %v6377_v19  ;;  %v332_v60 = vadd.f32 %v331_v55, %v6375_v18  ;;  %v252_v61 = vpop.f32.mrf.mxu0  ;;  %v709_v62 = vrot.slane %v6452_v47, 1 }
  0xda   :  { %v6476_v63 = vsel %vm6454_vm2, %v463_v50, 0.0  ;;  %v253_v1 = vadd.f32 %v252_v61, %v6366_v9  ;;  %v6483_v3 = vmax.f32 %v6411_v54, %v708_v56  ;;  %v711_v20 = vrot.slane %v6464_v49, 1 }
  0xdb   :  { %v464_v4 = vmax.f32 %v432_v58, 0.0  ;;  %v402_v7 = vmul.f32 1.5258789e-05, %v373_v59  ;;  %v401_v11 = vmul.f32 1.5258789e-05, %v332_v60  ;;  %v710_v13 = vsel %vm692_vm1, %v700_v27, %v709_v62 }
  0xdc   :  { %v403_v15 = vmul.f32 1.5258789e-05, %v253_v1  ;;  %v293_v16 = vpop.f32.mrf.mxu1  ;;  %v6489_v17 = vmax.f32 %v6423_v5, %v710_v13  ;;  %v713_v40 = vrot.slane %v6476_v63, 1  ;;  %v712_v31 = vsel %vm692_vm1, %v703_v33, %v711_v20 }
  0xdd   :  { %v6495_v54 = vsel %vm6454_vm2, %v464_v4, 0.0  ;;  %v434_v21 = vfloor.f32 %v402_v7  ;;  %v433_v22 = vfloor.f32 %v401_v11  ;;  %v294_v23 = vadd.f32 %v293_v16, %v6368_v12 }
  0xde   :  { %v435_v24 = vfloor.f32 %v403_v15  ;;  %869 = vrot.lane.b32.xlu2 %v6489_v17, %s6281_s0  ;;  %v714_v41 = vsel %vm692_vm1, %v705_v57, %v713_v40  ;;  %v715_v50 = vrot.slane %v6495_v54, 1  ;;  %v6526_v57 = vmax.f32 %v6425_v6, %v712_v31 }
  0xdf   :  { %v466_v25 = vmax.f32 %v434_v21, 0.0  ;;  %v465_v26 = vmax.f32 %v433_v22, 0.0  ;;  %v404_v5 = vmul.f32 1.5258789e-05, %v294_v23  ;;  %863 = vrot.lane.b32.xlu0 %v6480_v2, %s6281_s0  ;;  %867 = vrot.lane.b32.xlu1 %v6483_v3, %s6281_s0  ;;  %v6530_v60 = vmax.f32 %v6399_v42, %v706_v32 }
  0xe0   :  { %v375_v27 = vpop.f32.mrf.mxu3  ;;  %v334_v28 = vpop.f32.mrf.mxu2  ;;  %v6518_v33 = vmax.f32 %v435_v24, 0.0  ;;  %v6533_v61 = vmax.f32 %v6430_v8, %v714_v41  ;;  %v716_v42 = vsel %vm692_vm1, %v707_v46, %v715_v50 }
  0xe1   :  { %v539_v34 = vsel %vm6454_vm2, %v466_v25, 0.0  ;;  %v436_v35 = vfloor.f32 %v404_v5  ;;  %v376_v36 = vadd.f32 %v375_v27, %v6377_v19  ;;  %v255_v38 = vpop.f32.mrf.mxu0  ;;  %v6516_v43 = vsel %vm6454_vm2, %v465_v26, 0.0 }
  0xe2   :  { %v335_v45 = vadd.f32 %v334_v28, %v6375_v18  ;;  %v256_v53 = vadd.f32 %v255_v38, %v6366_v9  ;;  %v719_v48 = vrot.slane %v539_v34, 1  ;;  %v6556_v46 = vmax.f32 %v6438_v29, %v716_v42 }
  0xe3   :  { %v6522_v30 = vmax.f32 %v436_v35, 0.0  ;;  %v406_v39 = vmul.f32 1.5258789e-05, %v376_v36  ;;  %v717_v36 = vrot.slane %v6516_v43, 1 }
  0xe4   :  { %v405_v52 = vmul.f32 1.5258789e-05, %v335_v45  ;;  %v296_v55 = vpop.f32.mrf.mxu1  ;;  %v407_v56 = vmul.f32 1.5258789e-05, %v256_v53  ;;  %v720_v16 = vsel %vm692_vm1, %v711_v20, %v719_v48 }
  0xe5   :  { %v438_v58 = vfloor.f32 %v406_v39  ;;  %v297_v59 = vadd.f32 %v296_v55, %v6368_v12  ;;  %v6564_v35 = vmax.f32 %v6464_v49, %v720_v16  ;;  %v723_v38 = vrot.slane %v6522_v30, 1 }
  0xe6   :  { %v437_v1 = vfloor.f32 %v405_v52  ;;  %v439_v4 = vfloor.f32 %v407_v56  ;;  %871 = vrot.lane.b32.xlu2 %v6526_v57, %s6281_s0  ;;  %v491_v52 = vadd.s32 56, %v6408_v51 }
  0xe7   :  { %v6537_v7 = vmax.f32 %v438_v58, 0.0  ;;  %v408_v11 = vmul.f32 1.5258789e-05, %v297_v59  ;;  %865 = vrot.lane.b32.xlu0 %v6530_v60, %s6281_s0  ;;  %873 = vrot.lane.b32.xlu1 %v6533_v61, %s6281_s0  ;;  %v718_v59 = vsel %vm692_vm1, %v709_v62, %v717_v36  ;;  %v724_v51 = vsel %vm692_vm1, %v715_v50, %v723_v38 }
  0xe8   :  { %v6546_v6 = vmax.f32 %v437_v1, 0.0  ;;  %v378_v8 = vpop.f32.mrf.mxu3  ;;  %v337_v13 = vpop.f32.mrf.mxu2  ;;  %v6548_v15 = vmax.f32 %v439_v4, 0.0  ;;  %v721_v50 = vrot.slane %v6518_v33, 1 }
  0xe9   :  { %v440_v21 = vfloor.f32 %v408_v11  ;;  %v379_v22 = vadd.f32 %v378_v8, %v6377_v19  ;;  %v338_v23 = vadd.f32 %v337_v13, %v6375_v18  ;;  %v258_v24 = vpop.f32.mrf.mxu0  ;;  %v727_v25 = vrot.slane %v6537_v7, 1 }
  0xea   :  { %v259_v26 = vadd.f32 %v258_v24, %v6366_v9  ;;  %v499_v13 = vand.u32 31, %v491_v52 }
  0xeb   :  { %v6558_v5 = vmax.f32 %v440_v21, 0.0  ;;  %v410_v27 = vmul.f32 1.5258789e-05, %v379_v22  ;;  %v409_v28 = vmul.f32 1.5258789e-05, %v338_v23  ;;  %v728_v20 = vsel %vm692_vm1, %v719_v48, %v727_v25 }
  0xec   :  { %v299_v31 = vpop.f32.mrf.mxu1  ;;  %v411_v32 = vmul.f32 1.5258789e-05, %v259_v26  ;;  %v6569_v53 = vmax.f32 %v539_v34, %v728_v20  ;;  %v6599_v26 = vmax.f32 %v6452_v47, %v718_v59  ;;  %vm6614_vm3 = vcmp.lt.s32.totalorder %v499_v13, 28 }
  0xed   :  { %v442_v41 = vfloor.f32 %v410_v27  ;;  %v441_v29 = vfloor.f32 %v409_v28  ;;  %v300_v45 = vadd.f32 %v299_v31, %v6368_v12  ;;  %v731_v55 = vrot.slane %v6558_v5, 1 }
  0xee   :  { %v443_v39 = vfloor.f32 %v411_v32  ;;  %875 = vrot.lane.b32.xlu2 %v6556_v46, %s6281_s0  ;;  %v6602_v27 = vmax.f32 %v6495_v54, %v724_v51 }
  0xef   :  { %v6575_v49 = vmax.f32 %v442_v41, 0.0  ;;  %v412_v56 = vmul.f32 1.5258789e-05, %v300_v45  ;;  %879 = vrot.lane.b32.xlu0 %v6564_v35, %s6281_s0  ;;  %887 = vrot.lane.b32.xlu1 %v6569_v53, %s6281_s0  ;;  %v6581_v48 = vmax.f32 %v441_v29, 0.0  ;;  %v732_v21 = vsel %vm692_vm1, %v723_v38, %v731_v55 }
  0xf0   :  { %v340_v34 = vpop.f32.mrf.mxu2  ;;  %v381_v58 = vpop.f32.mrf.mxu3  ;;  %v6589_v42 = vmax.f32 %v443_v39, 0.0  ;;  %v6606_v32 = vmax.f32 %v6522_v30, %v732_v21 }
  0xf1   :  { %v444_v1 = vfloor.f32 %v412_v56  ;;  %v341_v4 = vadd.f32 %v340_v34, %v6375_v18  ;;  %v382_v11 = vadd.f32 %v381_v58, %v6377_v19  ;;  %v261_v8 = vpop.f32.mrf.mxu0  ;;  %v733_v47 = vrot.slane %v6581_v48, 1 }
  0xf2   :  { %v262_v16 = vadd.f32 %v261_v8, %v6366_v9  ;;  %v725_v9 = vrot.slane %v6546_v6, 1  ;;  %v722_v56 = vsel %vm692_vm1, %v713_v40, %v721_v50 }
  0xf3   :  { %v6595_v22 = vmax.f32 %v444_v1, 0.0  ;;  %v413_v62 = vmul.f32 1.5258789e-05, %v341_v4  ;;  %v414_v23 = vmul.f32 1.5258789e-05, %v382_v11  ;;  %v6636_v40 = vmax.f32 %v6476_v63, %v722_v56 }
  0xf4   :  { %v415_v24 = vmul.f32 1.5258789e-05, %v262_v16  ;;  %v302_v28 = vpop.f32.mrf.mxu1  ;;  %v726_v51 = vsel %vm692_vm1, %v717_v36, %v725_v9  ;;  %v734_v4 = vsel %vm692_vm1, %v725_v9, %v733_v47  ;;  %v729_v63 = vrot.slane %v6548_v15, 1 }
  0xf5   :  { %v445_v20 = vfloor.f32 %v413_v62  ;;  %v446_v31 = vfloor.f32 %v414_v23  ;;  %v303_v38 = vadd.f32 %v302_v28, %v6368_v12  ;;  %v6647_v62 = vmax.f32 %v6546_v6, %v734_v4  ;;  %v653_v4 = vld [vmem:[#allocation2 + $0x128] sm:$0x1] }
  0xf6   :  { %v447_v41 = vfloor.f32 %v415_v24  ;;  %877 = vrot.lane.b32.xlu2 %v6599_v26, %s6281_s0  ;;  %v737_v23 = vrot.slane %v6589_v42, 1 }
  0xf7   :  { %v6612_v29 = vmax.f32 %v445_v20, 0.0  ;;  %883 = vrot.lane.b32.xlu0 %v6602_v27, %s6281_s0  ;;  %891 = vrot.lane.b32.xlu1 %v6606_v32, %s6281_s0  ;;  %v416_v30 = vmul.f32 1.5258789e-05, %v303_v38  ;;  %v478_v12 = vmax.f32 %v446_v31, 0.0  ;;  %v730_v20 = vsel %vm692_vm1, %v721_v50, %v729_v63 }
  0xf8   :  { %v343_v45 = vpop.f32.mrf.mxu2  ;;  %v384_v39 = vpop.f32.mrf.mxu3  ;;  %v479_v52 = vmax.f32 %v447_v41, 0.0  ;;  %v738_v31 = vsel %vm692_vm1, %v729_v63, %v737_v23  ;;  %v6674_v41 = vmax.f32 %v6518_v33, %v730_v20  ;;  %v1473_v33 = vld [vmem:[#allocation11 + $0xbe0] sm:$0xff] }
  0xf9   :  { %v344_v34 = vadd.f32 %v343_v45, %v6375_v18  ;;  %v385_v58 = vadd.f32 %v384_v39, %v6377_v19  ;;  %v448_v59 = vfloor.f32 %v416_v30  ;;  %v6639_v18 = vmax.f32 %v6516_v43, %v726_v51  ;;  %1646 = vmatpush.msrb.mxu1 %v1473_v33  ;;  %v1465_v63 = vld [vmem:[#allocation11 + $0xba0] sm:$0xff] }
  0xfa   :  { %v6630_v1 = vsel %vm6614_vm3, %v479_v52, 0.0  ;;  %v735_v19 = vrot.slane %v6575_v49, 1  ;;  %v6677_v30 = vmax.f32 %v6548_v15, %v738_v31  ;;  %v743_v54 = vrot.slane %v478_v12, 1  ;;  %v654_v52 = vld [vmem:[#allocation2 + $0x130] sm:$0x1]  ;;  %v1533_v20 = vld [vmem:[#allocation11 + $0xdc0] sm:$0xff] }
  0xfb   :  { %v417_v11 = vmul.f32 1.5258789e-05, %v344_v34  ;;  %v418_v8 = vmul.f32 1.5258789e-05, %v385_v58  ;;  %v480_v13 = vmax.f32 %v448_v59, 0.0  ;;  %v741_v59 = vrot.slane %v6612_v29, 1  ;;  %v1601_v33 = vld [vmem:[#allocation11 + $0xfe0] sm:$0xff] }
  0xfc   :  { %v736_v6 = vsel %vm692_vm1, %v727_v25, %v735_v19  ;;  %v739_v25 = vrot.slane %v6595_v22, 1  ;;  %v744_v45 = vsel %vm692_vm1, %v735_v19, %v743_v54  ;;  %v757_v51 = vrot.slane %v654_v52, 1  ;;  %1728 = vmatpush.msrb.mxu3 %v1601_v33  ;;  %v1389_v52 = vld [vmem:[#allocation11 + $0x940] sm:$0xff] }
  0xfd   :  { %v449_v36 = vfloor.f32 %v417_v11  ;;  %v450_v16 = vfloor.f32 %v418_v8  ;;  %v6644_v21 = vsel %vm6614_vm3, %v480_v13, 0.0  ;;  %v6671_v38 = vmax.f32 %v6537_v7, %v736_v6  ;;  %v1409_v7 = vld [vmem:[#allocation11 + $0x9e0] sm:$0xff] }
  0xfe   :  { %881 = vrot.lane.b32.xlu2 %v6636_v40, %s6281_s0  ;;  %1605 = vmatpush.msrb.mxu0 %v1409_v7  ;;  %v740_v15 = vsel %vm692_vm1, %v731_v55, %v739_v25  ;;  %v6698_v34 = vmax.f32 %v6575_v49, %v744_v45  ;;  %v1405_v11 = vld [vmem:[#allocation11 + $0x9c0] sm:$0xff] }
  0xff   :  { %v481_v43 = vmax.f32 %v449_v36, 0.0  ;;  %v482_v24 = vmax.f32 %v450_v16, 0.0  ;;  %885 = vrot.lane.b32.xlu0 %v6639_v18, %s6281_s0  ;;  %893 = vrot.lane.b32.xlu1 %v6647_v62, %s6281_s0  ;;  %v6695_v56 = vmax.f32 %v6558_v5, %v740_v15  ;;  %v742_v5 = vsel %vm692_vm1, %v733_v47, %v741_v59  ;;  %v1469_v8 = vld [vmem:[#allocation11 + $0xbc0] sm:$0xff] }
 0x100   :  { %v6715_v13 = vmax.f32 %v6581_v48, %v742_v5  ;;  %1606 = vmatpush.msrb.mxu0 %v1405_v11  ;;  %1647 = vmatpush.msrb.mxu1 %v1469_v8  ;;  %v745_v16 = vrot.slane %v6630_v1, 1  ;;  %v1401_v47 = vld [vmem:[#allocation11 + $0x9a0] sm:$0xff] }
 0x101   :  { %v554_v28 = vsel %vm6614_vm3, %v481_v43, 0.0  ;;  %v6664_v9 = vsel %vm6614_vm3, %v482_v24, 0.0  ;;  %v747_v43 = vrot.slane %v6644_v21, 1  ;;  %v755_v24 = vrot.slane %v653_v4, 1  ;;  %v1397_v48 = vld [vmem:[#allocation11 + $0x980] sm:$0xff] }
 0x102   :  { %v751_v50 = vrot.slane %v6664_v9, 1  ;;  %v749_v55 = vrot.slane %v554_v28, 1  ;;  %1607 = vmatpush.msrb.mxu0 %v1401_v47  ;;  %1648 = vmatpush.msrb.mxu1 %v1465_v63  ;;  %v1393_v6 = vld [vmem:[#allocation11 + $0x960] sm:$0xff]  ;;  %v746_v31 = vsel %vm692_vm1, %v737_v23, %v745_v16 }
 0x103   :  { %v1457_v7 = vld [vmem:[#allocation11 + $0xb60] sm:$0xff]  ;;  %v748_v15 = vsel %vm692_vm1, %v739_v25, %v747_v43  ;;  %v756_v45 = vsel %vm692_vm1, %v747_v43, %v755_v24 }
 0x104   :  { %v752_v39 = vsel %vm692_vm1, %v743_v54, %v751_v50  ;;  %v750_v49 = vsel %vm692_vm1, %v741_v59, %v749_v55  ;;  %1608 = vmatpush.msrb.mxu0 %v1397_v48  ;;  %v652_v54 = vld [vmem:[#allocation2 + $0x120] sm:$0x1]  ;;  %v6739_v5 = vmax.f32 %v6595_v22, %v748_v15  ;;  %v6742_v25 = vmax.f32 %v6644_v21, %v756_v45 }
 0x105   :  { %v6700_v58 = vmax.f32 %v478_v12, %v752_v39  ;;  %v758_v12 = vsel %vm692_vm1, %v749_v55, %v757_v51  ;;  %v6718_v19 = vmax.f32 %v6612_v29, %v750_v49  ;;  %v1461_v29 = vld [vmem:[#allocation11 + $0xb80] sm:$0xff]  ;;  %v655_v39 = vld [vmem:[#allocation2 + $0x138] sm:$0x1]  ;;  %v6736_v51 = vmax.f32 %v6589_v42, %v746_v31 }
 0x106   :  { %895 = vrot.lane.b32.xlu2 %v6671_v38, %s6281_s0  ;;  %v6720_v36 = vmax.f32 %v554_v28, %v758_v12  ;;  %v1537_v28 = vld [vmem:[#allocation11 + $0xde0] sm:$0xff]  ;;  %1649 = vmatpush.msrb.mxu1 %v1461_v29  ;;  %v753_v23 = vrot.slane %v652_v54, 1  ;;  %v759_v49 = vrot.slane %v655_v39, 1 }
 0x107   :  { %889 = vrot.lane.b32.xlu0 %v6674_v41, %s6281_s0  ;;  %897 = vrot.lane.b32.xlu1 %v6677_v30, %s6281_s0  ;;  %v1453_v59 = vld [vmem:[#allocation11 + $0xb40] sm:$0xff] }
 0x108   :  { %1687 = vmatpush.msrb.mxu2 %v1537_v28  ;;  %1609 = vmatpush.msrb.mxu0 %v1393_v6  ;;  %v1529_v55 = vld [vmem:[#allocation11 + $0xda0] sm:$0xff]  ;;  %v754_v22 = vsel %vm692_vm1, %v745_v16, %v753_v23  ;;  %v760_v47 = vsel %vm692_vm1, %v751_v50, %v759_v49 }
 0x109   :  { %1650 = vmatpush.msrb.mxu1 %v1457_v7  ;;  %v1385_v12 = vld [vmem:[#allocation11 + $0x920] sm:$0xff]  ;;  %v6755_v29 = vmax.f32 %v6630_v1, %v754_v22  ;;  %v6758_v16 = vmax.f32 %v6664_v9, %v760_v47 }
 0x10a   :  { %1688 = vmatpush.msrb.mxu2 %v1533_v20  ;;  %1610 = vmatpush.msrb.mxu0 %v1389_v52  ;;  %v1449_v4 = vld [vmem:[#allocation11 + $0xb20] sm:$0xff] }
 0x10b   :  { %1651 = vmatpush.msrb.mxu1 %v1453_v59  ;;  %v1525_v11 = vld [vmem:[#allocation11 + $0xd80] sm:$0xff] }
 0x10c   :  { %1689 = vmatpush.msrb.mxu2 %v1529_v55  ;;  %v1381_v42 = vld [vmem:[#allocation11 + $0x900] sm:$0xff]  ;;  %1611 = vmatpush.msrb.mxu0 %v1385_v12 }
 0x10d   :  { %1652 = vmatpush.msrb.mxu1 %v1449_v4  ;;  %v1445_v21 = vld [vmem:[#allocation11 + $0xb00] sm:$0xff] }
 0x10e   :  { %899 = vrot.lane.b32.xlu2 %v6695_v56, %s6281_s0  ;;  %v1521_v8 = vld [vmem:[#allocation11 + $0xd60] sm:$0xff]  ;;  %1690 = vmatpush.msrb.mxu2 %v1525_v11 }
 0x10f   :  { %903 = vrot.lane.b32.xlu0 %v6698_v34, %s6281_s0  ;;  %911 = vrot.lane.b32.xlu1 %v6700_v58, %s6281_s0  ;;  %v1597_v63 = vld [vmem:[#allocation11 + $0xfc0] sm:$0xff] }
 0x110   :  { %v1377_v43 = vld [vmem:[#allocation11 + $0x8e0] sm:$0xff]  ;;  %1729 = vmatpush.msrb.mxu3 %v1597_v63  ;;  %1612 = vmatpush.msrb.mxu0 %v1381_v42 }
 0x111   :  { %v1441_v24 = vld [vmem:[#allocation11 + $0xae0] sm:$0xff]  ;;  %1653 = vmatpush.msrb.mxu1 %v1445_v21  ;;  %1691 = vmatpush.msrb.mxu2 %v1521_v8 }
 0x112   :  { %v1517_v48 = vld [vmem:[#allocation11 + $0xd40] sm:$0xff]  ;;  %1613 = vmatpush.msrb.mxu0 %v1377_v43 }
 0x113   :  { %v1593_v28 = vld [vmem:[#allocation11 + $0xfa0] sm:$0xff]  ;;  %1654 = vmatpush.msrb.mxu1 %v1441_v24  ;;  %1692 = vmatpush.msrb.mxu2 %v1517_v48 }
 0x114   :  { %1730 = vmatpush.msrb.mxu3 %v1593_v28  ;;  %v1373_v6 = vld [vmem:[#allocation11 + $0x8c0] sm:$0xff] }
 0x115   :  { %v1589_v50 = vld [vmem:[#allocation11 + $0xf80] sm:$0xff]  ;;  %1614 = vmatpush.msrb.mxu0 %v1373_v6 }
 0x116   :  { %901 = vrot.lane.b32.xlu2 %v6715_v13, %s6281_s0  ;;  %v1585_v20 = vld [vmem:[#allocation11 + $0xf60] sm:$0xff]  ;;  %1731 = vmatpush.msrb.mxu3 %v1589_v50 }
 0x117   :  { %909 = vrot.lane.b32.xlu0 %v6718_v19, %s6281_s0  ;;  %917 = vrot.lane.b32.xlu1 %v6720_v36, %s6281_s0  ;;  %v1437_v31 = vld [vmem:[#allocation11 + $0xac0] sm:$0xff] }
 0x118   :  { %v1513_v1 = vld [vmem:[#allocation11 + $0xd20] sm:$0xff]  ;;  %1732 = vmatpush.msrb.mxu3 %v1585_v20  ;;  %1655 = vmatpush.msrb.mxu1 %v1437_v31 }
 0x119   :  { %v1369_v54 = vld [vmem:[#allocation11 + $0x8a0] sm:$0xff]  ;;  %1693 = vmatpush.msrb.mxu2 %v1513_v1 }
 0x11a   :  { %v1433_v9 = vld [vmem:[#allocation11 + $0xaa0] sm:$0xff]  ;;  %1615 = vmatpush.msrb.mxu0 %v1369_v54 }
 0x11b   :  { %v1509_v7 = vld [vmem:[#allocation11 + $0xd00] sm:$0xff]  ;;  %1656 = vmatpush.msrb.mxu1 %v1433_v9 }
 0x11c   :  { %v1365_v33 = vld [vmem:[#allocation11 + $0x880] sm:$0xff]  ;;  %1694 = vmatpush.msrb.mxu2 %v1509_v7 }
 0x11d   :  { %v1581_v15 = vld [vmem:[#allocation11 + $0xf40] sm:$0xff]  ;;  %1616 = vmatpush.msrb.mxu0 %v1365_v33 }
 0x11e   :  { %905 = vrot.lane.b32.xlu2 %v6736_v51, %s6281_s0  ;;  %v1429_v45 = vld [vmem:[#allocation11 + $0xa80] sm:$0xff]  ;;  %1733 = vmatpush.msrb.mxu3 %v1581_v15 }
 0x11f   :  { %907 = vrot.lane.b32.xlu0 %v6739_v5, %s6281_s0  ;;  %915 = vrot.lane.b32.xlu1 %v6742_v25, %s6281_s0  ;;  %v1505_v39 = vld [vmem:[#allocation11 + $0xce0] sm:$0xff] }
 0x120   :  { %v1361_v52 = vld [vmem:[#allocation11 + $0x860] sm:$0xff]  ;;  %1657 = vmatpush.msrb.mxu1 %v1429_v45  ;;  %1695 = vmatpush.msrb.mxu2 %v1505_v39 }
 0x121   :  { %v1577_v59 = vld [vmem:[#allocation11 + $0xf20] sm:$0xff]  ;;  %1617 = vmatpush.msrb.mxu0 %v1361_v52 }
 0x122   :  { %v1425_v55 = vld [vmem:[#allocation11 + $0xa60] sm:$0xff]  ;;  %1734 = vmatpush.msrb.mxu3 %v1577_v59 }
 0x123   :  { %v1501_v23 = vld [vmem:[#allocation11 + $0xcc0] sm:$0xff]  ;;  %1658 = vmatpush.msrb.mxu1 %v1425_v55 }
 0x124   :  { %v1357_v49 = vld [vmem:[#allocation11 + $0x840] sm:$0xff]  ;;  %1696 = vmatpush.msrb.mxu2 %v1501_v23 }
 0x125   :  { %v1573_v12 = vld [vmem:[#allocation11 + $0xf00] sm:$0xff]  ;;  %1618 = vmatpush.msrb.mxu0 %v1357_v49 }
 0x126   :  { %919 = vrot.lane.b32.xlu2 %v6758_v16, %s6281_s0  ;;  %v1421_v4 = vld [vmem:[#allocation11 + $0xa40] sm:$0xff]  ;;  %1735 = vmatpush.msrb.mxu3 %v1573_v12 }
 0x127   :  { %913 = vrot.lane.b32.xlu0 %v6755_v29, %s6281_s0  ;;  %v1569_v11 = vld [vmem:[#allocation11 + $0xee0] sm:$0xff]  ;;  %1659 = vmatpush.msrb.mxu1 %v1421_v4 }
 0x128   :  { %v1497_v42 = vld [vmem:[#allocation11 + $0xca0] sm:$0xff]  ;;  %1736 = vmatpush.msrb.mxu3 %v1569_v11 }
 0x129   :  { %v1353_v22 = vld [vmem:[#allocation11 + $0x820] sm:$0xff]  ;;  %1697 = vmatpush.msrb.mxu2 %v1497_v42 }
 0x12a   :  { %v1417_v21 = vld [vmem:[#allocation11 + $0xa20] sm:$0xff]  ;;  %1619 = vmatpush.msrb.mxu0 %v1353_v22 }
 0x12b   :  { %v1493_v8 = vld [vmem:[#allocation11 + $0xc80] sm:$0xff]  ;;  %1660 = vmatpush.msrb.mxu1 %v1417_v21 }
 0x12c   :  { %v1349_v47 = vld [vmem:[#allocation11 + $0x800] sm:$0xff]  ;;  %1698 = vmatpush.msrb.mxu2 %v1493_v8 }
 0x12d   :  { %v1565_v63 = vld [vmem:[#allocation11 + $0xec0] sm:$0xff]  ;;  %1620 = vmatpush.msrb.mxu0 %v1349_v47 }
 0x12e   :  { %v1413_v43 = vld [vmem:[#allocation11 + $0xa00] sm:$0xff]  ;;  %1737 = vmatpush.msrb.mxu3 %v1565_v63 }
 0x12f   :  { %v1489_v24 = vld [vmem:[#allocation11 + $0xc60] sm:$0xff]  ;;  %1661 = vmatpush.msrb.mxu1 %v1413_v43 }
 0x130   :  { %v1561_v48 = vld [vmem:[#allocation11 + $0xea0] sm:$0xff]  ;;  %1699 = vmatpush.msrb.mxu2 %v1489_v24 }
 0x131   :  { %1738 = vmatpush.msrb.mxu3 %v1561_v48  ;;  %v1485_v28 = vld [vmem:[#allocation11 + $0xc40] sm:$0xff] }
 0x132   :  { %v1557_v6 = vld [vmem:[#allocation11 + $0xe80] sm:$0xff]  ;;  %1700 = vmatpush.msrb.mxu2 %v1485_v28 }
 0x133   :  { %1739 = vmatpush.msrb.mxu3 %v1557_v6  ;;  %v1481_v50 = vld [vmem:[#allocation11 + $0xc20] sm:$0xff]  ;;  %v1538_v6 = vld [vmem:[#allocation11 + $0xde8] sm:$0xff] }
 0x134   :  { %v1553_v20 = vld [vmem:[#allocation11 + $0xe60] sm:$0xff]  ;;  %1701 = vmatpush.msrb.mxu2 %v1481_v50 }
 0x135   :  { %1740 = vmatpush.msrb.mxu3 %v1553_v20  ;;  %v1477_v1 = vld [vmem:[#allocation11 + $0xc00] sm:$0xff] }
 0x136   :  { %v1549_v54 = vld [vmem:[#allocation11 + $0xe40] sm:$0xff]  ;;  %1702 = vmatpush.msrb.mxu2 %v1477_v1 }
 0x137   :  { %1741 = vmatpush.msrb.mxu3 %v1549_v54  ;;  %v1545_v9 = vld [vmem:[#allocation11 + $0xe20] sm:$0xff] }
 0x138   :  { %v870_v31 = vpop.permute.xlu2 %869  ;;  %v1541_v7 = vld [vmem:[#allocation11 + $0xe00] sm:$0xff]  ;;  %1851 = vmatpush.msra.mxu2 %v1538_v6  ;;  %v1458_v6 = vld [vmem:[#allocation11 + $0xb68] sm:$0xff] }
 0x139   :  { %1742 = vmatpush.msrb.mxu3 %v1545_v9 }
 0x13b   :  { %1743 = vmatpush.msrb.mxu3 %v1541_v7 }
 0x140   :  { %v872_v33 = vpop.permute.xlu2 %871 }
 0x141   :  { %v927_v15 = vsel %vm921_vm4, %v870_v31, %v872_v33  ;;  %v985_v45 = vmax.f32 %v6526_v57, %v872_v33  ;;  %v858_v39 = vpop.permute.xlu1 %857  ;;  %v1530_v33 = vld [vmem:[#allocation11 + $0xda8] sm:$0xff] }
 0x142   :  { %v6767_v52 = vmax.f32 %v6489_v17, %v927_v15  ;;  %v1410_v15 = vld [vmem:[#allocation11 + $0x9e8] sm:$0xff] }
 0x143   :  { %1018 = vst.msk [vmem:[#allocation3 + $0x58] sm:$0xff] %vm1013_vm5, %v985_v45  ;;  %v1474_v45 = vld [vmem:[#allocation11 + $0xbe8] sm:$0xff]  ;;  %1769 = vmatpush.msra.mxu0 %v1410_v15 }
 0x144   :  { %1017 = vst [vmem:[#allocation3 + $0x50] sm:$0xff] %v6767_v52  ;;  %1810 = vmatpush.msra.mxu1 %v1474_v45 }
 0x145   :  { %1045 = vst.msk [vmem:[#allocation3 + $0x58] sm:$0xff] %vm1043_vm6, %v6280_v14 }
 0x148   :  { %v876_v59 = vpop.permute.xlu2 %875 }
 0x149   :  { %v862_v55 = vpop.permute.xlu0 %861  ;;  %v860_v23 = vpop.permute.xlu1 %859 }
 0x14a   :  { %v922_v49 = vsel %vm921_vm4, %v858_v39, %v860_v23  ;;  %v923_v12 = vsel %vm921_vm4, %v860_v23, %v862_v55  ;;  %v1522_v39 = vld [vmem:[#allocation11 + $0xd68] sm:$0xff] }
 0x14b   :  { %v6776_v57 = vmax.f32 %v6418_v0, %v922_v49  ;;  %v6779_v17 = vmax.f32 %v6444_v37, %v923_v12  ;;  %v1598_v23 = vld [vmem:[#allocation11 + $0xfc8] sm:$0xff] }
 0x14c   :  { %v6834_v7 = vld [vmem:[#allocation3 + $0x58] sm:$0xff]  ;;  %v1406_v49 = vld [vmem:[#allocation11 + $0x9c8] sm:$0xff] }
 0x14d   :  { %1010 = vst [vmem:[#allocation3 + $0x20] sm:$0xff] %v6776_v57  ;;  %1621 = vmatmul.f32.vlgmr.msrb.gmra.mxu0 %v6776_v57  ;;  %1662 = vmatmul.f32.vlgmr.msrb.gmra.mxu1 %v6779_v17  ;;  %v1470_v12 = vld [vmem:[#allocation11 + $0xbc8] sm:$0xff] }
 0x14e   :  { %1011 = vst [vmem:[#allocation3 + $0x28] sm:$0xff] %v6779_v17  ;;  %1770 = vmatpush.msra.mxu0 %v1406_v49  ;;  %1811 = vmatpush.msra.mxu1 %v1470_v12  ;;  %v1502_v12 = vld [vmem:[#allocation11 + $0xcc8] sm:$0xff] }
 0x150   :  { %v878_v4 = vpop.permute.xlu2 %877 }
 0x151   :  { %v864_v11 = vpop.permute.xlu0 %863  ;;  %v929_v42 = vsel %vm921_vm4, %v876_v59, %v878_v4  ;;  %v868_v22 = vpop.permute.xlu1 %867 }
 0x152   :  { %v924_v21 = vsel %vm921_vm4, %v862_v55, %v864_v11  ;;  %v981_v0 = vmax.f32 %v6480_v2, %v864_v11  ;;  %v926_v37 = vsel %vm921_vm4, %v868_v22, %v870_v31  ;;  %v6793_v47 = vmax.f32 %v6556_v46, %v929_v42  ;;  %v1534_v31 = vld [vmem:[#allocation11 + $0xdc8] sm:$0xff] }
 0x153   :  { %v6790_v8 = vmax.f32 %v6448_v44, %v924_v21  ;;  %v6796_v63 = vmax.f32 %v6483_v3, %v926_v37  ;;  %1852 = vmatpush.msra.mxu2 %v1534_v31  ;;  %v1518_v11 = vld [vmem:[#allocation11 + $0xd48] sm:$0xff] }
 0x154   :  { %1014 = vst.msk [vmem:[#allocation3 + $0x38] sm:$0xff] %vm1013_vm5, %v981_v0  ;;  %v1466_v21 = vld [vmem:[#allocation11 + $0xba8] sm:$0xff] }
 0x155   :  { %1012 = vst [vmem:[#allocation3 + $0x30] sm:$0xff] %v6790_v8  ;;  %1703 = vmatmul.f32.vlgmr.msrb.gmra.mxu2 %v6790_v8  ;;  %1665 = vmatmul.f32.gmra.mxu1 %v6796_v63  ;;  %v1514_v0 = vld [vmem:[#allocation11 + $0xd28] sm:$0xff] }
 0x156   :  { %1044 = vst.msk [vmem:[#allocation3 + $0x38] sm:$0xff] %vm1043_vm6, %v6280_v14  ;;  %1853 = vmatpush.msra.mxu2 %v1530_v33  ;;  %1812 = vmatpush.msra.mxu1 %v1466_v21  ;;  %v1590_v37 = vld [vmem:[#allocation11 + $0xf88] sm:$0xff] }
 0x157   :  { %1020 = vst [vmem:[#allocation3 + $0x68] sm:$0xff] %v6793_v47  ;;  %v1582_v33 = vld [vmem:[#allocation11 + $0xf48] sm:$0xff] }
 0x158   :  { %1016 = vst [vmem:[#allocation3 + $0x48] sm:$0xff] %v6796_v63  ;;  %v882_v44 = vpop.permute.xlu2 %881  ;;  %v1494_v21 = vld [vmem:[#allocation11 + $0xc88] sm:$0xff] }
 0x159   :  { %v866_v2 = vpop.permute.xlu0 %865  ;;  %v874_v46 = vpop.permute.xlu1 %873 }
 0x15a   :  { %v925_v3 = vsel %vm921_vm4, %v866_v2, %v868_v22  ;;  %v928_v43 = vsel %vm921_vm4, %v874_v46, %v876_v59  ;;  %v1594_v22 = vld [vmem:[#allocation11 + $0xfa8] sm:$0xff] }
 0x15b   :  { %v6809_v24 = vmax.f32 %v6530_v60, %v925_v3  ;;  %v6812_v48 = vmax.f32 %v6533_v61, %v928_v43  ;;  %v1462_v2 = vld [vmem:[#allocation11 + $0xb88] sm:$0xff] }
 0x15c   :  { %v1586_v3 = vld [vmem:[#allocation11 + $0xf68] sm:$0xff]  ;;  %1813 = vmatpush.msra.mxu1 %v1462_v2 }
 0x15d   :  { %1015 = vst [vmem:[#allocation3 + $0x40] sm:$0xff] %v6809_v24  ;;  %v6815_v28 = vld [vmem:[#allocation3 + $0x38] sm:$0xff]  ;;  %1624 = vmatmul.f32.gmra.mxu0 %v6809_v24  ;;  %1706 = vmatmul.f32.gmra.mxu2 %v6767_v52  ;;  %v1394_v43 = vld [vmem:[#allocation11 + $0x968] sm:$0xff] }
 0x15e   :  { %1019 = vst [vmem:[#allocation3 + $0x60] sm:$0xff] %v6812_v48  ;;  %1744 = vmatmul.f32.vlgmr.msrb.gmra.mxu3 %v6815_v28  ;;  %1668 = vmatmul.f32.gmra.mxu1 %v6793_v47  ;;  %v1570_v2 = vld [vmem:[#allocation11 + $0xee8] sm:$0xff] }
 0x15f   :  { %1814 = vmatpush.msra.mxu1 %v1458_v6 }
 0x160   :  { %v6822_v60 = vpop.permute.xlu2 %895 }
 0x161   :  { %v997_v61 = vmax.f32 %v6671_v38, %v6822_v60  ;;  %v880_v50 = vpop.permute.xlu0 %879  ;;  %v6826_v20 = vpop.permute.xlu1 %887 }
 0x162   :  { %v930_v1 = vsel %vm921_vm4, %v878_v4, %v880_v50  ;;  %v989_v54 = vmax.f32 %v6564_v35, %v880_v50  ;;  %v993_v38 = vmax.f32 %v6569_v53, %v6826_v20  ;;  %v1526_v35 = vld [vmem:[#allocation11 + $0xd88] sm:$0xff] }
 0x163   :  { %1030 = vst.msk [vmem:[#allocation3 + $0xb8] sm:$0xff] %vm1013_vm5, %v997_v61  ;;  %v6832_v9 = vmax.f32 %v6599_v26, %v930_v1  ;;  %1854 = vmatpush.msra.mxu2 %v1526_v35  ;;  %v1602_v26 = vld [vmem:[#allocation11 + $0xfe8] sm:$0xff] }
 0x164   :  { %1048 = vst.msk [vmem:[#allocation3 + $0xb8] sm:$0xff] %vm1043_vm6, %v6280_v14  ;;  %1892 = vmatpush.msra.mxu3 %v1602_v26  ;;  %v1506_v50 = vld [vmem:[#allocation11 + $0xce8] sm:$0xff] }
 0x165   :  { %1021 = vst [vmem:[#allocation3 + $0x70] sm:$0xff] %v6832_v9  ;;  %1627 = vmatmul.f32.gmra.mxu0 %v6812_v48  ;;  %1709 = vmatmul.f32.gmra.mxu2 %v6832_v9 }
 0x166   :  { %1022 = vst.msk [vmem:[#allocation3 + $0x78] sm:$0xff] %vm1013_vm5, %v989_v54  ;;  %1747 = vmatmul.f32.gmra.mxu3 %v6834_v7  ;;  %1855 = vmatpush.msra.mxu2 %v1522_v39 }
 0x167   :  { %1046 = vst.msk [vmem:[#allocation3 + $0x78] sm:$0xff] %vm1043_vm6, %v6280_v14  ;;  %1893 = vmatpush.msra.mxu3 %v1598_v23 }
 0x168   :  { %1026 = vst.msk [vmem:[#allocation3 + $0x98] sm:$0xff] %vm1013_vm5, %v993_v38  ;;  %v6848_v53 = vpop.permute.xlu2 %899  ;;  %1856 = vmatpush.msra.mxu2 %v1518_v11  ;;  %v1390_v38 = vld [vmem:[#allocation11 + $0x948] sm:$0xff] }
 0x169   :  { %1047 = vst.msk [vmem:[#allocation3 + $0x98] sm:$0xff] %vm1043_vm6, %v6280_v14  ;;  %v884_v59 = vpop.permute.xlu0 %883  ;;  %v6852_v55 = vpop.permute.xlu1 %891  ;;  %v1402_v14 = vld [vmem:[#allocation11 + $0x9a8] sm:$0xff]  ;;  %1894 = vmatpush.msra.mxu3 %v1594_v22 }
 0x16a   :  { %v931_v4 = vsel %vm921_vm4, %v882_v44, %v884_v59  ;;  %1771 = vmatpush.msra.mxu0 %v1402_v14  ;;  %v1398_v44 = vld [vmem:[#allocation11 + $0x988] sm:$0xff]  ;;  %1857 = vmatpush.msra.mxu2 %v1514_v0 }
 0x16b   :  { %v6856_v42 = vmax.f32 %v6636_v40, %v931_v4  ;;  %1895 = vmatpush.msra.mxu3 %v1590_v37  ;;  %v1510_v40 = vld [vmem:[#allocation11 + $0xd08] sm:$0xff] }
 0x16c   :  { %1772 = vmatpush.msra.mxu0 %v1398_v44  ;;  %1858 = vmatpush.msra.mxu2 %v1510_v40  ;;  %v1574_v11 = vld [vmem:[#allocation11 + $0xf08] sm:$0xff] }
 0x16d   :  { %1023 = vst [vmem:[#allocation3 + $0x80] sm:$0xff] %v6856_v42  ;;  %1630 = vmatmul.f32.gmra.mxu0 %v6856_v42  ;;  %1896 = vmatpush.msra.mxu3 %v1586_v3  ;;  %v1446_v22 = vld [vmem:[#allocation11 + $0xb08] sm:$0xff] }
 0x16e   :  { %v6860_v46 = vld [vmem:[#allocation3 + $0x78] sm:$0xff]  ;;  %1773 = vmatpush.msra.mxu0 %v1394_v43  ;;  %1859 = vmatpush.msra.mxu2 %v1506_v50  ;;  %v1378_v0 = vld [vmem:[#allocation11 + $0x8e8] sm:$0xff] }
 0x16f   :  { %1750 = vmatmul.f32.gmra.mxu3 %v6860_v46  ;;  %v1442_v40 = vld [vmem:[#allocation11 + $0xae8] sm:$0xff] }
 0x170   :  { %v6863_v61 = vpop.permute.xlu2 %901  ;;  %v6891_v4 = vld [vmem:[#allocation3 + $0x98] sm:$0xff]  ;;  %1897 = vmatpush.msra.mxu3 %v1582_v33  ;;  %1774 = vmatpush.msra.mxu0 %v1390_v38  ;;  %v1370_v33 = vld [vmem:[#allocation11 + $0x8a8] sm:$0xff] }
 0x171   :  { %v938_v31 = vsel %vm921_vm4, %v6848_v53, %v6863_v61  ;;  %v886_v1 = vpop.permute.xlu0 %885  ;;  %v894_v54 = vpop.permute.xlu1 %893  ;;  %1860 = vmatpush.msra.mxu2 %v1502_v12  ;;  %v1434_v38 = vld [vmem:[#allocation11 + $0xaa8] sm:$0xff] }
 0x172   :  { %v6869_v35 = vmax.f32 %v6695_v56, %v938_v31  ;;  %v932_v26 = vsel %vm921_vm4, %v884_v59, %v886_v1  ;;  %v933_v15 = vsel %vm921_vm4, %v886_v1, %v6826_v20  ;;  %v935_v45 = vsel %vm921_vm4, %v6852_v55, %v894_v54  ;;  %v1454_v59 = vld [vmem:[#allocation11 + $0xb48] sm:$0xff]  ;;  %v6912_v1 = vld [vmem:[#allocation3 + $0xb8] sm:$0xff] }
 0x173   :  { %v6877_v39 = vmax.f32 %v6602_v27, %v932_v26  ;;  %v6880_v23 = vmax.f32 %v6639_v18, %v933_v15  ;;  %v936_v49 = vsel %vm921_vm4, %v894_v54, %v6822_v60  ;;  %v6885_v56 = vmax.f32 %v6606_v32, %v935_v45  ;;  %v1386_v27 = vld [vmem:[#allocation11 + $0x928] sm:$0xff]  ;;  %1815 = vmatpush.msra.mxu1 %v1454_v59 }
 0x174   :  { %1032 = vst [vmem:[#allocation3 + $0xc8] sm:$0xff] %v6869_v35  ;;  %v6889_v20 = vmax.f32 %v6647_v62, %v936_v49  ;;  %v1578_v32 = vld [vmem:[#allocation11 + $0xf28] sm:$0xff]  ;;  %1775 = vmatpush.msra.mxu0 %v1386_v27 }
 0x175   :  { %1024 = vst [vmem:[#allocation3 + $0x88] sm:$0xff] %v6877_v39  ;;  %1671 = vmatmul.f32.gmra.mxu1 %v6877_v39  ;;  %1712 = vmatmul.f32.gmra.mxu2 %v6880_v23  ;;  %v1450_v18 = vld [vmem:[#allocation11 + $0xb28] sm:$0xff] }
 0x176   :  { %1025 = vst [vmem:[#allocation3 + $0x90] sm:$0xff] %v6880_v23  ;;  %v1498_v60 = vld [vmem:[#allocation11 + $0xca8] sm:$0xff]  ;;  %1898 = vmatpush.msra.mxu3 %v1578_v32  ;;  %1816 = vmatpush.msra.mxu1 %v1450_v18 }
 0x177   :  { %v1382_v62 = vld [vmem:[#allocation11 + $0x908] sm:$0xff]  ;;  %1028 = vst [vmem:[#allocation3 + $0xa8] sm:$0xff] %v6885_v56  ;;  %1753 = vmatmul.f32.gmra.mxu3 %v6891_v4  ;;  %1861 = vmatpush.msra.mxu2 %v1498_v60 }
 0x178   :  { %1029 = vst [vmem:[#allocation3 + $0xb0] sm:$0xff] %v6889_v20  ;;  %v6900_v14 = vpop.permute.xlu2 %905  ;;  %1776 = vmatpush.msra.mxu0 %v1382_v62  ;;  %1899 = vmatpush.msra.mxu3 %v1574_v11  ;;  %v1566_v31 = vld [vmem:[#allocation11 + $0xec8] sm:$0xff] }
 0x179   :  { %v890_v37 = vpop.permute.xlu0 %889  ;;  %v898_v44 = vpop.permute.xlu1 %897  ;;  %1817 = vmatpush.msra.mxu1 %v1446_v22  ;;  %1862 = vmatpush.msra.mxu2 %v1494_v21  ;;  %v1490_v54 = vld [vmem:[#allocation11 + $0xc68] sm:$0xff] }
 0x17a   :  { %v934_v3 = vsel %vm921_vm4, %v890_v37, %v6852_v55  ;;  %v937_v43 = vsel %vm921_vm4, %v898_v44, %v6848_v53  ;;  %1777 = vmatpush.msra.mxu0 %v1378_v0  ;;  %1900 = vmatpush.msra.mxu3 %v1570_v2  ;;  %v1374_v53 = vld [vmem:[#allocation11 + $0x8c8] sm:$0xff] }
 0x17b   :  { %v6907_v6 = vmax.f32 %v6674_v41, %v934_v3  ;;  %v6910_v50 = vmax.f32 %v6677_v30, %v937_v43  ;;  %1818 = vmatpush.msra.mxu1 %v1442_v40  ;;  %v1438_v41 = vld [vmem:[#allocation11 + $0xac8] sm:$0xff]  ;;  %1863 = vmatpush.msra.mxu2 %v1490_v54 }
 0x17c   :  { %1901 = vmatpush.msra.mxu3 %v1566_v31  ;;  %v1486_v30 = vld [vmem:[#allocation11 + $0xc48] sm:$0xff]  ;;  %1778 = vmatpush.msra.mxu0 %v1374_v53 }
 0x17d   :  { %1027 = vst [vmem:[#allocation3 + $0xa0] sm:$0xff] %v6907_v6  ;;  %1633 = vmatmul.f32.gmra.mxu0 %v6907_v6  ;;  %1674 = vmatmul.f32.gmra.mxu1 %v6885_v56  ;;  %v1562_v55 = vld [vmem:[#allocation11 + $0xea8] sm:$0xff] }
 0x17e   :  { %1031 = vst [vmem:[#allocation3 + $0xc0] sm:$0xff] %v6910_v50  ;;  %1715 = vmatmul.f32.gmra.mxu2 %v6889_v20  ;;  %1819 = vmatpush.msra.mxu1 %v1438_v41  ;;  %v1482_v15 = vld [vmem:[#allocation11 + $0xc28] sm:$0xff] }
 0x17f   :  { %1756 = vmatmul.f32.gmra.mxu3 %v6912_v1  ;;  %v1558_v45 = vld [vmem:[#allocation11 + $0xe88] sm:$0xff]  ;;  %1864 = vmatpush.msra.mxu2 %v1486_v30 }
 0x180   :  { %v920_v26 = vpop.permute.xlu2 %919  ;;  %1902 = vmatpush.msra.mxu3 %v1562_v55  ;;  %v1366_v27 = vld [vmem:[#allocation11 + $0x888] sm:$0xff]  ;;  %1779 = vmatpush.msra.mxu0 %v1370_v33 }
 0x181   :  { %v904_v49 = vpop.permute.xlu0 %903  ;;  %v1009_v59 = vmax.f32 %v6758_v16, %v920_v26  ;;  %v912_v12 = vpop.permute.xlu1 %911  ;;  %v1430_v32 = vld [vmem:[#allocation11 + $0xa88] sm:$0xff]  ;;  %1820 = vmatpush.msra.mxu1 %v1434_v38  ;;  %1865 = vmatpush.msra.mxu2 %v1482_v15 }
 0x182   :  { %v939_v18 = vsel %vm921_vm4, %v6863_v61, %v904_v49  ;;  %v1001_v60 = vmax.f32 %v6698_v34, %v904_v49  ;;  %1903 = vmatpush.msra.mxu3 %v1558_v45  ;;  %v1554_v16 = vld [vmem:[#allocation11 + $0xe68] sm:$0xff]  ;;  %v1005_v11 = vmax.f32 %v6700_v58, %v912_v12  ;;  %1780 = vmatpush.msra.mxu0 %v1366_v27  ;;  %v1539_v27 = vld [vmem:[#allocation11 + $0xdf0] sm:$0xff] }
 0x183   :  { %v6925_v62 = vmax.f32 %v6715_v13, %v939_v18  ;;  %1042 = vst.msk [vmem:[#allocation3 + $0x118] sm:$0xff] %vm1013_vm5, %v1009_v59  ;;  %1821 = vmatpush.msra.mxu1 %v1430_v32  ;;  %v1478_v22 = vld [vmem:[#allocation11 + $0xc08] sm:$0xff]  ;;  %v1535_v32 = vld [vmem:[#allocation11 + $0xdd0] sm:$0xff] }
 0x184   :  { %1034 = vst.msk [vmem:[#allocation3 + $0xd8] sm:$0xff] %vm1013_vm5, %v1001_v60  ;;  %v1362_v61 = vld [vmem:[#allocation11 + $0x868] sm:$0xff]  ;;  %1904 = vmatpush.msra.mxu3 %v1554_v16  ;;  %1866 = vmatpush.msra.mxu2 %v1478_v22  ;;  %v1531_v18 = vld [vmem:[#allocation11 + $0xdb0] sm:$0xff] }
 0x185   :  { %1033 = vst [vmem:[#allocation3 + $0xd0] sm:$0xff] %v6925_v62  ;;  %1636 = vmatmul.f32.gmra.mxu0 %v6910_v50  ;;  %1677 = vmatmul.f32.gmra.mxu1 %v6869_v35  ;;  %v1426_v34 = vld [vmem:[#allocation11 + $0xa68] sm:$0xff]  ;;  %v1603_v60 = vld [vmem:[#allocation11 + $0xff0] sm:$0xff] }
 0x186   :  { %v1550_v13 = vld [vmem:[#allocation11 + $0xe48] sm:$0xff]  ;;  %1718 = vmatmul.f32.gmra.mxu2 %v6925_v62  ;;  %1781 = vmatpush.msra.mxu0 %v1362_v61  ;;  %1038 = vst.msk [vmem:[#allocation3 + $0xf8] sm:$0xff] %vm1013_vm5, %v1005_v11  ;;  %v1411_v16 = vld [vmem:[#allocation11 + $0x9f0] sm:$0xff] }
 0x187   :  { %v6058_v21 = vld [vmem:[#allocation5] sm:$0xff]  ;;  %1822 = vmatpush.msra.mxu1 %v1426_v34  ;;  %1905 = vmatpush.msra.mxu3 %v1550_v13  ;;  %v1475_v11 = vld [vmem:[#allocation11 + $0xbf0] sm:$0xff] }
 0x188   :  { %1049 = vst.msk [vmem:[#allocation3 + $0xd8] sm:$0xff] %vm1043_vm6, %v6058_v21  ;;  %v1358_v0 = vld [vmem:[#allocation11 + $0x848] sm:$0xff]  ;;  %2015 = vmatpush.msrb.mxu2 %v1539_v27  ;;  %v1523_v22 = vld [vmem:[#allocation11 + $0xd70] sm:$0xff] }
 0x189   :  { %1051 = vst.msk [vmem:[#allocation3 + $0x118] sm:$0xff] %vm1043_vm6, %v6058_v21  ;;  %v1422_v58 = vld [vmem:[#allocation11 + $0xa48] sm:$0xff]  ;;  %v910_v2 = vpop.permute.xlu0 %909  ;;  %v918_v40 = vpop.permute.xlu1 %917  ;;  %1782 = vmatpush.msra.mxu0 %v1358_v0  ;;  %v1599_v61 = vld [vmem:[#allocation11 + $0xfd0] sm:$0xff] }
 0x18a   :  { %v1546_v37 = vld [vmem:[#allocation11 + $0xe28] sm:$0xff]  ;;  %1050 = vst.msk [vmem:[#allocation3 + $0xf8] sm:$0xff] %vm1043_vm6, %v6058_v21  ;;  %v942_v31 = vsel %vm921_vm4, %v910_v2, %v912_v12  ;;  %v945_v54 = vsel %vm921_vm4, %v918_v40, %v920_v26  ;;  %1823 = vmatpush.msra.mxu1 %v1422_v58  ;;  %2016 = vmatpush.msrb.mxu2 %v1535_v32  ;;  %v1407_v34 = vld [vmem:[#allocation11 + $0x9d0] sm:$0xff] }
 0x18b   :  { %v1354_v44 = vld [vmem:[#allocation11 + $0x828] sm:$0xff]  ;;  %1906 = vmatpush.msra.mxu3 %v1546_v37  ;;  %v6941_v41 = vmax.f32 %v6718_v19, %v942_v31  ;;  %v6944_v30 = vmax.f32 %v6720_v36, %v945_v54  ;;  %v1471_v13 = vld [vmem:[#allocation11 + $0xbd0] sm:$0xff] }
 0x18c   :  { %v1418_v3 = vld [vmem:[#allocation11 + $0xa28] sm:$0xff]  ;;  %1783 = vmatpush.msra.mxu0 %v1354_v44  ;;  %2017 = vmatpush.msrb.mxu2 %v1531_v18  ;;  %v1519_v21 = vld [vmem:[#allocation11 + $0xd50] sm:$0xff] }
 0x18d   :  { %v1542_v43 = vld [vmem:[#allocation11 + $0xe08] sm:$0xff]  ;;  %1824 = vmatpush.msra.mxu1 %v1418_v3  ;;  %1037 = vst [vmem:[#allocation3 + $0xf0] sm:$0xff] %v6941_v41  ;;  %v1595_v0 = vld [vmem:[#allocation11 + $0xfb0] sm:$0xff] }
 0x18e   :  { %v1350_v53 = vld [vmem:[#allocation11 + $0x808] sm:$0xff]  ;;  %1907 = vmatpush.msra.mxu3 %v1542_v43  ;;  %1041 = vst [vmem:[#allocation3 + $0x110] sm:$0xff] %v6944_v30  ;;  %1721 = vmatmul.f32.gmra.mxu2 %v6941_v41  ;;  %v1403_v58 = vld [vmem:[#allocation11 + $0x9b0] sm:$0xff] }
 0x18f   :  { %v1414_v55 = vld [vmem:[#allocation11 + $0xa08] sm:$0xff]  ;;  %v6947_v33 = vld [vmem:[#allocation3 + $0xd8] sm:$0xff]  ;;  %1784 = vmatpush.msra.mxu0 %v1350_v53  ;;  %v1467_v37 = vld [vmem:[#allocation11 + $0xbb0] sm:$0xff] }
 0x190   :  { %1759 = vmatmul.f32.gmra.mxu3 %v6947_v33  ;;  %1825 = vmatpush.msra.mxu1 %v1414_v55  ;;  %v1515_v44 = vld [vmem:[#allocation11 + $0xd30] sm:$0xff] }
 0x191   :  { %v908_v19 = vpop.permute.xlu0 %907  ;;  %v916_v38 = vpop.permute.xlu1 %915  ;;  %v6965_v12 = vld [vmem:[#allocation3 + $0xf8] sm:$0xff]  ;;  %2056 = vmatpush.msrb.mxu3 %v1603_v60  ;;  %1933 = vmatpush.msrb.mxu0 %v1411_v16  ;;  %v1463_v3 = vld [vmem:[#allocation11 + $0xb90] sm:$0xff] }
 0x192   :  { %v940_v36 = vsel %vm921_vm4, %v6900_v14, %v908_v19  ;;  %v941_v26 = vsel %vm921_vm4, %v908_v19, %v910_v2  ;;  %v944_v15 = vsel %vm921_vm4, %v916_v38, %v918_v40  ;;  %v6978_v14 = vld [vmem:[#allocation3 + $0x118] sm:$0xff]  ;;  %1974 = vmatpush.msrb.mxu1 %v1475_v11  ;;  %v1591_v2 = vld [vmem:[#allocation11 + $0xf90] sm:$0xff] }
 0x193   :  { %v6957_v45 = vmax.f32 %v6736_v51, %v940_v36  ;;  %v6960_v49 = vmax.f32 %v6739_v5, %v941_v26  ;;  %v6963_v59 = vmax.f32 %v6742_v25, %v944_v15  ;;  %2057 = vmatpush.msrb.mxu3 %v1599_v61  ;;  %1934 = vmatpush.msrb.mxu0 %v1407_v34  ;;  %v1399_v40 = vld [vmem:[#allocation11 + $0x990] sm:$0xff] }
 0x194   :  { %1975 = vmatpush.msrb.mxu1 %v1471_v13  ;;  %v1511_v43 = vld [vmem:[#allocation11 + $0xd10] sm:$0xff] }
 0x195   :  { %1035 = vst [vmem:[#allocation3 + $0xe0] sm:$0xff] %v6957_v45  ;;  %1639 = vmatmul.f32.gmra.mxu0 %v6957_v45  ;;  %1680 = vmatmul.f32.gmra.mxu1 %v6960_v49  ;;  %v1587_v31 = vld [vmem:[#allocation11 + $0xf70] sm:$0xff] }
 0x196   :  { %1036 = vst [vmem:[#allocation3 + $0xe8] sm:$0xff] %v6960_v49  ;;  %1724 = vmatmul.f32.gmra.mxu2 %v6944_v30  ;;  %2058 = vmatpush.msrb.mxu3 %v1595_v0  ;;  %v1395_v54 = vld [vmem:[#allocation11 + $0x970] sm:$0xff] }
 0x197   :  { %1040 = vst [vmem:[#allocation3 + $0x108] sm:$0xff] %v6963_v59  ;;  %1935 = vmatpush.msrb.mxu0 %v1403_v58  ;;  %1976 = vmatpush.msrb.mxu1 %v1467_v37  ;;  %v1459_v53 = vld [vmem:[#allocation11 + $0xb70] sm:$0xff] }
 0x198   :  { %1762 = vmatmul.f32.gmra.mxu3 %v6965_v12  ;;  %v1507_v55 = vld [vmem:[#allocation11 + $0xcf0] sm:$0xff] }
 0x199   :  { %v914_v51 = vpop.permute.xlu0 %913  ;;  %2059 = vmatpush.msrb.mxu3 %v1591_v2  ;;  %1936 = vmatpush.msrb.mxu0 %v1399_v40  ;;  %v1583_v19 = vld [vmem:[#allocation11 + $0xf50] sm:$0xff] }
 0x19a   :  { %v943_v5 = vsel %vm921_vm4, %v914_v51, %v916_v38  ;;  %1977 = vmatpush.msrb.mxu1 %v1463_v3  ;;  %v1391_v38 = vld [vmem:[#allocation11 + $0x950] sm:$0xff] }
 0x19b   :  { %v6976_v25 = vmax.f32 %v6755_v29, %v943_v5  ;;  %v1527_v29 = vld [vmem:[#allocation11 + $0xd90] sm:$0xff]  ;;  %2060 = vmatpush.msrb.mxu3 %v1587_v31  ;;  %1937 = vmatpush.msrb.mxu0 %v1395_v54 }
 0x19c   :  { %2018 = vmatpush.msrb.mxu2 %v1527_v29  ;;  %v1455_v36 = vld [vmem:[#allocation11 + $0xb50] sm:$0xff]  ;;  %1978 = vmatpush.msrb.mxu1 %v1459_v53 }
 0x19d   :  { %1039 = vst [vmem:[#allocation3 + $0x100] sm:$0xff] %v6976_v25  ;;  %1642 = vmatmul.f32.gmra.mxu0 %v6976_v25  ;;  %1683 = vmatmul.f32.gmra.mxu1 %v6963_v59  ;;  %v1503_v26 = vld [vmem:[#allocation11 + $0xcd0] sm:$0xff] }
 0x19e   :  { %1867 = vmatmul.f32.vlgmr.msra.gmra.mxu2 %v6790_v8  ;;  %2061 = vmatpush.msrb.mxu3 %v1583_v19  ;;  %v1579_v15 = vld [vmem:[#allocation11 + $0xf30] sm:$0xff] }
 0x19f   :  { %2019 = vmatpush.msrb.mxu2 %v1523_v22  ;;  %1938 = vmatpush.msrb.mxu0 %v1391_v38  ;;  %v1387_v51 = vld [vmem:[#allocation11 + $0x930] sm:$0xff] }
 0x1a0   :  { %1765 = vmatmul.f32.gmra.mxu3 %v6978_v14  ;;  %1979 = vmatpush.msrb.mxu1 %v1455_v36  ;;  %v1451_v5 = vld [vmem:[#allocation11 + $0xb30] sm:$0xff] }
 0x1a1   :  { %2020 = vmatpush.msrb.mxu2 %v1519_v21  ;;  %v1499_v27 = vld [vmem:[#allocation11 + $0xcb0] sm:$0xff]  ;;  %2062 = vmatpush.msrb.mxu3 %v1579_v15 }
 0x1a2   :  { %v1575_v32 = vld [vmem:[#allocation11 + $0xf10] sm:$0xff]  ;;  %1939 = vmatpush.msrb.mxu0 %v1387_v51  ;;  %1980 = vmatpush.msrb.mxu1 %v1451_v5 }
 0x1a3   :  { %2021 = vmatpush.msrb.mxu2 %v1515_v44  ;;  %v1383_v18 = vld [vmem:[#allocation11 + $0x910] sm:$0xff]  ;;  %2063 = vmatpush.msrb.mxu3 %v1575_v32 }
 0x1a4   :  { %v1447_v29 = vld [vmem:[#allocation11 + $0xb10] sm:$0xff]  ;;  %1940 = vmatpush.msrb.mxu0 %v1383_v18 }
 0x1a5   :  { %1785 = vmatmul.f32.vlgmr.msra.gmra.mxu0 %v6776_v57  ;;  %1826 = vmatmul.f32.vlgmr.msra.gmra.mxu1 %v6779_v17  ;;  %v1495_v60 = vld [vmem:[#allocation11 + $0xc90] sm:$0xff] }
 0x1a6   :  { %1870 = vmatmul.f32.gmra.mxu2 %v6767_v52  ;;  %v1571_v16 = vld [vmem:[#allocation11 + $0xef0] sm:$0xff]  ;;  %1981 = vmatpush.msrb.mxu1 %v1447_v29 }
 0x1a7   :  { %2022 = vmatpush.msrb.mxu2 %v1511_v43  ;;  %v1379_v11 = vld [vmem:[#allocation11 + $0x8f0] sm:$0xff]  ;;  %2064 = vmatpush.msrb.mxu3 %v1571_v16  ;;  %v1540_v16 = vld [vmem:[#allocation11 + $0xdf8] sm:$0xff] }
 0x1a8   :  { %1908 = vmatmul.f32.vlgmr.msra.gmra.mxu3 %v6815_v28  ;;  %v1443_v22 = vld [vmem:[#allocation11 + $0xaf0] sm:$0xff]  ;;  %1941 = vmatpush.msrb.mxu0 %v1379_v11  ;;  %v1536_v11 = vld [vmem:[#allocation11 + $0xdd8] sm:$0xff] }
 0x1a9   :  { %2023 = vmatpush.msrb.mxu2 %v1507_v55  ;;  %1982 = vmatpush.msrb.mxu1 %v1443_v22  ;;  %v1491_v61 = vld [vmem:[#allocation11 + $0xc70] sm:$0xff] }
 0x1aa   :  { %v1567_v34 = vld [vmem:[#allocation11 + $0xed0] sm:$0xff] }
 0x1ab   :  { %2024 = vmatpush.msrb.mxu2 %v1503_v26  ;;  %v1375_v13 = vld [vmem:[#allocation11 + $0x8d0] sm:$0xff]  ;;  %2065 = vmatpush.msrb.mxu3 %v1567_v34 }
 0x1ac   :  { %v1439_v21 = vld [vmem:[#allocation11 + $0xad0] sm:$0xff]  ;;  %1942 = vmatpush.msrb.mxu0 %v1375_v13 }
 0x1ad   :  { %1788 = vmatmul.f32.gmra.mxu0 %v6809_v24  ;;  %1829 = vmatmul.f32.gmra.mxu1 %v6796_v63  ;;  %v1487_v0 = vld [vmem:[#allocation11 + $0xc50] sm:$0xff] }
 0x1ae   :  { %1873 = vmatmul.f32.gmra.mxu2 %v6832_v9  ;;  %v1563_v58 = vld [vmem:[#allocation11 + $0xeb0] sm:$0xff]  ;;  %1983 = vmatpush.msrb.mxu1 %v1439_v21  ;;  %v1528_v21 = vld [vmem:[#allocation11 + $0xd98] sm:$0xff] }
 0x1af   :  { %2025 = vmatpush.msrb.mxu2 %v1499_v27  ;;  %v1371_v37 = vld [vmem:[#allocation11 + $0x8b0] sm:$0xff]  ;;  %2066 = vmatpush.msrb.mxu3 %v1563_v58  ;;  %v1412_v58 = vld [vmem:[#allocation11 + $0x9f8] sm:$0xff] }
 0x1b0   :  { %1911 = vmatmul.f32.gmra.mxu3 %v6834_v7  ;;  %v1435_v44 = vld [vmem:[#allocation11 + $0xab0] sm:$0xff]  ;;  %1943 = vmatpush.msrb.mxu0 %v1371_v37  ;;  %v1476_v37 = vld [vmem:[#allocation11 + $0xbf8] sm:$0xff] }
 0x1b1   :  { %2026 = vmatpush.msrb.mxu2 %v1495_v60  ;;  %v1483_v2 = vld [vmem:[#allocation11 + $0xc30] sm:$0xff]  ;;  %1984 = vmatpush.msrb.mxu1 %v1435_v44  ;;  %v1524_v44 = vld [vmem:[#allocation11 + $0xd78] sm:$0xff] }
 0x1b2   :  { %v1559_v40 = vld [vmem:[#allocation11 + $0xe90] sm:$0xff] }
 0x1b3   :  { %2027 = vmatpush.msrb.mxu2 %v1491_v61  ;;  %v1367_v3 = vld [vmem:[#allocation11 + $0x890] sm:$0xff]  ;;  %2067 = vmatpush.msrb.mxu3 %v1559_v40  ;;  %v1532_v61 = vld [vmem:[#allocation11 + $0xdb8] sm:$0xff] }
 0x1b4   :  { %v1431_v43 = vld [vmem:[#allocation11 + $0xa90] sm:$0xff]  ;;  %1944 = vmatpush.msrb.mxu0 %v1367_v3  ;;  %v1520_v40 = vld [vmem:[#allocation11 + $0xd58] sm:$0xff] }
 0x1b5   :  { %1791 = vmatmul.f32.gmra.mxu0 %v6812_v48  ;;  %1832 = vmatmul.f32.gmra.mxu1 %v6793_v47  ;;  %v1479_v31 = vld [vmem:[#allocation11 + $0xc10] sm:$0xff]  ;;  %v1596_v3 = vld [vmem:[#allocation11 + $0xfb8] sm:$0xff] }
 0x1b6   :  { %1876 = vmatmul.f32.gmra.mxu2 %v6880_v23  ;;  %1985 = vmatpush.msrb.mxu1 %v1431_v43  ;;  %v1555_v54 = vld [vmem:[#allocation11 + $0xe70] sm:$0xff]  ;;  %v1516_v43 = vld [vmem:[#allocation11 + $0xd38] sm:$0xff] }
 0x1b7   :  { %2028 = vmatpush.msrb.mxu2 %v1487_v0  ;;  %v1363_v53 = vld [vmem:[#allocation11 + $0x870] sm:$0xff]  ;;  %2068 = vmatpush.msrb.mxu3 %v1555_v54  ;;  %v1592_v54 = vld [vmem:[#allocation11 + $0xf98] sm:$0xff] }
 0x1b8   :  { %1914 = vmatmul.f32.gmra.mxu3 %v6860_v46  ;;  %v1427_v55 = vld [vmem:[#allocation11 + $0xa70] sm:$0xff]  ;;  %1945 = vmatpush.msrb.mxu0 %v1363_v53  ;;  %v1400_v53 = vld [vmem:[#allocation11 + $0x998] sm:$0xff] }
 0x1b9   :  { %2029 = vmatpush.msrb.mxu2 %v1483_v2  ;;  %v1551_v19 = vld [vmem:[#allocation11 + $0xe50] sm:$0xff]  ;;  %1986 = vmatpush.msrb.mxu1 %v1427_v55  ;;  %v1600_v2 = vld [vmem:[#allocation11 + $0xfd8] sm:$0xff] }
 0x1ba   :  { %v1359_v38 = vld [vmem:[#allocation11 + $0x850] sm:$0xff]  ;;  %2069 = vmatpush.msrb.mxu3 %v1551_v19  ;;  %v1464_v55 = vld [vmem:[#allocation11 + $0xb98] sm:$0xff] }
 0x1bb   :  { %2030 = vmatpush.msrb.mxu2 %v1479_v31  ;;  %v1423_v36 = vld [vmem:[#allocation11 + $0xa50] sm:$0xff]  ;;  %1946 = vmatpush.msrb.mxu0 %v1359_v38 }
 0x1bc   :  { %v1547_v26 = vld [vmem:[#allocation11 + $0xe30] sm:$0xff]  ;;  %1987 = vmatpush.msrb.mxu1 %v1423_v36  ;;  %v1512_v36 = vld [vmem:[#allocation11 + $0xd18] sm:$0xff] }
 0x1bd   :  { %1794 = vmatmul.f32.gmra.mxu0 %v6856_v42  ;;  %1835 = vmatmul.f32.gmra.mxu1 %v6877_v39  ;;  %v1355_v15 = vld [vmem:[#allocation11 + $0x830] sm:$0xff] }
 0x1be   :  { %1879 = vmatmul.f32.gmra.mxu2 %v6889_v20  ;;  %v1419_v51 = vld [vmem:[#allocation11 + $0xa30] sm:$0xff]  ;;  %2070 = vmatpush.msrb.mxu3 %v1547_v26  ;;  %v1588_v26 = vld [vmem:[#allocation11 + $0xf78] sm:$0xff] }
 0x1bf   :  { %1947 = vmatpush.msrb.mxu0 %v1355_v15  ;;  %1988 = vmatpush.msrb.mxu1 %v1419_v51  ;;  %v1543_v5 = vld [vmem:[#allocation11 + $0xe10] sm:$0xff]  ;;  %v1396_v15 = vld [vmem:[#allocation11 + $0x978] sm:$0xff] }
 0x1c0   :  { %1917 = vmatmul.f32.gmra.mxu3 %v6891_v4  ;;  %v1351_v27 = vld [vmem:[#allocation11 + $0x810] sm:$0xff]  ;;  %2179 = vmatpush.msra.mxu2 %v1540_v16  ;;  %v1460_v51 = vld [vmem:[#allocation11 + $0xb78] sm:$0xff] }
 0x1c1   :  { %v1415_v32 = vld [vmem:[#allocation11 + $0xa10] sm:$0xff]  ;;  %2071 = vmatpush.msrb.mxu3 %v1543_v5  ;;  %1948 = vmatpush.msrb.mxu0 %v1351_v27  ;;  %v1584_v5 = vld [vmem:[#allocation11 + $0xf58] sm:$0xff] }
 0x1c2   :  { %1989 = vmatpush.msrb.mxu1 %v1415_v32  ;;  %2180 = vmatpush.msra.mxu2 %v1536_v11  ;;  %v1392_v27 = vld [vmem:[#allocation11 + $0x958] sm:$0xff] }
 0x1c3   :  { %2097 = vmatpush.msra.mxu0 %v1412_v58  ;;  %v1456_v32 = vld [vmem:[#allocation11 + $0xb58] sm:$0xff] }
 0x1c4   :  { %2181 = vmatpush.msra.mxu2 %v1532_v61  ;;  %2138 = vmatpush.msra.mxu1 %v1476_v37  ;;  %v1388_v16 = vld [vmem:[#allocation11 + $0x938] sm:$0xff] }
 0x1c5   :  { %1797 = vmatmul.f32.gmra.mxu0 %v6907_v6  ;;  %1838 = vmatmul.f32.gmra.mxu1 %v6885_v56  ;;  %v1452_v11 = vld [vmem:[#allocation11 + $0xb38] sm:$0xff] }
 0x1c6   :  { %1882 = vmatmul.f32.gmra.mxu2 %v6925_v62  ;;  %v1384_v37 = vld [vmem:[#allocation11 + $0x918] sm:$0xff] }
 0x1c7   :  { %2182 = vmatpush.msra.mxu2 %v1528_v21  ;;  %v1500_v21 = vld [vmem:[#allocation11 + $0xcb8] sm:$0xff] }
 0x1c8   :  { %1920 = vmatmul.f32.gmra.mxu3 %v6912_v1 }
 0x1c9   :  { %2183 = vmatpush.msra.mxu2 %v1524_v44  ;;  %v1448_v44 = vld [vmem:[#allocation11 + $0xb18] sm:$0xff] }
 0x1ca   :  { %v7013_v18 = vpop.f32.mrf.mxu1  ;;  %v7015_v29 = vpop.f32.mrf.mxu0 }
 0x1cb   :  { %2184 = vmatpush.msra.mxu2 %v1520_v40  ;;  %v1568_v40 = vld [vmem:[#allocation11 + $0xed8] sm:$0xff] }
 0x1cd   :  { %1800 = vmatmul.f32.gmra.mxu0 %v6910_v50  ;;  %1841 = vmatmul.f32.gmra.mxu1 %v6869_v35 }
 0x1ce   :  { %1885 = vmatmul.f32.gmra.mxu2 %v6941_v41 }
 0x1cf   :  { %2185 = vmatpush.msra.mxu2 %v1516_v43  ;;  %v1564_v43 = vld [vmem:[#allocation11 + $0xeb8] sm:$0xff] }
 0x1d0   :  { %1923 = vmatmul.f32.gmra.mxu3 %v6947_v33 }
 0x1d1   :  { %2186 = vmatpush.msra.mxu2 %v1512_v36 }
 0x1d2   :  { %v7025_v34 = vpop.f32.mrf.mxu1 }
 0x1d5   :  { %1803 = vmatmul.f32.gmra.mxu0 %v6957_v45  ;;  %1844 = vmatmul.f32.gmra.mxu1 %v6960_v49 }
 0x1d6   :  { %1888 = vmatmul.f32.gmra.mxu2 %v6944_v30 }
 0x1d8   :  { %1926 = vmatmul.f32.gmra.mxu3 %v6965_v12  ;;  %v7017_v60 = vpop.f32.mrf.mxu2 }
 0x1da   :  { %v7027_v13 = vpop.f32.mrf.mxu0 }
 0x1db   :  { %v7039_v19 = vpop.f32.mrf.mxu1 }
 0x1dd   :  { %1806 = vmatmul.f32.gmra.mxu0 %v6976_v25  ;;  %1847 = vmatmul.f32.gmra.mxu1 %v6963_v59 }
 0x1de   :  { %2031 = vmatmul.f32.vlgmr.msrb.gmra.mxu2 %v6790_v8  ;;  %v1604_v8 = vld [vmem:[#allocation11 + $0xff8] sm:$0xff] }
 0x1df   :  { %2220 = vmatpush.msra.mxu3 %v1604_v8  ;;  %v1576_v8 = vld [vmem:[#allocation11 + $0xf18] sm:$0xff] }
 0x1e0   :  { %1929 = vmatmul.f32.gmra.mxu3 %v6978_v14  ;;  %v7031_v0 = vpop.f32.mrf.mxu2 }
 0x1e1   :  { %v7023_v22 = vpop.f32.mrf.mxu3  ;;  %2221 = vmatpush.msra.mxu3 %v1600_v2 }
 0x1e2   :  { %v7041_v38 = vpop.f32.mrf.mxu0 }
 0x1e3   :  { %2222 = vmatpush.msra.mxu3 %v1596_v3  ;;  %v1376_v3 = vld [vmem:[#allocation11 + $0x8d8] sm:$0xff] }
 0x1e5   :  { %1949 = vmatmul.f32.vlgmr.msrb.gmra.mxu0 %v6776_v57  ;;  %1990 = vmatmul.f32.vlgmr.msrb.gmra.mxu1 %v6779_v17  ;;  %v1408_v57 = vld [vmem:[#allocation11 + $0x9d8] sm:$0xff] }
 0x1e6   :  { %2034 = vmatmul.f32.gmra.mxu2 %v6767_v52  ;;  %v1472_v17 = vld [vmem:[#allocation11 + $0xbd8] sm:$0xff]  ;;  %2098 = vmatpush.msra.mxu0 %v1408_v57 }
 0x1e7   :  { %2139 = vmatpush.msra.mxu1 %v1472_v17  ;;  %v1404_v52 = vld [vmem:[#allocation11 + $0x9b8] sm:$0xff]  ;;  %2223 = vmatpush.msra.mxu3 %v1592_v54 }
 0x1e8   :  { %2072 = vmatmul.f32.vlgmr.msrb.gmra.mxu3 %v6815_v28  ;;  %v1468_v28 = vld [vmem:[#allocation11 + $0xbb8] sm:$0xff]  ;;  %2099 = vmatpush.msra.mxu0 %v1404_v52 }
 0x1e9   :  { %2140 = vmatpush.msra.mxu1 %v1468_v28  ;;  %v7035_v31 = vpop.f32.mrf.mxu3  ;;  %2224 = vmatpush.msra.mxu3 %v1588_v26  ;;  %v1572_v57 = vld [vmem:[#allocation11 + $0xef8] sm:$0xff] }
 0x1ea   :  { %2100 = vmatpush.msra.mxu0 %v1400_v53  ;;  %v7055_v2 = vpop.f32.mrf.mxu0  ;;  %v1492_v17 = vld [vmem:[#allocation11 + $0xc78] sm:$0xff] }
 0x1eb   :  { %2141 = vmatpush.msra.mxu1 %v1464_v55  ;;  %2225 = vmatpush.msra.mxu3 %v1584_v5  ;;  %8560 = vst [vmem:[#allocation24_spill] sm:$0xff] %v7055_v2  ;;  %v1440_v52 = vld [vmem:[#allocation11 + $0xad8] sm:$0xff]  ;;  %v1129_v2 = vld [vmem:[#allocation11 + $0x148] sm:$0xff] }
 0x1ec   :  { %2101 = vmatpush.msra.mxu0 %v1396_v15  ;;  %v1488_v28 = vld [vmem:[#allocation11 + $0xc58] sm:$0xff] }
 0x1ed   :  { %1952 = vmatmul.f32.gmra.mxu0 %v6809_v24  ;;  %1993 = vmatmul.f32.gmra.mxu1 %v6796_v63  ;;  %v7045_v24 = vpop.f32.mrf.mxu2  ;;  %v1508_v63 = vld [vmem:[#allocation11 + $0xcf8] sm:$0xff] }
 0x1ee   :  { %2037 = vmatmul.f32.gmra.mxu2 %v6832_v9  ;;  %2142 = vmatpush.msra.mxu1 %v1460_v51  ;;  %v1504_v9 = vld [vmem:[#allocation11 + $0xcd8] sm:$0xff] }
 0x1ef   :  { %2187 = vmatpush.msra.mxu2 %v1508_v63  ;;  %2102 = vmatpush.msra.mxu0 %v1392_v27  ;;  %v1372_v53 = vld [vmem:[#allocation11 + $0x8b8] sm:$0xff] }
 0x1f0   :  { %2075 = vmatmul.f32.gmra.mxu3 %v6834_v7  ;;  %2143 = vmatpush.msra.mxu1 %v1456_v32  ;;  %v1580_v7 = vld [vmem:[#allocation11 + $0xf38] sm:$0xff] }
 0x1f1   :  { %2188 = vmatpush.msra.mxu2 %v1504_v9  ;;  %2226 = vmatpush.msra.mxu3 %v1580_v7  ;;  %v1436_v55 = vld [vmem:[#allocation11 + $0xab8] sm:$0xff] }
 0x1f2   :  { %v7049_v61 = vpop.f32.mrf.mxu1  ;;  %v7053_v58 = vpop.f32.mrf.mxu3  ;;  %2103 = vmatpush.msra.mxu0 %v1388_v16  ;;  %2144 = vmatpush.msra.mxu1 %v1452_v11  ;;  %v1480_v51 = vld [vmem:[#allocation11 + $0xc18] sm:$0xff] }
 0x1f3   :  { %8559 = vst [vmem:[#allocation23_spill] sm:$0xff] %v7049_v61  ;;  %2189 = vmatpush.msra.mxu2 %v1500_v21  ;;  %2227 = vmatpush.msra.mxu3 %v1576_v8  ;;  %v1556_v63 = vld [vmem:[#allocation11 + $0xe78] sm:$0xff]  ;;  %v1321_v61 = vld [vmem:[#allocation11 + $0x748] sm:$0xff] }
 0x1f4   :  { %2104 = vmatpush.msra.mxu0 %v1384_v37  ;;  %2145 = vmatpush.msra.mxu1 %v1448_v44  ;;  %v1364_v5 = vld [vmem:[#allocation11 + $0x878] sm:$0xff] }
 0x1f5   :  { %1955 = vmatmul.f32.gmra.mxu0 %v6812_v48  ;;  %1996 = vmatmul.f32.gmra.mxu1 %v6793_v47  ;;  %v1496_v47 = vld [vmem:[#allocation11 + $0xc98] sm:$0xff] }
 0x1f6   :  { %2040 = vmatmul.f32.gmra.mxu2 %v6880_v23  ;;  %v1444_v23 = vld [vmem:[#allocation11 + $0xaf8] sm:$0xff]  ;;  %2228 = vmatpush.msra.mxu3 %v1572_v57 }
 0x1f7   :  { %2190 = vmatpush.msra.mxu2 %v1496_v47  ;;  %2146 = vmatpush.msra.mxu1 %v1444_v23  ;;  %v1428_v27 = vld [vmem:[#allocation11 + $0xa78] sm:$0xff] }
 0x1f8   :  { %2078 = vmatmul.f32.gmra.mxu3 %v6860_v46  ;;  %v7057_v48 = vpop.f32.mrf.mxu2  ;;  %v1380_v46 = vld [vmem:[#allocation11 + $0x8f8] sm:$0xff] }
 0x1f9   :  { %8561 = vst [vmem:[#allocation25_spill] sm:$0xff] %v7057_v48  ;;  %2105 = vmatpush.msra.mxu0 %v1380_v46  ;;  %2191 = vmatpush.msra.mxu2 %v1492_v17  ;;  %v1552_v32 = vld [vmem:[#allocation11 + $0xe58] sm:$0xff] }
 0x1fa   :  { %v7063_v54 = vpop.f32.mrf.mxu3  ;;  %2229 = vmatpush.msra.mxu3 %v1568_v40  ;;  %v7065_v36 = vpop.f32.mrf.mxu0  ;;  %2147 = vmatpush.msra.mxu1 %v1440_v52  ;;  %v1360_v9 = vld [vmem:[#allocation11 + $0x858] sm:$0xff] }
 0x1fb   :  { %8562 = vst [vmem:[#allocation26_spill] sm:$0xff] %v7063_v54  ;;  %v7067_v26 = vpop.f32.mrf.mxu1  ;;  %2106 = vmatpush.msra.mxu0 %v1376_v3  ;;  %2192 = vmatpush.msra.mxu2 %v1488_v28  ;;  %v1424_v7 = vld [vmem:[#allocation11 + $0xa58] sm:$0xff] }
 0x1fc   :  { %8563 = vst [vmem:[#allocation27_spill] sm:$0xff] %v7065_v36  ;;  %2230 = vmatpush.msra.mxu3 %v1564_v43  ;;  %2148 = vmatpush.msra.mxu1 %v1436_v55  ;;  %v1548_v16 = vld [vmem:[#allocation11 + $0xe38] sm:$0xff] }
 0x1fd   :  { %1958 = vmatmul.f32.gmra.mxu0 %v6856_v42  ;;  %1999 = vmatmul.f32.gmra.mxu1 %v6877_v39  ;;  %8564 = vst [vmem:[#allocation28_spill] sm:$0xff] %v7067_v26  ;;  %v1484_v42 = vld [vmem:[#allocation11 + $0xc38] sm:$0xff] }
 0x1fe   :  { %2043 = vmatmul.f32.gmra.mxu2 %v6889_v20  ;;  %v1560_v39 = vld [vmem:[#allocation11 + $0xe98] sm:$0xff]  ;;  %2107 = vmatpush.msra.mxu0 %v1372_v53 }
 0x1ff   :  { %v1368_v20 = vld [vmem:[#allocation11 + $0x898] sm:$0xff]  ;;  %2193 = vmatpush.msra.mxu2 %v1484_v42  ;;  %2231 = vmatpush.msra.mxu3 %v1560_v39  ;;  %v1272_v42 = vld [vmem:[#allocation11 + $0x5c0] sm:$0xff] }
 0x200   :  { %2081 = vmatmul.f32.gmra.mxu3 %v6891_v4  ;;  %v1432_v4 = vld [vmem:[#allocation11 + $0xa98] sm:$0xff]  ;;  %2108 = vmatpush.msra.mxu0 %v1368_v20 }
 0x201   :  { %v7069_v15 = vpop.f32.mrf.mxu2  ;;  %2149 = vmatpush.msra.mxu1 %v1432_v4  ;;  %2194 = vmatpush.msra.mxu2 %v1480_v51  ;;  %v1416_v44 = vld [vmem:[#allocation11 + $0xa18] sm:$0xff] }
 0x202   :  { %8565 = vst [vmem:[#allocation29_spill] sm:$0xff] %v7069_v15  ;;  %2232 = vmatpush.msra.mxu3 %v1556_v63  ;;  %2109 = vmatpush.msra.mxu0 %v1364_v5  ;;  %v7075_v11 = vpop.f32.mrf.mxu3  ;;  %v1637_v8 = vpop.f32.mrf.mxu0  ;;  %v1264_v63 = vld [vmem:[#allocation11 + $0x580] sm:$0xff]  ;;  %v1273_v15 = vld [vmem:[#allocation11 + $0x5c8] sm:$0xff] }
 0x203   :  { %2150 = vmatpush.msra.mxu1 %v1428_v27  ;;  %8566 = vst [vmem:[#allocation30_spill] sm:$0xff] %v7075_v11  ;;  %v1678_v37 = vpop.f32.mrf.mxu1  ;;  %v7103_v5 = vld [vmem:[#allocation3 + $0x38] sm:$0xff]  ;;  %v7106_v27 = vld [vmem:[#allocation3 + $0x50] sm:$0xff]  ;;  %v6089_v11 = vld [vmem:[#allocation3 + $0x108] sm:$0xff] }
 0x204   :  { %2233 = vmatpush.msra.mxu3 %v1552_v32  ;;  %2110 = vmatpush.msra.mxu0 %v1360_v9  ;;  %v1679_v47 = vadd.f32 %v1678_v37, %v1637_v8  ;;  %v1340_v32 = vld [vmem:[#allocation11 + $0x7e0] sm:$0xff] }
 0x205   :  { %1961 = vmatmul.f32.gmra.mxu0 %v6907_v6  ;;  %2002 = vmatmul.f32.gmra.mxu1 %v6885_v56  ;;  %v1356_v6 = vld [vmem:[#allocation11 + $0x838] sm:$0xff]  ;;  %v1148_v9 = vld [vmem:[#allocation11 + $0x1e0] sm:$0xff] }
 0x206   :  { %2046 = vmatmul.f32.gmra.mxu2 %v6925_v62  ;;  %v1420_v56 = vld [vmem:[#allocation11 + $0xa38] sm:$0xff]  ;;  %2151 = vmatpush.msra.mxu1 %v1424_v7  ;;  %v1212_v7 = vld [vmem:[#allocation11 + $0x3e0] sm:$0xff] }
 0x207   :  { %2234 = vmatpush.msra.mxu3 %v1548_v16  ;;  %2111 = vmatpush.msra.mxu0 %v1356_v6  ;;  %v1352_v62 = vld [vmem:[#allocation11 + $0x818] sm:$0xff]  ;;  %v1260_v16 = vld [vmem:[#allocation11 + $0x560] sm:$0xff] }
 0x208   :  { %2084 = vmatmul.f32.gmra.mxu3 %v6912_v1  ;;  %2152 = vmatpush.msra.mxu1 %v1420_v56  ;;  %v1544_v1 = vld [vmem:[#allocation11 + $0xe18] sm:$0xff]  ;;  %v1336_v8 = vld [vmem:[#allocation11 + $0x7c0] sm:$0xff] }
 0x209   :  { %v1719_v21 = vpop.f32.mrf.mxu2  ;;  %2235 = vmatpush.msra.mxu3 %v1544_v1  ;;  %2112 = vmatpush.msra.mxu0 %v1352_v62  ;;  %v1144_v37 = vld [vmem:[#allocation11 + $0x1c0] sm:$0xff] }
 0x20a   :  { %v1720_v57 = vadd.f32 %v1719_v21, %v1679_v47  ;;  %2153 = vmatpush.msra.mxu1 %v1416_v44  ;;  %v1208_v1 = vld [vmem:[#allocation11 + $0x3c0] sm:$0xff] }
 0x20b   :  { %2521 = vmatpush.msrb.mxu3 %v1340_v32  ;;  %2398 = vmatpush.msrb.mxu0 %v1148_v9  ;;  %v1128_v32 = vld [vmem:[#allocation11 + $0x140] sm:$0xff] }
 0x20c   :  { %2439 = vmatpush.msrb.mxu1 %v1212_v7 }
 0x20d   :  { %1964 = vmatmul.f32.gmra.mxu0 %v6910_v50  ;;  %2005 = vmatmul.f32.gmra.mxu1 %v6869_v35 }
 0x20e   :  { %2049 = vmatmul.f32.gmra.mxu2 %v6941_v41  ;;  %2522 = vmatpush.msrb.mxu3 %v1336_v8  ;;  %v7125_v8 = vld [vmem:[#allocation3 + $0x60] sm:$0xff] }
 0x20f   :  { %2399 = vmatpush.msrb.mxu0 %v1144_v37  ;;  %2440 = vmatpush.msrb.mxu1 %v1208_v1  ;;  %v7128_v37 = vld [vmem:[#allocation3 + $0x68] sm:$0xff]  ;;  %v1316_v1 = vld [vmem:[#allocation11 + $0x720] sm:$0xff] }
 0x210   :  { %2087 = vmatmul.f32.gmra.mxu3 %v6947_v33 }
 0x211   :  { %v1722_v23 = vpop.f32.mrf.mxu2 }
 0x212   :  { %v1640_v40 = vpop.f32.mrf.mxu0  ;;  %v1681_v3 = vpop.f32.mrf.mxu1 }
 0x213   :  { %v1760_v46 = vpop.f32.mrf.mxu3  ;;  %v1682_v52 = vadd.f32 %v1681_v3, %v1640_v40  ;;  %v1204_v3 = vld [vmem:[#allocation11 + $0x3a0] sm:$0xff] }
 0x214   :  { %v7081_v17 = vadd.f32 %v1760_v46, %v1720_v57  ;;  %v1256_v57 = vld [vmem:[#allocation11 + $0x540] sm:$0xff]  ;;  %2441 = vmatpush.msrb.mxu1 %v1204_v3 }
 0x215   :  { %1967 = vmatmul.f32.gmra.mxu0 %v6957_v45  ;;  %2008 = vmatmul.f32.gmra.mxu1 %v6960_v49  ;;  %v1723_v35 = vadd.f32 %v1722_v23, %v1682_v52  ;;  %v7092_v45 = vld [vmem:[#allocation3 + $0x30] sm:$0xff]  ;;  %v1276_v49 = vld [vmem:[#allocation11 + $0x5e0] sm:$0xff] }
 0x216   :  { %8567 = vst [vmem:[#allocation31_spill] sm:$0xff] %v7081_v17  ;;  %2052 = vmatmul.f32.gmra.mxu2 %v6944_v30  ;;  %v1332_v46 = vld [vmem:[#allocation11 + $0x7a0] sm:$0xff] }
 0x217   :  { %2480 = vmatpush.msrb.mxu2 %v1276_v49  ;;  %v1140_v23 = vld [vmem:[#allocation11 + $0x1a0] sm:$0xff]  ;;  %2523 = vmatpush.msrb.mxu3 %v1332_v46 }
 0x218   :  { %2090 = vmatmul.f32.gmra.mxu3 %v6965_v12  ;;  %2400 = vmatpush.msrb.mxu0 %v1140_v23  ;;  %v1252_v52 = vld [vmem:[#allocation11 + $0x520] sm:$0xff] }
 0x219   :  { %v1725_v41 = vpop.f32.mrf.mxu2  ;;  %2481 = vmatpush.msrb.mxu2 %v1272_v42  ;;  %v1200_v49 = vld [vmem:[#allocation11 + $0x380] sm:$0xff] }
 0x21a   :  { %v1643_v28 = vpop.f32.mrf.mxu0  ;;  %v1684_v43 = vpop.f32.mrf.mxu1  ;;  %2442 = vmatpush.msrb.mxu1 %v1200_v49  ;;  %v1188_v46 = vld [vmem:[#allocation11 + $0x320] sm:$0xff] }
 0x21b   :  { %v1763_v50 = vpop.f32.mrf.mxu3  ;;  %v1685_v53 = vadd.f32 %v1684_v43, %v1643_v28  ;;  %v1136_v28 = vld [vmem:[#allocation11 + $0x180] sm:$0xff] }
 0x21c   :  { %v7087_v33 = vadd.f32 %v1763_v50, %v1723_v35  ;;  %v7111_v35 = vld [vmem:[#allocation3 + $0x40] sm:$0xff]  ;;  %v7114_v50 = vld [vmem:[#allocation3 + $0x48] sm:$0xff]  ;;  %v7117_v43 = vld [vmem:[#allocation3 + $0x58] sm:$0xff]  ;;  %2401 = vmatpush.msrb.mxu0 %v1136_v28 }
 0x21d   :  { %1970 = vmatmul.f32.gmra.mxu0 %v6976_v25  ;;  %2011 = vmatmul.f32.gmra.mxu1 %v6963_v59  ;;  %v1726_v30 = vadd.f32 %v1725_v41, %v1685_v53  ;;  %v1268_v25 = vld [vmem:[#allocation11 + $0x5a0] sm:$0xff]  ;;  %v7120_v53 = vld [vmem:[#allocation3 + $0x70] sm:$0xff] }
 0x21e   :  { %8568 = vst [vmem:[#allocation32_spill] sm:$0xff] %v7087_v33  ;;  %2195 = vmatmul.f32.vlgmr.msra.gmra.mxu2 %v7092_v45  ;;  %v7097_v59 = vld [vmem:[#allocation3 + $0x20] sm:$0xff] }
 0x21f   :  { %2482 = vmatpush.msrb.mxu2 %v1268_v25  ;;  %v1328_v41 = vld [vmem:[#allocation11 + $0x780] sm:$0xff]  ;;  %v1052_v33 = vld [vmem:[#allocation3] sm:$0xc0] }
 0x220   :  { %2093 = vmatmul.f32.gmra.mxu3 %v6978_v14  ;;  %v7100_v14 = vld [vmem:[#allocation3 + $0x28] sm:$0xff]  ;;  %v1236_v23 = vld [vmem:[#allocation11 + $0x4a0] sm:$0xff] }
 0x221   :  { %v1868_v55 = vpop.f32.mrf.mxu2  ;;  %2483 = vmatpush.msrb.mxu2 %v1264_v63  ;;  %2524 = vmatpush.msrb.mxu3 %v1328_v41  ;;  %v1320_v63 = vld [vmem:[#allocation11 + $0x740] sm:$0xff] }
 0x222   :  { %v1786_v20 = vpop.f32.mrf.mxu0  ;;  %v1827_v4 = vpop.f32.mrf.mxu1  ;;  %v1120_v3 = vld [vmem:[#allocation11 + $0x100] sm:$0xff] }
 0x223   :  { %v1766_v12 = vpop.f32.mrf.mxu3  ;;  %v1828_v51 = vadd.f32 %v1827_v4, %v1786_v20  ;;  %2484 = vmatpush.msrb.mxu2 %v1260_v16  ;;  %v1196_v20 = vld [vmem:[#allocation11 + $0x360] sm:$0xff] }
 0x224   :  { %v7095_v39 = vadd.f32 %v1766_v12, %v1726_v30  ;;  %v1248_v30 = vld [vmem:[#allocation11 + $0x500] sm:$0xff]  ;;  %2443 = vmatpush.msrb.mxu1 %v1196_v20 }
 0x225   :  { %2113 = vmatmul.f32.vlgmr.msra.gmra.mxu0 %v7097_v59  ;;  %2154 = vmatmul.f32.vlgmr.msra.gmra.mxu1 %v7100_v14  ;;  %v1869_v21 = vadd.f32 %v1868_v55, %v1828_v51  ;;  %v1324_v12 = vld [vmem:[#allocation11 + $0x760] sm:$0xff] }
 0x226   :  { %8569 = vst [vmem:[#allocation33_spill] sm:$0xff] %v7095_v39  ;;  %2198 = vmatmul.f32.gmra.mxu2 %v7106_v27  ;;  %v1132_v55 = vld [vmem:[#allocation11 + $0x160] sm:$0xff]  ;;  %2525 = vmatpush.msrb.mxu3 %v1324_v12 }
 0x227   :  { %2485 = vmatpush.msrb.mxu2 %v1256_v57  ;;  %v1244_v4 = vld [vmem:[#allocation11 + $0x4e0] sm:$0xff]  ;;  %2402 = vmatpush.msrb.mxu0 %v1132_v55  ;;  %v7134_v57 = vld [vmem:[#allocation3 + $0x90] sm:$0xff] }
 0x228   :  { %2236 = vmatmul.f32.vlgmr.msra.gmra.mxu3 %v7103_v5  ;;  %v1184_v41 = vld [vmem:[#allocation11 + $0x300] sm:$0xff]  ;;  %v8544_v48 = vrot.slane %v7134_v57, 6 }
 0x229   :  { %v1871_v56 = vpop.f32.mrf.mxu2  ;;  %2486 = vmatpush.msrb.mxu2 %v1252_v52  ;;  %2526 = vmatpush.msrb.mxu3 %v1320_v63  ;;  %v1232_v28 = vld [vmem:[#allocation11 + $0x480] sm:$0xff] }
 0x22a   :  { %v1789_v44 = vpop.f32.mrf.mxu0  ;;  %v1830_v47 = vpop.f32.mrf.mxu1  ;;  %2403 = vmatpush.msrb.mxu0 %v1128_v32  ;;  %v1308_v12 = vld [vmem:[#allocation11 + $0x6e0] sm:$0xff] }
 0x22b   :  { %v1909_v6 = vpop.f32.mrf.mxu3  ;;  %v1831_v40 = vadd.f32 %v1830_v47, %v1789_v44  ;;  %2487 = vmatpush.msrb.mxu2 %v1248_v30  ;;  %v1124_v44 = vld [vmem:[#allocation11 + $0x120] sm:$0xff]  ;;  %2527 = vmatpush.msrb.mxu3 %v1316_v1 }
 0x22c   :  { %v7109_v62 = vadd.f32 %v1909_v6, %v1869_v21  ;;  %v1192_v6 = vld [vmem:[#allocation11 + $0x340] sm:$0xff]  ;;  %2404 = vmatpush.msrb.mxu0 %v1124_v44 }
 0x22d   :  { %2116 = vmatmul.f32.gmra.mxu0 %v7111_v35  ;;  %2157 = vmatmul.f32.gmra.mxu1 %v7114_v50  ;;  %v1872_v42 = vadd.f32 %v1871_v56, %v1831_v40  ;;  %v1240_v56 = vld [vmem:[#allocation11 + $0x4c0] sm:$0xff] }
 0x22e   :  { %8570 = vst [vmem:[#allocation34_spill] sm:$0xff] %v7109_v62  ;;  %2201 = vmatmul.f32.gmra.mxu2 %v7120_v53  ;;  %v7131_v47 = vld [vmem:[#allocation3 + $0x78] sm:$0xff]  ;;  %2444 = vmatpush.msrb.mxu1 %v1192_v6  ;;  %v7139_v32 = vld [vmem:[#allocation3 + $0x80] sm:$0xff] }
 0x22f   :  { %2488 = vmatpush.msrb.mxu2 %v1244_v4  ;;  %v1312_v40 = vld [vmem:[#allocation11 + $0x700] sm:$0xff]  ;;  %2405 = vmatpush.msrb.mxu0 %v1120_v3 }
 0x230   :  { %2239 = vmatmul.f32.gmra.mxu3 %v7117_v43  ;;  %2445 = vmatpush.msrb.mxu1 %v1188_v46  ;;  %v1116_v55 = vld [vmem:[#allocation11 + $0xe0] sm:$0xff] }
 0x231   :  { %v1874_v51 = vpop.f32.mrf.mxu2  ;;  %2489 = vmatpush.msrb.mxu2 %v1240_v56  ;;  %2528 = vmatpush.msrb.mxu3 %v1312_v40  ;;  %v1228_v63 = vld [vmem:[#allocation11 + $0x460] sm:$0xff]  ;;  %v7148_v56 = vld [vmem:[#allocation3 + $0xb0] sm:$0xff] }
 0x232   :  { %v1792_v7 = vpop.f32.mrf.mxu0  ;;  %v1833_v16 = vpop.f32.mrf.mxu1  ;;  %2446 = vmatpush.msrb.mxu1 %v1184_v41  ;;  %2406 = vmatpush.msrb.mxu0 %v1116_v55  ;;  %v7145_v6 = vld [vmem:[#allocation3 + $0x98] sm:$0xff]  ;;  %v6088_v17 = vld [vmem:[#allocation3 + $0x100] sm:$0xff] }
 0x233   :  { %v1912_v25 = vpop.f32.mrf.mxu3  ;;  %v1834_v21 = vadd.f32 %v1833_v16, %v1792_v7  ;;  %2490 = vmatpush.msrb.mxu2 %v1236_v23  ;;  %2529 = vmatpush.msrb.mxu3 %v1308_v12  ;;  %v7142_v7 = vld [vmem:[#allocation3 + $0x88] sm:$0xff]  ;;  %v1304_v16 = vld [vmem:[#allocation11 + $0x6c0] sm:$0xff] }
 0x234   :  { %v7123_v9 = vadd.f32 %v1912_v25, %v1872_v42  ;;  %v1176_v1 = vld [vmem:[#allocation11 + $0x2c0] sm:$0xff] }
 0x235   :  { %2119 = vmatmul.f32.gmra.mxu0 %v7125_v8  ;;  %2160 = vmatmul.f32.gmra.mxu1 %v7128_v37  ;;  %v1875_v52 = vadd.f32 %v1874_v51, %v1834_v21  ;;  %v1180_v51 = vld [vmem:[#allocation11 + $0x2e0] sm:$0xff] }
 0x236   :  { %8571 = vst [vmem:[#allocation35_spill] sm:$0xff] %v7123_v9  ;;  %2204 = vmatmul.f32.gmra.mxu2 %v7134_v57  ;;  %v1112_v21 = vld [vmem:[#allocation11 + $0xc0] sm:$0xff]  ;;  %2447 = vmatpush.msrb.mxu1 %v1180_v51  ;;  %v7184_v9 = vld [vmem:[#allocation3 + $0xe8] sm:$0xff] }
 0x237   :  { %2491 = vmatpush.msrb.mxu2 %v1232_v28  ;;  %v1224_v44 = vld [vmem:[#allocation11 + $0x440] sm:$0xff]  ;;  %2530 = vmatpush.msrb.mxu3 %v1304_v16  ;;  %v7156_v16 = vld [vmem:[#allocation3 + $0xa8] sm:$0xff] }
 0x238   :  { %2242 = vmatmul.f32.gmra.mxu3 %v7131_v47  ;;  %v1300_v46 = vld [vmem:[#allocation11 + $0x6a0] sm:$0xff]  ;;  %2407 = vmatpush.msrb.mxu0 %v1112_v21 }
 0x239   :  { %v1877_v30 = vpop.f32.mrf.mxu2  ;;  %2492 = vmatpush.msrb.mxu2 %v1228_v63  ;;  %v1108_v23 = vld [vmem:[#allocation11 + $0xa0] sm:$0xff]  ;;  %2448 = vmatpush.msrb.mxu1 %v1176_v1 }
 0x23a   :  { %v1795_v20 = vpop.f32.mrf.mxu0  ;;  %v1836_v4 = vpop.f32.mrf.mxu1  ;;  %v1172_v3 = vld [vmem:[#allocation11 + $0x2a0] sm:$0xff]  ;;  %2531 = vmatpush.msrb.mxu3 %v1300_v46  ;;  %2408 = vmatpush.msrb.mxu0 %v1108_v23  ;;  %v7162_v46 = vld [vmem:[#allocation3 + $0xd0] sm:$0xff] }
 0x23b   :  { %v1915_v49 = vpop.f32.mrf.mxu3  ;;  %v1837_v25 = vadd.f32 %v1836_v4, %v1795_v20  ;;  %2493 = vmatpush.msrb.mxu2 %v1224_v44  ;;  %v1104_v12 = vld [vmem:[#allocation11 + $0x80] sm:$0xff]  ;;  %2449 = vmatpush.msrb.mxu1 %v1172_v3 }
 0x23c   :  { %v7137_v42 = vadd.f32 %v1915_v49, %v1875_v52  ;;  %v1220_v52 = vld [vmem:[#allocation11 + $0x420] sm:$0xff]  ;;  %2409 = vmatpush.msrb.mxu0 %v1104_v12 }
 0x23d   :  { %2122 = vmatmul.f32.gmra.mxu0 %v7139_v32  ;;  %2163 = vmatmul.f32.gmra.mxu1 %v7142_v7  ;;  %v1878_v40 = vadd.f32 %v1877_v30, %v1837_v25  ;;  %v1296_v49 = vld [vmem:[#allocation11 + $0x680] sm:$0xff] }
 0x23e   :  { %8572 = vst [vmem:[#allocation36_spill] sm:$0xff] %v7137_v42  ;;  %2207 = vmatmul.f32.gmra.mxu2 %v7148_v56  ;;  %2532 = vmatpush.msrb.mxu3 %v1296_v49  ;;  %v1168_v30 = vld [vmem:[#allocation11 + $0x280] sm:$0xff] }
 0x23f   :  { %2494 = vmatpush.msrb.mxu2 %v1220_v52  ;;  %v1216_v25 = vld [vmem:[#allocation11 + $0x400] sm:$0xff]  ;;  %2450 = vmatpush.msrb.mxu1 %v1168_v30 }
 0x240   :  { %2245 = vmatmul.f32.gmra.mxu3 %v7145_v6  ;;  %v7153_v63 = vld [vmem:[#allocation3 + $0xa0] sm:$0xff]  ;;  %v7159_v44 = vld [vmem:[#allocation3 + $0xb8] sm:$0xff] }
 0x241   :  { %v1880_v28 = vpop.f32.mrf.mxu2  ;;  %v1292_v21 = vld [vmem:[#allocation11 + $0x660] sm:$0xff]  ;;  %2495 = vmatpush.msrb.mxu2 %v1216_v25 }
 0x242   :  { %v1798_v20 = vpop.f32.mrf.mxu0  ;;  %v1839_v4 = vpop.f32.mrf.mxu1  ;;  %v1100_v1 = vld [vmem:[#allocation11 + $0x60] sm:$0xff]  ;;  %2533 = vmatpush.msrb.mxu3 %v1292_v21  ;;  %v7170_v21 = vld [vmem:[#allocation3 + $0xc8] sm:$0xff] }
 0x243   :  { %v1918_v41 = vpop.f32.mrf.mxu3  ;;  %v1840_v51 = vadd.f32 %v1839_v4, %v1798_v20  ;;  %v1164_v23 = vld [vmem:[#allocation11 + $0x260] sm:$0xff]  ;;  %2410 = vmatpush.msrb.mxu0 %v1100_v1 }
 0x244   :  { %v7151_v55 = vadd.f32 %v1918_v41, %v1878_v40  ;;  %v1288_v40 = vld [vmem:[#allocation11 + $0x640] sm:$0xff]  ;;  %2451 = vmatpush.msrb.mxu1 %v1164_v23 }
 0x245   :  { %2125 = vmatmul.f32.gmra.mxu0 %v7153_v63  ;;  %2166 = vmatmul.f32.gmra.mxu1 %v7156_v16  ;;  %v1096_v3 = vld [vmem:[#allocation11 + $0x40] sm:$0xff]  ;;  %v1881_v52 = vadd.f32 %v1880_v28, %v1840_v51 }
 0x246   :  { %8573 = vst [vmem:[#allocation37_spill] sm:$0xff] %v7151_v55  ;;  %2210 = vmatmul.f32.gmra.mxu2 %v7162_v46  ;;  %v1160_v41 = vld [vmem:[#allocation11 + $0x240] sm:$0xff]  ;;  %2534 = vmatpush.msrb.mxu3 %v1288_v40  ;;  %v7176_v40 = vld [vmem:[#allocation3 + $0xf0] sm:$0xff] }
 0x247   :  { %v1284_v20 = vld [vmem:[#allocation11 + $0x620] sm:$0xff]  ;;  %2411 = vmatpush.msrb.mxu0 %v1096_v3  ;;  %2452 = vmatpush.msrb.mxu1 %v1160_v41 }
 0x248   :  { %2248 = vmatmul.f32.gmra.mxu3 %v7159_v44  ;;  %v1092_v4 = vld [vmem:[#allocation11 + $0x20] sm:$0xff] }
 0x249   :  { %v1883_v12 = vpop.f32.mrf.mxu2  ;;  %2535 = vmatpush.msrb.mxu3 %v1284_v20  ;;  %2412 = vmatpush.msrb.mxu0 %v1092_v4  ;;  %v1156_v25 = vld [vmem:[#allocation11 + $0x220] sm:$0xff] }
 0x24a   :  { %v1801_v55 = vpop.f32.mrf.mxu0  ;;  %v1842_v42 = vpop.f32.mrf.mxu1  ;;  %v1280_v28 = vld [vmem:[#allocation11 + $0x600] sm:$0xff]  ;;  %2453 = vmatpush.msrb.mxu1 %v1156_v25 }
 0x24b   :  { %v1921_v49 = vpop.f32.mrf.mxu3  ;;  %v1843_v30 = vadd.f32 %v1842_v42, %v1801_v55  ;;  %v7167_v51 = vld [vmem:[#allocation3 + $0xc0] sm:$0xff]  ;;  %v7173_v23 = vld [vmem:[#allocation3 + $0xd8] sm:$0xff]  ;;  %2536 = vmatpush.msrb.mxu3 %v1280_v28 }
 0x24c   :  { %v7165_v10 = vadd.f32 %v1921_v49, %v1881_v52  ;;  %v1088_v1 = vld [vmem:[#allocation11] sm:$0xff] }
 0x24d   :  { %2128 = vmatmul.f32.gmra.mxu0 %v7167_v51  ;;  %2169 = vmatmul.f32.gmra.mxu1 %v7170_v21  ;;  %v1152_v42 = vld [vmem:[#allocation11 + $0x200] sm:$0xff]  ;;  %v1884_v55 = vadd.f32 %v1883_v12, %v1843_v30  ;;  %v6087_v12 = vld [vmem:[#allocation3 + $0x110] sm:$0xff] }
 0x24e   :  { %8574 = vst [vmem:[#allocation38_spill] sm:$0xff] %v7165_v10  ;;  %2213 = vmatmul.f32.gmra.mxu2 %v7176_v40  ;;  %2413 = vmatpush.msrb.mxu0 %v1088_v1  ;;  %v7181_v10 = vld [vmem:[#allocation3 + $0xe0] sm:$0xff]  ;;  %v7187_v25 = vld [vmem:[#allocation3 + $0xf8] sm:$0xff]  ;;  %v1054_v30 = vld [vmem:[#allocation3 + $0x10] sm:$0xc0] }
 0x24f   :  { %2454 = vmatpush.msrb.mxu1 %v1152_v42  ;;  %v1055_v39 = vld [vmem:[#allocation3 + $0x18] sm:$0xc0] }
 0x250   :  { %2251 = vmatmul.f32.gmra.mxu3 %v7173_v23 }
 0x251   :  { %v1886_v52 = vpop.f32.mrf.mxu2 }
 0x252   :  { %v1804_v49 = vpop.f32.mrf.mxu0  ;;  %v1845_v20 = vpop.f32.mrf.mxu1 }
 0x253   :  { %v1924_v3 = vpop.f32.mrf.mxu3  ;;  %v1846_v4 = vadd.f32 %v1845_v20, %v1804_v49 }
 0x254   :  { %v7179_v41 = vadd.f32 %v1924_v3, %v1884_v55  ;;  %v2304_v55 = vrot.slane %v1054_v30, 6  ;;  %v2305_v3 = vrot.slane %v7092_v45, 6  ;;  %v2307_v45 = vrot.slane %v1055_v39, 6 }
 0x255   :  { %2131 = vmatmul.f32.gmra.mxu0 %v7181_v10  ;;  %2172 = vmatmul.f32.gmra.mxu1 %v7184_v9  ;;  %v1887_v28 = vadd.f32 %v1886_v52, %v1846_v4  ;;  %v1053_v52 = vld [vmem:[#allocation3 + $0x8] sm:$0xc0]  ;;  %v6090_v4 = vld [vmem:[#allocation3 + $0x118] sm:$0xff]  ;;  %v2308_v30 = vrot.slane %v7103_v5, 6  ;;  %v1269_v5 = vld [vmem:[#allocation11 + $0x5a8] sm:$0xff] }
 0x256   :  { %8575 = vst [vmem:[#allocation39_spill] sm:$0xff] %v7179_v41  ;;  %2216 = vmatmul.f32.gmra.mxu2 %v6087_v12  ;;  %v7194_v12 = vsel %vm2297_vm7, %v2304_v55, %v2305_v3 }
 0x257   :  { %v7203_v39 = vsel %vm2297_vm7, %v2307_v45, %v2308_v30  ;;  %v1261_v45 = vld [vmem:[#allocation11 + $0x568] sm:$0xff] }
 0x258   :  { %2254 = vmatmul.f32.gmra.mxu3 %v7187_v25 }
 0x259   :  { %v1889_v42 = vpop.f32.mrf.mxu2 }
 0x25a   :  { %v1807_v20 = vpop.f32.mrf.mxu0  ;;  %v1848_v41 = vpop.f32.mrf.mxu1 }
 0x25b   :  { %v1927_v1 = vpop.f32.mrf.mxu3  ;;  %v1849_v62 = vadd.f32 %v1848_v41, %v1807_v20  ;;  %v1277_v41 = vld [vmem:[#allocation11 + $0x5e8] sm:$0xff]  ;;  %v2299_v20 = vrot.slane %v7097_v59, 6 }
 0x25c   :  { %v7191_v49 = vadd.f32 %v1927_v1, %v1887_v28  ;;  %v2298_v28 = vrot.slane %v1052_v33, 6  ;;  %2644 = vmatpush.msra.mxu2 %v1277_v41  ;;  %v2314_v33 = vrot.slane %v7106_v27, 6  ;;  %v8543_v41 = vrot.slane %v7111_v35, 6  ;;  %v1209_v27 = vld [vmem:[#allocation11 + $0x3c8] sm:$0xff] }
 0x25d   :  { %2134 = vmatmul.f32.gmra.mxu0 %v6088_v17  ;;  %2175 = vmatmul.f32.gmra.mxu1 %v6089_v11  ;;  %v1890_v1 = vadd.f32 %v1889_v42, %v1849_v62  ;;  %v2302_v17 = vrot.slane %v7100_v14, 6  ;;  %v1265_v42 = vld [vmem:[#allocation11 + $0x588] sm:$0xff] }
 0x25e   :  { %8576 = vst [vmem:[#allocation40_spill] sm:$0xff] %v7191_v49  ;;  %2496 = vmatmul.f32.vlgmr.msrb.gmra.mxu2 %v7194_v12  ;;  %v2301_v49 = vrot.slane %v1053_v52, 6  ;;  %v7207_v59 = vsel %vm2297_vm7, %v2298_v28, %v2299_v20  ;;  %v1213_v52 = vld [vmem:[#allocation11 + $0x3e8] sm:$0xff] }
 0x25f   :  { %2645 = vmatpush.msra.mxu2 %v1273_v15  ;;  %v7215_v15 = vsel %vm2297_vm7, %v2305_v3, %v2314_v33  ;;  %2603 = vmatpush.msra.mxu1 %v1213_v52  ;;  %v1141_v52 = vld [vmem:[#allocation11 + $0x1a8] sm:$0xff] }
 0x260   :  { %2257 = vmatmul.f32.gmra.mxu3 %v6090_v4  ;;  %v7210_v14 = vsel %vm2297_vm7, %v2301_v49, %v2302_v17  ;;  %v1149_v49 = vld [vmem:[#allocation11 + $0x1e8] sm:$0xff] }
 0x261   :  { %v2032_v55 = vpop.f32.mrf.mxu2  ;;  %2646 = vmatpush.msra.mxu2 %v1269_v5  ;;  %2562 = vmatpush.msra.mxu0 %v1149_v49  ;;  %v1337_v5 = vld [vmem:[#allocation11 + $0x7c8] sm:$0xff] }
 0x262   :  { %v1950_v4 = vpop.f32.mrf.mxu0  ;;  %v1991_v36 = vpop.f32.mrf.mxu1  ;;  %2604 = vmatpush.msra.mxu1 %v1209_v27  ;;  %v1137_v27 = vld [vmem:[#allocation11 + $0x188] sm:$0xff] }
 0x263   :  { %v1930_v11 = vpop.f32.mrf.mxu3  ;;  %v1992_v62 = vadd.f32 %v1991_v36, %v1950_v4  ;;  %v1341_v36 = vld [vmem:[#allocation11 + $0x7e8] sm:$0xff]  ;;  %2647 = vmatpush.msra.mxu2 %v1265_v42 }
 0x264   :  { %v7200_v26 = vadd.f32 %v1930_v11, %v1890_v1  ;;  %2685 = vmatpush.msra.mxu3 %v1341_v36  ;;  %v8579_v1 = vrot.slane %v7117_v43, 6  ;;  %v1253_v4 = vld [vmem:[#allocation11 + $0x528] sm:$0xff] }
 0x265   :  { %2414 = vmatmul.f32.vlgmr.msrb.gmra.mxu0 %v7207_v59  ;;  %2455 = vmatmul.f32.vlgmr.msrb.gmra.mxu1 %v7210_v14  ;;  %v2033_v28 = vadd.f32 %v2032_v55, %v1992_v62  ;;  %v1257_v55 = vld [vmem:[#allocation11 + $0x548] sm:$0xff] }
 0x266   :  { %8577 = vst [vmem:[#allocation41_spill] sm:$0xff] %v7200_v26  ;;  %2499 = vmatmul.f32.gmra.mxu2 %v7215_v15  ;;  %v1145_v26 = vld [vmem:[#allocation11 + $0x1c8] sm:$0xff]  ;;  %2686 = vmatpush.msra.mxu3 %v1337_v5  ;;  %v7228_v49 = vsel %vm2297_vm7, %v2308_v30, %v8579_v1 }
 0x267   :  { %2648 = vmatpush.msra.mxu2 %v1261_v45  ;;  %2563 = vmatpush.msra.mxu0 %v1145_v26  ;;  %v1333_v62 = vld [vmem:[#allocation11 + $0x7a8] sm:$0xff] }
 0x268   :  { %2537 = vmatmul.f32.vlgmr.msrb.gmra.mxu3 %v7203_v39  ;;  %v1205_v5 = vld [vmem:[#allocation11 + $0x3a8] sm:$0xff] }
 0x269   :  { %v2035_v11 = vpop.f32.mrf.mxu2  ;;  %2649 = vmatpush.msra.mxu2 %v1257_v55  ;;  %2687 = vmatpush.msra.mxu3 %v1333_v62  ;;  %v1249_v1 = vld [vmem:[#allocation11 + $0x508] sm:$0xff] }
 0x26a   :  { %v1953_v36 = vpop.f32.mrf.mxu0  ;;  %v1994_v54 = vpop.f32.mrf.mxu1  ;;  %2564 = vmatpush.msra.mxu0 %v1141_v52  ;;  %2605 = vmatpush.msra.mxu1 %v1205_v5  ;;  %v1325_v55 = vld [vmem:[#allocation11 + $0x768] sm:$0xff] }
 0x26b   :  { %v2073_v3 = vpop.f32.mrf.mxu3  ;;  %v1995_v45 = vadd.f32 %v1994_v54, %v1953_v36  ;;  %v8581_v54 = vrot.slane %v7120_v53, 6  ;;  %2650 = vmatpush.msra.mxu2 %v1253_v4  ;;  %v1133_v62 = vld [vmem:[#allocation11 + $0x168] sm:$0xff] }
 0x26c   :  { %v7223_v42 = vadd.f32 %v2073_v3, %v2033_v28  ;;  %v7233_v28 = vsel %vm2297_vm7, %v2299_v20, %v8543_v41  ;;  %v8580_v3 = vrot.slane %v7114_v50, 6  ;;  %v1329_v20 = vld [vmem:[#allocation11 + $0x788] sm:$0xff]  ;;  %2565 = vmatpush.msra.mxu0 %v1137_v27 }
 0x26d   :  { %2417 = vmatmul.f32.gmra.mxu0 %v7233_v28  ;;  %v7245_v30 = vsel %vm2297_vm7, %v2314_v33, %v8581_v54  ;;  %v2036_v52 = vadd.f32 %v2035_v11, %v1995_v45  ;;  %2688 = vmatpush.msra.mxu3 %v1329_v20  ;;  %v1197_v33 = vld [vmem:[#allocation11 + $0x368] sm:$0xff]  ;;  %v2320_v11 = vrot.slane %v7128_v37, 6  ;;  %v8583_v45 = vrot.slane %v7131_v47, 6 }
 0x26e   :  { %8578 = vst [vmem:[#allocation42_spill] sm:$0xff] %v7223_v42  ;;  %v7238_v26 = vsel %vm2297_vm7, %v2302_v17, %v8580_v3  ;;  %2502 = vmatmul.f32.gmra.mxu2 %v7245_v30  ;;  %v1201_v17 = vld [vmem:[#allocation11 + $0x388] sm:$0xff]  ;;  %v8545_v3 = vrot.slane %v7125_v8, 6  ;;  %2566 = vmatpush.msra.mxu0 %v1133_v62  ;;  %v8584_v20 = vrot.slane %v7117_v43, 6  ;;  %v8586_v37 = vrot.slane %v7114_v50, 6 }
 0x26f   :  { %2458 = vmatmul.f32.gmra.mxu1 %v7238_v26  ;;  %v1245_v54 = vld [vmem:[#allocation11 + $0x4e8] sm:$0xff]  ;;  %2651 = vmatpush.msra.mxu2 %v1249_v1 }
 0x270   :  { %2540 = vmatmul.f32.gmra.mxu3 %v7228_v49  ;;  %2606 = vmatpush.msra.mxu1 %v1201_v17  ;;  %v7260_v27 = vsel %vm2297_vm7, %v8584_v20, %v8583_v45  ;;  %v1193_v43 = vld [vmem:[#allocation11 + $0x348] sm:$0xff]  ;;  %v8546_v20 = vrot.slane %v7142_v7, 6 }
 0x271   :  { %v2038_v42 = vpop.f32.mrf.mxu2  ;;  %2689 = vmatpush.msra.mxu3 %v1325_v55  ;;  %2652 = vmatpush.msra.mxu2 %v1245_v54  ;;  %v7272_v55 = vsel %vm2297_vm7, %v8586_v37, %v2320_v11  ;;  %v1241_v62 = vld [vmem:[#allocation11 + $0x4c8] sm:$0xff] }
 0x272   :  { %v1956_v4 = vpop.f32.mrf.mxu0  ;;  %v1997_v5 = vpop.f32.mrf.mxu1  ;;  %2607 = vmatpush.msra.mxu1 %v1197_v33  ;;  %2567 = vmatpush.msra.mxu0 %v1129_v2  ;;  %v1317_v33 = vld [vmem:[#allocation11 + $0x728] sm:$0xff] }
 0x273   :  { %v2076_v41 = vpop.f32.mrf.mxu3  ;;  %v1998_v17 = vadd.f32 %v1997_v5, %v1956_v4  ;;  %2690 = vmatpush.msra.mxu3 %v1321_v61  ;;  %v1125_v50 = vld [vmem:[#allocation11 + $0x128] sm:$0xff]  ;;  %2653 = vmatpush.msra.mxu2 %v1241_v62 }
 0x274   :  { %v7252_v36 = vadd.f32 %v2076_v41, %v2036_v52  ;;  %v8585_v41 = vrot.slane %v7111_v35, 6  ;;  %v8587_v35 = vrot.slane %v7120_v53, 6  ;;  %v1189_v61 = vld [vmem:[#allocation11 + $0x328] sm:$0xff]  ;;  %2608 = vmatpush.msra.mxu1 %v1193_v43  ;;  %v8547_v53 = vrot.slane %v7139_v32, 6  ;;  %2568 = vmatpush.msra.mxu0 %v1125_v50 }
 0x275   :  { %v1237_v2 = vld [vmem:[#allocation11 + $0x4a8] sm:$0xff]  ;;  %v2039_v45 = vadd.f32 %v2038_v42, %v1998_v17  ;;  %2691 = vmatpush.msra.mxu3 %v1317_v33  ;;  %v8589_v17 = vrot.slane %v7145_v6, 6  ;;  %v8590_v33 = vrot.slane %v7131_v47, 6 }
 0x276   :  { %8582 = vst [vmem:[#allocation43_spill] sm:$0xff] %v7252_v36  ;;  %v7267_v1 = vsel %vm2297_vm7, %v8585_v41, %v8545_v3  ;;  %v7281_v52 = vsel %vm2297_vm7, %v8587_v35, %v8544_v48  ;;  %v1313_v4 = vld [vmem:[#allocation11 + $0x708] sm:$0xff]  ;;  %2609 = vmatpush.msra.mxu1 %v1189_v61  ;;  %2654 = vmatpush.msra.mxu2 %v1237_v2  ;;  %v8591_v61 = vrot.slane %v7125_v8, 6  ;;  %v8593_v8 = vrot.slane %v7134_v57, 6 }
 0x277   :  { %2420 = vmatmul.f32.gmra.mxu0 %v7267_v1  ;;  %2461 = vmatmul.f32.gmra.mxu1 %v7272_v55  ;;  %v1121_v5 = vld [vmem:[#allocation11 + $0x108] sm:$0xff]  ;;  %v7296_v50 = vsel %vm2297_vm7, %v8590_v33, %v8589_v17  ;;  %v2334_v57 = vrot.slane %v7153_v63, 6  ;;  %v2336_v33 = vrot.slane %v7156_v16, 6  ;;  %v8595_v63 = vrot.slane %v7159_v44, 6 }
 0x278   :  { %2543 = vmatmul.f32.gmra.mxu3 %v7260_v27  ;;  %2505 = vmatmul.f32.gmra.mxu2 %v7281_v52  ;;  %v1185_v41 = vld [vmem:[#allocation11 + $0x308] sm:$0xff]  ;;  %v7303_v2 = vsel %vm2297_vm7, %v8591_v61, %v8547_v53  ;;  %v2346_v53 = vrot.slane %v7162_v46, 6  ;;  %v8596_v16 = vrot.slane %v7145_v6, 6 }
 0x279   :  { %v1233_v37 = vld [vmem:[#allocation11 + $0x488] sm:$0xff]  ;;  %v2041_v48 = vpop.f32.mrf.mxu2  ;;  %2692 = vmatpush.msra.mxu3 %v1313_v4  ;;  %2569 = vmatpush.msra.mxu0 %v1121_v5  ;;  %v7308_v4 = vsel %vm2297_vm7, %v2320_v11, %v8546_v20 }
 0x27a   :  { %v1309_v54 = vld [vmem:[#allocation11 + $0x6e8] sm:$0xff]  ;;  %v1959_v36 = vpop.f32.mrf.mxu0  ;;  %v2000_v42 = vpop.f32.mrf.mxu1  ;;  %2610 = vmatpush.msra.mxu1 %v1185_v41  ;;  %2655 = vmatpush.msra.mxu2 %v1233_v37 }
 0x27b   :  { %v2079_v35 = vpop.f32.mrf.mxu3  ;;  %v1117_v43 = vld [vmem:[#allocation11 + $0xe8] sm:$0xff]  ;;  %v2001_v3 = vadd.f32 %v2000_v42, %v1959_v36  ;;  %2693 = vmatpush.msra.mxu3 %v1309_v54  ;;  %v8592_v36 = vrot.slane %v7148_v56, 6 }
 0x27c   :  { %v7289_v62 = vadd.f32 %v2079_v35, %v2039_v45  ;;  %2570 = vmatpush.msra.mxu0 %v1117_v43  ;;  %v1181_v47 = vld [vmem:[#allocation11 + $0x2e8] sm:$0xff] }
 0x27d   :  { %v1229_v5 = vld [vmem:[#allocation11 + $0x468] sm:$0xff]  ;;  %v7317_v45 = vsel %vm2297_vm7, %v8593_v8, %v8592_v36  ;;  %2611 = vmatpush.msra.mxu1 %v1181_v47  ;;  %v2042_v17 = vadd.f32 %v2041_v48, %v2001_v3  ;;  %v7332_v3 = vsel %vm2297_vm7, %v8596_v16, %v8595_v63  ;;  %v2354_v16 = vrot.slane %v7176_v40, 6 }
 0x27e   :  { %8588 = vst [vmem:[#allocation44_spill] sm:$0xff] %v7289_v62  ;;  %v1305_v41 = vld [vmem:[#allocation11 + $0x6c8] sm:$0xff]  ;;  %2656 = vmatpush.msra.mxu2 %v1229_v5 }
 0x27f   :  { %2423 = vmatmul.f32.gmra.mxu0 %v7303_v2  ;;  %2464 = vmatmul.f32.gmra.mxu1 %v7308_v4  ;;  %v1113_v37 = vld [vmem:[#allocation11 + $0xc8] sm:$0xff] }
 0x280   :  { %2546 = vmatmul.f32.gmra.mxu3 %v7296_v50  ;;  %2508 = vmatmul.f32.gmra.mxu2 %v7317_v45  ;;  %v1177_v11 = vld [vmem:[#allocation11 + $0x2c8] sm:$0xff] }
 0x281   :  { %v1225_v54 = vld [vmem:[#allocation11 + $0x448] sm:$0xff]  ;;  %2694 = vmatpush.msra.mxu3 %v1305_v41  ;;  %2571 = vmatpush.msra.mxu0 %v1113_v37  ;;  %v2044_v20 = vpop.f32.mrf.mxu2  ;;  %v8597_v41 = vrot.slane %v7139_v32, 6 }
 0x282   :  { %v1301_v43 = vld [vmem:[#allocation11 + $0x6a8] sm:$0xff]  ;;  %2612 = vmatpush.msra.mxu1 %v1177_v11  ;;  %2657 = vmatpush.msra.mxu2 %v1225_v54  ;;  %v1962_v62 = vpop.f32.mrf.mxu0  ;;  %v2003_v48 = vpop.f32.mrf.mxu1  ;;  %v8598_v11 = vrot.slane %v7142_v7, 6 }
 0x283   :  { %v1109_v42 = vld [vmem:[#allocation11 + $0xa8] sm:$0xff]  ;;  %v2082_v8 = vpop.f32.mrf.mxu3  ;;  %2695 = vmatpush.msra.mxu3 %v1301_v43  ;;  %v2004_v46 = vadd.f32 %v2003_v48, %v1962_v62  ;;  %v7337_v37 = vsel %vm2297_vm7, %v8597_v41, %v2334_v57  ;;  %v8599_v62 = vrot.slane %v7148_v56, 6 }
 0x284   :  { %v1173_v61 = vld [vmem:[#allocation11 + $0x2a8] sm:$0xff]  ;;  %v7325_v5 = vadd.f32 %v2082_v8, %v2042_v17  ;;  %2572 = vmatpush.msra.mxu0 %v1109_v42  ;;  %v7342_v54 = vsel %vm2297_vm7, %v8598_v11, %v2336_v33 }
 0x285   :  { %v1221_v36 = vld [vmem:[#allocation11 + $0x428] sm:$0xff]  ;;  %2613 = vmatpush.msra.mxu1 %v1173_v61  ;;  %v7349_v32 = vsel %vm2297_vm7, %v8599_v62, %v2346_v53  ;;  %v2045_v8 = vadd.f32 %v2044_v20, %v2004_v46 }
 0x286   :  { %v1297_v35 = vld [vmem:[#allocation11 + $0x688] sm:$0xff]  ;;  %8594 = vst [vmem:[#allocation45_spill] sm:$0xff] %v7325_v5  ;;  %2658 = vmatpush.msra.mxu2 %v1221_v36 }
 0x287   :  { %v1105_v47 = vld [vmem:[#allocation11 + $0x88] sm:$0xff]  ;;  %2696 = vmatpush.msra.mxu3 %v1297_v35  ;;  %2426 = vmatmul.f32.gmra.mxu0 %v7337_v37  ;;  %v2348_v35 = vrot.slane %v7173_v23, 6 }
 0x288   :  { %2573 = vmatpush.msra.mxu0 %v1105_v47  ;;  %v1169_v43 = vld [vmem:[#allocation11 + $0x288] sm:$0xff]  ;;  %2467 = vmatmul.f32.gmra.mxu1 %v7342_v54  ;;  %v2342_v47 = vrot.slane %v7167_v51, 6  ;;  %v8601_v51 = vrot.slane %v7159_v44, 6  ;;  %v7373_v44 = vsel %vm2297_vm7, %v2346_v53, %v2354_v16 }
 0x289   :  { %v1217_v6 = vld [vmem:[#allocation11 + $0x408] sm:$0xff]  ;;  %2549 = vmatmul.f32.gmra.mxu3 %v7332_v3  ;;  %2511 = vmatmul.f32.gmra.mxu2 %v7349_v32  ;;  %v2047_v63 = vpop.f32.mrf.mxu2 }
 0x28a   :  { %v1293_v42 = vld [vmem:[#allocation11 + $0x668] sm:$0xff]  ;;  %2614 = vmatpush.msra.mxu1 %v1169_v43  ;;  %2659 = vmatpush.msra.mxu2 %v1217_v6  ;;  %v1965_v23 = vpop.f32.mrf.mxu0  ;;  %v2006_v43 = vpop.f32.mrf.mxu1  ;;  %v2344_v6 = vrot.slane %v7170_v21, 6  ;;  %v7362_v20 = vsel %vm2297_vm7, %v8601_v51, %v2348_v35  ;;  %v7365_v40 = vsel %vm2297_vm7, %v2334_v57, %v2342_v47  ;;  %v1086_v57 = vld [vmem:[#allocation3 + $0x110] sm:$0x3f] }
 0x28b   :  { %v1101_v17 = vld [vmem:[#allocation11 + $0x68] sm:$0xff]  ;;  %2697 = vmatpush.msra.mxu3 %v1293_v42  ;;  %v2085_v48 = vpop.f32.mrf.mxu3  ;;  %v2007_v46 = vadd.f32 %v2006_v43, %v1965_v23 }
 0x28c   :  { %v1165_v7 = vld [vmem:[#allocation11 + $0x268] sm:$0xff]  ;;  %2574 = vmatpush.msra.mxu0 %v1101_v17  ;;  %v7356_v62 = vadd.f32 %v2085_v48, %v2045_v8  ;;  %v7368_v42 = vsel %vm2297_vm7, %v2336_v33, %v2344_v6  ;;  %v2356_v33 = vrot.slane %v7187_v25, 6  ;;  %v2350_v8 = vrot.slane %v7181_v10, 6 }
 0x28d   :  { %v1289_v61 = vld [vmem:[#allocation11 + $0x648] sm:$0xff]  ;;  %2615 = vmatpush.msra.mxu1 %v1165_v7 }
 0x28e   :  { %v1097_v36 = vld [vmem:[#allocation11 + $0x48] sm:$0xff]  ;;  %8600 = vst [vmem:[#allocation46_spill] sm:$0xff] %v7356_v62  ;;  %2698 = vmatpush.msra.mxu3 %v1289_v61  ;;  %v7383_v51 = vsel %vm2297_vm7, %v2348_v35, %v2356_v33 }
 0x28f   :  { %v1161_v56 = vld [vmem:[#allocation11 + $0x248] sm:$0xff]  ;;  %2575 = vmatpush.msra.mxu0 %v1097_v36  ;;  %v2048_v36 = vadd.f32 %v2047_v63, %v2007_v46 }
 0x290   :  { %v1285_v41 = vld [vmem:[#allocation11 + $0x628] sm:$0xff]  ;;  %2616 = vmatpush.msra.mxu1 %v1161_v56  ;;  %2429 = vmatmul.f32.gmra.mxu0 %v7365_v40  ;;  %v2352_v56 = vrot.slane %v7184_v9, 6  ;;  %v1087_v9 = vld [vmem:[#allocation3 + $0x118] sm:$0x3f] }
 0x291   :  { %v1093_v11 = vld [vmem:[#allocation11 + $0x28] sm:$0xff]  ;;  %2699 = vmatpush.msra.mxu3 %v1285_v41  ;;  %2470 = vmatmul.f32.gmra.mxu1 %v7368_v42  ;;  %v2050_v53 = vpop.f32.mrf.mxu2  ;;  %v2362_v41 = vrot.slane %v1086_v57, 6  ;;  %v2364_v35 = vrot.slane %v1087_v9, 6 }
 0x292   :  { %2576 = vmatpush.msra.mxu0 %v1093_v11  ;;  %v1157_v17 = vld [vmem:[#allocation11 + $0x228] sm:$0xff]  ;;  %2552 = vmatmul.f32.gmra.mxu3 %v7362_v20  ;;  %v1968_v23 = vpop.f32.mrf.mxu0  ;;  %v2009_v43 = vpop.f32.mrf.mxu1  ;;  %v7389_v10 = vsel %vm2297_vm7, %v2344_v6, %v2352_v56 }
 0x293   :  { %v1281_v7 = vld [vmem:[#allocation11 + $0x608] sm:$0xff]  ;;  %2514 = vmatmul.f32.gmra.mxu2 %v7373_v44  ;;  %2617 = vmatpush.msra.mxu1 %v1157_v17  ;;  %v2088_v48 = vpop.f32.mrf.mxu3  ;;  %v2010_v25 = vadd.f32 %v2009_v43, %v1968_v23  ;;  %v7386_v17 = vsel %vm2297_vm7, %v2342_v47, %v2350_v8  ;;  %v7394_v63 = vsel %vm2297_vm7, %v2354_v16, %v2362_v41 }
 0x294   :  { %v1089_v21 = vld [vmem:[#allocation11 + $0x8] sm:$0xff]  ;;  %2700 = vmatpush.msra.mxu3 %v1281_v7  ;;  %v7380_v11 = vadd.f32 %v2088_v48, %v2048_v36  ;;  %v7401_v43 = vsel %vm2297_vm7, %v2356_v33, %v2364_v35 }
 0x295   :  { %v1153_v61 = vld [vmem:[#allocation11 + $0x208] sm:$0xff]  ;;  %2577 = vmatpush.msra.mxu0 %v1089_v21  ;;  %v2051_v47 = vadd.f32 %v2050_v53, %v2010_v25  ;;  %v1278_v53 = vld [vmem:[#allocation11 + $0x5f0] sm:$0xff] }
 0x296   :  { %2618 = vmatpush.msra.mxu1 %v1153_v61  ;;  %8602 = vst [vmem:[#allocation47_spill] sm:$0xff] %v7380_v11  ;;  %v1084_v46 = vld [vmem:[#allocation3 + $0x100] sm:$0x3f]  ;;  %v1085_v7 = vld [vmem:[#allocation3 + $0x108] sm:$0x3f]  ;;  %2808 = vmatpush.msrb.mxu2 %v1278_v53 }
 0x297   :  { %v2358_v21 = vrot.slane %v1084_v46, 6  ;;  %v2360_v57 = vrot.slane %v1085_v7, 6  ;;  %v1274_v46 = vld [vmem:[#allocation11 + $0x5d0] sm:$0xff] }
 0x298   :  { %2432 = vmatmul.f32.gmra.mxu0 %v7386_v17  ;;  %2809 = vmatpush.msrb.mxu2 %v1274_v46  ;;  %v1210_v46 = vld [vmem:[#allocation11 + $0x3d0] sm:$0xff] }
 0x299   :  { %2473 = vmatmul.f32.gmra.mxu1 %v7389_v10  ;;  %v2053_v61 = vpop.f32.mrf.mxu2  ;;  %v7404_v41 = vsel %vm2297_vm7, %v2350_v8, %v2358_v21  ;;  %v7407_v11 = vsel %vm2297_vm7, %v2352_v56, %v2360_v57  ;;  %v1270_v56 = vld [vmem:[#allocation11 + $0x5b0] sm:$0xff] }
 0x29a   :  { %2555 = vmatmul.f32.gmra.mxu3 %v7383_v51  ;;  %v1971_v48 = vpop.f32.mrf.mxu0  ;;  %v2012_v23 = vpop.f32.mrf.mxu1  ;;  %2810 = vmatpush.msrb.mxu2 %v1270_v56  ;;  %v1266_v21 = vld [vmem:[#allocation11 + $0x590] sm:$0xff] }
 0x29b   :  { %2517 = vmatmul.f32.gmra.mxu2 %v7394_v63  ;;  %v2091_v6 = vpop.f32.mrf.mxu3  ;;  %v2013_v16 = vadd.f32 %v2012_v23, %v1971_v48  ;;  %v1342_v57 = vld [vmem:[#allocation11 + $0x7f0] sm:$0xff] }
 0x29c   :  { %v7398_v36 = vadd.f32 %v2091_v6, %v2051_v47  ;;  %2811 = vmatpush.msrb.mxu2 %v1266_v21  ;;  %2849 = vmatpush.msrb.mxu3 %v1342_v57  ;;  %v1150_v6 = vld [vmem:[#allocation11 + $0x1f0] sm:$0xff] }
 0x29d   :  { %v2054_v25 = vadd.f32 %v2053_v61, %v2013_v16  ;;  %v1214_v61 = vld [vmem:[#allocation11 + $0x3f0] sm:$0xff]  ;;  %2726 = vmatpush.msrb.mxu0 %v1150_v6 }
 0x29e   :  { %8603 = vst [vmem:[#allocation48_spill] sm:$0xff] %v7398_v36  ;;  %v1262_v48 = vld [vmem:[#allocation11 + $0x570] sm:$0xff]  ;;  %2767 = vmatpush.msrb.mxu1 %v1214_v61 }
 0x29f   :  { %2812 = vmatpush.msrb.mxu2 %v1262_v48  ;;  %v1258_v21 = vld [vmem:[#allocation11 + $0x550] sm:$0xff] }
 0x2a0   :  { %2435 = vmatmul.f32.gmra.mxu0 %v7404_v41  ;;  %v1334_v57 = vld [vmem:[#allocation11 + $0x7b0] sm:$0xff]  ;;  %2768 = vmatpush.msrb.mxu1 %v1210_v46 }
 0x2a1   :  { %2476 = vmatmul.f32.gmra.mxu1 %v7407_v11  ;;  %v2196_v9 = vpop.f32.mrf.mxu2  ;;  %2813 = vmatpush.msrb.mxu2 %v1258_v21  ;;  %v1254_v6 = vld [vmem:[#allocation11 + $0x530] sm:$0xff] }
 0x2a2   :  { %2558 = vmatmul.f32.gmra.mxu3 %v7401_v43  ;;  %v2114_v8 = vpop.f32.mrf.mxu0  ;;  %v2155_v35 = vpop.f32.mrf.mxu1  ;;  %v1330_v61 = vld [vmem:[#allocation11 + $0x790] sm:$0xff] }
 0x2a3   :  { %2660 = vmatmul.f32.vlgmr.msra.gmra.mxu2 %v7194_v12  ;;  %v2094_v33 = vpop.f32.mrf.mxu3  ;;  %v2156_v47 = vadd.f32 %v2155_v35, %v2114_v8  ;;  %v1138_v48 = vld [vmem:[#allocation11 + $0x190] sm:$0xff] }
 0x2a4   :  { %v7413_v7 = vadd.f32 %v2094_v33, %v2054_v25  ;;  %v1338_v25 = vld [vmem:[#allocation11 + $0x7d0] sm:$0xff]  ;;  %2814 = vmatpush.msrb.mxu2 %v1254_v6 }
 0x2a5   :  { %v2197_v23 = vadd.f32 %v2196_v9, %v2156_v47  ;;  %v1146_v33 = vld [vmem:[#allocation11 + $0x1d0] sm:$0xff]  ;;  %2850 = vmatpush.msrb.mxu3 %v1338_v25 }
 0x2a6   :  { %8604 = vst [vmem:[#allocation49_spill] sm:$0xff] %v7413_v7  ;;  %2727 = vmatpush.msrb.mxu0 %v1146_v33  ;;  %v1142_v7 = vld [vmem:[#allocation11 + $0x1b0] sm:$0xff] }
 0x2a7   :  { %2851 = vmatpush.msrb.mxu3 %v1334_v57  ;;  %v1206_v47 = vld [vmem:[#allocation11 + $0x3b0] sm:$0xff] }
 0x2a8   :  { %2578 = vmatmul.f32.vlgmr.msra.gmra.mxu0 %v7207_v59  ;;  %2769 = vmatpush.msrb.mxu1 %v1206_v47  ;;  %v1326_v25 = vld [vmem:[#allocation11 + $0x770] sm:$0xff] }
 0x2a9   :  { %2619 = vmatmul.f32.vlgmr.msra.gmra.mxu1 %v7210_v14  ;;  %v2199_v53 = vpop.f32.mrf.mxu2  ;;  %2728 = vmatpush.msrb.mxu0 %v1142_v7  ;;  %v1134_v33 = vld [vmem:[#allocation11 + $0x170] sm:$0xff] }
 0x2aa   :  { %2701 = vmatmul.f32.vlgmr.msra.gmra.mxu3 %v7203_v39  ;;  %v2117_v35 = vpop.f32.mrf.mxu0  ;;  %v2158_v56 = vpop.f32.mrf.mxu1  ;;  %v1198_v7 = vld [vmem:[#allocation11 + $0x370] sm:$0xff] }
 0x2ab   :  { %2663 = vmatmul.f32.gmra.mxu2 %v7215_v15  ;;  %v2237_v16 = vpop.f32.mrf.mxu3  ;;  %v2159_v9 = vadd.f32 %v2158_v56, %v2117_v35  ;;  %2852 = vmatpush.msrb.mxu3 %v1330_v61  ;;  %v1246_v35 = vld [vmem:[#allocation11 + $0x4f0] sm:$0xff] }
 0x2ac   :  { %v7419_v8 = vadd.f32 %v2237_v16, %v2197_v23  ;;  %v1202_v23 = vld [vmem:[#allocation11 + $0x390] sm:$0xff]  ;;  %2729 = vmatpush.msrb.mxu0 %v1138_v48 }
 0x2ad   :  { %v1250_v16 = vld [vmem:[#allocation11 + $0x510] sm:$0xff]  ;;  %v2200_v46 = vadd.f32 %v2199_v53, %v2159_v9  ;;  %2770 = vmatpush.msrb.mxu1 %v1202_v23  ;;  %2853 = vmatpush.msrb.mxu3 %v1326_v25 }
 0x2ae   :  { %8605 = vst [vmem:[#allocation50_spill] sm:$0xff] %v7419_v8  ;;  %2815 = vmatpush.msrb.mxu2 %v1250_v16  ;;  %v1322_v57 = vld [vmem:[#allocation11 + $0x750] sm:$0xff]  ;;  %2730 = vmatpush.msrb.mxu0 %v1134_v33 }
 0x2af   :  { %v1130_v8 = vld [vmem:[#allocation11 + $0x150] sm:$0xff]  ;;  %2771 = vmatpush.msrb.mxu1 %v1198_v7  ;;  %2854 = vmatpush.msrb.mxu3 %v1322_v57 }
 0x2b0   :  { %2581 = vmatmul.f32.gmra.mxu0 %v7233_v28  ;;  %2816 = vmatpush.msrb.mxu2 %v1246_v35  ;;  %v1194_v53 = vld [vmem:[#allocation11 + $0x350] sm:$0xff] }
 0x2b1   :  { %2622 = vmatmul.f32.gmra.mxu1 %v7238_v26  ;;  %v2202_v21 = vpop.f32.mrf.mxu2  ;;  %2731 = vmatpush.msrb.mxu0 %v1130_v8  ;;  %v1242_v9 = vld [vmem:[#allocation11 + $0x4d0] sm:$0xff] }
 0x2b2   :  { %2704 = vmatmul.f32.gmra.mxu3 %v7228_v49  ;;  %v2120_v62 = vpop.f32.mrf.mxu0  ;;  %v2161_v5 = vpop.f32.mrf.mxu1  ;;  %v1318_v6 = vld [vmem:[#allocation11 + $0x730] sm:$0xff]  ;;  %2772 = vmatpush.msrb.mxu1 %v1194_v53 }
 0x2b3   :  { %2666 = vmatmul.f32.gmra.mxu2 %v7245_v30  ;;  %v2240_v56 = vpop.f32.mrf.mxu3  ;;  %v2162_v47 = vadd.f32 %v2161_v5, %v2120_v62  ;;  %v1126_v61 = vld [vmem:[#allocation11 + $0x130] sm:$0xff]  ;;  %2855 = vmatpush.msrb.mxu3 %v1318_v6 }
 0x2b4   :  { %v7425_v36 = vadd.f32 %v2240_v56, %v2200_v46  ;;  %v1190_v48 = vld [vmem:[#allocation11 + $0x330] sm:$0xff]  ;;  %2817 = vmatpush.msrb.mxu2 %v1242_v9  ;;  %2732 = vmatpush.msrb.mxu0 %v1126_v61 }
 0x2b5   :  { %v1238_v23 = vld [vmem:[#allocation11 + $0x4b0] sm:$0xff]  ;;  %v2203_v62 = vadd.f32 %v2202_v21, %v2162_v47  ;;  %2773 = vmatpush.msrb.mxu1 %v1190_v48 }
 0x2b6   :  { %8606 = vst [vmem:[#allocation51_spill] sm:$0xff] %v7425_v36  ;;  %v1314_v16 = vld [vmem:[#allocation11 + $0x710] sm:$0xff]  ;;  %2818 = vmatpush.msrb.mxu2 %v1238_v23 }
 0x2b7   :  { %v1122_v5 = vld [vmem:[#allocation11 + $0x110] sm:$0xff]  ;;  %2856 = vmatpush.msrb.mxu3 %v1314_v16 }
 0x2b8   :  { %2584 = vmatmul.f32.gmra.mxu0 %v7267_v1  ;;  %v1186_v8 = vld [vmem:[#allocation11 + $0x310] sm:$0xff] }
 0x2b9   :  { %2625 = vmatmul.f32.gmra.mxu1 %v7272_v55  ;;  %v1234_v25 = vld [vmem:[#allocation11 + $0x490] sm:$0xff]  ;;  %v2205_v46 = vpop.f32.mrf.mxu2  ;;  %2733 = vmatpush.msrb.mxu0 %v1122_v5 }
 0x2ba   :  { %2707 = vmatmul.f32.gmra.mxu3 %v7260_v27  ;;  %v1310_v7 = vld [vmem:[#allocation11 + $0x6f0] sm:$0xff]  ;;  %v2123_v57 = vpop.f32.mrf.mxu0  ;;  %v2164_v36 = vpop.f32.mrf.mxu1  ;;  %2774 = vmatpush.msrb.mxu1 %v1186_v8 }
 0x2bb   :  { %2669 = vmatmul.f32.gmra.mxu2 %v7281_v52  ;;  %v2243_v33 = vpop.f32.mrf.mxu3  ;;  %v1118_v35 = vld [vmem:[#allocation11 + $0xf0] sm:$0xff]  ;;  %v2165_v53 = vadd.f32 %v2164_v36, %v2123_v57  ;;  %2857 = vmatpush.msrb.mxu3 %v1310_v7 }
 0x2bc   :  { %v7431_v56 = vadd.f32 %v2243_v33, %v2203_v62  ;;  %2819 = vmatpush.msrb.mxu2 %v1234_v25  ;;  %2734 = vmatpush.msrb.mxu0 %v1118_v35  ;;  %v1182_v21 = vld [vmem:[#allocation11 + $0x2f0] sm:$0xff] }
 0x2bd   :  { %v1230_v47 = vld [vmem:[#allocation11 + $0x470] sm:$0xff]  ;;  %2775 = vmatpush.msrb.mxu1 %v1182_v21  ;;  %v2206_v16 = vadd.f32 %v2205_v46, %v2165_v53 }
 0x2be   :  { %8607 = vst [vmem:[#allocation52_spill] sm:$0xff] %v7431_v56  ;;  %v1306_v9 = vld [vmem:[#allocation11 + $0x6d0] sm:$0xff]  ;;  %2820 = vmatpush.msrb.mxu2 %v1230_v47 }
 0x2bf   :  { %v1114_v6 = vld [vmem:[#allocation11 + $0xd0] sm:$0xff]  ;;  %2858 = vmatpush.msrb.mxu3 %v1306_v9 }
 0x2c0   :  { %2587 = vmatmul.f32.gmra.mxu0 %v7303_v2  ;;  %v1178_v61 = vld [vmem:[#allocation11 + $0x2d0] sm:$0xff] }
 0x2c1   :  { %2628 = vmatmul.f32.gmra.mxu1 %v7308_v4  ;;  %v1226_v48 = vld [vmem:[#allocation11 + $0x450] sm:$0xff]  ;;  %2735 = vmatpush.msrb.mxu0 %v1114_v6  ;;  %v2208_v25 = vpop.f32.mrf.mxu2 }
 0x2c2   :  { %2710 = vmatmul.f32.gmra.mxu3 %v7296_v50  ;;  %v1302_v23 = vld [vmem:[#allocation11 + $0x6b0] sm:$0xff]  ;;  %2776 = vmatpush.msrb.mxu1 %v1178_v61  ;;  %v2126_v57 = vpop.f32.mrf.mxu0  ;;  %v2167_v56 = vpop.f32.mrf.mxu1 }
 0x2c3   :  { %2672 = vmatmul.f32.gmra.mxu2 %v7317_v45  ;;  %v1110_v36 = vld [vmem:[#allocation11 + $0xb0] sm:$0xff]  ;;  %v2246_v8 = vpop.f32.mrf.mxu3  ;;  %2859 = vmatpush.msrb.mxu3 %v1302_v23  ;;  %v2168_v21 = vadd.f32 %v2167_v56, %v2126_v57 }
 0x2c4   :  { %v1174_v5 = vld [vmem:[#allocation11 + $0x2b0] sm:$0xff]  ;;  %2821 = vmatpush.msrb.mxu2 %v1226_v48  ;;  %v7437_v35 = vadd.f32 %v2246_v8, %v2206_v16  ;;  %2736 = vmatpush.msrb.mxu0 %v1110_v36 }
 0x2c5   :  { %v1222_v62 = vld [vmem:[#allocation11 + $0x430] sm:$0xff]  ;;  %2777 = vmatpush.msrb.mxu1 %v1174_v5  ;;  %v2209_v56 = vadd.f32 %v2208_v25, %v2168_v21 }
 0x2c6   :  { %v1298_v33 = vld [vmem:[#allocation11 + $0x690] sm:$0xff]  ;;  %2822 = vmatpush.msrb.mxu2 %v1222_v62 }
 0x2c7   :  { %v1106_v7 = vld [vmem:[#allocation11 + $0x90] sm:$0xff]  ;;  %2860 = vmatpush.msrb.mxu3 %v1298_v33 }
 0x2c8   :  { %2737 = vmatpush.msrb.mxu0 %v1106_v7  ;;  %v1170_v46 = vld [vmem:[#allocation11 + $0x290] sm:$0xff] }
 0x2c9   :  { %v1218_v53 = vld [vmem:[#allocation11 + $0x410] sm:$0xff]  ;;  %2590 = vmatmul.f32.gmra.mxu0 %v7337_v37  ;;  %2631 = vmatmul.f32.gmra.mxu1 %v7342_v54  ;;  %v2211_v16 = vpop.f32.mrf.mxu2 }
 0x2ca   :  { %v1294_v47 = vld [vmem:[#allocation11 + $0x670] sm:$0xff]  ;;  %2713 = vmatmul.f32.gmra.mxu3 %v7332_v3  ;;  %2778 = vmatpush.msrb.mxu1 %v1170_v46  ;;  %v2129_v33 = vpop.f32.mrf.mxu0  ;;  %v2170_v7 = vpop.f32.mrf.mxu1 }
 0x2cb   :  { %v1102_v9 = vld [vmem:[#allocation11 + $0x70] sm:$0xff]  ;;  %2675 = vmatmul.f32.gmra.mxu2 %v7349_v32  ;;  %2861 = vmatpush.msrb.mxu3 %v1294_v47  ;;  %v2249_v36 = vpop.f32.mrf.mxu3  ;;  %v2171_v57 = vadd.f32 %v2170_v7, %v2129_v33 }
 0x2cc   :  { %v1166_v6 = vld [vmem:[#allocation11 + $0x270] sm:$0xff]  ;;  %2823 = vmatpush.msrb.mxu2 %v1218_v53  ;;  %2738 = vmatpush.msrb.mxu0 %v1102_v9  ;;  %v7443_v8 = vadd.f32 %v2249_v36, %v2209_v56 }
 0x2cd   :  { %v1290_v61 = vld [vmem:[#allocation11 + $0x650] sm:$0xff]  ;;  %2779 = vmatpush.msrb.mxu1 %v1166_v6  ;;  %v2212_v47 = vadd.f32 %v2211_v16, %v2171_v57 }
 0x2ce   :  { %v1098_v48 = vld [vmem:[#allocation11 + $0x50] sm:$0xff]  ;;  %2862 = vmatpush.msrb.mxu3 %v1290_v61 }
 0x2cf   :  { %v1162_v23 = vld [vmem:[#allocation11 + $0x250] sm:$0xff]  ;;  %2739 = vmatpush.msrb.mxu0 %v1098_v48 }
 0x2d0   :  { %v1286_v5 = vld [vmem:[#allocation11 + $0x630] sm:$0xff]  ;;  %2780 = vmatpush.msrb.mxu1 %v1162_v23 }
 0x2d1   :  { %v1094_v62 = vld [vmem:[#allocation11 + $0x30] sm:$0xff]  ;;  %2863 = vmatpush.msrb.mxu3 %v1286_v5  ;;  %2593 = vmatmul.f32.gmra.mxu0 %v7365_v40  ;;  %v2214_v6 = vpop.f32.mrf.mxu2 }
 0x2d2   :  { %2740 = vmatpush.msrb.mxu0 %v1094_v62  ;;  %v1158_v46 = vld [vmem:[#allocation11 + $0x230] sm:$0xff]  ;;  %2634 = vmatmul.f32.gmra.mxu1 %v7368_v42  ;;  %v2132_v48 = vpop.f32.mrf.mxu0  ;;  %v2173_v56 = vpop.f32.mrf.mxu1 }
 0x2d3   :  { %v1282_v25 = vld [vmem:[#allocation11 + $0x610] sm:$0xff]  ;;  %2716 = vmatmul.f32.gmra.mxu3 %v7362_v20  ;;  %2678 = vmatmul.f32.gmra.mxu2 %v7373_v44  ;;  %v2252_v9 = vpop.f32.mrf.mxu3  ;;  %v2174_v23 = vadd.f32 %v2173_v56, %v2132_v48  ;;  %v1275_v48 = vld [vmem:[#allocation11 + $0x5d8] sm:$0xff] }
 0x2d4   :  { %v1090_v21 = vld [vmem:[#allocation11 + $0x10] sm:$0xff]  ;;  %2781 = vmatpush.msrb.mxu1 %v1158_v46  ;;  %2864 = vmatpush.msrb.mxu3 %v1282_v25  ;;  %v7449_v61 = vadd.f32 %v2252_v9, %v2212_v47  ;;  %v1664_v46 = vadd.f32 %v7013_v18, %v7015_v29 }
 0x2d5   :  { %v1154_v53 = vld [vmem:[#allocation11 + $0x210] sm:$0xff]  ;;  %2741 = vmatpush.msrb.mxu0 %v1090_v21  ;;  %v2215_v36 = vadd.f32 %v2214_v6, %v2174_v23  ;;  %v1279_v21 = vld [vmem:[#allocation11 + $0x5f8] sm:$0xff] }
 0x2d6   :  { %2782 = vmatpush.msrb.mxu1 %v1154_v53  ;;  %v1705_v25 = vadd.f32 %v7017_v60, %v1664_v46  ;;  %2972 = vmatpush.msra.mxu2 %v1279_v21  ;;  %v1215_v46 = vld [vmem:[#allocation11 + $0x3f8] sm:$0xff] }
 0x2d8   :  { %v1746_v47 = vadd.f32 %v7023_v22, %v1705_v25  ;;  %2973 = vmatpush.msra.mxu2 %v1275_v48  ;;  %v1267_v22 = vld [vmem:[#allocation11 + $0x598] sm:$0xff]  ;;  %2931 = vmatpush.msra.mxu1 %v1215_v46 }
 0x2d9   :  { %2596 = vmatmul.f32.gmra.mxu0 %v7386_v17  ;;  %v2217_v16 = vpop.f32.mrf.mxu2  ;;  %v1263_v25 = vld [vmem:[#allocation11 + $0x578] sm:$0xff] }
 0x2da   :  { %2637 = vmatmul.f32.gmra.mxu1 %v7389_v10  ;;  %v2135_v33 = vpop.f32.mrf.mxu0  ;;  %v2176_v7 = vpop.f32.mrf.mxu1 }
 0x2db   :  { %2719 = vmatmul.f32.gmra.mxu3 %v7383_v51  ;;  %2681 = vmatmul.f32.gmra.mxu2 %v7394_v63  ;;  %v2255_v5 = vpop.f32.mrf.mxu3  ;;  %v2177_v57 = vadd.f32 %v2176_v7, %v2135_v33 }
 0x2dc   :  { %v7455_v62 = vadd.f32 %v2255_v5, %v2215_v36  ;;  %v1271_v36 = vld [vmem:[#allocation11 + $0x5b8] sm:$0xff]  ;;  %v1667_v5 = vadd.f32 %v7025_v34, %v7027_v13 }
 0x2dd   :  { %v2218_v53 = vadd.f32 %v2217_v16, %v2177_v57  ;;  %2974 = vmatpush.msra.mxu2 %v1271_v36  ;;  %v1343_v16 = vld [vmem:[#allocation11 + $0x7f8] sm:$0xff] }
 0x2de   :  { %v1708_v33 = vadd.f32 %v7031_v0, %v1667_v5  ;;  %3013 = vmatpush.msra.mxu3 %v1343_v16  ;;  %v1151_v57 = vld [vmem:[#allocation11 + $0x1f8] sm:$0xff] }
 0x2df   :  { %2975 = vmatpush.msra.mxu2 %v1267_v22  ;;  %2890 = vmatpush.msra.mxu0 %v1151_v57  ;;  %v1143_v36 = vld [vmem:[#allocation11 + $0x1b8] sm:$0xff] }
 0x2e0   :  { %v1749_v34 = vadd.f32 %v7035_v31, %v1708_v33  ;;  %v1207_v31 = vld [vmem:[#allocation11 + $0x3b8] sm:$0xff] }
 0x2e1   :  { %2599 = vmatmul.f32.gmra.mxu0 %v7404_v41  ;;  %v2497_v6 = vpop.f32.mrf.mxu2  ;;  %2976 = vmatpush.msra.mxu2 %v1263_v25  ;;  %v1255_v5 = vld [vmem:[#allocation11 + $0x538] sm:$0xff] }
 0x2e2   :  { %2640 = vmatmul.f32.gmra.mxu1 %v7407_v11  ;;  %v2415_v18 = vpop.f32.mrf.mxu0  ;;  %v2456_v29 = vpop.f32.mrf.mxu1  ;;  %v1331_v16 = vld [vmem:[#allocation11 + $0x798] sm:$0xff] }
 0x2e3   :  { %2722 = vmatmul.f32.gmra.mxu3 %v7401_v43  ;;  %2824 = vmatmul.f32.vlgmr.msrb.gmra.mxu2 %v7194_v12  ;;  %v2258_v9 = vpop.f32.mrf.mxu3  ;;  %v2416_v23 = vadd.f32 %v2415_v18, %v1746_v47  ;;  %v1147_v47 = vld [vmem:[#allocation11 + $0x1d8] sm:$0xff] }
 0x2e4   :  { %v7465_v56 = vadd.f32 %v2258_v9, %v2218_v53  ;;  %v1339_v53 = vld [vmem:[#allocation11 + $0x7d8] sm:$0xff]  ;;  %2891 = vmatpush.msra.mxu0 %v1147_v47 }
 0x2e5   :  { %v2457_v60 = vadd.f32 %v2456_v29, %v2416_v23  ;;  %v1211_v9 = vld [vmem:[#allocation11 + $0x3d8] sm:$0xff]  ;;  %3014 = vmatpush.msra.mxu3 %v1339_v53 }
 0x2e6   :  { %v1335_v29 = vld [vmem:[#allocation11 + $0x7b8] sm:$0xff]  ;;  %2932 = vmatpush.msra.mxu1 %v1211_v9  ;;  %2892 = vmatpush.msra.mxu0 %v1143_v36 }
 0x2e7   :  { %v2498_v7 = vadd.f32 %v2497_v6, %v2457_v60  ;;  %v1259_v6 = vld [vmem:[#allocation11 + $0x558] sm:$0xff]  ;;  %3015 = vmatpush.msra.mxu3 %v1335_v29  ;;  %v1670_v60 = vadd.f32 %v7039_v19, %v7041_v38  ;;  %v8608_v29 = vld [vmem:[#allocation24_spill] sm:$0xff] }
 0x2e8   :  { %2977 = vmatpush.msra.mxu2 %v1259_v6  ;;  %v1139_v33 = vld [vmem:[#allocation11 + $0x198] sm:$0xff]  ;;  %2933 = vmatpush.msra.mxu1 %v1207_v31 }
 0x2e9   :  { %2742 = vmatmul.f32.vlgmr.msrb.gmra.mxu0 %v7207_v59  ;;  %v2500_v21 = vpop.f32.mrf.mxu2  ;;  %v1251_v57 = vld [vmem:[#allocation11 + $0x518] sm:$0xff]  ;;  %v1711_v46 = vadd.f32 %v7045_v24, %v1670_v60  ;;  %3016 = vmatpush.msra.mxu3 %v1331_v16 }
 0x2ea   :  { %2783 = vmatmul.f32.vlgmr.msrb.gmra.mxu1 %v7210_v14  ;;  %v2418_v18 = vpop.f32.mrf.mxu0  ;;  %2978 = vmatpush.msra.mxu2 %v1255_v5  ;;  %v1135_v19 = vld [vmem:[#allocation11 + $0x178] sm:$0xff] }
 0x2eb   :  { %2865 = vmatmul.f32.vlgmr.msrb.gmra.mxu3 %v7203_v39  ;;  %2827 = vmatmul.f32.gmra.mxu2 %v7215_v15  ;;  %v2538_v13 = vpop.f32.mrf.mxu3  ;;  %v2419_v23 = vadd.f32 %v2418_v18, %v1749_v34  ;;  %v1327_v34 = vld [vmem:[#allocation11 + $0x778] sm:$0xff]  ;;  %v1752_v53 = vadd.f32 %v7053_v58, %v1711_v46 }
 0x2ec   :  { %v7475_v48 = vadd.f32 %v2538_v13, %v2498_v7  ;;  %v2459_v0 = vpop.f32.mrf.mxu1  ;;  %v1203_v7 = vld [vmem:[#allocation11 + $0x398] sm:$0xff]  ;;  %2893 = vmatpush.msra.mxu0 %v1139_v33  ;;  %2979 = vmatpush.msra.mxu2 %v1251_v57 }
 0x2ed   :  { %v2460_v22 = vadd.f32 %v2459_v0, %v2419_v23  ;;  %v1199_v38 = vld [vmem:[#allocation11 + $0x378] sm:$0xff]  ;;  %2934 = vmatpush.msra.mxu1 %v1203_v7  ;;  %3017 = vmatpush.msra.mxu3 %v1327_v34  ;;  %v8609_v23 = vld [vmem:[#allocation23_spill] sm:$0xff] }
 0x2ee   :  { %v1247_v13 = vld [vmem:[#allocation11 + $0x4f8] sm:$0xff]  ;;  %2894 = vmatpush.msra.mxu0 %v1135_v19  ;;  %v1673_v36 = vadd.f32 %v8609_v23, %v8608_v29 }
 0x2ef   :  { %v2501_v25 = vadd.f32 %v2500_v21, %v2460_v22  ;;  %v1323_v18 = vld [vmem:[#allocation11 + $0x758] sm:$0xff]  ;;  %2935 = vmatpush.msra.mxu1 %v1199_v38  ;;  %2980 = vmatpush.msra.mxu2 %v1247_v13 }
 0x2f0   :  { %v1131_v0 = vld [vmem:[#allocation11 + $0x158] sm:$0xff]  ;;  %3018 = vmatpush.msra.mxu3 %v1323_v18 }
 0x2f1   :  { %2745 = vmatmul.f32.gmra.mxu0 %v7233_v28  ;;  %v2503_v9 = vpop.f32.mrf.mxu2  ;;  %v1195_v58 = vld [vmem:[#allocation11 + $0x358] sm:$0xff] }
 0x2f2   :  { %2786 = vmatmul.f32.gmra.mxu1 %v7238_v26  ;;  %2895 = vmatpush.msra.mxu0 %v1131_v0  ;;  %v1243_v5 = vld [vmem:[#allocation11 + $0x4d8] sm:$0xff] }
 0x2f3   :  { %2868 = vmatmul.f32.gmra.mxu3 %v7228_v49  ;;  %2830 = vmatmul.f32.gmra.mxu2 %v7245_v30  ;;  %v2541_v47 = vpop.f32.mrf.mxu3  ;;  %v8610_v60 = vld [vmem:[#allocation25_spill] sm:$0xff] }
 0x2f4   :  { %v7485_v6 = vadd.f32 %v2541_v47, %v2501_v25  ;;  %v2421_v24 = vpop.f32.mrf.mxu0  ;;  %v2462_v21 = vpop.f32.mrf.mxu1  ;;  %v1714_v22 = vadd.f32 %v8610_v60, %v1673_v36  ;;  %v1319_v33 = vld [vmem:[#allocation11 + $0x738] sm:$0xff]  ;;  %2936 = vmatpush.msra.mxu1 %v1195_v58  ;;  %2981 = vmatpush.msra.mxu2 %v1243_v5  ;;  %v8612_v36 = vld [vmem:[#allocation27_spill] sm:$0xff] }
 0x2f5   :  { %v2422_v31 = vadd.f32 %v2421_v24, %v1752_v53  ;;  %v1127_v7 = vld [vmem:[#allocation11 + $0x138] sm:$0xff]  ;;  %3019 = vmatpush.msra.mxu3 %v1319_v33  ;;  %v8611_v53 = vld [vmem:[#allocation26_spill] sm:$0xff] }
 0x2f6   :  { %v1191_v57 = vld [vmem:[#allocation11 + $0x338] sm:$0xff]  ;;  %2896 = vmatpush.msra.mxu0 %v1127_v7  ;;  %v1755_v47 = vadd.f32 %v8611_v53, %v1714_v22 }
 0x2f7   :  { %v2463_v16 = vadd.f32 %v2462_v21, %v2422_v31  ;;  %v1239_v46 = vld [vmem:[#allocation11 + $0x4b8] sm:$0xff]  ;;  %2937 = vmatpush.msra.mxu1 %v1191_v57  ;;  %v8613_v31 = vld [vmem:[#allocation28_spill] sm:$0xff] }
 0x2f8   :  { %v1315_v34 = vld [vmem:[#allocation11 + $0x718] sm:$0xff]  ;;  %2982 = vmatpush.msra.mxu2 %v1239_v46  ;;  %v1676_v58 = vadd.f32 %v8613_v31, %v8612_v36 }
 0x2f9   :  { %2748 = vmatmul.f32.gmra.mxu0 %v7267_v1  ;;  %v2504_v25 = vadd.f32 %v2503_v9, %v2463_v16  ;;  %v1123_v19 = vld [vmem:[#allocation11 + $0x118] sm:$0xff]  ;;  %3020 = vmatpush.msra.mxu3 %v1315_v34 }
 0x2fa   :  { %2789 = vmatmul.f32.gmra.mxu1 %v7272_v55  ;;  %v1187_v38 = vld [vmem:[#allocation11 + $0x318] sm:$0xff]  ;;  %2897 = vmatpush.msra.mxu0 %v1123_v19 }
 0x2fb   :  { %2871 = vmatmul.f32.gmra.mxu3 %v7260_v27  ;;  %2833 = vmatmul.f32.gmra.mxu2 %v7281_v52  ;;  %v1235_v13 = vld [vmem:[#allocation11 + $0x498] sm:$0xff]  ;;  %v2544_v18 = vpop.f32.mrf.mxu3  ;;  %v2506_v0 = vpop.f32.mrf.mxu2 }
 0x2fc   :  { %v1311_v24 = vld [vmem:[#allocation11 + $0x6f8] sm:$0xff]  ;;  %v7495_v29 = vadd.f32 %v2544_v18, %v2504_v25  ;;  %v2424_v23 = vpop.f32.mrf.mxu0  ;;  %v2465_v9 = vpop.f32.mrf.mxu1  ;;  %2938 = vmatpush.msra.mxu1 %v1187_v38  ;;  %2983 = vmatpush.msra.mxu2 %v1235_v13  ;;  %v8615_v18 = vld [vmem:[#allocation30_spill] sm:$0xff] }
 0x2fd   :  { %v1119_v21 = vld [vmem:[#allocation11 + $0xf8] sm:$0xff]  ;;  %v2425_v5 = vadd.f32 %v2424_v23, %v1755_v47  ;;  %3021 = vmatpush.msra.mxu3 %v1311_v24 }
 0x2fe   :  { %2898 = vmatpush.msra.mxu0 %v1119_v21  ;;  %v1183_v60 = vld [vmem:[#allocation11 + $0x2f8] sm:$0xff] }
 0x2ff   :  { %v1231_v22 = vld [vmem:[#allocation11 + $0x478] sm:$0xff]  ;;  %v2466_v7 = vadd.f32 %v2465_v9, %v2425_v5  ;;  %2939 = vmatpush.msra.mxu1 %v1183_v60 }
 0x300   :  { %v8614_v16 = vld [vmem:[#allocation29_spill] sm:$0xff]  ;;  %2984 = vmatpush.msra.mxu2 %v1231_v22 }
 0x301   :  { %v1717_v33 = vadd.f32 %v8614_v16, %v1676_v58  ;;  %2751 = vmatmul.f32.gmra.mxu0 %v7303_v2  ;;  %v1307_v57 = vld [vmem:[#allocation11 + $0x6d8] sm:$0xff]  ;;  %v2507_v19 = vadd.f32 %v2506_v0, %v2466_v7 }
 0x302   :  { %2792 = vmatmul.f32.gmra.mxu1 %v7308_v4  ;;  %v1115_v46 = vld [vmem:[#allocation11 + $0xd8] sm:$0xff]  ;;  %3022 = vmatpush.msra.mxu3 %v1307_v57 }
 0x303   :  { %2874 = vmatmul.f32.gmra.mxu3 %v7296_v50  ;;  %2836 = vmatmul.f32.gmra.mxu2 %v7317_v45  ;;  %v1179_v25 = vld [vmem:[#allocation11 + $0x2d8] sm:$0xff]  ;;  %v1758_v24 = vadd.f32 %v8615_v18, %v1717_v33  ;;  %v2547_v21 = vpop.f32.mrf.mxu3  ;;  %v2509_v23 = vpop.f32.mrf.mxu2 }
 0x304   :  { %v1227_v34 = vld [vmem:[#allocation11 + $0x458] sm:$0xff]  ;;  %2899 = vmatpush.msra.mxu0 %v1115_v46  ;;  %2940 = vmatpush.msra.mxu1 %v1179_v25  ;;  %v7505_v31 = vadd.f32 %v2547_v21, %v2507_v19  ;;  %v2427_v58 = vpop.f32.mrf.mxu0 }
 0x305   :  { %v1303_v38 = vld [vmem:[#allocation11 + $0x6b8] sm:$0xff]  ;;  %2985 = vmatpush.msra.mxu2 %v1227_v34  ;;  %v2468_v0 = vpop.f32.mrf.mxu1  ;;  %v2428_v5 = vadd.f32 %v2427_v58, %v1758_v24 }
 0x306   :  { %v1111_v13 = vld [vmem:[#allocation11 + $0xb8] sm:$0xff]  ;;  %3023 = vmatpush.msra.mxu3 %v1303_v38 }
 0x307   :  { %v1175_v53 = vld [vmem:[#allocation11 + $0x2b8] sm:$0xff]  ;;  %2900 = vmatpush.msra.mxu0 %v1111_v13  ;;  %v2469_v16 = vadd.f32 %v2468_v0, %v2428_v5 }
 0x308   :  { %v1223_v47 = vld [vmem:[#allocation11 + $0x438] sm:$0xff]  ;;  %2941 = vmatpush.msra.mxu1 %v1175_v53 }
 0x309   :  { %v1299_v9 = vld [vmem:[#allocation11 + $0x698] sm:$0xff]  ;;  %2986 = vmatpush.msra.mxu2 %v1223_v47  ;;  %2754 = vmatmul.f32.gmra.mxu0 %v7337_v37  ;;  %v2510_v46 = vadd.f32 %v2509_v23, %v2469_v16 }
 0x30a   :  { %v1107_v36 = vld [vmem:[#allocation11 + $0x98] sm:$0xff]  ;;  %3024 = vmatpush.msra.mxu3 %v1299_v9  ;;  %2795 = vmatmul.f32.gmra.mxu1 %v7342_v54  ;;  %v8616_v9 = vld [vmem:[#allocation31_spill] sm:$0xff] }
 0x30b   :  { %2901 = vmatpush.msra.mxu0 %v1107_v36  ;;  %v1171_v60 = vld [vmem:[#allocation11 + $0x298] sm:$0xff]  ;;  %2877 = vmatmul.f32.gmra.mxu3 %v7332_v3 }
 0x30c   :  { %v1219_v22 = vld [vmem:[#allocation11 + $0x418] sm:$0xff]  ;;  %2839 = vmatmul.f32.gmra.mxu2 %v7349_v32  ;;  %2942 = vmatpush.msra.mxu1 %v1171_v60  ;;  %v2550_v38 = vpop.f32.mrf.mxu3  ;;  %v2512_v13 = vpop.f32.mrf.mxu2 }
 0x30d   :  { %v1295_v33 = vld [vmem:[#allocation11 + $0x678] sm:$0xff]  ;;  %2987 = vmatpush.msra.mxu2 %v1219_v22  ;;  %v7511_v18 = vadd.f32 %v2550_v38, %v2510_v46  ;;  %v2430_v24 = vpop.f32.mrf.mxu0 }
 0x30e   :  { %v1103_v7 = vld [vmem:[#allocation11 + $0x78] sm:$0xff]  ;;  %3025 = vmatpush.msra.mxu3 %v1295_v33  ;;  %v2471_v21 = vpop.f32.mrf.mxu1  ;;  %v2431_v23 = vadd.f32 %v2430_v24, %v8616_v9 }
 0x30f   :  { %v1167_v57 = vld [vmem:[#allocation11 + $0x278] sm:$0xff]  ;;  %2902 = vmatpush.msra.mxu0 %v1103_v7 }
 0x310   :  { %v1291_v25 = vld [vmem:[#allocation11 + $0x658] sm:$0xff]  ;;  %2943 = vmatpush.msra.mxu1 %v1167_v57  ;;  %v2472_v0 = vadd.f32 %v2471_v21, %v2431_v23 }
 0x311   :  { %v1099_v34 = vld [vmem:[#allocation11 + $0x58] sm:$0xff]  ;;  %3026 = vmatpush.msra.mxu3 %v1291_v25  ;;  %2757 = vmatmul.f32.gmra.mxu0 %v7365_v40  ;;  %v8617_v25 = vld [vmem:[#allocation32_spill] sm:$0xff] }
 0x312   :  { %v1163_v19 = vld [vmem:[#allocation11 + $0x258] sm:$0xff]  ;;  %2903 = vmatpush.msra.mxu0 %v1099_v34  ;;  %2798 = vmatmul.f32.gmra.mxu1 %v7368_v42  ;;  %v2513_v22 = vadd.f32 %v2512_v13, %v2472_v0  ;;  %v3279_v0 = vld [vmem:[#allocation11 + $0x15e0] sm:$0xff] }
 0x313   :  { %v1287_v53 = vld [vmem:[#allocation11 + $0x638] sm:$0xff]  ;;  %2944 = vmatpush.msra.mxu1 %v1163_v19  ;;  %2880 = vmatmul.f32.gmra.mxu3 %v7362_v20 }
 0x314   :  { %v1095_v47 = vld [vmem:[#allocation11 + $0x38] sm:$0xff]  ;;  %3027 = vmatpush.msra.mxu3 %v1287_v53  ;;  %2842 = vmatmul.f32.gmra.mxu2 %v7373_v44 }
 0x315   :  { %2904 = vmatpush.msra.mxu0 %v1095_v47  ;;  %v1159_v36 = vld [vmem:[#allocation11 + $0x238] sm:$0xff]  ;;  %v2553_v16 = vpop.f32.mrf.mxu3  ;;  %v2433_v57 = vpop.f32.mrf.mxu0  ;;  %3566 = vmatpush.msrb.mxu2 %v3279_v0 }
 0x316   :  { %v1283_v58 = vld [vmem:[#allocation11 + $0x618] sm:$0xff]  ;;  %2945 = vmatpush.msra.mxu1 %v1159_v36  ;;  %v2515_v33 = vpop.f32.mrf.mxu2  ;;  %v7518_v7 = vadd.f32 %v2553_v16, %v2513_v22  ;;  %v2474_v46 = vpop.f32.mrf.mxu1  ;;  %v2434_v34 = vadd.f32 %v2433_v57, %v8617_v25  ;;  %v3275_v22 = vld [vmem:[#allocation11 + $0x15c0] sm:$0xff] }
 0x317   :  { %v1091_v5 = vld [vmem:[#allocation11 + $0x18] sm:$0xff]  ;;  %3028 = vmatpush.msra.mxu3 %v1283_v58  ;;  %3567 = vmatpush.msrb.mxu2 %v3275_v22 }
 0x318   :  { %v1155_v60 = vld [vmem:[#allocation11 + $0x218] sm:$0xff]  ;;  %2905 = vmatpush.msra.mxu0 %v1091_v5  ;;  %v2475_v19 = vadd.f32 %v2474_v46, %v2434_v34  ;;  %v8621_v46 = vld [vmem:[#allocation34_spill] sm:$0xff] }
 0x319   :  { %2946 = vmatpush.msra.mxu1 %v1155_v60  ;;  %2760 = vmatmul.f32.gmra.mxu0 %v7386_v17  ;;  %v8619_v9 = vld [vmem:[#allocation33_spill] sm:$0xff]  ;;  %v3271_v34 = vld [vmem:[#allocation11 + $0x15a0] sm:$0xff] }
 0x31a   :  { %2801 = vmatmul.f32.gmra.mxu1 %v7389_v10  ;;  %v2516_v38 = vadd.f32 %v2515_v33, %v2475_v19  ;;  %3568 = vmatpush.msrb.mxu2 %v3271_v34  ;;  %v3331_v34 = vld [vmem:[#allocation11 + $0x1780] sm:$0xff] }
 0x31b   :  { %2883 = vmatmul.f32.gmra.mxu3 %v7383_v51 }
 0x31c   :  { %2845 = vmatmul.f32.gmra.mxu2 %v7394_v63 }
 0x31d   :  { %v2556_v13 = vpop.f32.mrf.mxu3  ;;  %v2436_v24 = vpop.f32.mrf.mxu0 }
 0x31e   :  { %v2518_v53 = vpop.f32.mrf.mxu2  ;;  %v7525_v47 = vadd.f32 %v2556_v13, %v2516_v38  ;;  %v2477_v21 = vpop.f32.mrf.mxu1  ;;  %v2437_v23 = vadd.f32 %v2436_v24, %v8619_v9  ;;  %v3343_v38 = vld [vmem:[#allocation11 + $0x17e0] sm:$0xff] }
 0x31f   :  { %3607 = vmatpush.msrb.mxu3 %v3343_v38  ;;  %v3215_v24 = vld [vmem:[#allocation11 + $0x13e0] sm:$0xff] }
 0x320   :  { %8618 = vst [vmem:[#allocation24_spill] sm:$0xff] %v7525_v47  ;;  %v2478_v36 = vadd.f32 %v2477_v21, %v2437_v23  ;;  %v3263_v21 = vld [vmem:[#allocation11 + $0x1560] sm:$0xff]  ;;  %3525 = vmatpush.msrb.mxu1 %v3215_v24 }
 0x321   :  { %2763 = vmatmul.f32.gmra.mxu0 %v7404_v41  ;;  %v3251_v38 = vld [vmem:[#allocation11 + $0x1500] sm:$0xff] }
 0x322   :  { %2804 = vmatmul.f32.gmra.mxu1 %v7407_v11  ;;  %v2519_v58 = vadd.f32 %v2518_v53, %v2478_v36  ;;  %v3151_v53 = vld [vmem:[#allocation11 + $0x11e0] sm:$0xff] }
 0x323   :  { %2886 = vmatmul.f32.gmra.mxu3 %v7401_v43  ;;  %3484 = vmatpush.msrb.mxu0 %v3151_v53  ;;  %v3147_v36 = vld [vmem:[#allocation11 + $0x11c0] sm:$0xff] }
 0x324   :  { %2988 = vmatmul.f32.vlgmr.msra.gmra.mxu2 %v7194_v12  ;;  %v3267_v12 = vld [vmem:[#allocation11 + $0x1580] sm:$0xff] }
 0x325   :  { %v2559_v5 = vpop.f32.mrf.mxu3  ;;  %v2579_v33 = vpop.f32.mrf.mxu0  ;;  %3569 = vmatpush.msrb.mxu2 %v3267_v12  ;;  %3485 = vmatpush.msrb.mxu0 %v3147_v36  ;;  %v3203_v12 = vld [vmem:[#allocation11 + $0x1380] sm:$0xff] }
 0x326   :  { %v2661_v60 = vpop.f32.mrf.mxu2  ;;  %v7532_v16 = vadd.f32 %v2559_v5, %v2519_v58  ;;  %v2620_v57 = vpop.f32.mrf.mxu1  ;;  %v2580_v25 = vadd.f32 %v2579_v33, %v8621_v46  ;;  %v3335_v5 = vld [vmem:[#allocation11 + $0x17a0] sm:$0xff] }
 0x327   :  { %3570 = vmatpush.msrb.mxu2 %v3263_v21  ;;  %v3143_v33 = vld [vmem:[#allocation11 + $0x11a0] sm:$0xff] }
 0x328   :  { %8620 = vst [vmem:[#allocation23_spill] sm:$0xff] %v7532_v16  ;;  %v2621_v19 = vadd.f32 %v2620_v57, %v2580_v25  ;;  %3486 = vmatpush.msrb.mxu0 %v3143_v33  ;;  %v3207_v57 = vld [vmem:[#allocation11 + $0x13a0] sm:$0xff] }
 0x329   :  { %2906 = vmatmul.f32.vlgmr.msra.gmra.mxu0 %v7207_v59  ;;  %v3339_v59 = vld [vmem:[#allocation11 + $0x17c0] sm:$0xff] }
 0x32a   :  { %2947 = vmatmul.f32.vlgmr.msra.gmra.mxu1 %v7210_v14  ;;  %v2662_v13 = vadd.f32 %v2661_v60, %v2621_v19  ;;  %v3211_v14 = vld [vmem:[#allocation11 + $0x13c0] sm:$0xff]  ;;  %3608 = vmatpush.msrb.mxu3 %v3339_v59  ;;  %v8623_v60 = vld [vmem:[#allocation35_spill] sm:$0xff] }
 0x32b   :  { %3029 = vmatmul.f32.vlgmr.msra.gmra.mxu3 %v7203_v39  ;;  %3526 = vmatpush.msrb.mxu1 %v3211_v14  ;;  %v3255_v46 = vld [vmem:[#allocation11 + $0x1520] sm:$0xff] }
 0x32c   :  { %2991 = vmatmul.f32.gmra.mxu2 %v7215_v15  ;;  %v3259_v15 = vld [vmem:[#allocation11 + $0x1540] sm:$0xff]  ;;  %3609 = vmatpush.msrb.mxu3 %v3335_v5 }
 0x32d   :  { %v2702_v9 = vpop.f32.mrf.mxu3  ;;  %v2582_v39 = vpop.f32.mrf.mxu0  ;;  %3571 = vmatpush.msrb.mxu2 %v3259_v15  ;;  %v3139_v19 = vld [vmem:[#allocation11 + $0x1180] sm:$0xff]  ;;  %3527 = vmatpush.msrb.mxu1 %v3207_v57 }
 0x32e   :  { %v2664_v23 = vpop.f32.mrf.mxu2  ;;  %v7539_v58 = vadd.f32 %v2702_v9, %v2662_v13  ;;  %v2623_v0 = vpop.f32.mrf.mxu1  ;;  %v2583_v22 = vadd.f32 %v2582_v39, %v8623_v60  ;;  %v3327_v53 = vld [vmem:[#allocation11 + $0x1760] sm:$0xff]  ;;  %3610 = vmatpush.msrb.mxu3 %v3331_v34  ;;  %3487 = vmatpush.msrb.mxu0 %v3139_v19 }
 0x32f   :  { %3572 = vmatpush.msrb.mxu2 %v3255_v46  ;;  %v3135_v24 = vld [vmem:[#allocation11 + $0x1160] sm:$0xff]  ;;  %3528 = vmatpush.msrb.mxu1 %v3203_v12 }
 0x330   :  { %8622 = vst [vmem:[#allocation25_spill] sm:$0xff] %v7539_v58  ;;  %v2624_v25 = vadd.f32 %v2623_v0, %v2583_v22  ;;  %v3199_v21 = vld [vmem:[#allocation11 + $0x1360] sm:$0xff]  ;;  %3611 = vmatpush.msrb.mxu3 %v3327_v53  ;;  %3488 = vmatpush.msrb.mxu0 %v3135_v24  ;;  %v8627_v24 = vld [vmem:[#allocation37_spill] sm:$0xff] }
 0x331   :  { %2909 = vmatmul.f32.gmra.mxu0 %v7233_v28  ;;  %v3247_v9 = vld [vmem:[#allocation11 + $0x14e0] sm:$0xff]  ;;  %3573 = vmatpush.msrb.mxu2 %v3251_v38 }
 0x332   :  { %2950 = vmatmul.f32.gmra.mxu1 %v7238_v26  ;;  %v2665_v13 = vadd.f32 %v2664_v23, %v2624_v25  ;;  %v3323_v26 = vld [vmem:[#allocation11 + $0x1740] sm:$0xff]  ;;  %v8625_v23 = vld [vmem:[#allocation36_spill] sm:$0xff] }
 0x333   :  { %3032 = vmatmul.f32.gmra.mxu3 %v7228_v49  ;;  %v3131_v36 = vld [vmem:[#allocation11 + $0x1140] sm:$0xff]  ;;  %3529 = vmatpush.msrb.mxu1 %v3199_v21 }
 0x334   :  { %2994 = vmatmul.f32.gmra.mxu2 %v7245_v30  ;;  %3612 = vmatpush.msrb.mxu3 %v3323_v26  ;;  %v3195_v0 = vld [vmem:[#allocation11 + $0x1340] sm:$0xff] }
 0x335   :  { %v2705_v28 = vpop.f32.mrf.mxu3  ;;  %v2585_v30 = vpop.f32.mrf.mxu0  ;;  %3574 = vmatpush.msrb.mxu2 %v3247_v9  ;;  %3489 = vmatpush.msrb.mxu0 %v3131_v36  ;;  %v3243_v15 = vld [vmem:[#allocation11 + $0x14c0] sm:$0xff] }
 0x336   :  { %v2667_v59 = vpop.f32.mrf.mxu2  ;;  %v7546_v49 = vadd.f32 %v2705_v28, %v2665_v13  ;;  %v2626_v14 = vpop.f32.mrf.mxu1  ;;  %v2586_v39 = vadd.f32 %v2585_v30, %v8625_v23  ;;  %v3319_v60 = vld [vmem:[#allocation11 + $0x1720] sm:$0xff]  ;;  %3530 = vmatpush.msrb.mxu1 %v3195_v0 }
 0x337   :  { %v3127_v22 = vld [vmem:[#allocation11 + $0x1120] sm:$0xff]  ;;  %3575 = vmatpush.msrb.mxu2 %v3243_v15  ;;  %3613 = vmatpush.msrb.mxu3 %v3319_v60 }
 0x338   :  { %8624 = vst [vmem:[#allocation26_spill] sm:$0xff] %v7546_v49  ;;  %v2627_v5 = vadd.f32 %v2626_v14, %v2586_v39  ;;  %v3191_v33 = vld [vmem:[#allocation11 + $0x1320] sm:$0xff]  ;;  %3490 = vmatpush.msrb.mxu0 %v3127_v22 }
 0x339   :  { %2912 = vmatmul.f32.gmra.mxu0 %v7267_v1  ;;  %v3239_v57 = vld [vmem:[#allocation11 + $0x14a0] sm:$0xff]  ;;  %3531 = vmatpush.msrb.mxu1 %v3191_v33 }
 0x33a   :  { %2953 = vmatmul.f32.gmra.mxu1 %v7272_v55  ;;  %v2668_v46 = vadd.f32 %v2667_v59, %v2627_v5  ;;  %v3315_v25 = vld [vmem:[#allocation11 + $0x1700] sm:$0xff]  ;;  %3576 = vmatpush.msrb.mxu2 %v3239_v57 }
 0x33b   :  { %3035 = vmatmul.f32.gmra.mxu3 %v7260_v27  ;;  %v3123_v34 = vld [vmem:[#allocation11 + $0x1100] sm:$0xff] }
 0x33c   :  { %2997 = vmatmul.f32.gmra.mxu2 %v7281_v52  ;;  %v3187_v19 = vld [vmem:[#allocation11 + $0x1300] sm:$0xff]  ;;  %3614 = vmatpush.msrb.mxu3 %v3315_v25 }
 0x33d   :  { %v3235_v12 = vld [vmem:[#allocation11 + $0x1480] sm:$0xff]  ;;  %v2708_v1 = vpop.f32.mrf.mxu3  ;;  %v2588_v52 = vpop.f32.mrf.mxu0  ;;  %3491 = vmatpush.msrb.mxu0 %v3123_v34  ;;  %3532 = vmatpush.msrb.mxu1 %v3187_v19 }
 0x33e   :  { %v2670_v38 = vpop.f32.mrf.mxu2  ;;  %v3311_v55 = vld [vmem:[#allocation11 + $0x16e0] sm:$0xff]  ;;  %v7553_v27 = vadd.f32 %v2708_v1, %v2668_v46  ;;  %v2629_v53 = vpop.f32.mrf.mxu1  ;;  %v2589_v21 = vadd.f32 %v2588_v52, %v8627_v24  ;;  %3577 = vmatpush.msrb.mxu2 %v3235_v12 }
 0x33f   :  { %v3119_v13 = vld [vmem:[#allocation11 + $0x10e0] sm:$0xff]  ;;  %3615 = vmatpush.msrb.mxu3 %v3311_v55 }
 0x340   :  { %8626 = vst [vmem:[#allocation27_spill] sm:$0xff] %v7553_v27  ;;  %3492 = vmatpush.msrb.mxu0 %v3119_v13  ;;  %v3183_v9 = vld [vmem:[#allocation11 + $0x12e0] sm:$0xff]  ;;  %v2630_v59 = vadd.f32 %v2629_v53, %v2589_v21 }
 0x341   :  { %v3231_v28 = vld [vmem:[#allocation11 + $0x1460] sm:$0xff]  ;;  %2915 = vmatmul.f32.gmra.mxu0 %v7303_v2  ;;  %3533 = vmatpush.msrb.mxu1 %v3183_v9 }
 0x342   :  { %2956 = vmatmul.f32.gmra.mxu1 %v7308_v4  ;;  %v3307_v26 = vld [vmem:[#allocation11 + $0x16c0] sm:$0xff]  ;;  %v2671_v23 = vadd.f32 %v2670_v38, %v2630_v59  ;;  %3578 = vmatpush.msrb.mxu2 %v3231_v28 }
 0x343   :  { %v3115_v36 = vld [vmem:[#allocation11 + $0x10c0] sm:$0xff]  ;;  %3038 = vmatmul.f32.gmra.mxu3 %v7296_v50 }
 0x344   :  { %3000 = vmatmul.f32.gmra.mxu2 %v7317_v45  ;;  %v3179_v30 = vld [vmem:[#allocation11 + $0x12c0] sm:$0xff]  ;;  %3616 = vmatpush.msrb.mxu3 %v3307_v26 }
 0x345   :  { %v3227_v14 = vld [vmem:[#allocation11 + $0x1440] sm:$0xff]  ;;  %3493 = vmatpush.msrb.mxu0 %v3115_v36  ;;  %v2711_v2 = vpop.f32.mrf.mxu3  ;;  %3534 = vmatpush.msrb.mxu1 %v3179_v30 }
 0x346   :  { %v3303_v39 = vld [vmem:[#allocation11 + $0x16a0] sm:$0xff]  ;;  %v2673_v60 = vpop.f32.mrf.mxu2  ;;  %3579 = vmatpush.msrb.mxu2 %v3227_v14  ;;  %v7560_v50 = vadd.f32 %v2711_v2, %v2671_v23  ;;  %v2591_v45 = vpop.f32.mrf.mxu0 }
 0x347   :  { %v3111_v0 = vld [vmem:[#allocation11 + $0x10a0] sm:$0xff]  ;;  %v2632_v33 = vpop.f32.mrf.mxu1  ;;  %3617 = vmatpush.msrb.mxu3 %v3303_v39 }
 0x348   :  { %v3175_v15 = vld [vmem:[#allocation11 + $0x12a0] sm:$0xff]  ;;  %8628 = vst [vmem:[#allocation28_spill] sm:$0xff] %v7560_v50  ;;  %3494 = vmatpush.msrb.mxu0 %v3111_v0 }
 0x349   :  { %v3223_v5 = vld [vmem:[#allocation11 + $0x1420] sm:$0xff]  ;;  %3535 = vmatpush.msrb.mxu1 %v3175_v15  ;;  %2918 = vmatmul.f32.gmra.mxu0 %v7337_v37 }
 0x34a   :  { %v3299_v4 = vld [vmem:[#allocation11 + $0x1680] sm:$0xff]  ;;  %3580 = vmatpush.msrb.mxu2 %v3223_v5  ;;  %2959 = vmatmul.f32.gmra.mxu1 %v7342_v54 }
 0x34b   :  { %v3107_v22 = vld [vmem:[#allocation11 + $0x1080] sm:$0xff]  ;;  %3618 = vmatpush.msrb.mxu3 %v3299_v4 }
 0x34c   :  { %v8629_v57 = vld [vmem:[#allocation38_spill] sm:$0xff]  ;;  %3495 = vmatpush.msrb.mxu0 %v3107_v22  ;;  %3041 = vmatmul.f32.gmra.mxu3 %v7332_v3  ;;  %v3060_v22 = vld [vmem:[#allocation3 + $0x50] sm:$0xff] }
 0x34d   :  { %v2592_v46 = vadd.f32 %v2591_v45, %v8629_v57  ;;  %v3171_v25 = vld [vmem:[#allocation11 + $0x1280] sm:$0xff]  ;;  %3003 = vmatmul.f32.gmra.mxu2 %v7349_v32  ;;  %v2714_v24 = vpop.f32.mrf.mxu3  ;;  %v8631_v32 = vld [vmem:[#allocation39_spill] sm:$0xff] }
 0x34e   :  { %v3219_v34 = vld [vmem:[#allocation11 + $0x1400] sm:$0xff]  ;;  %3536 = vmatpush.msrb.mxu1 %v3171_v25  ;;  %v2676_v21 = vpop.f32.mrf.mxu2  ;;  %v2594_v28 = vpop.f32.mrf.mxu0 }
 0x34f   :  { %v2633_v19 = vadd.f32 %v2632_v33, %v2592_v46  ;;  %v3295_v12 = vld [vmem:[#allocation11 + $0x1660] sm:$0xff]  ;;  %3581 = vmatpush.msrb.mxu2 %v3219_v34  ;;  %v2635_v3 = vpop.f32.mrf.mxu1  ;;  %v2595_v59 = vadd.f32 %v2594_v28, %v8631_v32 }
 0x350   :  { %v3103_v1 = vld [vmem:[#allocation11 + $0x1060] sm:$0xff]  ;;  %3619 = vmatpush.msrb.mxu3 %v3295_v12 }
 0x351   :  { %v3167_v38 = vld [vmem:[#allocation11 + $0x1260] sm:$0xff]  ;;  %v2674_v55 = vadd.f32 %v2673_v60, %v2633_v19  ;;  %3496 = vmatpush.msrb.mxu0 %v3103_v1  ;;  %v2636_v30 = vadd.f32 %v2635_v3, %v2595_v59  ;;  %v8635_v19 = vld [vmem:[#allocation41_spill] sm:$0xff] }
 0x352   :  { %v3291_v13 = vld [vmem:[#allocation11 + $0x1640] sm:$0xff]  ;;  %3537 = vmatpush.msrb.mxu1 %v3167_v38  ;;  %2921 = vmatmul.f32.gmra.mxu0 %v7365_v40  ;;  %v8633_v40 = vld [vmem:[#allocation40_spill] sm:$0xff] }
 0x353   :  { %v3099_v52 = vld [vmem:[#allocation11 + $0x1040] sm:$0xff]  ;;  %v7567_v9 = vadd.f32 %v2714_v24, %v2674_v55  ;;  %3620 = vmatpush.msrb.mxu3 %v3291_v13  ;;  %2962 = vmatmul.f32.gmra.mxu1 %v7368_v42  ;;  %v2677_v39 = vadd.f32 %v2676_v21, %v2636_v30  ;;  %v7593_v55 = vld [vmem:[#allocation3 + $0x48] sm:$0xff]  ;;  %v7597_v13 = vld [vmem:[#allocation3 + $0x70] sm:$0xff] }
 0x354   :  { %v3163_v53 = vld [vmem:[#allocation11 + $0x1240] sm:$0xff]  ;;  %3497 = vmatpush.msrb.mxu0 %v3099_v52  ;;  %3044 = vmatmul.f32.gmra.mxu3 %v7362_v20  ;;  %v3056_v20 = vld [vmem:[#allocation3 + $0x30] sm:$0xfc]  ;;  %v3055_v21 = vld [vmem:[#allocation3 + $0x28] sm:$0xfc]  ;;  %v3400_v3 = vrot.slane %v7597_v13, 2 }
 0x355   :  { %v3287_v37 = vld [vmem:[#allocation11 + $0x1620] sm:$0xff]  ;;  %8630 = vst [vmem:[#allocation29_spill] sm:$0xff] %v7567_v9  ;;  %3538 = vmatpush.msrb.mxu1 %v3163_v53  ;;  %3006 = vmatmul.f32.gmra.mxu2 %v7373_v44  ;;  %v3390_v57 = vrot.slane %v3056_v20, 2  ;;  %v3280_v30 = vld [vmem:[#allocation11 + $0x15e8] sm:$0xff]  ;;  %v7626_v20 = vld [vmem:[#allocation3 + $0x90] sm:$0xff] }
 0x356   :  { %v3095_v54 = vld [vmem:[#allocation11 + $0x1020] sm:$0xff]  ;;  %3621 = vmatpush.msrb.mxu3 %v3287_v37  ;;  %v2717_v0 = vpop.f32.mrf.mxu3  ;;  %v2679_v15 = vpop.f32.mrf.mxu2  ;;  %v3388_v37 = vrot.slane %v7593_v55, 2  ;;  %3730 = vmatpush.msra.mxu2 %v3280_v30  ;;  %v3152_v55 = vld [vmem:[#allocation11 + $0x11e8] sm:$0xff] }
 0x357   :  { %3498 = vmatpush.msrb.mxu0 %v3095_v54  ;;  %v3159_v26 = vld [vmem:[#allocation11 + $0x1220] sm:$0xff]  ;;  %v7574_v5 = vadd.f32 %v2717_v0, %v2677_v39  ;;  %v2597_v2 = vpop.f32.mrf.mxu0  ;;  %v2638_v60 = vpop.f32.mrf.mxu1  ;;  %v3216_v13 = vld [vmem:[#allocation11 + $0x13e8] sm:$0xff] }
 0x358   :  { %v3283_v36 = vld [vmem:[#allocation11 + $0x1600] sm:$0xff]  ;;  %3539 = vmatpush.msrb.mxu1 %v3159_v26  ;;  %v2598_v4 = vadd.f32 %v2597_v2, %v8633_v40 }
 0x359   :  { %v3091_v14 = vld [vmem:[#allocation11 + $0x1000] sm:$0xff]  ;;  %3622 = vmatpush.msrb.mxu3 %v3283_v36  ;;  %8632 = vst [vmem:[#allocation30_spill] sm:$0xff] %v7574_v5  ;;  %v3387_v36 = vrot.slane %v3055_v21, 2 }
 0x35a   :  { %v3155_v23 = vld [vmem:[#allocation11 + $0x1200] sm:$0xff]  ;;  %3499 = vmatpush.msrb.mxu0 %v3091_v14  ;;  %v2639_v42 = vadd.f32 %v2638_v60, %v2598_v4  ;;  %v3276_v60 = vld [vmem:[#allocation11 + $0x15c8] sm:$0xff] }
 0x35b   :  { %3540 = vmatpush.msrb.mxu1 %v3155_v23  ;;  %2924 = vmatmul.f32.gmra.mxu0 %v7386_v17  ;;  %v3391_v17 = vrot.slane %v3060_v22, 2  ;;  %v3057_v1 = vld [vmem:[#allocation3 + $0x38] sm:$0xfc]  ;;  %v7591_v38 = vld [vmem:[#allocation3 + $0x40] sm:$0xff] }
 0x35c   :  { %2965 = vmatmul.f32.gmra.mxu1 %v7389_v10  ;;  %3047 = vmatmul.f32.gmra.mxu3 %v7383_v51  ;;  %v2680_v44 = vadd.f32 %v2679_v15, %v2639_v42  ;;  %v7584_v10 = vld [vmem:[#allocation3 + $0x58] sm:$0xff]  ;;  %v3393_v53 = vrot.slane %v3057_v1, 2  ;;  %v7613_v15 = vsel %vm3383_vm8, %v3387_v36, %v3388_v37  ;;  %v7622_v42 = vld [vmem:[#allocation3 + $0x60] sm:$0xff] }
 0x35d   :  { %3009 = vmatmul.f32.gmra.mxu2 %v7394_v63  ;;  %v7589_v63 = vsel %vm3383_vm8, %v3390_v57, %v3391_v17  ;;  %v3394_v24 = vrot.slane %v7584_v10, 2  ;;  %v8637_v14 = vld [vmem:[#allocation42_spill] sm:$0xff]  ;;  %v7620_v4 = vsel %vm3383_vm8, %v3391_v17, %v3400_v3  ;;  %v3344_v22 = vld [vmem:[#allocation11 + $0x17e8] sm:$0xff]  ;;  %v3408_v17 = vrot.slane %v7626_v20, 2  ;;  %3648 = vmatpush.msra.mxu0 %v3152_v55 }
 0x35e   :  { %v2720_v45 = vpop.f32.mrf.mxu3  ;;  %v2682_v33 = vpop.f32.mrf.mxu2  ;;  %v7615_v2 = vld [vmem:[#allocation3 + $0x78] sm:$0xff]  ;;  %v7629_v57 = vld [vmem:[#allocation3 + $0x68] sm:$0xff]  ;;  %3731 = vmatpush.msra.mxu2 %v3276_v60  ;;  %3771 = vmatpush.msra.mxu3 %v3344_v22  ;;  %v7642_v21 = vld [vmem:[#allocation3 + $0x80] sm:$0xff] }
 0x35f   :  { %v7581_v46 = vadd.f32 %v2720_v45, %v2680_v44  ;;  %v2600_v25 = vpop.f32.mrf.mxu0  ;;  %v2641_v34 = vpop.f32.mrf.mxu1  ;;  %v7607_v39 = vsel %vm3383_vm8, %v3393_v53, %v3394_v24  ;;  %v3272_v44 = vld [vmem:[#allocation11 + $0x15a8] sm:$0xff]  ;;  %3689 = vmatpush.msra.mxu1 %v3216_v13  ;;  %v7659_v30 = vsel %vm3383_vm8, %v3400_v3, %v3408_v17 }
 0x360   :  { %v2601_v12 = vadd.f32 %v2600_v25, %v8635_v19  ;;  %v3396_v25 = vrot.slane %v7622_v42, 2  ;;  %3732 = vmatpush.msra.mxu2 %v3272_v44  ;;  %v3260_v60 = vld [vmem:[#allocation11 + $0x1548] sm:$0xff] }
 0x361   :  { %8634 = vst [vmem:[#allocation31_spill] sm:$0xff] %v7581_v46  ;;  %v3332_v3 = vld [vmem:[#allocation11 + $0x1788] sm:$0xff] }
 0x362   :  { %v2642_v51 = vadd.f32 %v2641_v34, %v2601_v12  ;;  %v3268_v34 = vld [vmem:[#allocation11 + $0x1588] sm:$0xff] }
 0x363   :  { %2927 = vmatmul.f32.gmra.mxu0 %v7404_v41  ;;  %v3054_v41 = vld [vmem:[#allocation3 + $0x20] sm:$0xfc]  ;;  %3733 = vmatpush.msra.mxu2 %v3268_v34 }
 0x364   :  { %2968 = vmatmul.f32.gmra.mxu1 %v7407_v11  ;;  %3050 = vmatmul.f32.gmra.mxu3 %v7401_v43  ;;  %v2683_v52 = vadd.f32 %v2682_v33, %v2642_v51  ;;  %v3385_v11 = vrot.slane %v7591_v38, 2  ;;  %v3384_v26 = vrot.slane %v3054_v41, 2  ;;  %v3402_v33 = vrot.slane %v7615_v2, 2  ;;  %v7695_v2 = vld [vmem:[#allocation3 + $0xb8] sm:$0xff]  ;;  %v3196_v20 = vld [vmem:[#allocation11 + $0x1348] sm:$0xff] }
 0x365   :  { %3582 = vmatmul.f32.vlgmr.msrb.gmra.mxu2 %v7589_v63  ;;  %v3398_v38 = vrot.slane %v7629_v57, 2  ;;  %v8550_v57 = vrot.slane %v7642_v21, 2  ;;  %v8653_v46 = vrot.slane %v7695_v2, 2 }
 0x366   :  { %v2723_v54 = vpop.f32.mrf.mxu3  ;;  %v2825_v28 = vpop.f32.mrf.mxu2  ;;  %v7610_v0 = vsel %vm3383_vm8, %v3384_v26, %v3385_v11  ;;  %v7640_v41 = vsel %vm3383_vm8, %v3394_v24, %v3402_v33  ;;  %v3264_v26 = vld [vmem:[#allocation11 + $0x1568] sm:$0xff] }
 0x367   :  { %v7603_v32 = vadd.f32 %v2723_v54, %v2683_v52  ;;  %v2743_v43 = vpop.f32.mrf.mxu0  ;;  %v2784_v59 = vpop.f32.mrf.mxu1  ;;  %v8639_v52 = vld [vmem:[#allocation43_spill] sm:$0xff]  ;;  %3734 = vmatpush.msra.mxu2 %v3264_v26 }
 0x368   :  { %v2744_v23 = vadd.f32 %v2743_v43, %v8637_v14  ;;  %v3340_v54 = vld [vmem:[#allocation11 + $0x17c8] sm:$0xff]  ;;  %v7650_v43 = vsel %vm3383_vm8, %v3388_v37, %v3398_v38 }
 0x369   :  { %8636 = vst [vmem:[#allocation32_spill] sm:$0xff] %v7603_v32  ;;  %3772 = vmatpush.msra.mxu3 %v3340_v54  ;;  %v3148_v24 = vld [vmem:[#allocation11 + $0x11c8] sm:$0xff]  ;;  %3735 = vmatpush.msra.mxu2 %v3260_v60  ;;  %v7688_v60 = vsel %vm3383_vm8, %v3396_v25, %v8550_v57 }
 0x36a   :  { %v2785_v40 = vadd.f32 %v2784_v59, %v2744_v23  ;;  %v7652_v59 = vld [vmem:[#allocation3 + $0x98] sm:$0xff]  ;;  %v3212_v37 = vld [vmem:[#allocation11 + $0x13c8] sm:$0xff]  ;;  %v7665_v23 = vld [vmem:[#allocation3 + $0xb0] sm:$0xff]  ;;  %3649 = vmatpush.msra.mxu0 %v3148_v24 }
 0x36b   :  { %3500 = vmatmul.f32.vlgmr.msrb.gmra.mxu0 %v7610_v0  ;;  %v3336_v14 = vld [vmem:[#allocation11 + $0x17a8] sm:$0xff]  ;;  %v8551_v22 = vrot.slane %v7652_v59, 2  ;;  %3690 = vmatpush.msra.mxu1 %v3212_v37  ;;  %v8548_v13 = vrot.slane %v7665_v23, 2  ;;  %v8641_v24 = vld [vmem:[#allocation44_spill] sm:$0xff] }
 0x36c   :  { %3541 = vmatmul.f32.vlgmr.msrb.gmra.mxu1 %v7613_v15  ;;  %3623 = vmatmul.f32.vlgmr.msrb.gmra.mxu3 %v7607_v39  ;;  %v2826_v45 = vadd.f32 %v2825_v28, %v2785_v40  ;;  %v7647_v28 = vsel %vm3383_vm8, %v3385_v11, %v3396_v25  ;;  %v7661_v11 = vld [vmem:[#allocation3 + $0x88] sm:$0xff]  ;;  %v7706_v25 = vld [vmem:[#allocation3 + $0xa0] sm:$0xff] }
 0x36d   :  { %3585 = vmatmul.f32.gmra.mxu2 %v7620_v4  ;;  %v3144_v40 = vld [vmem:[#allocation11 + $0x11a8] sm:$0xff]  ;;  %v8549_v34 = vrot.slane %v7661_v11, 2  ;;  %3773 = vmatpush.msra.mxu3 %v3336_v14  ;;  %v7679_v37 = vsel %vm3383_vm8, %v3402_v33, %v8551_v22  ;;  %v7704_v42 = vsel %vm3383_vm8, %v3408_v17, %v8548_v13 }
 0x36e   :  { %v2866_v19 = vpop.f32.mrf.mxu3  ;;  %v2828_v12 = vpop.f32.mrf.mxu2  ;;  %3650 = vmatpush.msra.mxu0 %v3144_v40  ;;  %v7681_v14 = vld [vmem:[#allocation3 + $0xa8] sm:$0xff] }
 0x36f   :  { %v7633_v1 = vadd.f32 %v2866_v19, %v2826_v45  ;;  %v2746_v10 = vpop.f32.mrf.mxu0  ;;  %v2787_v51 = vpop.f32.mrf.mxu1  ;;  %v3208_v45 = vld [vmem:[#allocation11 + $0x13a8] sm:$0xff]  ;;  %3774 = vmatpush.msra.mxu3 %v3332_v3  ;;  %v7693_v40 = vsel %vm3383_vm8, %v3398_v38, %v8549_v34 }
 0x370   :  { %v2747_v53 = vadd.f32 %v2746_v10, %v8639_v52  ;;  %v3256_v19 = vld [vmem:[#allocation11 + $0x1528] sm:$0xff]  ;;  %3691 = vmatpush.msra.mxu1 %v3208_v45 }
 0x371   :  { %8638 = vst [vmem:[#allocation33_spill] sm:$0xff] %v7633_v1  ;;  %v3140_v10 = vld [vmem:[#allocation11 + $0x1188] sm:$0xff]  ;;  %3736 = vmatpush.msra.mxu2 %v3256_v19  ;;  %v7710_v19 = vld [vmem:[#allocation3 + $0xd0] sm:$0xff] }
 0x372   :  { %v2788_v36 = vadd.f32 %v2787_v51, %v2747_v53  ;;  %v3328_v52 = vld [vmem:[#allocation11 + $0x1768] sm:$0xff]  ;;  %3651 = vmatpush.msra.mxu0 %v3140_v10  ;;  %v8552_v57 = vrot.slane %v7710_v19, 2 }
 0x373   :  { %3503 = vmatmul.f32.gmra.mxu0 %v7647_v28  ;;  %v3252_v33 = vld [vmem:[#allocation11 + $0x1508] sm:$0xff]  ;;  %3775 = vmatpush.msra.mxu3 %v3328_v52  ;;  %v8553_v52 = vrot.slane %v7695_v2, 2  ;;  %v7787_v2 = vld [vmem:[#allocation3 + $0xf8] sm:$0xff] }
 0x374   :  { %3544 = vmatmul.f32.gmra.mxu1 %v7650_v43  ;;  %3626 = vmatmul.f32.gmra.mxu3 %v7640_v41  ;;  %v2829_v44 = vadd.f32 %v2828_v12, %v2788_v36  ;;  %v3204_v12 = vld [vmem:[#allocation11 + $0x1388] sm:$0xff] }
 0x375   :  { %3588 = vmatmul.f32.gmra.mxu2 %v7659_v30  ;;  %3692 = vmatpush.msra.mxu1 %v3204_v12  ;;  %v3200_v38 = vld [vmem:[#allocation11 + $0x1368] sm:$0xff] }
 0x376   :  { %v2869_v51 = vpop.f32.mrf.mxu3  ;;  %v2831_v55 = vpop.f32.mrf.mxu2  ;;  %v3324_v3 = vld [vmem:[#allocation11 + $0x1748] sm:$0xff]  ;;  %3737 = vmatpush.msra.mxu2 %v3252_v33 }
 0x377   :  { %v7671_v53 = vadd.f32 %v2869_v51, %v2829_v44  ;;  %v2749_v54 = vpop.f32.mrf.mxu0  ;;  %v2790_v26 = vpop.f32.mrf.mxu1  ;;  %v3136_v44 = vld [vmem:[#allocation11 + $0x1168] sm:$0xff]  ;;  %3693 = vmatpush.msra.mxu1 %v3200_v38  ;;  %3776 = vmatpush.msra.mxu3 %v3324_v3  ;;  %v8644_v38 = vrot.slane %v7652_v59, 2  ;;  %v7740_v59 = vld [vmem:[#allocation3 + $0xd8] sm:$0xff] }
 0x378   :  { %v2750_v36 = vadd.f32 %v2749_v54, %v8641_v24  ;;  %v3248_v10 = vld [vmem:[#allocation11 + $0x14e8] sm:$0xff]  ;;  %3652 = vmatpush.msra.mxu0 %v3136_v44  ;;  %v8643_v54 = vld [vmem:[#allocation45_spill] sm:$0xff] }
 0x379   :  { %8640 = vst [vmem:[#allocation34_spill] sm:$0xff] %v7671_v53  ;;  %v3132_v51 = vld [vmem:[#allocation11 + $0x1148] sm:$0xff]  ;;  %3738 = vmatpush.msra.mxu2 %v3248_v10  ;;  %3694 = vmatpush.msra.mxu1 %v3196_v20  ;;  %v7724_v3 = vsel %vm3383_vm8, %v8644_v38, %v8553_v52  ;;  %v8645_v10 = vrot.slane %v7706_v25, 2  ;;  %v8648_v20 = vrot.slane %v7661_v11, 2 }
 0x37a   :  { %v2791_v45 = vadd.f32 %v2790_v26, %v2750_v36  ;;  %v3320_v17 = vld [vmem:[#allocation11 + $0x1728] sm:$0xff]  ;;  %3653 = vmatpush.msra.mxu0 %v3132_v51 }
 0x37b   :  { %3506 = vmatmul.f32.gmra.mxu0 %v7688_v60  ;;  %v3244_v24 = vld [vmem:[#allocation11 + $0x14c8] sm:$0xff]  ;;  %3777 = vmatpush.msra.mxu3 %v3320_v17 }
 0x37c   :  { %3547 = vmatmul.f32.gmra.mxu1 %v7693_v40  ;;  %3629 = vmatmul.f32.gmra.mxu3 %v7679_v37  ;;  %v2832_v12 = vadd.f32 %v2831_v55, %v2791_v45  ;;  %v3128_v36 = vld [vmem:[#allocation11 + $0x1128] sm:$0xff] }
 0x37d   :  { %3591 = vmatmul.f32.gmra.mxu2 %v7704_v42  ;;  %v3192_v55 = vld [vmem:[#allocation11 + $0x1328] sm:$0xff]  ;;  %3654 = vmatpush.msra.mxu0 %v3128_v36 }
 0x37e   :  { %v2872_v13 = vpop.f32.mrf.mxu3  ;;  %v2834_v34 = vpop.f32.mrf.mxu2  ;;  %v3316_v45 = vld [vmem:[#allocation11 + $0x1708] sm:$0xff]  ;;  %3739 = vmatpush.msra.mxu2 %v3244_v24  ;;  %3695 = vmatpush.msra.mxu1 %v3192_v55 }
 0x37f   :  { %v7716_v33 = vadd.f32 %v2872_v13, %v2832_v12  ;;  %v2752_v44 = vpop.f32.mrf.mxu0  ;;  %v2793_v22 = vpop.f32.mrf.mxu1  ;;  %v8646_v13 = vrot.slane %v7642_v21, 2  ;;  %v8647_v12 = vrot.slane %v7681_v14, 2  ;;  %3778 = vmatpush.msra.mxu3 %v3316_v45  ;;  %v3124_v24 = vld [vmem:[#allocation11 + $0x1108] sm:$0xff]  ;;  %v8649_v21 = vrot.slane %v7665_v23, 2 }
 0x380   :  { %v2753_v26 = vadd.f32 %v2752_v44, %v8643_v54  ;;  %v3240_v54 = vld [vmem:[#allocation11 + $0x14a8] sm:$0xff]  ;;  %3655 = vmatpush.msra.mxu0 %v3124_v24 }
 0x381   :  { %8642 = vst [vmem:[#allocation35_spill] sm:$0xff] %v7716_v33  ;;  %v7731_v51 = vsel %vm3383_vm8, %v8646_v13, %v8645_v10  ;;  %v7738_v17 = vsel %vm3383_vm8, %v8648_v20, %v8647_v12  ;;  %v7749_v11 = vsel %vm3383_vm8, %v8649_v21, %v8552_v57  ;;  %v7751_v44 = vld [vmem:[#allocation3 + $0xc0] sm:$0xff]  ;;  %v7758_v12 = vld [vmem:[#allocation3 + $0xc8] sm:$0xff]  ;;  %3740 = vmatpush.msra.mxu2 %v3240_v54  ;;  %v8652_v21 = vrot.slane %v7740_v59, 2 }
 0x382   :  { %v2794_v36 = vadd.f32 %v2793_v22, %v2753_v26  ;;  %v3188_v38 = vld [vmem:[#allocation11 + $0x1308] sm:$0xff]  ;;  %v7755_v22 = vld [vmem:[#allocation3 + $0xf0] sm:$0xff]  ;;  %v3422_v32 = vrot.slane %v7758_v12, 2  ;;  %v8656_v12 = vrot.slane %v7681_v14, 2 }
 0x383   :  { %3509 = vmatmul.f32.gmra.mxu0 %v7731_v51  ;;  %v3312_v10 = vld [vmem:[#allocation11 + $0x16e8] sm:$0xff]  ;;  %3696 = vmatpush.msra.mxu1 %v3188_v38  ;;  %v8651_v38 = vld [vmem:[#allocation46_spill] sm:$0xff]  ;;  %v7771_v1 = vsel %vm3383_vm8, %v8653_v46, %v8652_v21 }
 0x384   :  { %3550 = vmatmul.f32.gmra.mxu1 %v7738_v17  ;;  %3632 = vmatmul.f32.gmra.mxu3 %v7724_v3  ;;  %v3236_v26 = vld [vmem:[#allocation11 + $0x1488] sm:$0xff]  ;;  %v2835_v45 = vadd.f32 %v2834_v34, %v2794_v36 }
 0x385   :  { %3594 = vmatmul.f32.gmra.mxu2 %v7749_v11  ;;  %v3120_v55 = vld [vmem:[#allocation11 + $0x10e8] sm:$0xff]  ;;  %3779 = vmatpush.msra.mxu3 %v3312_v10 }
 0x386   :  { %v3184_v23 = vld [vmem:[#allocation11 + $0x12e8] sm:$0xff]  ;;  %v2875_v33 = vpop.f32.mrf.mxu3  ;;  %v2837_v53 = vpop.f32.mrf.mxu2  ;;  %3741 = vmatpush.msra.mxu2 %v3236_v26  ;;  %3656 = vmatpush.msra.mxu0 %v3120_v55  ;;  %v8655_v55 = vrot.slane %v7706_v25, 2  ;;  %v8657_v25 = vrot.slane %v7755_v22, 2 }
 0x387   :  { %v3308_v20 = vld [vmem:[#allocation11 + $0x16c8] sm:$0xff]  ;;  %v7762_v13 = vadd.f32 %v2875_v33, %v2835_v45  ;;  %v2755_v54 = vpop.f32.mrf.mxu0  ;;  %v2796_v24 = vpop.f32.mrf.mxu1  ;;  %3697 = vmatpush.msra.mxu1 %v3184_v23  ;;  %v8654_v33 = vrot.slane %v7751_v44, 2  ;;  %v7785_v23 = vsel %vm3383_vm8, %v8656_v12, %v3422_v32 }
 0x388   :  { %v3232_v57 = vld [vmem:[#allocation11 + $0x1468] sm:$0xff]  ;;  %3780 = vmatpush.msra.mxu3 %v3308_v20  ;;  %v2756_v10 = vadd.f32 %v2755_v54, %v8651_v38 }
 0x389   :  { %v3116_v52 = vld [vmem:[#allocation11 + $0x10c8] sm:$0xff]  ;;  %8650 = vst [vmem:[#allocation36_spill] sm:$0xff] %v7762_v13  ;;  %3742 = vmatpush.msra.mxu2 %v3232_v57  ;;  %v7780_v45 = vsel %vm3383_vm8, %v8655_v55, %v8654_v33 }
 0x38a   :  { %v3180_v34 = vld [vmem:[#allocation11 + $0x12c8] sm:$0xff]  ;;  %3657 = vmatpush.msra.mxu0 %v3116_v52  ;;  %v2797_v57 = vadd.f32 %v2796_v24, %v2756_v10  ;;  %v8658_v52 = vrot.slane %v7710_v19, 2 }
 0x38b   :  { %v3304_v36 = vld [vmem:[#allocation11 + $0x16a8] sm:$0xff]  ;;  %3698 = vmatpush.msra.mxu1 %v3180_v34  ;;  %3512 = vmatmul.f32.gmra.mxu0 %v7780_v45  ;;  %v7802_v34 = vld [vmem:[#allocation3 + $0x110] sm:$0xff] }
 0x38c   :  { %v7773_v26 = vld [vmem:[#allocation3 + $0xe0] sm:$0xff]  ;;  %3781 = vmatpush.msra.mxu3 %v3304_v36  ;;  %3553 = vmatmul.f32.gmra.mxu1 %v7785_v23  ;;  %v7796_v14 = vsel %vm3383_vm8, %v8658_v52, %v8657_v25  ;;  %v7798_v21 = vld [vmem:[#allocation3 + $0xe8] sm:$0xff]  ;;  %v2838_v10 = vadd.f32 %v2837_v53, %v2797_v57  ;;  %v8554_v50 = vrot.slane %v7802_v34, 2 }
 0x38d   :  { %v3228_v46 = vld [vmem:[#allocation11 + $0x1448] sm:$0xff]  ;;  %3635 = vmatmul.f32.gmra.mxu3 %v7771_v1  ;;  %3597 = vmatmul.f32.gmra.mxu2 %v7796_v14 }
 0x38e   :  { %v3112_v20 = vld [vmem:[#allocation11 + $0x10a8] sm:$0xff]  ;;  %3743 = vmatpush.msra.mxu2 %v3228_v46  ;;  %v2878_v5 = vpop.f32.mrf.mxu3 }
 0x38f   :  { %v3176_v54 = vld [vmem:[#allocation11 + $0x12a8] sm:$0xff]  ;;  %3658 = vmatpush.msra.mxu0 %v3112_v20  ;;  %v2840_v9 = vpop.f32.mrf.mxu2  ;;  %v7808_v46 = vadd.f32 %v2878_v5, %v2838_v10  ;;  %v2758_v20 = vpop.f32.mrf.mxu0  ;;  %v8664_v5 = vrot.slane %v7751_v44, 2  ;;  %v8665_v10 = vrot.slane %v7798_v21, 2  ;;  %v8666_v44 = vrot.slane %v7755_v22, 2 }
 0x390   :  { %v3300_v38 = vld [vmem:[#allocation11 + $0x1688] sm:$0xff]  ;;  %3699 = vmatpush.msra.mxu1 %v3176_v54  ;;  %v2799_v33 = vpop.f32.mrf.mxu1  ;;  %v8661_v54 = vrot.slane %v7787_v2, 2 }
 0x391   :  { %v3224_v36 = vld [vmem:[#allocation11 + $0x1428] sm:$0xff]  ;;  %3782 = vmatpush.msra.mxu3 %v3300_v38  ;;  %8659 = vst [vmem:[#allocation37_spill] sm:$0xff] %v7808_v46  ;;  %v8662_v38 = vrot.slane %v7740_v59, 2 }
 0x392   :  { %v3108_v24 = vld [vmem:[#allocation11 + $0x1088] sm:$0xff]  ;;  %3744 = vmatpush.msra.mxu2 %v3224_v36  ;;  %v8663_v36 = vrot.slane %v7773_v26, 2 }
 0x393   :  { %v3172_v19 = vld [vmem:[#allocation11 + $0x1288] sm:$0xff]  ;;  %3659 = vmatpush.msra.mxu0 %v3108_v24  ;;  %v7816_v27 = vsel %vm3383_vm8, %v8662_v38, %v8661_v54 }
 0x394   :  { %v3296_v55 = vld [vmem:[#allocation11 + $0x1668] sm:$0xff]  ;;  %3700 = vmatpush.msra.mxu1 %v3172_v19  ;;  %v7823_v24 = vsel %vm3383_vm8, %v8664_v5, %v8663_v36  ;;  %v7828_v19 = vsel %vm3383_vm8, %v3422_v32, %v8665_v10 }
 0x395   :  { %v3220_v52 = vld [vmem:[#allocation11 + $0x1408] sm:$0xff]  ;;  %3783 = vmatpush.msra.mxu3 %v3296_v55  ;;  %v7830_v55 = vld [vmem:[#allocation3 + $0x118] sm:$0xff]  ;;  %3515 = vmatmul.f32.gmra.mxu0 %v7823_v24 }
 0x396   :  { %v3104_v13 = vld [vmem:[#allocation11 + $0x1068] sm:$0xff]  ;;  %3745 = vmatpush.msra.mxu2 %v3220_v52  ;;  %3556 = vmatmul.f32.gmra.mxu1 %v7828_v19  ;;  %v3442_v38 = vrot.slane %v7830_v55, 2 }
 0x397   :  { %v3168_v53 = vld [vmem:[#allocation11 + $0x1268] sm:$0xff]  ;;  %3660 = vmatpush.msra.mxu0 %v3104_v13  ;;  %v7839_v13 = vsel %vm3383_vm8, %v8666_v44, %v8554_v50  ;;  %3638 = vmatmul.f32.gmra.mxu3 %v7816_v27  ;;  %v2881_v50 = vpop.f32.mrf.mxu3  ;;  %v2843_v46 = vpop.f32.mrf.mxu2 }
 0x398   :  { %v3292_v57 = vld [vmem:[#allocation11 + $0x1648] sm:$0xff]  ;;  %3701 = vmatpush.msra.mxu1 %v3168_v53  ;;  %3600 = vmatmul.f32.gmra.mxu2 %v7839_v13  ;;  %v3088_v53 = vld [vmem:[#allocation3 + $0x130] sm:$0x3]  ;;  %v2761_v16 = vpop.f32.mrf.mxu0  ;;  %v2802_v47 = vpop.f32.mrf.mxu1 }
 0x399   :  { %v8660_v12 = vld [vmem:[#allocation47_spill] sm:$0xff]  ;;  %3784 = vmatpush.msra.mxu3 %v3292_v57  ;;  %v3448_v49 = vrot.slane %v3088_v53, 2 }
 0x39a   :  { %v2759_v25 = vadd.f32 %v2758_v20, %v8660_v12  ;;  %v3100_v59 = vld [vmem:[#allocation11 + $0x1048] sm:$0xff] }
 0x39b   :  { %v3164_v12 = vld [vmem:[#allocation11 + $0x1248] sm:$0xff]  ;;  %3661 = vmatpush.msra.mxu0 %v3100_v59  ;;  %v8668_v59 = vrot.slane %v7787_v2, 2 }
 0x39c   :  { %v2800_v52 = vadd.f32 %v2799_v33, %v2759_v25  ;;  %v3082_v32 = vld [vmem:[#allocation3 + $0x100] sm:$0xff]  ;;  %v3083_v20 = vld [vmem:[#allocation3 + $0x108] sm:$0xff]  ;;  %3702 = vmatpush.msra.mxu1 %v3164_v12 }
 0x39d   :  { %v3288_v54 = vld [vmem:[#allocation11 + $0x1628] sm:$0xff]  ;;  %v3436_v22 = vrot.slane %v3082_v32, 2  ;;  %v3438_v5 = vrot.slane %v3083_v20, 2  ;;  %v7850_v12 = vsel %vm3383_vm8, %v8668_v59, %v3442_v38 }
 0x39e   :  { %v3096_v33 = vld [vmem:[#allocation11 + $0x1028] sm:$0xff]  ;;  %v2841_v57 = vadd.f32 %v2840_v9, %v2800_v52  ;;  %3785 = vmatpush.msra.mxu3 %v3288_v54  ;;  %v8667_v9 = vld [vmem:[#allocation48_spill] sm:$0xff]  ;;  %v8669_v52 = vrot.slane %v7773_v26, 2  ;;  %v3089_v54 = vld [vmem:[#allocation3 + $0x138] sm:$0x3] }
 0x39f   :  { %v3160_v25 = vld [vmem:[#allocation11 + $0x1228] sm:$0xff]  ;;  %3662 = vmatpush.msra.mxu0 %v3096_v33  ;;  %v2762_v55 = vadd.f32 %v2761_v16, %v8667_v9  ;;  %v8671_v16 = vrot.slane %v7802_v34, 2  ;;  %v3086_v26 = vld [vmem:[#allocation3 + $0x120] sm:$0x3]  ;;  %3641 = vmatmul.f32.gmra.mxu3 %v7850_v12  ;;  %v8673_v34 = vld [vmem:[#allocation49_spill] sm:$0xff] }
 0x3a0   :  { %v3284_v36 = vld [vmem:[#allocation11 + $0x1608] sm:$0xff]  ;;  %3703 = vmatpush.msra.mxu1 %v3160_v25  ;;  %v7844_v58 = vadd.f32 %v2881_v50, %v2841_v57  ;;  %v7855_v32 = vsel %vm3383_vm8, %v8669_v52, %v3436_v22  ;;  %v8670_v50 = vrot.slane %v7798_v21, 2  ;;  %v3450_v25 = vrot.slane %v3089_v54, 2  ;;  %v2764_v9 = vpop.f32.mrf.mxu0 }
 0x3a1   :  { %v3092_v10 = vld [vmem:[#allocation11 + $0x1008] sm:$0xff]  ;;  %3786 = vmatpush.msra.mxu3 %v3284_v36  ;;  %v2803_v53 = vadd.f32 %v2802_v47, %v2762_v55  ;;  %3518 = vmatmul.f32.gmra.mxu0 %v7855_v32  ;;  %v7867_v2 = vsel %vm3383_vm8, %v8671_v16, %v3448_v49  ;;  %v3444_v57 = vrot.slane %v3086_v26, 2  ;;  %v2884_v47 = vpop.f32.mrf.mxu3  ;;  %v2805_v55 = vpop.f32.mrf.mxu1  ;;  %v2765_v59 = vadd.f32 %v2764_v9, %v8673_v34  ;;  %v3269_v9 = vld [vmem:[#allocation11 + $0x1590] sm:$0xff] }
 0x3a2   :  { %v3156_v44 = vld [vmem:[#allocation11 + $0x1208] sm:$0xff]  ;;  %3663 = vmatpush.msra.mxu0 %v3092_v10  ;;  %v7860_v20 = vsel %vm3383_vm8, %v8670_v50, %v3438_v5  ;;  %3603 = vmatmul.f32.gmra.mxu2 %v7867_v2  ;;  %v2846_v10 = vpop.f32.mrf.mxu2  ;;  %v7875_v49 = vsel %vm3383_vm8, %v3442_v38, %v3450_v25  ;;  %v3277_v25 = vld [vmem:[#allocation11 + $0x15d0] sm:$0xff] }
 0x3a3   :  { %3704 = vmatpush.msra.mxu1 %v3156_v44  ;;  %v3087_v33 = vld [vmem:[#allocation3 + $0x128] sm:$0x3]  ;;  %v2844_v21 = vadd.f32 %v2843_v46, %v2803_v53  ;;  %v7878_v52 = vsel %vm3383_vm8, %v3436_v22, %v3444_v57  ;;  %v2806_v46 = vadd.f32 %v2805_v55, %v2765_v59 }
 0x3a4   :  { %3559 = vmatmul.f32.gmra.mxu1 %v7860_v20  ;;  %v3446_v36 = vrot.slane %v3087_v33, 2  ;;  %v3281_v33 = vld [vmem:[#allocation11 + $0x15f0] sm:$0xff] }
 0x3a5   :  { %v7871_v44 = vadd.f32 %v2884_v47, %v2844_v21  ;;  %v2847_v54 = vadd.f32 %v2846_v10, %v2806_v46  ;;  %v8675_v21 = vld [vmem:[#allocation50_spill] sm:$0xff]  ;;  %3894 = vmatpush.msrb.mxu2 %v3281_v33  ;;  %v3345_v47 = vld [vmem:[#allocation11 + $0x17f0] sm:$0xff] }
 0x3a6   :  { %v7881_v50 = vsel %vm3383_vm8, %v3438_v5, %v3446_v36  ;;  %v3273_v36 = vld [vmem:[#allocation11 + $0x15b0] sm:$0xff]  ;;  %3935 = vmatpush.msrb.mxu3 %v3345_v47 }
 0x3a7   :  { %8672 = vst [vmem:[#allocation38_spill] sm:$0xff] %v7871_v44  ;;  %3644 = vmatmul.f32.gmra.mxu3 %v7875_v49  ;;  %3895 = vmatpush.msrb.mxu2 %v3277_v25  ;;  %v3261_v47 = vld [vmem:[#allocation11 + $0x1550] sm:$0xff] }
 0x3a8   :  { %v2907_v26 = vpop.f32.mrf.mxu0 }
 0x3a9   :  { %3521 = vmatmul.f32.gmra.mxu0 %v7878_v52  ;;  %v2887_v53 = vpop.f32.mrf.mxu3  ;;  %v2948_v22 = vpop.f32.mrf.mxu1  ;;  %v2908_v5 = vadd.f32 %v2907_v26, %v8675_v21  ;;  %3896 = vmatpush.msrb.mxu2 %v3273_v36  ;;  %v3217_v26 = vld [vmem:[#allocation11 + $0x13f0] sm:$0xff] }
 0x3aa   :  { %3746 = vmatmul.f32.vlgmr.msra.gmra.mxu2 %v7589_v63  ;;  %v2989_v16 = vpop.f32.mrf.mxu2  ;;  %v7887_v38 = vadd.f32 %v2887_v53, %v2847_v54  ;;  %v3153_v53 = vld [vmem:[#allocation11 + $0x11f0] sm:$0xff]  ;;  %3853 = vmatpush.msrb.mxu1 %v3217_v26 }
 0x3ab   :  { %v2949_v57 = vadd.f32 %v2948_v22, %v2908_v5  ;;  %v8677_v22 = vld [vmem:[#allocation51_spill] sm:$0xff]  ;;  %3897 = vmatpush.msrb.mxu2 %v3269_v9  ;;  %3812 = vmatpush.msrb.mxu0 %v3153_v53  ;;  %v3341_v21 = vld [vmem:[#allocation11 + $0x17d0] sm:$0xff] }
 0x3ac   :  { %3562 = vmatmul.f32.gmra.mxu1 %v7881_v50  ;;  %8674 = vst [vmem:[#allocation39_spill] sm:$0xff] %v7887_v38  ;;  %v3265_v5 = vld [vmem:[#allocation11 + $0x1570] sm:$0xff]  ;;  %3936 = vmatpush.msrb.mxu3 %v3341_v21 }
 0x3ad   :  { %v2990_v10 = vadd.f32 %v2989_v16, %v2949_v57  ;;  %v3149_v16 = vld [vmem:[#allocation11 + $0x11d0] sm:$0xff]  ;;  %3898 = vmatpush.msrb.mxu2 %v3265_v5 }
 0x3ae   :  { %v3213_v57 = vld [vmem:[#allocation11 + $0x13d0] sm:$0xff]  ;;  %3813 = vmatpush.msrb.mxu0 %v3149_v16 }
 0x3af   :  { %3787 = vmatmul.f32.vlgmr.msra.gmra.mxu3 %v7607_v39  ;;  %v3337_v36 = vld [vmem:[#allocation11 + $0x17b0] sm:$0xff]  ;;  %3854 = vmatpush.msrb.mxu1 %v3213_v57 }
 0x3b0   :  { %v2910_v46 = vpop.f32.mrf.mxu0  ;;  %3937 = vmatpush.msrb.mxu3 %v3337_v36  ;;  %v3141_v53 = vld [vmem:[#allocation11 + $0x1190] sm:$0xff]  ;;  %3899 = vmatpush.msrb.mxu2 %v3261_v47 }
 0x3b1   :  { %3664 = vmatmul.f32.vlgmr.msra.gmra.mxu0 %v7610_v0  ;;  %v3030_v55 = vpop.f32.mrf.mxu3  ;;  %v2951_v54 = vpop.f32.mrf.mxu1  ;;  %v2911_v33 = vadd.f32 %v2910_v46, %v8677_v22  ;;  %v3333_v46 = vld [vmem:[#allocation11 + $0x1790] sm:$0xff] }
 0x3b2   :  { %3749 = vmatmul.f32.gmra.mxu2 %v7620_v4  ;;  %v2992_v34 = vpop.f32.mrf.mxu2  ;;  %v7894_v59 = vadd.f32 %v3030_v55, %v2990_v10  ;;  %v3145_v10 = vld [vmem:[#allocation11 + $0x11b0] sm:$0xff]  ;;  %3938 = vmatpush.msrb.mxu3 %v3333_v46 }
 0x3b3   :  { %v2952_v25 = vadd.f32 %v2951_v54, %v2911_v33  ;;  %v3209_v55 = vld [vmem:[#allocation11 + $0x13b0] sm:$0xff]  ;;  %3814 = vmatpush.msrb.mxu0 %v3145_v10 }
 0x3b4   :  { %3705 = vmatmul.f32.vlgmr.msra.gmra.mxu1 %v7613_v15  ;;  %8676 = vst [vmem:[#allocation40_spill] sm:$0xff] %v7894_v59  ;;  %v3257_v54 = vld [vmem:[#allocation11 + $0x1530] sm:$0xff] }
 0x3b5   :  { %v2993_v9 = vadd.f32 %v2992_v34, %v2952_v25  ;;  %v3205_v33 = vld [vmem:[#allocation11 + $0x1390] sm:$0xff]  ;;  %3855 = vmatpush.msrb.mxu1 %v3209_v55  ;;  %3900 = vmatpush.msrb.mxu2 %v3257_v54 }
 0x3b6   :  { %v3329_v21 = vld [vmem:[#allocation11 + $0x1770] sm:$0xff]  ;;  %3815 = vmatpush.msrb.mxu0 %v3141_v53 }
 0x3b7   :  { %3790 = vmatmul.f32.gmra.mxu3 %v7640_v41  ;;  %v8679_v34 = vld [vmem:[#allocation52_spill] sm:$0xff]  ;;  %3856 = vmatpush.msrb.mxu1 %v3205_v33 }
 0x3b8   :  { %v2913_v38 = vpop.f32.mrf.mxu0  ;;  %v3253_v16 = vld [vmem:[#allocation11 + $0x1510] sm:$0xff]  ;;  %3939 = vmatpush.msrb.mxu3 %v3329_v21 }
 0x3b9   :  { %3667 = vmatmul.f32.gmra.mxu0 %v7647_v28  ;;  %v3033_v26 = vpop.f32.mrf.mxu3  ;;  %v2954_v44 = vpop.f32.mrf.mxu1  ;;  %v2914_v5 = vadd.f32 %v2913_v38, %v8679_v34  ;;  %v3137_v25 = vld [vmem:[#allocation11 + $0x1170] sm:$0xff]  ;;  %3901 = vmatpush.msrb.mxu2 %v3253_v16 }
 0x3ba   :  { %3752 = vmatmul.f32.gmra.mxu2 %v7659_v30  ;;  %v2995_v22 = vpop.f32.mrf.mxu2  ;;  %v7901_v59 = vadd.f32 %v3033_v26, %v2993_v9  ;;  %v3201_v36 = vld [vmem:[#allocation11 + $0x1370] sm:$0xff]  ;;  %3816 = vmatpush.msrb.mxu0 %v3137_v25 }
 0x3bb   :  { %v2955_v57 = vadd.f32 %v2954_v44, %v2914_v5  ;;  %v3325_v47 = vld [vmem:[#allocation11 + $0x1750] sm:$0xff]  ;;  %3857 = vmatpush.msrb.mxu1 %v3201_v36 }
 0x3bc   :  { %3708 = vmatmul.f32.gmra.mxu1 %v7650_v43  ;;  %8678 = vst [vmem:[#allocation41_spill] sm:$0xff] %v7901_v59  ;;  %v3249_v10 = vld [vmem:[#allocation11 + $0x14f0] sm:$0xff]  ;;  %3940 = vmatpush.msrb.mxu3 %v3325_v47 }
 0x3bd   :  { %v3133_v9 = vld [vmem:[#allocation11 + $0x1150] sm:$0xff]  ;;  %v2996_v38 = vadd.f32 %v2995_v22, %v2955_v57  ;;  %3902 = vmatpush.msrb.mxu2 %v3249_v10 }
 0x3be   :  { %v3197_v55 = vld [vmem:[#allocation11 + $0x1350] sm:$0xff]  ;;  %3817 = vmatpush.msrb.mxu0 %v3133_v9 }
 0x3bf   :  { %3793 = vmatmul.f32.gmra.mxu3 %v7679_v37  ;;  %v3321_v46 = vld [vmem:[#allocation11 + $0x1730] sm:$0xff]  ;;  %3858 = vmatpush.msrb.mxu1 %v3197_v55 }
 0x3c0   :  { %v3245_v44 = vld [vmem:[#allocation11 + $0x14d0] sm:$0xff]  ;;  %v2916_v5 = vpop.f32.mrf.mxu0  ;;  %3941 = vmatpush.msrb.mxu3 %v3321_v46 }
 0x3c1   :  { %3670 = vmatmul.f32.gmra.mxu0 %v7688_v60  ;;  %v3129_v54 = vld [vmem:[#allocation11 + $0x1130] sm:$0xff]  ;;  %v3036_v53 = vpop.f32.mrf.mxu3  ;;  %v2957_v59 = vpop.f32.mrf.mxu1  ;;  %v2917_v22 = vadd.f32 %v2916_v5, %v7437_v35  ;;  %3903 = vmatpush.msrb.mxu2 %v3245_v44 }
 0x3c2   :  { %3755 = vmatmul.f32.gmra.mxu2 %v7704_v42  ;;  %v2998_v26 = vpop.f32.mrf.mxu2  ;;  %v3193_v33 = vld [vmem:[#allocation11 + $0x1330] sm:$0xff]  ;;  %v7908_v34 = vadd.f32 %v3036_v53, %v2996_v38  ;;  %3818 = vmatpush.msrb.mxu0 %v3129_v54 }
 0x3c3   :  { %v3317_v21 = vld [vmem:[#allocation11 + $0x1710] sm:$0xff]  ;;  %3859 = vmatpush.msrb.mxu1 %v3193_v33  ;;  %v2958_v57 = vadd.f32 %v2957_v59, %v2917_v22 }
 0x3c4   :  { %3711 = vmatmul.f32.gmra.mxu1 %v7693_v40  ;;  %8680 = vst [vmem:[#allocation42_spill] sm:$0xff] %v7908_v34  ;;  %v3241_v16 = vld [vmem:[#allocation11 + $0x14b0] sm:$0xff]  ;;  %3942 = vmatpush.msrb.mxu3 %v3317_v21 }
 0x3c5   :  { %v3125_v25 = vld [vmem:[#allocation11 + $0x1110] sm:$0xff]  ;;  %v2999_v35 = vadd.f32 %v2998_v26, %v2958_v57  ;;  %3904 = vmatpush.msrb.mxu2 %v3241_v16 }
 0x3c6   :  { %v3189_v36 = vld [vmem:[#allocation11 + $0x1310] sm:$0xff]  ;;  %3819 = vmatpush.msrb.mxu0 %v3125_v25 }
 0x3c7   :  { %v3313_v47 = vld [vmem:[#allocation11 + $0x16f0] sm:$0xff]  ;;  %3796 = vmatmul.f32.gmra.mxu3 %v7724_v3  ;;  %3860 = vmatpush.msrb.mxu1 %v3189_v36 }
 0x3c8   :  { %v3237_v10 = vld [vmem:[#allocation11 + $0x1490] sm:$0xff]  ;;  %3943 = vmatpush.msrb.mxu3 %v3313_v47  ;;  %v2919_v5 = vpop.f32.mrf.mxu0 }
 0x3c9   :  { %3673 = vmatmul.f32.gmra.mxu0 %v7731_v51  ;;  %v3121_v9 = vld [vmem:[#allocation11 + $0x10f0] sm:$0xff]  ;;  %v3039_v44 = vpop.f32.mrf.mxu3  ;;  %3905 = vmatpush.msrb.mxu2 %v3237_v10  ;;  %v2960_v22 = vpop.f32.mrf.mxu1  ;;  %v2920_v26 = vadd.f32 %v2919_v5, %v7443_v8 }
 0x3ca   :  { %3758 = vmatmul.f32.gmra.mxu2 %v7749_v11  ;;  %v3185_v38 = vld [vmem:[#allocation11 + $0x12f0] sm:$0xff]  ;;  %v3001_v54 = vpop.f32.mrf.mxu2  ;;  %3820 = vmatpush.msrb.mxu0 %v3121_v9  ;;  %v7915_v21 = vadd.f32 %v3039_v44, %v2999_v35 }
 0x3cb   :  { %v3309_v55 = vld [vmem:[#allocation11 + $0x16d0] sm:$0xff]  ;;  %3861 = vmatpush.msrb.mxu1 %v3185_v38  ;;  %v2961_v57 = vadd.f32 %v2960_v22, %v2920_v26 }
 0x3cc   :  { %3714 = vmatmul.f32.gmra.mxu1 %v7738_v17  ;;  %v3233_v59 = vld [vmem:[#allocation11 + $0x1470] sm:$0xff]  ;;  %8681 = vst [vmem:[#allocation43_spill] sm:$0xff] %v7915_v21  ;;  %3944 = vmatpush.msrb.mxu3 %v3309_v55 }
 0x3cd   :  { %v3117_v46 = vld [vmem:[#allocation11 + $0x10d0] sm:$0xff]  ;;  %3906 = vmatpush.msrb.mxu2 %v3233_v59  ;;  %v3002_v8 = vadd.f32 %v3001_v54, %v2961_v57 }
 0x3ce   :  { %v3181_v53 = vld [vmem:[#allocation11 + $0x12d0] sm:$0xff]  ;;  %3821 = vmatpush.msrb.mxu0 %v3117_v46 }
 0x3cf   :  { %v3305_v33 = vld [vmem:[#allocation11 + $0x16b0] sm:$0xff]  ;;  %3862 = vmatpush.msrb.mxu1 %v3181_v53  ;;  %3799 = vmatmul.f32.gmra.mxu3 %v7771_v1 }
 0x3d0   :  { %v3229_v16 = vld [vmem:[#allocation11 + $0x1450] sm:$0xff]  ;;  %3945 = vmatpush.msrb.mxu3 %v3305_v33  ;;  %v2922_v22 = vpop.f32.mrf.mxu0 }
 0x3d1   :  { %v3113_v25 = vld [vmem:[#allocation11 + $0x10b0] sm:$0xff]  ;;  %3676 = vmatmul.f32.gmra.mxu0 %v7780_v45  ;;  %3907 = vmatpush.msrb.mxu2 %v3229_v16  ;;  %v3042_v46 = vpop.f32.mrf.mxu3  ;;  %v2963_v26 = vpop.f32.mrf.mxu1  ;;  %v2923_v54 = vadd.f32 %v2922_v22, %v7449_v61 }
 0x3d2   :  { %v3177_v36 = vld [vmem:[#allocation11 + $0x12b0] sm:$0xff]  ;;  %3761 = vmatmul.f32.gmra.mxu2 %v7796_v14  ;;  %3822 = vmatpush.msrb.mxu0 %v3113_v25  ;;  %v3004_v44 = vpop.f32.mrf.mxu2  ;;  %v7922_v5 = vadd.f32 %v3042_v46, %v3002_v8 }
 0x3d3   :  { %v3301_v47 = vld [vmem:[#allocation11 + $0x1690] sm:$0xff]  ;;  %3863 = vmatpush.msrb.mxu1 %v3177_v36  ;;  %v2964_v57 = vadd.f32 %v2963_v26, %v2923_v54 }
 0x3d4   :  { %3717 = vmatmul.f32.gmra.mxu1 %v7785_v23  ;;  %v3225_v10 = vld [vmem:[#allocation11 + $0x1430] sm:$0xff]  ;;  %3946 = vmatpush.msrb.mxu3 %v3301_v47  ;;  %8682 = vst [vmem:[#allocation44_spill] sm:$0xff] %v7922_v5 }
 0x3d5   :  { %v3109_v9 = vld [vmem:[#allocation11 + $0x1090] sm:$0xff]  ;;  %3908 = vmatpush.msrb.mxu2 %v3225_v10 }
 0x3d6   :  { %v3173_v35 = vld [vmem:[#allocation11 + $0x1290] sm:$0xff]  ;;  %3823 = vmatpush.msrb.mxu0 %v3109_v9  ;;  %v3005_v9 = vadd.f32 %v3004_v44, %v2964_v57 }
 0x3d7   :  { %v3297_v38 = vld [vmem:[#allocation11 + $0x1670] sm:$0xff]  ;;  %3864 = vmatpush.msrb.mxu1 %v3173_v35  ;;  %3802 = vmatmul.f32.gmra.mxu3 %v7816_v27 }
 0x3d8   :  { %v3221_v55 = vld [vmem:[#allocation11 + $0x1410] sm:$0xff]  ;;  %3947 = vmatpush.msrb.mxu3 %v3297_v38  ;;  %v2925_v46 = vpop.f32.mrf.mxu0 }
 0x3d9   :  { %v3105_v59 = vld [vmem:[#allocation11 + $0x1070] sm:$0xff]  ;;  %3909 = vmatpush.msrb.mxu2 %v3221_v55  ;;  %3679 = vmatmul.f32.gmra.mxu0 %v7823_v24  ;;  %v3045_v38 = vpop.f32.mrf.mxu3 }
 0x3da   :  { %v3169_v53 = vld [vmem:[#allocation11 + $0x1270] sm:$0xff]  ;;  %3824 = vmatpush.msrb.mxu0 %v3105_v59  ;;  %3764 = vmatmul.f32.gmra.mxu2 %v7839_v13  ;;  %v3007_v55 = vpop.f32.mrf.mxu2  ;;  %v7929_v59 = vadd.f32 %v3045_v38, %v3005_v9  ;;  %v3282_v38 = vld [vmem:[#allocation11 + $0x15f8] sm:$0xff] }
 0x3db   :  { %v3293_v33 = vld [vmem:[#allocation11 + $0x1650] sm:$0xff]  ;;  %3865 = vmatpush.msrb.mxu1 %v3169_v53  ;;  %v2966_v53 = vpop.f32.mrf.mxu1  ;;  %4058 = vmatpush.msra.mxu2 %v3282_v38  ;;  %v3342_v38 = vld [vmem:[#allocation11 + $0x17d8] sm:$0xff] }
 0x3dc   :  { %3948 = vmatpush.msrb.mxu3 %v3293_v33  ;;  %v3101_v16 = vld [vmem:[#allocation11 + $0x1050] sm:$0xff]  ;;  %3720 = vmatmul.f32.gmra.mxu1 %v7828_v19  ;;  %8683 = vst [vmem:[#allocation45_spill] sm:$0xff] %v7929_v59  ;;  %v2926_v33 = vadd.f32 %v2925_v46, %v7455_v62  ;;  %v3274_v46 = vld [vmem:[#allocation11 + $0x15b8] sm:$0xff] }
 0x3dd   :  { %v3165_v25 = vld [vmem:[#allocation11 + $0x1250] sm:$0xff]  ;;  %3825 = vmatpush.msrb.mxu0 %v3101_v16 }
 0x3de   :  { %v3289_v36 = vld [vmem:[#allocation11 + $0x1630] sm:$0xff]  ;;  %3866 = vmatpush.msrb.mxu1 %v3165_v25  ;;  %v2967_v44 = vadd.f32 %v2966_v53, %v2926_v33  ;;  %v7949_v53 = vld [vmem:[#allocation12] sm:$0xf] }
 0x3df   :  { %v3097_v47 = vld [vmem:[#allocation11 + $0x1030] sm:$0xff]  ;;  %3949 = vmatpush.msrb.mxu3 %v3289_v36 }
 0x3e0   :  { %v3161_v10 = vld [vmem:[#allocation11 + $0x1230] sm:$0xff]  ;;  %3826 = vmatpush.msrb.mxu0 %v3097_v47  ;;  %3805 = vmatmul.f32.gmra.mxu3 %v7850_v12  ;;  %v3008_v22 = vadd.f32 %v3007_v55, %v2967_v44  ;;  %v2928_v25 = vpop.f32.mrf.mxu0  ;;  %v3270_v44 = vld [vmem:[#allocation11 + $0x1598] sm:$0xff] }
 0x3e1   :  { %v3285_v61 = vld [vmem:[#allocation11 + $0x1610] sm:$0xff]  ;;  %3867 = vmatpush.msrb.mxu1 %v3161_v10  ;;  %3682 = vmatmul.f32.gmra.mxu0 %v7855_v32  ;;  %v3048_v26 = vpop.f32.mrf.mxu3  ;;  %v2929_v62 = vadd.f32 %v2928_v25, %v7465_v56  ;;  %v3278_v56 = vld [vmem:[#allocation11 + $0x15d8] sm:$0xff]  ;;  %v7952_v25 = vperm.slane %v7949_v53, 0 }
 0x3e2   :  { %v3093_v8 = vld [vmem:[#allocation11 + $0x1010] sm:$0xff]  ;;  %3950 = vmatpush.msrb.mxu3 %v3285_v61  ;;  %3767 = vmatmul.f32.gmra.mxu2 %v7867_v2  ;;  %v3010_v54 = vpop.f32.mrf.mxu2  ;;  %v7936_v16 = vadd.f32 %v3048_v26, %v3008_v22 }
 0x3e3   :  { %v3157_v35 = vld [vmem:[#allocation11 + $0x1210] sm:$0xff]  ;;  %3827 = vmatpush.msrb.mxu0 %v3093_v8  ;;  %v2969_v57 = vpop.f32.mrf.mxu1  ;;  %4059 = vmatpush.msra.mxu2 %v3278_v56  ;;  %v3214_v56 = vld [vmem:[#allocation11 + $0x13d8] sm:$0xff] }
 0x3e4   :  { %3868 = vmatpush.msrb.mxu1 %v3157_v35  ;;  %8684 = vst [vmem:[#allocation46_spill] sm:$0xff] %v7936_v16  ;;  %v2970_v36 = vadd.f32 %v2969_v57, %v2929_v62 }
 0x3e5   :  { %3723 = vmatmul.f32.gmra.mxu1 %v7860_v20  ;;  %4060 = vmatpush.msra.mxu2 %v3274_v46 }
 0x3e6   :  { %v3011_v47 = vadd.f32 %v3010_v54, %v2970_v36  ;;  %v3346_v36 = vld [vmem:[#allocation11 + $0x17f8] sm:$0xff] }
 0x3e7   :  { %4061 = vmatpush.msra.mxu2 %v3270_v44  ;;  %4099 = vmatpush.msra.mxu3 %v3346_v36  ;;  %v3338_v44 = vld [vmem:[#allocation11 + $0x17b8] sm:$0xff] }
 0x3e8   :  { %3808 = vmatmul.f32.gmra.mxu3 %v7875_v49  ;;  %v3501_v8 = vpop.f32.mrf.mxu0  ;;  %v3334_v36 = vld [vmem:[#allocation11 + $0x1798] sm:$0xff] }
 0x3e9   :  { %3685 = vmatmul.f32.gmra.mxu0 %v7878_v52  ;;  %v3051_v10 = vpop.f32.mrf.mxu3  ;;  %4100 = vmatpush.msra.mxu3 %v3342_v38  ;;  %v3254_v38 = vld [vmem:[#allocation11 + $0x1518] sm:$0xff] }
 0x3ea   :  { %3910 = vmatmul.f32.vlgmr.msrb.gmra.mxu2 %v7589_v63  ;;  %v3583_v9 = vpop.f32.mrf.mxu2  ;;  %v7943_v61 = vadd.f32 %v3051_v10, %v3011_v47  ;;  %v3154_v47 = vld [vmem:[#allocation11 + $0x11f8] sm:$0xff] }
 0x3eb   :  { %v3542_v35 = vpop.f32.mrf.mxu1  ;;  %v3218_v10 = vld [vmem:[#allocation11 + $0x13f8] sm:$0xff]  ;;  %3976 = vmatpush.msra.mxu0 %v3154_v47  ;;  %4101 = vmatpush.msra.mxu3 %v3338_v44 }
 0x3ec   :  { %8685 = vst [vmem:[#allocation47_spill] sm:$0xff] %v7943_v61  ;;  %v3543_v55 = vadd.f32 %v3542_v35, %v3501_v8  ;;  %4017 = vmatpush.msra.mxu1 %v3218_v10  ;;  %v3206_v61 = vld [vmem:[#allocation11 + $0x1398] sm:$0xff] }
 0x3ed   :  { %3726 = vmatmul.f32.gmra.mxu1 %v7881_v50  ;;  %4102 = vmatpush.msra.mxu3 %v3334_v36  ;;  %v3246_v44 = vld [vmem:[#allocation11 + $0x14d8] sm:$0xff] }
 0x3ee   :  { %v3584_v33 = vadd.f32 %v3583_v9, %v3543_v55  ;;  %v3266_v9 = vld [vmem:[#allocation11 + $0x1578] sm:$0xff]  ;;  %4018 = vmatpush.msra.mxu1 %v3214_v56 }
 0x3ef   :  { %v3150_v55 = vld [vmem:[#allocation11 + $0x11d8] sm:$0xff]  ;;  %4062 = vmatpush.msra.mxu2 %v3266_v9 }
 0x3f0   :  { %3951 = vmatmul.f32.vlgmr.msrb.gmra.mxu3 %v7607_v39  ;;  %v3504_v57 = vpop.f32.mrf.mxu0  ;;  %3977 = vmatpush.msra.mxu0 %v3150_v55  ;;  %v3330_v55 = vld [vmem:[#allocation11 + $0x1778] sm:$0xff] }
 0x3f1   :  { %3828 = vmatmul.f32.vlgmr.msrb.gmra.mxu0 %v7610_v0  ;;  %v3624_v22 = vpop.f32.mrf.mxu3  ;;  %v3138_v56 = vld [vmem:[#allocation11 + $0x1178] sm:$0xff]  ;;  %4103 = vmatpush.msra.mxu3 %v3330_v55 }
 0x3f2   :  { %3913 = vmatmul.f32.gmra.mxu2 %v7620_v4  ;;  %v3586_v26 = vpop.f32.mrf.mxu2  ;;  %v3625_v54 = vadd.f32 %v3624_v22, %v3584_v33  ;;  %v3262_v33 = vld [vmem:[#allocation11 + $0x1558] sm:$0xff] }
 0x3f3   :  { %v3545_v62 = vpop.f32.mrf.mxu1  ;;  %v3210_v22 = vld [vmem:[#allocation11 + $0x13b8] sm:$0xff]  ;;  %4063 = vmatpush.msra.mxu2 %v3262_v33 }
 0x3f4   :  { %v4140_v8 = vadd.f32 %v3625_v54, %v7475_v48  ;;  %v3546_v35 = vadd.f32 %v3545_v62, %v3504_v57  ;;  %v3146_v48 = vld [vmem:[#allocation11 + $0x11b8] sm:$0xff]  ;;  %4019 = vmatpush.msra.mxu1 %v3210_v22 }
 0x3f5   :  { %3869 = vmatmul.f32.vlgmr.msrb.gmra.mxu1 %v7613_v15  ;;  %v3258_v62 = vld [vmem:[#allocation11 + $0x1538] sm:$0xff]  ;;  %3978 = vmatpush.msra.mxu0 %v3146_v48 }
 0x3f6   :  { %v4182_v46 = vadd.f32 %v7952_v25, %v4140_v8  ;;  %v3587_v57 = vadd.f32 %v3586_v26, %v3546_v35  ;;  %v3142_v8 = vld [vmem:[#allocation11 + $0x1198] sm:$0xff]  ;;  %4064 = vmatpush.msra.mxu2 %v3258_v62  ;;  %4020 = vmatpush.msra.mxu1 %v3206_v61 }
 0x3f7   :  { %3979 = vmatpush.msra.mxu0 %v3142_v8  ;;  %v3322_v48 = vld [vmem:[#allocation11 + $0x1738] sm:$0xff] }
 0x3f8   :  { %3954 = vmatmul.f32.gmra.mxu3 %v7640_v41  ;;  %v4214_v54 = vmul.f32 1.5258789e-05, %v4182_v46  ;;  %v3507_v5 = vpop.f32.mrf.mxu0  ;;  %v3202_v46 = vld [vmem:[#allocation11 + $0x1378] sm:$0xff]  ;;  %4065 = vmatpush.msra.mxu2 %v3254_v38 }
 0x3f9   :  { %3831 = vmatmul.f32.gmra.mxu0 %v7647_v28  ;;  %v3627_v47 = vpop.f32.mrf.mxu3  ;;  %4021 = vmatpush.msra.mxu1 %v3202_v46  ;;  %v3194_v62 = vld [vmem:[#allocation11 + $0x1338] sm:$0xff] }
 0x3fa   :  { %3916 = vmatmul.f32.gmra.mxu2 %v7659_v30  ;;  %v3589_v10 = vpop.f32.mrf.mxu2  ;;  %v4246_v16 = vfloor.f32 %v4214_v54  ;;  %v3628_v59 = vadd.f32 %v3627_v47, %v3587_v57  ;;  %3980 = vmatpush.msra.mxu0 %v3138_v56  ;;  %v3130_v57 = vld [vmem:[#allocation11 + $0x1138] sm:$0xff] }
 0x3fb   :  { %v3548_v21 = vpop.f32.mrf.mxu1  ;;  %v3242_v55 = vld [vmem:[#allocation11 + $0x14b8] sm:$0xff] }
 0x3fc   :  { %v7960_v9 = vmax.f32 %v4246_v16, 0.0  ;;  %v4144_v26 = vadd.f32 %v3628_v59, %v7485_v6  ;;  %v3549_v35 = vadd.f32 %v3548_v21, %v3507_v5  ;;  %v3250_v6 = vld [vmem:[#allocation11 + $0x14f8] sm:$0xff] }
 0x3fd   :  { %3872 = vmatmul.f32.gmra.mxu1 %v7650_v43  ;;  %v3326_v21 = vld [vmem:[#allocation11 + $0x1758] sm:$0xff]  ;;  %4066 = vmatpush.msra.mxu2 %v3250_v6 }
 0x3fe   :  { %4310 = vst [vmem:[#allocation4 + $0x108] sm:$0xff] %v7960_v9  ;;  %v4186_v33 = vadd.f32 %v7952_v25, %v4144_v26  ;;  %v3134_v5 = vld [vmem:[#allocation11 + $0x1158] sm:$0xff]  ;;  %v3590_v61 = vadd.f32 %v3589_v10, %v3549_v35  ;;  %4104 = vmatpush.msra.mxu3 %v3326_v21 }
 0x3ff   :  { %v3198_v59 = vld [vmem:[#allocation11 + $0x1358] sm:$0xff]  ;;  %3981 = vmatpush.msra.mxu0 %v3134_v5  ;;  %4067 = vmatpush.msra.mxu2 %v3246_v44 }
 0x400   :  { %3957 = vmatmul.f32.gmra.mxu3 %v7679_v37  ;;  %v4218_v16 = vmul.f32 1.5258789e-05, %v4186_v33  ;;  %v3510_v8 = vpop.f32.mrf.mxu0  ;;  %4022 = vmatpush.msra.mxu1 %v3198_v59  ;;  %v3318_v56 = vld [vmem:[#allocation11 + $0x1718] sm:$0xff] }
 0x401   :  { %3834 = vmatmul.f32.gmra.mxu0 %v7688_v60  ;;  %v3630_v22 = vpop.f32.mrf.mxu3  ;;  %4105 = vmatpush.msra.mxu3 %v3322_v48  ;;  %v3126_v33 = vld [vmem:[#allocation11 + $0x1118] sm:$0xff] }
 0x402   :  { %3919 = vmatmul.f32.gmra.mxu2 %v7704_v42  ;;  %v3592_v54 = vpop.f32.mrf.mxu2  ;;  %v4250_v36 = vfloor.f32 %v4218_v16  ;;  %v3631_v47 = vadd.f32 %v3630_v22, %v3590_v61  ;;  %3982 = vmatpush.msra.mxu0 %v3130_v57  ;;  %v3190_v6 = vld [vmem:[#allocation11 + $0x1318] sm:$0xff] }
 0x403   :  { %v3551_v26 = vpop.f32.mrf.mxu1  ;;  %4023 = vmatpush.msra.mxu1 %v3194_v62  ;;  %v3238_v59 = vld [vmem:[#allocation11 + $0x1498] sm:$0xff]  ;;  %4068 = vmatpush.msra.mxu2 %v3242_v55 }
 0x404   :  { %v7969_v38 = vmax.f32 %v4250_v36, 0.0  ;;  %v4148_v10 = vadd.f32 %v3631_v47, %v7495_v29  ;;  %v3552_v35 = vadd.f32 %v3551_v26, %v3510_v8  ;;  %v3314_v16 = vld [vmem:[#allocation11 + $0x16f8] sm:$0xff]  ;;  %4106 = vmatpush.msra.mxu3 %v3318_v56  ;;  %3983 = vmatpush.msra.mxu0 %v3126_v33 }
 0x405   :  { %3875 = vmatmul.f32.gmra.mxu1 %v7693_v40  ;;  %v4374_v46 = vld [vmem:[#allocation4 + $0x108] sm:$0xfc]  ;;  %v3122_v61 = vld [vmem:[#allocation11 + $0x10f8] sm:$0xff]  ;;  %4069 = vmatpush.msra.mxu2 %v3238_v59 }
 0x406   :  { %v4190_v21 = vadd.f32 %v7952_v25, %v4148_v10  ;;  %v4446_v5 = vrot.slane %v4374_v46, 2  ;;  %v4447_v29 = vrot.slane %v7969_v38, 2  ;;  %v3186_v44 = vld [vmem:[#allocation11 + $0x12f8] sm:$0xff]  ;;  %v3593_v22 = vadd.f32 %v3592_v54, %v3552_v35  ;;  %4024 = vmatpush.msra.mxu1 %v3190_v6  ;;  %4107 = vmatpush.msra.mxu3 %v3314_v16 }
 0x407   :  { %v3234_v62 = vld [vmem:[#allocation11 + $0x1478] sm:$0xff]  ;;  %3984 = vmatpush.msra.mxu0 %v3122_v61 }
 0x408   :  { %3960 = vmatmul.f32.gmra.mxu3 %v7724_v3  ;;  %v4222_v48 = vmul.f32 1.5258789e-05, %v4190_v21  ;;  %v4448_v57 = vsel %vm3383_vm8, %v4446_v5, %v4447_v29  ;;  %v3310_v26 = vld [vmem:[#allocation11 + $0x16d8] sm:$0xff]  ;;  %v3513_v46 = vpop.f32.mrf.mxu0  ;;  %4025 = vmatpush.msra.mxu1 %v3186_v44 }
 0x409   :  { %3837 = vmatmul.f32.gmra.mxu0 %v7731_v51  ;;  %v3633_v36 = vpop.f32.mrf.mxu3  ;;  %v7980_v8 = vmax.f32 %v7960_v9, %v4448_v57  ;;  %v3118_v10 = vld [vmem:[#allocation11 + $0x10d8] sm:$0xff]  ;;  %4070 = vmatpush.msra.mxu2 %v3234_v62 }
 0x40a   :  { %3922 = vmatmul.f32.gmra.mxu2 %v7749_v11  ;;  %v3595_v47 = vpop.f32.mrf.mxu2  ;;  %v4254_v55 = vfloor.f32 %v4222_v48  ;;  %v3634_v56 = vadd.f32 %v3633_v36, %v3593_v22  ;;  %4108 = vmatpush.msra.mxu3 %v3310_v26  ;;  %v3182_v33 = vld [vmem:[#allocation11 + $0x12d8] sm:$0xff] }
 0x40b   :  { %v3554_v34 = vpop.f32.mrf.mxu1  ;;  %4610 = vrot.lane.b32.xlu2 %v7980_v8, %s6282_s20  ;;  %3985 = vmatpush.msra.mxu0 %v3118_v10  ;;  %v3230_v6 = vld [vmem:[#allocation11 + $0x1458] sm:$0xff] }
 0x40c   :  { %v7984_v54 = vmax.f32 %v4254_v55, 0.0  ;;  %v4152_v9 = vadd.f32 %v3634_v56, %v7505_v31  ;;  %v3555_v35 = vadd.f32 %v3554_v34, %v3513_v46  ;;  %v3306_v21 = vld [vmem:[#allocation11 + $0x16b8] sm:$0xff]  ;;  %4026 = vmatpush.msra.mxu1 %v3182_v33  ;;  %4071 = vmatpush.msra.mxu2 %v3230_v6 }
 0x40d   :  { %3878 = vmatmul.f32.gmra.mxu1 %v7738_v17  ;;  %v3114_v5 = vld [vmem:[#allocation11 + $0x10b8] sm:$0xff]  ;;  %4109 = vmatpush.msra.mxu3 %v3306_v21 }
 0x40e   :  { %v4194_v59 = vadd.f32 %v7952_v25, %v4152_v9  ;;  %v4458_v16 = vrot.slane %v7984_v54, 2  ;;  %v3178_v31 = vld [vmem:[#allocation11 + $0x12b8] sm:$0xff]  ;;  %v3596_v22 = vadd.f32 %v3595_v47, %v3555_v35  ;;  %3986 = vmatpush.msra.mxu0 %v3114_v5 }
 0x40f   :  { %v3226_v34 = vld [vmem:[#allocation11 + $0x1438] sm:$0xff]  ;;  %4027 = vmatpush.msra.mxu1 %v3178_v31 }
 0x410   :  { %3963 = vmatmul.f32.gmra.mxu3 %v7771_v1  ;;  %v3302_v61 = vld [vmem:[#allocation11 + $0x1698] sm:$0xff]  ;;  %v4226_v48 = vmul.f32 1.5258789e-05, %v4194_v59  ;;  %v4459_v57 = vsel %vm3383_vm8, %v4447_v29, %v4458_v16  ;;  %4072 = vmatpush.msra.mxu2 %v3226_v34 }
 0x411   :  { %3840 = vmatmul.f32.gmra.mxu0 %v7780_v45  ;;  %v3110_v44 = vld [vmem:[#allocation11 + $0x1098] sm:$0xff]  ;;  %v3636_v36 = vpop.f32.mrf.mxu3  ;;  %v7995_v10 = vmax.f32 %v7969_v38, %v4459_v57  ;;  %4110 = vmatpush.msra.mxu3 %v3302_v61 }
 0x412   :  { %3925 = vmatmul.f32.gmra.mxu2 %v7796_v14  ;;  %v3174_v62 = vld [vmem:[#allocation11 + $0x1298] sm:$0xff]  ;;  %v3598_v26 = vpop.f32.mrf.mxu2  ;;  %v4258_v46 = vfloor.f32 %v4226_v48  ;;  %v3637_v9 = vadd.f32 %v3636_v36, %v3596_v22  ;;  %v3516_v33 = vpop.f32.mrf.mxu0  ;;  %3987 = vmatpush.msra.mxu0 %v3110_v44 }
 0x413   :  { %v3222_v55 = vld [vmem:[#allocation11 + $0x1418] sm:$0xff]  ;;  %v3557_v6 = vpop.f32.mrf.mxu1  ;;  %4618 = vrot.lane.b32.xlu0 %v7995_v10, %s6282_s20  ;;  %4028 = vmatpush.msra.mxu1 %v3174_v62 }
 0x414   :  { %v3298_v56 = vld [vmem:[#allocation11 + $0x1678] sm:$0xff]  ;;  %v7999_v29 = vmax.f32 %v4258_v46, 0.0  ;;  %v4156_v47 = vadd.f32 %v3637_v9, %v7511_v18  ;;  %v3558_v38 = vadd.f32 %v3557_v6, %v3516_v33  ;;  %4073 = vmatpush.msra.mxu2 %v3222_v55 }
 0x415   :  { %3881 = vmatmul.f32.gmra.mxu1 %v7785_v23  ;;  %4111 = vmatpush.msra.mxu3 %v3298_v56  ;;  %v3106_v35 = vld [vmem:[#allocation11 + $0x1078] sm:$0xff] }
 0x416   :  { %v3170_v21 = vld [vmem:[#allocation11 + $0x1278] sm:$0xff]  ;;  %4322 = vst [vmem:[#allocation4 + $0x20] sm:$0xff] %v7999_v29  ;;  %v4198_v59 = vadd.f32 %v7952_v25, %v4156_v47  ;;  %v4466_v18 = vrot.slane %v7999_v29, 2  ;;  %3988 = vmatpush.msra.mxu0 %v3106_v35  ;;  %v3599_v48 = vadd.f32 %v3598_v26, %v3558_v38 }
 0x417   :  { %v3294_v5 = vld [vmem:[#allocation11 + $0x1658] sm:$0xff]  ;;  %4029 = vmatpush.msra.mxu1 %v3170_v21 }
 0x418   :  { %3966 = vmatmul.f32.gmra.mxu3 %v7816_v27  ;;  %v3102_v31 = vld [vmem:[#allocation11 + $0x1058] sm:$0xff]  ;;  %v4230_v44 = vmul.f32 1.5258789e-05, %v4198_v59  ;;  %v4467_v22 = vsel %vm3383_vm8, %v4458_v16, %v4466_v18 }
 0x419   :  { %3843 = vmatmul.f32.gmra.mxu0 %v7823_v24  ;;  %v3166_v34 = vld [vmem:[#allocation11 + $0x1258] sm:$0xff]  ;;  %4112 = vmatpush.msra.mxu3 %v3294_v5  ;;  %v8013_v55 = vmax.f32 %v7984_v54, %v4467_v22 }
 0x41a   :  { %3928 = vmatmul.f32.gmra.mxu2 %v7839_v13  ;;  %v3290_v61 = vld [vmem:[#allocation11 + $0x1638] sm:$0xff]  ;;  %v3639_v62 = vpop.f32.mrf.mxu3  ;;  %3989 = vmatpush.msra.mxu0 %v3102_v31  ;;  %v4262_v9 = vfloor.f32 %v4230_v44 }
 0x41b   :  { %v3098_v57 = vld [vmem:[#allocation11 + $0x1038] sm:$0xff]  ;;  %v3601_v36 = vpop.f32.mrf.mxu2  ;;  %4030 = vmatpush.msra.mxu1 %v3166_v34  ;;  %v3640_v33 = vadd.f32 %v3639_v62, %v3599_v48  ;;  %4113 = vmatpush.msra.mxu3 %v3290_v61 }
 0x41c   :  { %v3162_v56 = vld [vmem:[#allocation11 + $0x1238] sm:$0xff]  ;;  %4626 = vrot.lane.b32.xlu1 %v8013_v55, %s6282_s20  ;;  %3990 = vmatpush.msra.mxu0 %v3098_v57  ;;  %v4294_v16 = vmax.f32 %v4262_v9, 0.0  ;;  %v8686_v57 = vld [vmem:[#allocation24_spill] sm:$0xff] }
 0x41d   :  { %3884 = vmatmul.f32.gmra.mxu1 %v7828_v19  ;;  %v3286_v46 = vld [vmem:[#allocation11 + $0x1618] sm:$0xff]  ;;  %v4160_v26 = vadd.f32 %v3640_v33, %v7518_v7 }
 0x41e   :  { %v3519_v6 = vpop.f32.mrf.mxu0  ;;  %4031 = vmatpush.msra.mxu1 %v3162_v56  ;;  %4114 = vmatpush.msra.mxu3 %v3286_v46  ;;  %v3094_v54 = vld [vmem:[#allocation11 + $0x1018] sm:$0xff]  ;;  %4326 = vst [vmem:[#allocation4 + $0x70] sm:$0xff] %v4294_v16 }
 0x41f   :  { %v3158_v35 = vld [vmem:[#allocation11 + $0x1218] sm:$0xff]  ;;  %v4202_v21 = vadd.f32 %v7952_v25, %v4160_v26  ;;  %3991 = vmatpush.msra.mxu0 %v3094_v54 }
 0x420   :  { %3969 = vmatmul.f32.gmra.mxu3 %v7850_v12  ;;  %4032 = vmatpush.msra.mxu1 %v3158_v35  ;;  %v8687_v35 = vld [vmem:[#allocation23_spill] sm:$0xff]  ;;  %v4962_v29 = vld [vmem:[#allocation14 + $0xf8] sm:$0xff] }
 0x421   :  { %v3560_v47 = vpop.f32.mrf.mxu1  ;;  %3846 = vmatmul.f32.gmra.mxu0 %v7855_v32  ;;  %v4234_v5 = vmul.f32 1.5258789e-05, %v4202_v21 }
 0x422   :  { %v3561_v38 = vadd.f32 %v3560_v47, %v3519_v6  ;;  %3931 = vmatmul.f32.gmra.mxu2 %v7867_v2  ;;  %v3642_v59 = vpop.f32.mrf.mxu3  ;;  %5474 = vmatpush.msrb.mxu1 %v4962_v29  ;;  %v4990_v29 = vld [vmem:[#allocation14 + $0x1d8] sm:$0xff] }
 0x423   :  { %v4266_v34 = vfloor.f32 %v4234_v5 }
 0x424   :  { %v3602_v7 = vadd.f32 %v3601_v36, %v3561_v38 }
 0x425   :  { %3887 = vmatmul.f32.gmra.mxu1 %v7860_v20  ;;  %v3604_v31 = vpop.f32.mrf.mxu2  ;;  %v4298_v22 = vmax.f32 %v4266_v34, 0.0 }
 0x426   :  { %v3643_v61 = vadd.f32 %v3642_v59, %v3602_v7  ;;  %v3522_v44 = vpop.f32.mrf.mxu0 }
 0x427   :  { %4330 = vst [vmem:[#allocation4 + $0xa8] sm:$0xff] %v4298_v22 }
 0x428   :  { %v4164_v62 = vadd.f32 %v3643_v61, %v8686_v57  ;;  %3972 = vmatmul.f32.gmra.mxu3 %v7875_v49 }
 0x429   :  { %v3563_v48 = vpop.f32.mrf.mxu1  ;;  %3849 = vmatmul.f32.gmra.mxu0 %v7878_v52 }
 0x42a   :  { %v3564_v56 = vadd.f32 %v3563_v48, %v3522_v44  ;;  %v4206_v46 = vadd.f32 %v7952_v25, %v4164_v62  ;;  %4074 = vmatmul.f32.vlgmr.msra.gmra.mxu2 %v7589_v63  ;;  %v3645_v33 = vpop.f32.mrf.mxu3  ;;  %v8036_v48 = vperm.slane %v7949_v53, 1 }
 0x42c   :  { %v4238_v36 = vmul.f32 1.5258789e-05, %v4206_v46  ;;  %v3605_v9 = vadd.f32 %v3604_v31, %v3564_v56 }
 0x42d   :  { %3890 = vmatmul.f32.gmra.mxu1 %v7881_v50  ;;  %v3747_v6 = vpop.f32.mrf.mxu2 }
 0x42e   :  { %v4270_v47 = vfloor.f32 %v4238_v36  ;;  %v3646_v16 = vadd.f32 %v3645_v33, %v3605_v9  ;;  %v3665_v26 = vpop.f32.mrf.mxu0 }
 0x430   :  { %v4302_v54 = vmax.f32 %v4270_v47, 0.0  ;;  %v4168_v21 = vadd.f32 %v3646_v16, %v8687_v35  ;;  %4115 = vmatmul.f32.vlgmr.msra.gmra.mxu3 %v7607_v39 }
 0x431   :  { %v3706_v38 = vpop.f32.mrf.mxu1  ;;  %3992 = vmatmul.f32.vlgmr.msra.gmra.mxu0 %v7610_v0 }
 0x432   :  { %v3707_v5 = vadd.f32 %v3706_v38, %v3665_v26  ;;  %4334 = vst [vmem:[#allocation4 + $0x50] sm:$0xff] %v4302_v54  ;;  %v4210_v7 = vadd.f32 %v7952_v25, %v4168_v21  ;;  %4077 = vmatmul.f32.gmra.mxu2 %v7620_v4  ;;  %v3788_v31 = vpop.f32.mrf.mxu3 }
 0x434   :  { %v4242_v63 = vmul.f32 1.5258789e-05, %v4210_v7  ;;  %v3748_v59 = vadd.f32 %v3747_v6, %v3707_v5 }
 0x435   :  { %4033 = vmatmul.f32.vlgmr.msra.gmra.mxu1 %v7613_v15  ;;  %v3750_v34 = vpop.f32.mrf.mxu2  ;;  %v8688_v15 = vld [vmem:[#allocation25_spill] sm:$0xff] }
 0x436   :  { %v4274_v61 = vfloor.f32 %v4242_v63  ;;  %v3789_v44 = vadd.f32 %v3788_v31, %v3748_v59  ;;  %v3668_v22 = vpop.f32.mrf.mxu0  ;;  %v8690_v31 = vld [vmem:[#allocation27_spill] sm:$0xff] }
 0x438   :  { %v8038_v57 = vmax.f32 %v4274_v61, 0.0  ;;  %v4141_v62 = vadd.f32 %v3789_v44, %v8688_v15  ;;  %4118 = vmatmul.f32.gmra.mxu3 %v7640_v41 }
 0x439   :  { %v3709_v0 = vpop.f32.mrf.mxu1  ;;  %3995 = vmatmul.f32.gmra.mxu0 %v7647_v28  ;;  %v8689_v28 = vld [vmem:[#allocation26_spill] sm:$0xff] }
 0x43a   :  { %v3710_v25 = vadd.f32 %v3709_v0, %v3668_v22  ;;  %4338 = vst [vmem:[#allocation4 + $0x100] sm:$0xff] %v8038_v57  ;;  %v4183_v39 = vadd.f32 %v8036_v48, %v4141_v62  ;;  %4080 = vmatmul.f32.gmra.mxu2 %v7659_v30  ;;  %v3791_v46 = vpop.f32.mrf.mxu3 }
 0x43c   :  { %v4215_v4 = vmul.f32 1.5258789e-05, %v4183_v39  ;;  %v3751_v56 = vadd.f32 %v3750_v34, %v3710_v25 }
 0x43d   :  { %4036 = vmatmul.f32.gmra.mxu1 %v7650_v43  ;;  %v3753_v36 = vpop.f32.mrf.mxu2 }
 0x43e   :  { %v4247_v9 = vfloor.f32 %v4215_v4  ;;  %v3792_v33 = vadd.f32 %v3791_v46, %v3751_v56  ;;  %v3671_v6 = vpop.f32.mrf.mxu0  ;;  %v8691_v56 = vld [vmem:[#allocation28_spill] sm:$0xff] }
 0x440   :  { %v4279_v16 = vmax.f32 %v4247_v9, 0.0  ;;  %v4145_v26 = vadd.f32 %v3792_v33, %v8689_v28  ;;  %4121 = vmatmul.f32.gmra.mxu3 %v7679_v37 }
 0x441   :  { %v3712_v47 = vpop.f32.mrf.mxu1  ;;  %3998 = vmatmul.f32.gmra.mxu0 %v7688_v60 }
 0x442   :  { %v3713_v43 = vadd.f32 %v3712_v47, %v3671_v6  ;;  %4311 = vst [vmem:[#allocation4 + $0x68] sm:$0xff] %v4279_v16  ;;  %v4187_v41 = vadd.f32 %v8036_v48, %v4145_v26  ;;  %4083 = vmatmul.f32.gmra.mxu2 %v7704_v42  ;;  %v3794_v54 = vpop.f32.mrf.mxu3 }
 0x444   :  { %v4219_v30 = vmul.f32 1.5258789e-05, %v4187_v41  ;;  %v3754_v38 = vadd.f32 %v3753_v36, %v3713_v43 }
 0x445   :  { %4039 = vmatmul.f32.gmra.mxu1 %v7693_v40  ;;  %v3756_v35 = vpop.f32.mrf.mxu2 }
 0x446   :  { %v4251_v21 = vfloor.f32 %v4219_v30  ;;  %v3795_v5 = vadd.f32 %v3794_v54, %v3754_v38  ;;  %v3674_v7 = vpop.f32.mrf.mxu0 }
 0x448   :  { %v4283_v59 = vmax.f32 %v4251_v21, 0.0  ;;  %v4149_v60 = vadd.f32 %v3795_v5, %v8690_v31  ;;  %4124 = vmatmul.f32.gmra.mxu3 %v7724_v3 }
 0x449   :  { %v3715_v63 = vpop.f32.mrf.mxu1  ;;  %4001 = vmatmul.f32.gmra.mxu0 %v7731_v51  ;;  %v4375_v40 = vld [vmem:[#allocation4 + $0x68] sm:$0xfc] }
 0x44a   :  { %v3716_v34 = vadd.f32 %v3715_v63, %v3674_v7  ;;  %v4191_v37 = vadd.f32 %v8036_v48, %v4149_v60  ;;  %4086 = vmatmul.f32.gmra.mxu2 %v7749_v11  ;;  %v4449_v42 = vrot.slane %v4375_v40, 2  ;;  %v4450_v61 = vrot.slane %v4283_v59, 2  ;;  %v3797_v15 = vpop.f32.mrf.mxu3 }
 0x44c   :  { %v4223_v44 = vmul.f32 1.5258789e-05, %v4191_v37  ;;  %v3757_v22 = vadd.f32 %v3756_v35, %v3716_v34  ;;  %v4451_v0 = vsel %vm3383_vm8, %v4449_v42, %v4450_v61  ;;  %v8693_v37 = vld [vmem:[#allocation30_spill] sm:$0xff] }
 0x44d   :  { %4042 = vmatmul.f32.gmra.mxu1 %v7738_v17  ;;  %v3759_v62 = vpop.f32.mrf.mxu2  ;;  %v8060_v25 = vmax.f32 %v4279_v16, %v4451_v0 }
 0x44e   :  { %v4255_v51 = vfloor.f32 %v4223_v44  ;;  %v3798_v39 = vadd.f32 %v3797_v15, %v3757_v22  ;;  %v3677_v17 = vpop.f32.mrf.mxu0 }
 0x44f   :  { %4612 = vrot.lane.b32.xlu0 %v8060_v25, %s6282_s20 }
 0x450   :  { %v4287_v3 = vmax.f32 %v4255_v51, 0.0  ;;  %v4153_v11 = vadd.f32 %v3798_v39, %v8691_v56  ;;  %4127 = vmatmul.f32.gmra.mxu3 %v7771_v1  ;;  %v8692_v1 = vld [vmem:[#allocation29_spill] sm:$0xff] }
 0x451   :  { %v3718_v4 = vpop.f32.mrf.mxu1  ;;  %4004 = vmatmul.f32.gmra.mxu0 %v7780_v45 }
 0x452   :  { %v3719_v46 = vadd.f32 %v3718_v4, %v3677_v17  ;;  %v4195_v36 = vadd.f32 %v8036_v48, %v4153_v11  ;;  %4089 = vmatmul.f32.gmra.mxu2 %v7796_v14  ;;  %v4460_v9 = vrot.slane %v4287_v3, 2  ;;  %v3800_v16 = vpop.f32.mrf.mxu3 }
 0x454   :  { %v4227_v33 = vmul.f32 1.5258789e-05, %v4195_v36  ;;  %v3760_v6 = vadd.f32 %v3759_v62, %v3719_v46  ;;  %v4461_v47 = vsel %vm3383_vm8, %v4450_v61, %v4460_v9 }
 0x455   :  { %4045 = vmatmul.f32.gmra.mxu1 %v7785_v23  ;;  %v3762_v28 = vpop.f32.mrf.mxu2  ;;  %v8071_v26 = vmax.f32 %v4283_v59, %v4461_v47 }
 0x456   :  { %v4259_v43 = vfloor.f32 %v4227_v33  ;;  %v3801_v41 = vadd.f32 %v3800_v16, %v3760_v6  ;;  %v3680_v45 = vpop.f32.mrf.mxu0 }
 0x457   :  { %4620 = vrot.lane.b32.xlu1 %v8071_v26, %s6282_s20 }
 0x458   :  { %v4291_v23 = vmax.f32 %v4259_v43, 0.0  ;;  %v4157_v38 = vadd.f32 %v3801_v41, %v8692_v1  ;;  %4130 = vmatmul.f32.gmra.mxu3 %v7816_v27 }
 0x459   :  { %v3721_v30 = vpop.f32.mrf.mxu1  ;;  %4007 = vmatmul.f32.gmra.mxu0 %v7823_v24 }
 0x45a   :  { %v3722_v14 = vadd.f32 %v3721_v30, %v3680_v45  ;;  %v4199_v54 = vadd.f32 %v8036_v48, %v4157_v38  ;;  %4092 = vmatmul.f32.gmra.mxu2 %v7839_v13  ;;  %v4468_v35 = vrot.slane %v4291_v23, 2  ;;  %v3803_v63 = vpop.f32.mrf.mxu3  ;;  %v8695_v45 = vld [vmem:[#allocation32_spill] sm:$0xff] }
 0x45c   :  { %v4231_v21 = vmul.f32 1.5258789e-05, %v4199_v54  ;;  %v3763_v5 = vadd.f32 %v3762_v28, %v3722_v14  ;;  %v4469_v7 = vsel %vm3383_vm8, %v4460_v9, %v4468_v35 }
 0x45d   :  { %4048 = vmatmul.f32.gmra.mxu1 %v7828_v19  ;;  %v3765_v59 = vpop.f32.mrf.mxu2  ;;  %v8082_v31 = vmax.f32 %v4287_v3, %v4469_v7  ;;  %v8694_v3 = vld [vmem:[#allocation31_spill] sm:$0xff] }
 0x45e   :  { %v4263_v60 = vfloor.f32 %v4231_v21  ;;  %v3804_v34 = vadd.f32 %v3803_v63, %v3763_v5  ;;  %v3683_v24 = vpop.f32.mrf.mxu0  ;;  %v8107_v63 = vperm.slane %v7949_v53, 2 }
 0x460   :  { %v4295_v19 = vmax.f32 %v4263_v60, 0.0  ;;  %v4161_v42 = vadd.f32 %v3804_v34, %v8693_v37  ;;  %4133 = vmatmul.f32.gmra.mxu3 %v7850_v12 }
 0x461   :  { %4010 = vmatmul.f32.gmra.mxu0 %v7855_v32 }
 0x462   :  { %v3724_v40 = vpop.f32.mrf.mxu1  ;;  %v4203_v27 = vadd.f32 %v8036_v48, %v4161_v42  ;;  %4095 = vmatmul.f32.gmra.mxu2 %v7867_v2  ;;  %v4476_v13 = vrot.slane %v4295_v19, 2 }
 0x463   :  { %v3725_v61 = vadd.f32 %v3724_v40, %v3683_v24  ;;  %v3806_v15 = vpop.f32.mrf.mxu3  ;;  %v8696_v24 = vld [vmem:[#allocation33_spill] sm:$0xff] }
 0x464   :  { %v4235_v44 = vmul.f32 1.5258789e-05, %v4203_v27  ;;  %v4477_v0 = vsel %vm3383_vm8, %v4468_v35, %v4476_v13 }
 0x465   :  { %4051 = vmatmul.f32.gmra.mxu1 %v7860_v20  ;;  %v3766_v22 = vadd.f32 %v3765_v59, %v3725_v61  ;;  %v3768_v62 = vpop.f32.mrf.mxu2  ;;  %v8091_v51 = vmax.f32 %v4291_v23, %v4477_v0 }
 0x466   :  { %v4267_v39 = vfloor.f32 %v4235_v44  ;;  %v3686_v32 = vpop.f32.mrf.mxu0 }
 0x467   :  { %v3807_v17 = vadd.f32 %v3806_v15, %v3766_v22 }
 0x468   :  { %v4299_v20 = vmax.f32 %v4267_v39, 0.0  ;;  %4136 = vmatmul.f32.gmra.mxu3 %v7875_v49 }
 0x469   :  { %v4165_v56 = vadd.f32 %v3807_v17, %v8694_v3  ;;  %4013 = vmatmul.f32.gmra.mxu0 %v7878_v52  ;;  %v8697_v17 = vld [vmem:[#allocation34_spill] sm:$0xff] }
 0x46a   :  { %v3727_v4 = vpop.f32.mrf.mxu1  ;;  %v4484_v2 = vrot.slane %v4299_v20, 2 }
 0x46b   :  { %v3728_v11 = vadd.f32 %v3727_v4, %v3686_v32  ;;  %v4207_v12 = vadd.f32 %v8036_v48, %v4165_v56  ;;  %v3809_v33 = vpop.f32.mrf.mxu3 }
 0x46c   :  { %v4485_v9 = vsel %vm3383_vm8, %v4476_v13, %v4484_v2 }
 0x46d   :  { %4054 = vmatmul.f32.gmra.mxu1 %v7881_v50  ;;  %v4239_v46 = vmul.f32 1.5258789e-05, %v4207_v12  ;;  %v3769_v36 = vadd.f32 %v3768_v62, %v3728_v11  ;;  %v3911_v6 = vpop.f32.mrf.mxu2  ;;  %v8099_v47 = vmax.f32 %v4295_v19, %v4485_v9 }
 0x46e   :  { %v3829_v41 = vpop.f32.mrf.mxu0 }
 0x46f   :  { %v4271_v16 = vfloor.f32 %v4239_v46  ;;  %v3810_v28 = vadd.f32 %v3809_v33, %v3769_v36 }
 0x471   :  { %v4303_v52 = vmax.f32 %v4271_v16, 0.0  ;;  %v4169_v50 = vadd.f32 %v3810_v28, %v8695_v45 }
 0x472   :  { %v3870_v43 = vpop.f32.mrf.mxu1 }
 0x473   :  { %v3871_v30 = vadd.f32 %v3870_v43, %v3829_v41  ;;  %v4211_v23 = vadd.f32 %v8036_v48, %v4169_v50  ;;  %v4492_v49 = vrot.slane %v4303_v52, 2  ;;  %v3952_v54 = vpop.f32.mrf.mxu3 }
 0x475   :  { %v4243_v1 = vmul.f32 1.5258789e-05, %v4211_v23  ;;  %v3912_v38 = vadd.f32 %v3911_v6, %v3871_v30  ;;  %v4493_v14 = vsel %vm3383_vm8, %v4484_v2, %v4492_v49  ;;  %v3914_v35 = vpop.f32.mrf.mxu2  ;;  %v8698_v6 = vld [vmem:[#allocation35_spill] sm:$0xff] }
 0x476   :  { %v8104_v21 = vmax.f32 %v4299_v20, %v4493_v14  ;;  %v3832_v59 = vpop.f32.mrf.mxu0 }
 0x477   :  { %v4275_v5 = vfloor.f32 %v4243_v1  ;;  %v3953_v7 = vadd.f32 %v3952_v54, %v3912_v38 }
 0x479   :  { %v8109_v34 = vmax.f32 %v4275_v5, 0.0  ;;  %v4142_v48 = vadd.f32 %v3953_v7, %v8696_v24 }
 0x47a   :  { %v3873_v60 = vpop.f32.mrf.mxu1 }
 0x47b   :  { %v3874_v40 = vadd.f32 %v3873_v60, %v3832_v59  ;;  %v4184_v19 = vadd.f32 %v8107_v63, %v4142_v48  ;;  %v4500_v37 = vrot.slane %v8109_v34, 2  ;;  %v3955_v13 = vpop.f32.mrf.mxu3  ;;  %v8699_v59 = vld [vmem:[#allocation36_spill] sm:$0xff] }
 0x47d   :  { %v4216_v42 = vmul.f32 1.5258789e-05, %v4184_v19  ;;  %v3915_v61 = vadd.f32 %v3914_v35, %v3874_v40  ;;  %v4501_v27 = vsel %vm3383_vm8, %v4492_v49, %v4500_v37  ;;  %v3917_v53 = vpop.f32.mrf.mxu2 }
 0x47e   :  { %v8117_v44 = vmax.f32 %v4303_v52, %v4501_v27  ;;  %v3835_v15 = vpop.f32.mrf.mxu0 }
 0x47f   :  { %v4248_v22 = vfloor.f32 %v4216_v42  ;;  %v3956_v0 = vadd.f32 %v3955_v13, %v3915_v61 }
 0x481   :  { %v4280_v39 = vmax.f32 %v4248_v22, 0.0  ;;  %v4146_v32 = vadd.f32 %v3956_v0, %v8697_v17  ;;  %v8700_v17 = vld [vmem:[#allocation37_spill] sm:$0xff] }
 0x482   :  { %v3876_v62 = vpop.f32.mrf.mxu1 }
 0x483   :  { %v3877_v4 = vadd.f32 %v3876_v62, %v3835_v15  ;;  %4312 = vst [vmem:[#allocation4 + $0x30] sm:$0xff] %v4280_v39  ;;  %v4188_v20 = vadd.f32 %v8107_v63, %v4146_v32  ;;  %v3958_v11 = vpop.f32.mrf.mxu3 }
 0x485   :  { %v4220_v3 = vmul.f32 1.5258789e-05, %v4188_v20  ;;  %v3918_v56 = vadd.f32 %v3917_v53, %v3877_v4  ;;  %v3920_v12 = vpop.f32.mrf.mxu2 }
 0x486   :  { %v3838_v36 = vpop.f32.mrf.mxu0 }
 0x487   :  { %v4252_v2 = vfloor.f32 %v4220_v3  ;;  %v3959_v46 = vadd.f32 %v3958_v11, %v3918_v56 }
 0x489   :  { %v4284_v33 = vmax.f32 %v4252_v2, 0.0  ;;  %v4150_v16 = vadd.f32 %v3959_v46, %v8698_v6 }
 0x48a   :  { %v3879_v9 = vpop.f32.mrf.mxu1  ;;  %v4376_v43 = vld [vmem:[#allocation4 + $0x30] sm:$0xfc] }
 0x48b   :  { %v3880_v28 = vadd.f32 %v3879_v9, %v3838_v36  ;;  %v4192_v41 = vadd.f32 %v8107_v63, %v4150_v16  ;;  %v4452_v52 = vrot.slane %v4376_v43, 2  ;;  %v4453_v45 = vrot.slane %v4284_v33, 2  ;;  %v3961_v49 = vpop.f32.mrf.mxu3 }
 0x48d   :  { %v4224_v50 = vmul.f32 1.5258789e-05, %v4192_v41  ;;  %v3921_v30 = vadd.f32 %v3920_v12, %v3880_v28  ;;  %v4454_v23 = vsel %vm3383_vm8, %v4452_v52, %v4453_v45  ;;  %v3923_v1 = vpop.f32.mrf.mxu2 }
 0x48e   :  { %v8124_v38 = vmax.f32 %v4280_v39, %v4454_v23  ;;  %v3841_v5 = vpop.f32.mrf.mxu0 }
 0x48f   :  { %v4256_v14 = vfloor.f32 %v4224_v50  ;;  %v3962_v54 = vadd.f32 %v3961_v49, %v3921_v30 }
 0x490   :  { %4614 = vrot.lane.b32.xlu1 %v8124_v38, %s6282_s20 }
 0x491   :  { %v4288_v7 = vmax.f32 %v4256_v14, 0.0  ;;  %v4154_v60 = vadd.f32 %v3962_v54, %v8699_v59 }
 0x492   :  { %v3882_v35 = vpop.f32.mrf.mxu1 }
 0x493   :  { %v3883_v24 = vadd.f32 %v3882_v35, %v3841_v5  ;;  %v4196_v48 = vadd.f32 %v8107_v63, %v4154_v60  ;;  %v4462_v40 = vrot.slane %v4288_v7, 2  ;;  %v3964_v27 = vpop.f32.mrf.mxu3  ;;  %v8701_v60 = vld [vmem:[#allocation38_spill] sm:$0xff] }
 0x495   :  { %v4228_v19 = vmul.f32 1.5258789e-05, %v4196_v48  ;;  %v3924_v42 = vadd.f32 %v3923_v1, %v3883_v24  ;;  %v4463_v61 = vsel %vm3383_vm8, %v4453_v45, %v4462_v40  ;;  %v3926_v13 = vpop.f32.mrf.mxu2 }
 0x496   :  { %v8131_v53 = vmax.f32 %v4284_v33, %v4463_v61  ;;  %v3844_v62 = vpop.f32.mrf.mxu0 }
 0x497   :  { %v4260_v22 = vfloor.f32 %v4228_v19  ;;  %v3965_v0 = vadd.f32 %v3964_v27, %v3924_v42 }
 0x498   :  { %4622 = vrot.lane.b32.xlu2 %v8131_v53, %s6282_s20 }
 0x499   :  { %v4292_v39 = vmax.f32 %v4260_v22, 0.0  ;;  %v4158_v32 = vadd.f32 %v3965_v0, %v8700_v17 }
 0x49a   :  { %v3885_v15 = vpop.f32.mrf.mxu1 }
 0x49b   :  { %v3886_v4 = vadd.f32 %v3885_v15, %v3844_v62  ;;  %v4200_v20 = vadd.f32 %v8107_v63, %v4158_v32  ;;  %v4470_v3 = vrot.slane %v4292_v39, 2  ;;  %v3967_v2 = vpop.f32.mrf.mxu3  ;;  %v8702_v32 = vld [vmem:[#allocation39_spill] sm:$0xff] }
 0x49d   :  { %v4232_v56 = vmul.f32 1.5258789e-05, %v4200_v20  ;;  %v3927_v11 = vadd.f32 %v3926_v13, %v3886_v4  ;;  %v4471_v12 = vsel %vm3383_vm8, %v4462_v40, %v4470_v3  ;;  %v3929_v46 = vpop.f32.mrf.mxu2 }
 0x49e   :  { %v8138_v36 = vmax.f32 %v4288_v7, %v4471_v12  ;;  %v3847_v6 = vpop.f32.mrf.mxu0 }
 0x49f   :  { %v4264_v9 = vfloor.f32 %v4232_v56  ;;  %v3968_v33 = vadd.f32 %v3967_v2, %v3927_v11 }
 0x4a0   :  { %4630 = vrot.lane.b32.xlu0 %v8138_v36, %s6282_s20 }
 0x4a1   :  { %v4296_v28 = vmax.f32 %v4264_v9, 0.0  ;;  %v4162_v43 = vadd.f32 %v3968_v33, %v7844_v58 }
 0x4a2   :  { %v3888_v16 = vpop.f32.mrf.mxu1 }
 0x4a3   :  { %v3889_v41 = vadd.f32 %v3888_v16, %v3847_v6  ;;  %v4204_v52 = vadd.f32 %v8107_v63, %v4162_v43  ;;  %v4478_v45 = vrot.slane %v4296_v28, 2  ;;  %v3970_v49 = vpop.f32.mrf.mxu3 }
 0x4a5   :  { %v4236_v50 = vmul.f32 1.5258789e-05, %v4204_v52  ;;  %v3930_v30 = vadd.f32 %v3929_v46, %v3889_v41  ;;  %v4479_v23 = vsel %vm3383_vm8, %v4470_v3, %v4478_v45  ;;  %v3932_v1 = vpop.f32.mrf.mxu2 }
 0x4a6   :  { %v8145_v14 = vmax.f32 %v4292_v39, %v4479_v23  ;;  %v3850_v5 = vpop.f32.mrf.mxu0  ;;  %v8164_v23 = vpop.permute.xlu0 %4618 }
 0x4a7   :  { %v4268_v54 = vfloor.f32 %v4236_v50  ;;  %v3971_v35 = vadd.f32 %v3970_v49, %v3930_v30  ;;  %v8703_v50 = vld [vmem:[#allocation40_spill] sm:$0xff] }
 0x4a9   :  { %v4300_v59 = vmax.f32 %v4268_v54, 0.0  ;;  %v4166_v24 = vadd.f32 %v3971_v35, %v8701_v60 }
 0x4aa   :  { %v3891_v7 = vpop.f32.mrf.mxu1 }
 0x4ab   :  { %v3892_v58 = vadd.f32 %v3891_v7, %v3850_v5  ;;  %v4208_v48 = vadd.f32 %v8107_v63, %v4166_v24  ;;  %v4486_v40 = vrot.slane %v4300_v59, 2  ;;  %v3973_v27 = vpop.f32.mrf.mxu3 }
 0x4ad   :  { %v4240_v19 = vmul.f32 1.5258789e-05, %v4208_v48  ;;  %v3933_v42 = vadd.f32 %v3932_v1, %v3892_v58  ;;  %v4487_v61 = vsel %vm3383_vm8, %v4478_v45, %v4486_v40  ;;  %v4075_v13 = vpop.f32.mrf.mxu2 }
 0x4ae   :  { %v8150_v22 = vmax.f32 %v4296_v28, %v4487_v61  ;;  %v3993_v62 = vpop.f32.mrf.mxu0  ;;  %v6091_v28 = vld [vmem:[#allocation12] sm:$0xf] }
 0x4af   :  { %v4272_v0 = vfloor.f32 %v4240_v19  ;;  %v3974_v15 = vadd.f32 %v3973_v27, %v3933_v42  ;;  %v8159_v43 = vperm.slane %v6091_v28, 3  ;;  %v8704_v42 = vld [vmem:[#allocation41_spill] sm:$0xff] }
 0x4b0   :  { %4646 = vrot.lane.b32.xlu1 %v8150_v22, %s6282_s20 }
 0x4b1   :  { %v4304_v17 = vmax.f32 %v4272_v0, 0.0  ;;  %v4170_v4 = vadd.f32 %v3974_v15, %v8702_v32 }
 0x4b2   :  { %v4034_v39 = vpop.f32.mrf.mxu1 }
 0x4b3   :  { %v4035_v20 = vadd.f32 %v4034_v39, %v3993_v62  ;;  %v4212_v3 = vadd.f32 %v8107_v63, %v4170_v4  ;;  %v4494_v56 = vrot.slane %v4304_v17, 2  ;;  %v4116_v46 = vpop.f32.mrf.mxu3 }
 0x4b5   :  { %v4244_v11 = vmul.f32 1.5258789e-05, %v4212_v3  ;;  %v4076_v12 = vadd.f32 %v4075_v13, %v4035_v20  ;;  %v4495_v2 = vsel %vm3383_vm8, %v4486_v40, %v4494_v56  ;;  %v4078_v9 = vpop.f32.mrf.mxu2  ;;  %v4611_v13 = vpop.permute.xlu2 %4610 }
 0x4b6   :  { %v8157_v33 = vmax.f32 %v4300_v59, %v4495_v2  ;;  %v3996_v41 = vpop.f32.mrf.mxu0 }
 0x4b7   :  { %v4276_v6 = vfloor.f32 %v4244_v11  ;;  %v4117_v16 = vadd.f32 %v4116_v46, %v4076_v12  ;;  %v8705_v46 = vld [vmem:[#allocation42_spill] sm:$0xff] }
 0x4b9   :  { %v8161_v45 = vmax.f32 %v4276_v6, 0.0  ;;  %v4143_v63 = vadd.f32 %v4117_v16, %v8703_v50 }
 0x4ba   :  { %v4037_v52 = vpop.f32.mrf.mxu1 }
 0x4bb   :  { %v4038_v30 = vadd.f32 %v4037_v52, %v3996_v41  ;;  %v4185_v49 = vadd.f32 %v8159_v43, %v4143_v63  ;;  %v4502_v1 = vrot.slane %v8161_v45, 2  ;;  %v4119_v7 = vpop.f32.mrf.mxu3 }
 0x4bd   :  { %v4217_v54 = vmul.f32 1.5258789e-05, %v4185_v49  ;;  %v4079_v35 = vadd.f32 %v4078_v9, %v4038_v30  ;;  %v4503_v5 = vsel %vm3383_vm8, %v4494_v56, %v4502_v1  ;;  %v4081_v59 = vpop.f32.mrf.mxu2 }
 0x4be   :  { %v8171_v60 = vmax.f32 %v4304_v17, %v4503_v5  ;;  %v3999_v48 = vpop.f32.mrf.mxu0 }
 0x4bf   :  { %v4249_v24 = vfloor.f32 %v4217_v54  ;;  %v4120_v58 = vadd.f32 %v4119_v7, %v4079_v35 }
 0x4c1   :  { %v4281_v19 = vmax.f32 %v4249_v24, 0.0  ;;  %v4147_v61 = vadd.f32 %v4120_v58, %v8704_v42  ;;  %v8174_v0 = vpop.permute.xlu0 %4612  ;;  %v8706_v58 = vld [vmem:[#allocation43_spill] sm:$0xff] }
 0x4c2   :  { %v4040_v40 = vpop.f32.mrf.mxu1  ;;  %v4675_v62 = vsel %vm4674_vm9, %v4611_v13, %v8174_v0 }
 0x4c3   :  { %v4041_v27 = vadd.f32 %v4040_v40, %v3999_v48  ;;  %4313 = vst [vmem:[#allocation4 + $0x138] sm:$0xff] %v4281_v19  ;;  %v4189_v15 = vadd.f32 %v8159_v43, %v4147_v61  ;;  %v8180_v39 = vmax.f32 %v7980_v8, %v4675_v62  ;;  %v4122_v4 = vpop.f32.mrf.mxu3 }
 0x4c5   :  { %v4221_v17 = vmul.f32 1.5258789e-05, %v4189_v15  ;;  %v4082_v32 = vadd.f32 %v4081_v59, %v4041_v27  ;;  %v4084_v20 = vpop.f32.mrf.mxu2  ;;  %4779 = vst [vmem:[#allocation1] sm:$0xff] %v8180_v39  ;;  %v4394_v27 = vld [vmem:[#allocation4 + $0xa8] sm:$0xff] }
 0x4c6   :  { %v4002_v11 = vpop.f32.mrf.mxu0 }
 0x4c7   :  { %v4253_v3 = vfloor.f32 %v4221_v17  ;;  %v4123_v56 = vadd.f32 %v4122_v4, %v4082_v32  ;;  %v8195_v32 = vld [vmem:[#allocation4 + $0x70] sm:$0xff] }
 0x4c9   :  { %v4285_v2 = vmax.f32 %v4253_v3, 0.0  ;;  %v4151_v9 = vadd.f32 %v4123_v56, %v8705_v46 }
 0x4ca   :  { %v4043_v12 = vpop.f32.mrf.mxu1  ;;  %v4377_v16 = vld [vmem:[#allocation4 + $0x138] sm:$0xfc] }
 0x4cb   :  { %v4044_v6 = vadd.f32 %v4043_v12, %v4002_v11  ;;  %v4193_v28 = vadd.f32 %v8159_v43, %v4151_v9  ;;  %v4455_v41 = vrot.slane %v4377_v16, 2  ;;  %v4456_v8 = vrot.slane %v4285_v2, 2  ;;  %v4125_v30 = vpop.f32.mrf.mxu3  ;;  %v8707_v9 = vld [vmem:[#allocation44_spill] sm:$0xff] }
 0x4cc   :  { %v4482_v11 = vrot.slane %v4394_v27, 2 }
 0x4cd   :  { %v4225_v52 = vmul.f32 1.5258789e-05, %v4193_v28  ;;  %v4085_v50 = vadd.f32 %v4084_v20, %v4044_v6  ;;  %v4457_v63 = vsel %vm3383_vm8, %v4455_v41, %v4456_v8  ;;  %v4087_v49 = vpop.f32.mrf.mxu2 }
 0x4ce   :  { %v8186_v54 = vmax.f32 %v4281_v19, %v4457_v63  ;;  %v4005_v7 = vpop.f32.mrf.mxu0 }
 0x4cf   :  { %v4257_v35 = vfloor.f32 %v4225_v52  ;;  %v4126_v5 = vadd.f32 %v4125_v30, %v4085_v50  ;;  %v4398_v30 = vld [vmem:[#allocation4 + $0x50] sm:$0xff] }
 0x4d0   :  { %4616 = vrot.lane.b32.xlu2 %v8186_v54, %s6282_s20 }
 0x4d1   :  { %v4289_v24 = vmax.f32 %v4257_v35, 0.0  ;;  %v4155_v48 = vadd.f32 %v4126_v5, %v8706_v58 }
 0x4d2   :  { %v4046_v59 = vpop.f32.mrf.mxu1 }
 0x4d3   :  { %v4047_v40 = vadd.f32 %v4046_v59, %v4005_v7  ;;  %v4197_v42 = vadd.f32 %v8159_v43, %v4155_v48  ;;  %v4464_v61 = vrot.slane %v4289_v24, 2  ;;  %v4128_v62 = vpop.f32.mrf.mxu3 }
 0x4d5   :  { %v4229_v13 = vmul.f32 1.5258789e-05, %v4197_v42  ;;  %v4088_v15 = vadd.f32 %v4087_v49, %v4047_v40  ;;  %v4465_v19 = vsel %vm3383_vm8, %v4456_v8, %v4464_v61  ;;  %v4090_v12 = vpop.f32.mrf.mxu2  ;;  %v4490_v40 = vrot.slane %v4398_v30, 2 }
 0x4d6   :  { %v8193_v17 = vmax.f32 %v4285_v2, %v4465_v19  ;;  %v4008_v3 = vpop.f32.mrf.mxu0  ;;  %v4474_v2 = vrot.slane %v8195_v32, 2 }
 0x4d7   :  { %v4261_v4 = vfloor.f32 %v4229_v13  ;;  %v4129_v20 = vadd.f32 %v4128_v62, %v4088_v15 }
 0x4d8   :  { %4628 = vrot.lane.b32.xlu2 %v8082_v31, %s6282_s20  ;;  %4624 = vrot.lane.b32.xlu0 %v8193_v17, %s6282_s20  ;;  %v4483_v41 = vsel %vm3383_vm8, %v4474_v2, %v4482_v11 }
 0x4d9   :  { %v4293_v46 = vmax.f32 %v4261_v4, 0.0  ;;  %v4159_v6 = vadd.f32 %v4129_v20, %v8707_v9  ;;  %v8209_v35 = vmax.f32 %v8195_v32, %v4483_v41  ;;  %v4491_v4 = vsel %vm3383_vm8, %v4482_v11, %v4490_v40  ;;  %v8709_v11 = vld [vmem:[#allocation46_spill] sm:$0xff] }
 0x4da   :  { %v4049_v56 = vpop.f32.mrf.mxu1  ;;  %v4946_v32 = vld [vmem:[#allocation14 + $0x78] sm:$0xff] }
 0x4db   :  { %v4050_v16 = vadd.f32 %v4049_v56, %v4008_v3  ;;  %v4201_v28 = vadd.f32 %v8159_v43, %v4159_v6  ;;  %v4472_v8 = vrot.slane %v4293_v46, 2  ;;  %v4131_v49 = vpop.f32.mrf.mxu3  ;;  %5454 = vmatpush.msrb.mxu0 %v4946_v32  ;;  %v4974_v32 = vld [vmem:[#allocation14 + $0x158] sm:$0xff] }
 0x4dd   :  { %v4233_v52 = vmul.f32 1.5258789e-05, %v4201_v28  ;;  %v4091_v50 = vadd.f32 %v4090_v12, %v4050_v16  ;;  %v4473_v63 = vsel %vm3383_vm8, %v4464_v61, %v4472_v8  ;;  %v8708_v61 = vld [vmem:[#allocation45_spill] sm:$0xff] }
 0x4de   :  { %v8211_v5 = vmax.f32 %v4289_v24, %v4473_v63  ;;  %v4011_v58 = vpop.f32.mrf.mxu0  ;;  %v4093_v24 = vpop.f32.mrf.mxu2 }
 0x4df   :  { %v4265_v7 = vfloor.f32 %v4233_v52  ;;  %v4132_v59 = vadd.f32 %v4131_v49, %v4091_v50  ;;  %v8225_v52 = vmax.f32 %v4394_v27, %v4491_v4  ;;  %v4498_v50 = vrot.slane %v8038_v57, 2  ;;  %v4961_v57 = vld [vmem:[#allocation14 + $0xf0] sm:$0xff] }
 0x4e0   :  { %4642 = vrot.lane.b32.xlu2 %v8209_v35, %s6282_s20  ;;  %4632 = vrot.lane.b32.xlu1 %v8211_v5, %s6282_s20 }
 0x4e1   :  { %v4297_v42 = vmax.f32 %v4265_v7, 0.0  ;;  %v4163_v13 = vadd.f32 %v4132_v59, %v8708_v61  ;;  %4644 = vrot.lane.b32.xlu0 %v8099_v47, %s6282_s20  ;;  %v4499_v27 = vsel %vm3383_vm8, %v4490_v40, %v4498_v50  ;;  %v8710_v40 = vld [vmem:[#allocation47_spill] sm:$0xff]  ;;  %5475 = vmatpush.msrb.mxu1 %v4961_v57 }
 0x4e2   :  { %v4052_v48 = vpop.f32.mrf.mxu1 }
 0x4e3   :  { %v4053_v15 = vadd.f32 %v4052_v48, %v4011_v58  ;;  %v4205_v19 = vadd.f32 %v8159_v43, %v4163_v13  ;;  %v4480_v62 = vrot.slane %v4297_v42, 2  ;;  %v4134_v12 = vpop.f32.mrf.mxu3 }
 0x4e5   :  { %v4237_v20 = vmul.f32 1.5258789e-05, %v4205_v19  ;;  %v4094_v3 = vadd.f32 %v4093_v24, %v4053_v15  ;;  %v4481_v56 = vsel %vm3383_vm8, %v4472_v8, %v4480_v62  ;;  %v8240_v24 = vmax.f32 %v4398_v30, %v4499_v27  ;;  %v4408_v27 = vld [vmem:[#allocation4 + $0x130] sm:$0x3] }
 0x4e6   :  { %v8223_v9 = vmax.f32 %v4293_v46, %v4481_v56  ;;  %v4014_v28 = vpop.f32.mrf.mxu0  ;;  %v4096_v59 = vpop.f32.mrf.mxu2 }
 0x4e7   :  { %v4269_v6 = vfloor.f32 %v4237_v20  ;;  %v4135_v16 = vadd.f32 %v4134_v12, %v4094_v3  ;;  %v8247_v56 = vpop.permute.xlu1 %4626 }
 0x4e8   :  { %4652 = vrot.lane.b32.xlu1 %v8104_v21, %s6282_s20 }
 0x4e9   :  { %v4301_v63 = vmax.f32 %v4269_v6, 0.0  ;;  %v4167_v49 = vadd.f32 %v4135_v16, %v8709_v11  ;;  %4650 = vrot.lane.b32.xlu0 %v8225_v52, %s6282_s20 }
 0x4ea   :  { %v4055_v41 = vpop.f32.mrf.mxu1 }
 0x4eb   :  { %v4056_v7 = vadd.f32 %v4055_v41, %v4014_v28  ;;  %v4209_v46 = vadd.f32 %v8159_v43, %v4167_v49  ;;  %v4488_v8 = vrot.slane %v4301_v63, 2  ;;  %v4137_v13 = vpop.f32.mrf.mxu3 }
 0x4ed   :  { %v4241_v58 = vmul.f32 1.5258789e-05, %v4209_v46  ;;  %v4097_v48 = vadd.f32 %v4096_v59, %v4056_v7  ;;  %v4489_v61 = vsel %vm3383_vm8, %v4480_v62, %v4488_v8  ;;  %v4409_v59 = vld [vmem:[#allocation4 + $0x48] sm:$0x3] }
 0x4ee   :  { %v8238_v15 = vmax.f32 %v4297_v42, %v4489_v61  ;;  %v4512_v61 = vrot.slane %v4409_v59, 2 }
 0x4ef   :  { %v4273_v19 = vfloor.f32 %v4241_v58  ;;  %v4138_v4 = vadd.f32 %v4137_v13, %v4097_v48  ;;  %v8257_v41 = vpop.permute.xlu1 %4620  ;;  %v4510_v48 = vrot.slane %v4408_v27, 2 }
 0x4f0   :  { %4648 = vrot.lane.b32.xlu2 %v8238_v15, %s6282_s20  ;;  %4658 = vrot.lane.b32.xlu1 %v8240_v24, %s6282_s20 }
 0x4f1   :  { %v4305_v20 = vmax.f32 %v4273_v19, 0.0  ;;  %v4171_v3 = vadd.f32 %v4138_v4, %v8710_v40 }
 0x4f3   :  { %v4213_v62 = vadd.f32 %v8159_v43, %v4171_v3  ;;  %v4496_v12 = vrot.slane %v4305_v20, 2 }
 0x4f5   :  { %v4245_v42 = vmul.f32 1.5258789e-05, %v4213_v62  ;;  %v4497_v30 = vsel %vm3383_vm8, %v4488_v8, %v4496_v12  ;;  %v4407_v8 = vld [vmem:[#allocation4 + $0xd0] sm:$0x3] }
 0x4f6   :  { %v8251_v6 = vmax.f32 %v4301_v63, %v4497_v30  ;;  %v4508_v58 = vrot.slane %v4407_v8, 2  ;;  %v4993_v30 = vld [vmem:[#allocation14 + $0x1f0] sm:$0xff] }
 0x4f7   :  { %v4277_v16 = vfloor.f32 %v4245_v42  ;;  %v4978_v42 = vld [vmem:[#allocation14 + $0x178] sm:$0xff] }
 0x4f8   :  { %4654 = vrot.lane.b32.xlu2 %v8157_v33, %s6282_s20  ;;  %4656 = vrot.lane.b32.xlu0 %v8251_v6, %s6282_s20 }
 0x4f9   :  { %v4309_v28 = vmax.f32 %v4277_v16, 0.0  ;;  %5494 = vmatpush.msrb.mxu2 %v4978_v42  ;;  %v8317_v16 = vpop.permute.xlu2 %4622 }
 0x4fb   :  { %v4504_v11 = vrot.slane %v4309_v28, 2 }
 0x4fd   :  { %v4505_v49 = vsel %vm3383_vm8, %v4496_v12, %v4504_v11  ;;  %v4513_v13 = vsel %vm3383_vm8, %v4504_v11, %v4512_v61  ;;  %v4944_v61 = vld [vmem:[#allocation14 + $0x68] sm:$0xff] }
 0x4fe   :  { %v8260_v43 = vmax.f32 %v4305_v20, %v4505_v49  ;;  %v4406_v20 = vld [vmem:[#allocation4 + $0xb0] sm:$0x3]  ;;  %v8293_v40 = vmax.f32 %v4309_v28, %v4513_v13  ;;  %v4943_v13 = vld [vmem:[#allocation14 + $0x60] sm:$0xff] }
 0x500   :  { %4660 = vrot.lane.b32.xlu2 %v8117_v44, %s6282_s20  ;;  %4662 = vrot.lane.b32.xlu0 %v8171_v60, %s6282_s20 }
 0x501   :  { %4664 = vrot.lane.b32.xlu1 %v8260_v43, %s6282_s20 }
 0x502   :  { %v4615_v63 = vpop.permute.xlu1 %4614 }
 0x503   :  { %v4676_v7 = vsel %vm4674_vm9, %v8174_v0, %v4615_v63  ;;  %v4511_v0 = vsel %vm3383_vm8, %v4502_v1, %v4510_v48  ;;  %v4354_v1 = vld [vmem:[#allocation4 + $0x20] sm:$0xff]  ;;  %v5070_v48 = vld [vmem:[#allocation14 + $0x458] sm:$0xff] }
 0x504   :  { %v8271_v46 = vmax.f32 %v8060_v25, %v4676_v7  ;;  %v4509_v25 = vsel %vm3383_vm8, %v4500_v37, %v4508_v58  ;;  %v8291_v4 = vmax.f32 %v8161_v45, %v4511_v0  ;;  %v4506_v37 = vrot.slane %v4406_v20, 2  ;;  %v4370_v45 = vld [vmem:[#allocation4 + $0x100] sm:$0xff] }
 0x505   :  { %v8288_v19 = vmax.f32 %v8109_v34, %v4509_v25  ;;  %v4475_v34 = vsel %vm3383_vm8, %v4466_v18, %v4474_v2  ;;  %v4994_v18 = vld [vmem:[#allocation14 + $0x1f8] sm:$0xff]  ;;  %v4945_v2 = vld [vmem:[#allocation14 + $0x70] sm:$0xff]  ;;  %v8711_v58 = vlaneseq  ;;  %v4960_v25 = vld [vmem:[#allocation14 + $0xe8] sm:$0xff] }
 0x506   :  { %4780 = vst [vmem:[#allocation1 + $0x9] sm:$0xff] %v8271_v46  ;;  %v4507_v3 = vsel %vm3383_vm8, %v4498_v50, %v4506_v37  ;;  %v8309_v62 = vmax.f32 %v4354_v1, %v4475_v34  ;;  %5514 = vmatpush.msrb.mxu3 %v4994_v18  ;;  %v4977_v50 = vld [vmem:[#allocation14 + $0x170] sm:$0xff]  ;;  %5455 = vmatpush.msrb.mxu0 %v4945_v2  ;;  %v4767_v7 = vrot.slane %v8271_v46, 7  ;;  %v4959_v20 = vld [vmem:[#allocation14 + $0xe0] sm:$0xff]  ;;  %v4942_v1 = vld [vmem:[#allocation14 + $0x58] sm:$0xff] }
 0x507   :  { %v8311_v12 = vmax.f32 %v4370_v45, %v4507_v3  ;;  %5495 = vmatpush.msrb.mxu2 %v4977_v50  ;;  %vm8324_vm11 = vcmp.lt.s32.totalorder %v8711_v58, 416  ;;  %5476 = vmatpush.msrb.mxu1 %v4960_v25  ;;  %v4975_v37 = vld [vmem:[#allocation14 + $0x160] sm:$0xff]  ;;  %v4678_v34 = vsel %vm4674_vm9, %v8164_v23, %v8257_v41  ;;  %v4679_v45 = vsel %vm4674_vm9, %v8257_v41, %v8317_v16  ;;  %v4958_v3 = vld [vmem:[#allocation14 + $0xd8] sm:$0xff]  ;;  %v4941_v18 = vld [vmem:[#allocation14 + $0x50] sm:$0xff] }
 0x508   :  { %4636 = vrot.lane.b32.xlu2 %v8091_v51, %s6282_s20  ;;  %4638 = vrot.lane.b32.xlu0 %v8145_v14, %s6282_s20  ;;  %v8341_v23 = vmax.f32 %v7995_v10, %v4678_v34  ;;  %v4957_v2 = vld [vmem:[#allocation14 + $0xd0] sm:$0xff]  ;;  %v8344_v57 = vmax.f32 %v8071_v26, %v4679_v45  ;;  %v4988_v26 = vld [vmem:[#allocation14 + $0x1c8] sm:$0xff]  ;;  %v4954_v58 = vld [vmem:[#allocation14 + $0xb8] sm:$0xff] }
 0x509   :  { %4640 = vrot.lane.b32.xlu1 %v8223_v9, %s6282_s20  ;;  %5515 = vmatpush.msrb.mxu3 %v4993_v30  ;;  %v4973_v41 = vld [vmem:[#allocation14 + $0x150] sm:$0xff]  ;;  %v4940_v30 = vld [vmem:[#allocation14 + $0x48] sm:$0xff]  ;;  %v4986_v25 = vld [vmem:[#allocation14 + $0x1b8] sm:$0xff] }
 0x50a   :  { %5456 = vmatpush.msrb.mxu0 %v4944_v61  ;;  %5477 = vmatpush.msrb.mxu1 %v4959_v20  ;;  %v4989_v50 = vld [vmem:[#allocation14 + $0x1d0] sm:$0xff]  ;;  %v4970_v61 = vld [vmem:[#allocation14 + $0x138] sm:$0xff]  ;;  %v4936_v20 = vld [vmem:[#allocation14 + $0x28] sm:$0xff] }
 0x50b   :  { %v4968_v34 = vld [vmem:[#allocation14 + $0x128] sm:$0xff]  ;;  %v4935_v45 = vld [vmem:[#allocation14 + $0x20] sm:$0xff] }
 0x50c   :  { %5457 = vmatpush.msrb.mxu0 %v4943_v13  ;;  %5478 = vmatpush.msrb.mxu1 %v4958_v3  ;;  %v4985_v13 = vld [vmem:[#allocation14 + $0x1b0] sm:$0xff]  ;;  %v4967_v3 = vld [vmem:[#allocation14 + $0x120] sm:$0xff] }
 0x50e   :  { %5458 = vmatpush.msrb.mxu0 %v4942_v1  ;;  %5479 = vmatpush.msrb.mxu1 %v4957_v2  ;;  %v4951_v1 = vld [vmem:[#allocation14 + $0xa0] sm:$0xff]  ;;  %v4934_v2 = vld [vmem:[#allocation14 + $0x18] sm:$0xff] }
 0x510   :  { %4668 = vrot.lane.b32.xlu2 %v8288_v19, %s6282_s20  ;;  %4670 = vrot.lane.b32.xlu0 %v8291_v4, %s6282_s20 }
 0x511   :  { %4672 = vrot.lane.b32.xlu1 %v8293_v40, %s6282_s20  ;;  %5459 = vmatpush.msrb.mxu0 %v4941_v18 }
 0x513   :  { %5460 = vmatpush.msrb.mxu0 %v4940_v30 }
 0x518   :  { %4634 = vrot.lane.b32.xlu2 %v8309_v62, %s6282_s20  ;;  %4666 = vrot.lane.b32.xlu0 %v8311_v12, %s6282_s20 }
 0x52a   :  { %v4617_v28 = vpop.permute.xlu2 %4616 }
 0x52b   :  { %v4677_v11 = vsel %vm4674_vm9, %v4615_v63, %v4617_v28  ;;  %v4734_v49 = vmax.f32 %v8186_v54, %v4617_v28  ;;  %v4976_v63 = vld [vmem:[#allocation14 + $0x168] sm:$0xff]  ;;  %v4771_v54 = vsel %vm4770_vm12, %v8180_v39, %v4767_v7  ;;  %v4991_v39 = vld [vmem:[#allocation14 + $0x1e0] sm:$0xff] }
 0x52c   :  { %v4733_v8 = vmax.f32 %v8124_v38, %v4677_v11  ;;  %v4992_v38 = vld [vmem:[#allocation14 + $0x1e8] sm:$0xff]  ;;  %5496 = vmatpush.msrb.mxu2 %v4976_v63  ;;  %v4955_v7 = vld [vmem:[#allocation14 + $0xc0] sm:$0xff]  ;;  %v8352_v63 = vpop.permute.xlu0 %4630 }
 0x52d   :  { %v4769_v27 = vrot.slane %v4734_v49, 5  ;;  %4782 = vst [vmem:[#allocation1 + $0x1b] sm:$0xff] %v4734_v49  ;;  %5516 = vmatpush.msrb.mxu3 %v4992_v38  ;;  %v4956_v28 = vld [vmem:[#allocation14 + $0xc8] sm:$0xff]  ;;  %v4939_v49 = vld [vmem:[#allocation14 + $0x40] sm:$0xff]  ;;  %v4953_v38 = vld [vmem:[#allocation14 + $0xb0] sm:$0xff] }
 0x52e   :  { %v4768_v59 = vrot.slane %v4733_v8, 6  ;;  %4781 = vst [vmem:[#allocation1 + $0x12] sm:$0xff] %v4733_v8  ;;  %5497 = vmatpush.msrb.mxu2 %v4975_v37  ;;  %v4972_v11 = vld [vmem:[#allocation14 + $0x148] sm:$0xff]  ;;  %5480 = vmatpush.msrb.mxu1 %v4956_v28  ;;  %v4971_v8 = vld [vmem:[#allocation14 + $0x140] sm:$0xff] }
 0x52f   :  { %5517 = vmatpush.msrb.mxu3 %v4991_v39  ;;  %5461 = vmatpush.msrb.mxu0 %v4939_v49  ;;  %v4952_v37 = vld [vmem:[#allocation14 + $0xa8] sm:$0xff] }
 0x530   :  { %v4773_v46 = vsel %vm4772_vm10, %v4768_v59, %v4769_v27  ;;  %5498 = vmatpush.msrb.mxu2 %v4974_v32  ;;  %5481 = vmatpush.msrb.mxu1 %v4955_v7  ;;  %v4987_v27 = vld [vmem:[#allocation14 + $0x1c0] sm:$0xff]  ;;  %v4938_v59 = vld [vmem:[#allocation14 + $0x38] sm:$0xff]  ;;  %v4984_v39 = vld [vmem:[#allocation14 + $0x1a8] sm:$0xff]  ;;  %v8356_v32 = vpop.permute.xlu1 %4646 }
 0x531   :  { %v4774_v0 = vsel %vm2297_vm7, %v4771_v54, %v4773_v46  ;;  %5518 = vmatpush.msrb.mxu3 %v4990_v29  ;;  %5462 = vmatpush.msrb.mxu0 %v4938_v59  ;;  %v4937_v46 = vld [vmem:[#allocation14 + $0x30] sm:$0xff]  ;;  %v4983_v29 = vld [vmem:[#allocation14 + $0x1a0] sm:$0xff] }
 0x532   :  { %4778 = vst.msk [vmem:[#allocation5] ss:$2 sm:$0xf] %vm8324_vm11, %v4774_v0  ;;  %5499 = vmatpush.msrb.mxu2 %v4973_v41  ;;  %v8350_v10 = vpop.permute.xlu2 %4628  ;;  %5482 = vmatpush.msrb.mxu1 %v4954_v58  ;;  %v4969_v0 = vld [vmem:[#allocation14 + $0x130] sm:$0xff]  ;;  %v4950_v41 = vld [vmem:[#allocation14 + $0x98] sm:$0xff] }
 0x533   :  { %5519 = vmatpush.msrb.mxu3 %v4989_v50  ;;  %5463 = vmatpush.msrb.mxu0 %v4937_v46  ;;  %v4966_v50 = vld [vmem:[#allocation14 + $0x118] sm:$0xff]  ;;  %v4682_v49 = vsel %vm4674_vm9, %v8350_v10, %v8352_v63  ;;  %v4965_v59 = vld [vmem:[#allocation14 + $0x110] sm:$0xff] }
 0x534   :  { %5500 = vmatpush.msrb.mxu2 %v4972_v11  ;;  %5483 = vmatpush.msrb.mxu1 %v4953_v38  ;;  %v4982_v11 = vld [vmem:[#allocation14 + $0x198] sm:$0xff]  ;;  %v8369_v46 = vmax.f32 %v8082_v31, %v4682_v49  ;;  %v4980_v38 = vld [vmem:[#allocation14 + $0x188] sm:$0xff] }
 0x535   :  { %v4784_v42 = vld [vmem:[#allocation1 + $0x4] ss:$9 sm:$0xff]  ;;  %5520 = vmatpush.msrb.mxu3 %v4988_v26  ;;  %5464 = vmatpush.msrb.mxu0 %v4936_v20  ;;  %v4792_v26 = vrot.slane %v8344_v57, 7 }
 0x536   :  { %4787 = vst.msk [vmem:[#allocation5 + $0x8] ss:$2 sm:$0xf] %vm8324_vm11, %v4784_v42  ;;  %5501 = vmatpush.msrb.mxu2 %v4971_v8  ;;  %5484 = vmatpush.msrb.mxu1 %v4952_v37  ;;  %v4933_v8 = vld [vmem:[#allocation14 + $0x10] sm:$0xff]  ;;  %v4931_v37 = vld [vmem:[#allocation14] sm:$0xff] }
 0x537   :  { %4801 = vst [vmem:[#allocation1] sm:$0xff] %v8341_v23  ;;  %5521 = vmatpush.msrb.mxu3 %v4987_v27  ;;  %5465 = vmatpush.msrb.mxu0 %v4935_v45  ;;  %v4949_v27 = vld [vmem:[#allocation14 + $0x90] sm:$0xff] }
 0x538   :  { %4802 = vst [vmem:[#allocation1 + $0x9] sm:$0xff] %v8344_v57  ;;  %5502 = vmatpush.msrb.mxu2 %v4970_v61  ;;  %5485 = vmatpush.msrb.mxu1 %v4951_v1  ;;  %v4932_v61 = vld [vmem:[#allocation14 + $0x8] sm:$0xff]  ;;  %v4979_v1 = vld [vmem:[#allocation14 + $0x180] sm:$0xff] }
 0x539   :  { %5522 = vmatpush.msrb.mxu3 %v4986_v25  ;;  %5466 = vmatpush.msrb.mxu0 %v4934_v2  ;;  %v4948_v25 = vld [vmem:[#allocation14 + $0x88] sm:$0xff]  ;;  %v5009_v2 = vld [vmem:[#allocation14 + $0x270] sm:$0xff] }
 0x53a   :  { %v8354_v54 = vpop.permute.xlu2 %4642  ;;  %5503 = vmatpush.msrb.mxu2 %v4969_v0  ;;  %5486 = vmatpush.msrb.mxu1 %v4950_v41  ;;  %v4795_v0 = vsel %vm4770_vm12, %v8341_v23, %v4792_v26  ;;  %v5026_v23 = vld [vmem:[#allocation14 + $0x2f8] sm:$0xff]  ;;  %v4814_v41 = vrot.slane %v8369_v46, 7 }
 0x53b   :  { %5523 = vmatpush.msrb.mxu3 %v4985_v13  ;;  %5467 = vmatpush.msrb.mxu0 %v4933_v8 }
 0x53c   :  { %5504 = vmatpush.msrb.mxu2 %v4968_v34  ;;  %5487 = vmatpush.msrb.mxu1 %v4949_v27  ;;  %v4947_v34 = vld [vmem:[#allocation14 + $0x80] sm:$0xff] }
 0x53d   :  { %5524 = vmatpush.msrb.mxu3 %v4984_v39  ;;  %5468 = vmatpush.msrb.mxu0 %v4932_v61  ;;  %v4963_v39 = vld [vmem:[#allocation14 + $0x100] sm:$0xff] }
 0x53e   :  { %5505 = vmatpush.msrb.mxu2 %v4967_v3  ;;  %5488 = vmatpush.msrb.mxu1 %v4948_v25  ;;  %v5010_v3 = vld [vmem:[#allocation14 + $0x278] sm:$0xff]  ;;  %v5023_v61 = vld [vmem:[#allocation14 + $0x2e0] sm:$0xff] }
 0x53f   :  { %5525 = vmatpush.msrb.mxu3 %v4983_v29  ;;  %5469 = vmatpush.msrb.mxu0 %v4931_v37  ;;  %v5039_v25 = vld [vmem:[#allocation14 + $0x360] sm:$0xff] }
 0x540   :  { %5506 = vmatpush.msrb.mxu2 %v4966_v50  ;;  %5489 = vmatpush.msrb.mxu1 %v4947_v34  ;;  %v5006_v34 = vld [vmem:[#allocation14 + $0x258] sm:$0xff] }
 0x541   :  { %5526 = vmatpush.msrb.mxu3 %v4982_v11  ;;  %5534 = vmatpush.msra.mxu0 %v5010_v3  ;;  %v5054_v3 = vld [vmem:[#allocation14 + $0x3d8] sm:$0xff] }
 0x542   :  { %5507 = vmatpush.msrb.mxu2 %v4965_v59  ;;  %5554 = vmatpush.msra.mxu1 %v5026_v23  ;;  %v5005_v23 = vld [vmem:[#allocation14 + $0x250] sm:$0xff] }
 0x543   :  { %5535 = vmatpush.msra.mxu0 %v5009_v2  ;;  %v5020_v2 = vld [vmem:[#allocation14 + $0x2c8] sm:$0xff] }
 0x54a   :  { %v4649_v42 = vpop.permute.xlu2 %4648  ;;  %v4625_v18 = vpop.permute.xlu0 %4624 }
 0x54b   :  { %v4680_v30 = vsel %vm4674_vm9, %v8317_v16, %v4625_v18  ;;  %v4738_v28 = vmax.f32 %v8193_v17, %v4625_v18  ;;  %v4981_v17 = vld [vmem:[#allocation14 + $0x190] sm:$0xff]  ;;  %v4689_v16 = vsel %vm4674_vm9, %v8356_v32, %v4649_v42  ;;  %v8374_v13 = vmax.f32 %v8238_v15, %v4649_v42  ;;  %v5058_v18 = vld [vmem:[#allocation14 + $0x3f8] sm:$0xff] }
 0x54c   :  { %v4737_v7 = vmax.f32 %v8131_v53, %v4680_v30  ;;  %v4964_v53 = vld [vmem:[#allocation14 + $0x108] sm:$0xff]  ;;  %5527 = vmatpush.msrb.mxu3 %v4981_v17  ;;  %v8378_v45 = vmax.f32 %v8150_v22, %v4689_v16  ;;  %v4681_v15 = vsel %vm4674_vm9, %v8247_v56, %v8350_v10  ;;  %v5042_v22 = vld [vmem:[#allocation14 + $0x378] sm:$0xff]  ;;  %v5025_v56 = vld [vmem:[#allocation14 + $0x2f0] sm:$0xff] }
 0x54d   :  { %v4794_v58 = vrot.slane %v4738_v28, 5  ;;  %4804 = vst [vmem:[#allocation1 + $0x1b] sm:$0xff] %v4738_v28  ;;  %5508 = vmatpush.msrb.mxu2 %v4964_v53  ;;  %v5041_v10 = vld [vmem:[#allocation14 + $0x370] sm:$0xff]  ;;  %v4851_v11 = vrot.slane %v8374_v13, 5  ;;  %v5024_v17 = vld [vmem:[#allocation14 + $0x2e8] sm:$0xff]  ;;  %5555 = vmatpush.msra.mxu1 %v5025_v56  ;;  %v5035_v56 = vld [vmem:[#allocation14 + $0x340] sm:$0xff] }
 0x54e   :  { %v4793_v57 = vrot.slane %v4737_v7, 6  ;;  %4803 = vst [vmem:[#allocation1 + $0x12] sm:$0xff] %v4737_v7  ;;  %5528 = vmatpush.msrb.mxu3 %v4980_v38  ;;  %v4850_v8 = vrot.slane %v8378_v45, 6  ;;  %v5056_v16 = vld [vmem:[#allocation14 + $0x3e8] sm:$0xff] }
 0x54f   :  { %5509 = vmatpush.msrb.mxu2 %v4963_v39  ;;  %5556 = vmatpush.msra.mxu1 %v5024_v17  ;;  %v5022_v39 = vld [vmem:[#allocation14 + $0x2d8] sm:$0xff] }
 0x550   :  { %v4796_v20 = vsel %vm4772_vm10, %v4793_v57, %v4794_v58  ;;  %5529 = vmatpush.msrb.mxu3 %v4979_v1 }
 0x551   :  { %v4797_v31 = vsel %vm2297_vm7, %v4795_v0, %v4796_v20  ;;  %5574 = vmatpush.msra.mxu2 %v5042_v22  ;;  %v5055_v0 = vld [vmem:[#allocation14 + $0x3e0] sm:$0xff]  ;;  %v4853_v20 = vsel %vm4772_vm10, %v4850_v8, %v4851_v11  ;;  %5557 = vmatpush.msra.mxu1 %v5023_v61  ;;  %v5053_v22 = vld [vmem:[#allocation14 + $0x3d0] sm:$0xff]  ;;  %v5050_v8 = vld [vmem:[#allocation14 + $0x3b8] sm:$0xff] }
 0x552   :  { %4800 = vst.msk [vmem:[#allocation5 + $0x10] ss:$2 sm:$0xf] %vm8324_vm11, %v4797_v31  ;;  %v8386_v29 = vpop.permute.xlu2 %4654  ;;  %v4633_v42 = vpop.permute.xlu1 %4632  ;;  %5594 = vmatpush.msra.mxu3 %v5058_v18  ;;  %v5038_v31 = vld [vmem:[#allocation14 + $0x358] sm:$0xff]  ;;  %v5004_v18 = vld [vmem:[#allocation14 + $0x248] sm:$0xff]  ;;  %v5015_v61 = vld [vmem:[#allocation14 + $0x2a0] sm:$0xff] }
 0x553   :  { %v4683_v50 = vsel %vm4674_vm9, %v8352_v63, %v4633_v42  ;;  %v4742_v30 = vmax.f32 %v8211_v5, %v4633_v42  ;;  %v4645_v28 = vpop.permute.xlu0 %4644  ;;  %v5057_v63 = vld [vmem:[#allocation14 + $0x3f0] sm:$0xff]  ;;  %v4739_v5 = vmax.f32 %v8013_v55, %v4681_v15  ;;  %5575 = vmatpush.msra.mxu2 %v5041_v10  ;;  %5558 = vmatpush.msra.mxu1 %v5022_v39  ;;  %v5051_v10 = vld [vmem:[#allocation14 + $0x3c0] sm:$0xff] }
 0x554   :  { %v4741_v26 = vmax.f32 %v8138_v36, %v4683_v50  ;;  %v4687_v49 = vsel %vm4674_vm9, %v8354_v54, %v4645_v28  ;;  %v4688_v7 = vsel %vm4674_vm9, %v4645_v28, %v8356_v32  ;;  %v5008_v36 = vld [vmem:[#allocation14 + $0x268] sm:$0xff]  ;;  %5595 = vmatpush.msra.mxu3 %v5057_v63  ;;  %v5021_v15 = vld [vmem:[#allocation14 + $0x2d0] sm:$0xff]  ;;  %v5019_v28 = vld [vmem:[#allocation14 + $0x2c0] sm:$0xff] }
 0x555   :  { %v4806_v27 = vld [vmem:[#allocation1 + $0x4] ss:$9 sm:$0xff]  ;;  %v4816_v59 = vrot.slane %v4742_v30, 5  ;;  %v8401_v58 = vmax.f32 %v8099_v47, %v4688_v7  ;;  %v8406_v55 = vmax.f32 %v8209_v35, %v4687_v49  ;;  %5536 = vmatpush.msra.mxu0 %v5008_v36  ;;  %v4817_v53 = vsel %vm4770_vm12, %v4739_v5, %v4814_v41  ;;  %5559 = vmatpush.msra.mxu1 %v5021_v15 }
 0x556   :  { %4809 = vst.msk [vmem:[#allocation5 + $0x18] ss:$2 sm:$0xf] %vm8324_vm11, %v4806_v27  ;;  %v4815_v54 = vrot.slane %v4741_v26, 6  ;;  %v5040_v32 = vld [vmem:[#allocation14 + $0x368] sm:$0xff]  ;;  %v5007_v47 = vld [vmem:[#allocation14 + $0x260] sm:$0xff]  ;;  %5596 = vmatpush.msra.mxu3 %v5056_v16 }
 0x557   :  { %4823 = vst [vmem:[#allocation1] sm:$0xff] %v4739_v5  ;;  %v4849_v57 = vrot.slane %v8401_v58, 7  ;;  %5576 = vmatpush.msra.mxu2 %v5040_v32  ;;  %5537 = vmatpush.msra.mxu0 %v5007_v47  ;;  %v5037_v42 = vld [vmem:[#allocation14 + $0x350] sm:$0xff]  ;;  %v5036_v41 = vld [vmem:[#allocation14 + $0x348] sm:$0xff]  ;;  %v5018_v49 = vld [vmem:[#allocation14 + $0x2b8] sm:$0xff] }
 0x558   :  { %4824 = vst [vmem:[#allocation1 + $0x9] sm:$0xff] %v8369_v46  ;;  %v4818_v38 = vsel %vm4772_vm10, %v4815_v54, %v4816_v59  ;;  %5597 = vmatpush.msra.mxu3 %v5055_v0  ;;  %v5052_v50 = vld [vmem:[#allocation14 + $0x3c8] sm:$0xff]  ;;  %5560 = vmatpush.msra.mxu1 %v5020_v2  ;;  %v5034_v7 = vld [vmem:[#allocation14 + $0x338] sm:$0xff]  ;;  %v5001_v27 = vld [vmem:[#allocation14 + $0x230] sm:$0xff] }
 0x559   :  { %v4819_v35 = vsel %vm2297_vm7, %v4817_v53, %v4818_v38  ;;  %4825 = vst [vmem:[#allocation1 + $0x12] sm:$0xff] %v4741_v26  ;;  %v4852_v37 = vsel %vm4770_vm12, %v8406_v55, %v4849_v57  ;;  %5577 = vmatpush.msra.mxu2 %v5039_v25  ;;  %5538 = vmatpush.msra.mxu0 %v5006_v34  ;;  %v5002_v26 = vld [vmem:[#allocation14 + $0x238] sm:$0xff]  ;;  %v5017_v59 = vld [vmem:[#allocation14 + $0x2b0] sm:$0xff]  ;;  %v5000_v32 = vld [vmem:[#allocation14 + $0x228] sm:$0xff] }
 0x55a   :  { %4822 = vst.msk [vmem:[#allocation5 + $0x20] ss:$2 sm:$0xf] %vm8324_vm11, %v4819_v35  ;;  %v4854_v46 = vsel %vm2297_vm7, %v4852_v37, %v4853_v20  ;;  %v8419_v1 = vpop.permute.xlu2 %4660  ;;  %5598 = vmatpush.msra.mxu3 %v5054_v3  ;;  %v4653_v11 = vpop.permute.xlu1 %4652  ;;  %5561 = vmatpush.msra.mxu1 %v5019_v28  ;;  %v5033_v36 = vld [vmem:[#allocation14 + $0x330] sm:$0xff]  ;;  %v5032_v57 = vld [vmem:[#allocation14 + $0x328] sm:$0xff]  ;;  %v4999_v47 = vld [vmem:[#allocation14 + $0x220] sm:$0xff] }
 0x55b   :  { %4826 = vst [vmem:[#allocation1 + $0x1b] sm:$0xff] %v4742_v30  ;;  %5578 = vmatpush.msra.mxu2 %v5038_v31  ;;  %5539 = vmatpush.msra.mxu0 %v5005_v23  ;;  %v5003_v30 = vld [vmem:[#allocation14 + $0x240] sm:$0xff]  ;;  %v4651_v5 = vpop.permute.xlu0 %4650  ;;  %v5049_v54 = vld [vmem:[#allocation14 + $0x3b0] sm:$0xff]  ;;  %v4691_v16 = vsel %vm4674_vm9, %v4653_v11, %v8386_v29  ;;  %v4998_v0 = vld [vmem:[#allocation14 + $0x218] sm:$0xff] }
 0x55c   :  { %4857 = vst.msk [vmem:[#allocation5 + $0x1] ss:$2 sm:$0xf] %vm8324_vm11, %v4854_v46  ;;  %5599 = vmatpush.msra.mxu3 %v5053_v22  ;;  %5562 = vmatpush.msra.mxu1 %v5018_v49  ;;  %v5031_v25 = vld [vmem:[#allocation14 + $0x320] sm:$0xff]  ;;  %v4752_v53 = vmax.f32 %v8104_v21, %v4691_v16  ;;  %v5014_v20 = vld [vmem:[#allocation14 + $0x298] sm:$0xff]  ;;  %v4997_v34 = vld [vmem:[#allocation14 + $0x210] sm:$0xff] }
 0x55d   :  { %5579 = vmatpush.msra.mxu2 %v5037_v42  ;;  %5540 = vmatpush.msra.mxu0 %v5004_v18  ;;  %v5047_v38 = vld [vmem:[#allocation14 + $0x3a0] sm:$0xff]  ;;  %v5046_v37 = vld [vmem:[#allocation14 + $0x398] sm:$0xff]  ;;  %v5013_v46 = vld [vmem:[#allocation14 + $0x290] sm:$0xff] }
 0x55e   :  { %5600 = vmatpush.msra.mxu3 %v5052_v50  ;;  %5563 = vmatpush.msra.mxu1 %v5017_v59  ;;  %v5029_v3 = vld [vmem:[#allocation14 + $0x310] sm:$0xff]  ;;  %v4871_v23 = vrot.slane %v4752_v53, 7  ;;  %v4996_v22 = vld [vmem:[#allocation14 + $0x208] sm:$0xff] }
 0x55f   :  { %5580 = vmatpush.msra.mxu2 %v5036_v41  ;;  %5541 = vmatpush.msra.mxu0 %v5003_v30  ;;  %v5045_v42 = vld [vmem:[#allocation14 + $0x390] sm:$0xff]  ;;  %v5012_v2 = vld [vmem:[#allocation14 + $0x288] sm:$0xff] }
 0x560   :  { %5601 = vmatpush.msra.mxu3 %v5051_v10  ;;  %v5028_v41 = vld [vmem:[#allocation14 + $0x308] sm:$0xff]  ;;  %v5027_v10 = vld [vmem:[#allocation14 + $0x300] sm:$0xff] }
 0x561   :  { %5581 = vmatpush.msra.mxu2 %v5035_v56  ;;  %5542 = vmatpush.msra.mxu0 %v5002_v26  ;;  %v5044_v28 = vld [vmem:[#allocation14 + $0x388] sm:$0xff]  ;;  %v4995_v56 = vld [vmem:[#allocation14 + $0x200] sm:$0xff] }
 0x562   :  { %v4828_v63 = vld [vmem:[#allocation1 + $0x4] ss:$9 sm:$0xff]  ;;  %v8425_v17 = vpop.permute.xlu2 %4636  ;;  %5602 = vmatpush.msra.mxu3 %v5050_v8  ;;  %v4659_v39 = vpop.permute.xlu1 %4658 }
 0x563   :  { %4860 = vst [vmem:[#allocation1 + $0x12] sm:$0xff] %v8378_v45  ;;  %5582 = vmatpush.msra.mxu2 %v5034_v7  ;;  %5543 = vmatpush.msra.mxu0 %v5001_v27  ;;  %v5016_v45 = vld [vmem:[#allocation14 + $0x2a8] sm:$0xff] }
 0x564   :  { %4861 = vst [vmem:[#allocation1 + $0x1b] sm:$0xff] %v8374_v13  ;;  %v5048_v13 = vld [vmem:[#allocation14 + $0x3a8] sm:$0xff]  ;;  %5603 = vmatpush.msra.mxu3 %v5049_v54  ;;  %5564 = vmatpush.msra.mxu1 %v5016_v45 }
 0x565   :  { %4831 = vst.msk [vmem:[#allocation5 + $0x28] ss:$2 sm:$0xf] %vm8324_vm11, %v4828_v63  ;;  %5583 = vmatpush.msra.mxu2 %v5033_v36  ;;  %5544 = vmatpush.msra.mxu0 %v5000_v32  ;;  %v4693_v63 = vsel %vm4674_vm9, %v4659_v39, %v8419_v1 }
 0x566   :  { %4858 = vst [vmem:[#allocation1] sm:$0xff] %v8406_v55  ;;  %5604 = vmatpush.msra.mxu3 %v5048_v13  ;;  %v5030_v55 = vld [vmem:[#allocation14 + $0x318] sm:$0xff]  ;;  %5565 = vmatpush.msra.mxu1 %v5015_v61  ;;  %v4755_v32 = vmax.f32 %v8240_v24, %v4693_v63  ;;  %v5072_v63 = vld [vmem:[#allocation14 + $0x468] sm:$0xff] }
 0x567   :  { %4859 = vst [vmem:[#allocation1 + $0x9] sm:$0xff] %v8401_v58  ;;  %5584 = vmatpush.msra.mxu2 %v5032_v57  ;;  %5545 = vmatpush.msra.mxu0 %v4999_v47  ;;  %v4690_v58 = vsel %vm4674_vm9, %v4651_v5, %v4653_v11 }
 0x568   :  { %5605 = vmatpush.msra.mxu3 %v5047_v38  ;;  %5566 = vmatpush.msra.mxu1 %v5014_v20 }
 0x569   :  { %5585 = vmatpush.msra.mxu2 %v5031_v25  ;;  %5546 = vmatpush.msra.mxu0 %v4998_v0 }
 0x56a   :  { %v4657_v35 = vpop.permute.xlu0 %4656  ;;  %5606 = vmatpush.msra.mxu3 %v5046_v37  ;;  %5567 = vmatpush.msra.mxu1 %v5013_v46 }
 0x56b   :  { %v4692_v31 = vsel %vm4674_vm9, %v8386_v29, %v4657_v35  ;;  %v4754_v21 = vmax.f32 %v8251_v6, %v4657_v35  ;;  %5586 = vmatpush.msra.mxu2 %v5030_v55  ;;  %5547 = vmatpush.msra.mxu0 %v4997_v34  ;;  %v4751_v29 = vmax.f32 %v8225_v52, %v4690_v58  ;;  %v8440_v6 = vpop.permute.xlu2 %4668  ;;  %v5043_v52 = vld [vmem:[#allocation14 + $0x380] sm:$0xff] }
 0x56c   :  { %v4753_v15 = vmax.f32 %v8157_v33, %v4692_v31  ;;  %5607 = vmatpush.msra.mxu3 %v5045_v42  ;;  %v5011_v33 = vld [vmem:[#allocation14 + $0x280] sm:$0xff]  ;;  %5568 = vmatpush.msra.mxu1 %v5012_v2 }
 0x56d   :  { %v4873_v18 = vrot.slane %v4754_v21, 5  ;;  %5587 = vmatpush.msra.mxu2 %v5029_v3  ;;  %5548 = vmatpush.msra.mxu0 %v4996_v22  ;;  %v4874_v11 = vsel %vm4770_vm12, %v4751_v29, %v4871_v23  ;;  %v4924_v3 = vld [vmem:[#allocation5] sm:$0xff] }
 0x56e   :  { %v4863_v50 = vld [vmem:[#allocation1 + $0x4] ss:$9 sm:$0xff]  ;;  %v4872_v30 = vrot.slane %v4753_v15, 6  ;;  %5608 = vmatpush.msra.mxu3 %v5044_v28  ;;  %5569 = vmatpush.msra.mxu1 %v5011_v33 }
 0x56f   :  { %4866 = vst.msk [vmem:[#allocation5 + $0x9] ss:$2 sm:$0xf] %vm8324_vm11, %v4863_v50  ;;  %5588 = vmatpush.msra.mxu2 %v5028_v41  ;;  %5549 = vmatpush.msra.mxu0 %v4995_v56  ;;  %v5090_v50 = vld [vmem:[#allocation14 + $0x4f8] sm:$0xff] }
 0x570   :  { %4881 = vst [vmem:[#allocation1 + $0x9] sm:$0xff] %v4752_v53  ;;  %v4875_v26 = vsel %vm4772_vm10, %v4872_v30, %v4873_v18  ;;  %5609 = vmatpush.msra.mxu3 %v5043_v52  ;;  %v5106_v28 = vld [vmem:[#allocation14 + $0x578] sm:$0xff] }
 0x571   :  { %4880 = vst [vmem:[#allocation1] sm:$0xff] %v4751_v29  ;;  %v4876_v49 = vsel %vm2297_vm7, %v4874_v11, %v4875_v26  ;;  %5589 = vmatpush.msra.mxu2 %v5027_v10  ;;  %v5122_v56 = vld [vmem:[#allocation14 + $0x5f8] sm:$0xff]  ;;  %v5073_v11 = vld [vmem:[#allocation14 + $0x470] sm:$0xff] }
 0x572   :  { %4879 = vst.msk [vmem:[#allocation5 + $0x11] ss:$2 sm:$0xf] %vm8324_vm11, %v4876_v49  ;;  %v4663_v7 = vpop.permute.xlu0 %4662  ;;  %v5089_v26 = vld [vmem:[#allocation14 + $0x4f0] sm:$0xff] }
 0x573   :  { %4882 = vst [vmem:[#allocation1 + $0x12] sm:$0xff] %v4753_v15  ;;  %v4694_v5 = vsel %vm4674_vm9, %v8419_v1, %v4663_v7  ;;  %v4665_v8 = vpop.permute.xlu1 %4664  ;;  %v4635_v13 = vpop.permute.xlu2 %4634 }
 0x574   :  { %4883 = vst [vmem:[#allocation1 + $0x1b] sm:$0xff] %v4754_v21  ;;  %v4756_v27 = vmax.f32 %v8117_v44, %v4694_v5  ;;  %v4695_v59 = vsel %vm4674_vm9, %v4663_v7, %v4665_v8  ;;  %v4758_v36 = vmax.f32 %v8260_v43, %v4665_v8  ;;  %v4684_v53 = vsel %vm4674_vm9, %v4635_v13, %v8425_v17  ;;  %v5121_v7 = vld [vmem:[#allocation14 + $0x5f0] sm:$0xff]  ;;  %v5088_v5 = vld [vmem:[#allocation14 + $0x4e8] sm:$0xff]  ;;  %v5103_v13 = vld [vmem:[#allocation14 + $0x560] sm:$0xff] }
 0x575   :  { %v4757_v54 = vmax.f32 %v8171_v60, %v4695_v59  ;;  %v4743_v55 = vmax.f32 %v8309_v62, %v4684_v53 }
 0x576   :  { %v4893_v16 = vrot.slane %v4756_v27, 7  ;;  %v4895_v45 = vrot.slane %v4758_v36, 5  ;;  %v4925_v15 = vld [vmem:[#allocation5 + $0x8] sm:$0xff] }
 0x577   :  { %v4894_v57 = vrot.slane %v4757_v54, 6 }
 0x578   :  { %v4896_v47 = vsel %vm4770_vm12, %v4755_v32, %v4893_v16  ;;  %v5120_v16 = vld [vmem:[#allocation14 + $0x5e8] sm:$0xff] }
 0x579   :  { %v4897_v1 = vsel %vm4772_vm10, %v4894_v57, %v4895_v45  ;;  %v5071_v45 = vld [vmem:[#allocation14 + $0x460] sm:$0xff] }
 0x57a   :  { %v4898_v61 = vsel %vm2297_vm7, %v4896_v47, %v4897_v1  ;;  %v4639_v25 = vpop.permute.xlu0 %4638  ;;  %v5087_v57 = vld [vmem:[#allocation14 + $0x4e0] sm:$0xff] }
 0x57b   :  { %v4885_v44 = vld [vmem:[#allocation1 + $0x4] ss:$9 sm:$0xff]  ;;  %4901 = vst.msk [vmem:[#allocation5 + $0x21] ss:$2 sm:$0xf] %vm8324_vm11, %v4898_v61  ;;  %v4685_v60 = vsel %vm4674_vm9, %v8425_v17, %v4639_v25  ;;  %v4641_v24 = vpop.permute.xlu1 %4640 }
 0x57c   :  { %4888 = vst.msk [vmem:[#allocation5 + $0x19] ss:$2 sm:$0xf] %vm8324_vm11, %v4885_v44  ;;  %v4744_v43 = vmax.f32 %v8091_v51, %v4685_v60  ;;  %v4686_v38 = vsel %vm4674_vm9, %v4639_v25, %v4641_v24  ;;  %v4746_v0 = vmax.f32 %v8223_v9, %v4641_v24  ;;  %v5119_v47 = vld [vmem:[#allocation14 + $0x5e0] sm:$0xff]  ;;  %v5086_v25 = vld [vmem:[#allocation14 + $0x4d8] sm:$0xff] }
 0x57d   :  { %4902 = vst [vmem:[#allocation1] sm:$0xff] %v4755_v32  ;;  %v4745_v20 = vmax.f32 %v8145_v14, %v4686_v38  ;;  %v5104_v32 = vld [vmem:[#allocation14 + $0x568] sm:$0xff]  ;;  %v5102_v44 = vld [vmem:[#allocation14 + $0x558] sm:$0xff]  ;;  %v5069_v38 = vld [vmem:[#allocation14 + $0x450] sm:$0xff] }
 0x57e   :  { %4903 = vst [vmem:[#allocation1 + $0x9] sm:$0xff] %v4756_v27  ;;  %v4836_v35 = vrot.slane %v4744_v43, 7  ;;  %v4838_v37 = vrot.slane %v4746_v0, 5  ;;  %v5118_v24 = vld [vmem:[#allocation14 + $0x5d8] sm:$0xff]  ;;  %v5085_v0 = vld [vmem:[#allocation14 + $0x4d0] sm:$0xff] }
 0x57f   :  { %4904 = vst [vmem:[#allocation1 + $0x12] sm:$0xff] %v4757_v54  ;;  %v4837_v17 = vrot.slane %v4745_v20, 6  ;;  %v5101_v20 = vld [vmem:[#allocation14 + $0x550] sm:$0xff] }
 0x580   :  { %4905 = vst [vmem:[#allocation1 + $0x1b] sm:$0xff] %v4758_v36  ;;  %v4839_v34 = vsel %vm4770_vm12, %v4743_v55, %v4836_v35  ;;  %v5117_v55 = vld [vmem:[#allocation14 + $0x5d0] sm:$0xff]  ;;  %v5068_v35 = vld [vmem:[#allocation14 + $0x448] sm:$0xff] }
 0x581   :  { %v4840_v58 = vsel %vm4772_vm10, %v4837_v17, %v4838_v37  ;;  %v5084_v37 = vld [vmem:[#allocation14 + $0x4c8] sm:$0xff] }
 0x582   :  { %v4841_v51 = vsel %vm2297_vm7, %v4839_v34, %v4840_v58  ;;  %v4671_v39 = vpop.permute.xlu0 %4670  ;;  %v4928_v60 = vld [vmem:[#allocation5 + $0x20] sm:$0xff]  ;;  %v5100_v17 = vld [vmem:[#allocation14 + $0x548] sm:$0xff] }
 0x583   :  { %4844 = vst.msk [vmem:[#allocation5 + $0x30] ss:$2 sm:$0xf] %vm8324_vm11, %v4841_v51  ;;  %v4673_v9 = vpop.permute.xlu1 %4672  ;;  %v4697_v62 = vsel %vm4674_vm9, %v8440_v6, %v4671_v39  ;;  %v4927_v27 = vld [vmem:[#allocation5 + $0x18] sm:$0xff]  ;;  %v5116_v34 = vld [vmem:[#allocation14 + $0x5c8] sm:$0xff]  ;;  %v5067_v58 = vld [vmem:[#allocation14 + $0x440] sm:$0xff] }
 0x584   :  { %v4698_v14 = vsel %vm4674_vm9, %v4671_v39, %v4673_v9  ;;  %v4762_v21 = vmax.f32 %v8293_v40, %v4673_v9  ;;  %v4760_v23 = vmax.f32 %v8288_v19, %v4697_v62  ;;  %v5074_v40 = vld [vmem:[#allocation14 + $0x478] sm:$0xff]  ;;  %v4926_v19 = vld [vmem:[#allocation5 + $0x10] sm:$0xff]  ;;  %v5083_v51 = vld [vmem:[#allocation14 + $0x4c0] sm:$0xff] }
 0x585   :  { %v4761_v31 = vmax.f32 %v8291_v4, %v4698_v14  ;;  %v5099_v39 = vld [vmem:[#allocation14 + $0x540] sm:$0xff]  ;;  %v5066_v14 = vld [vmem:[#allocation14 + $0x438] sm:$0xff] }
 0x586   :  { %v4917_v18 = vrot.slane %v4762_v21, 5  ;;  %v4915_v41 = vrot.slane %v4760_v23, 7  ;;  %v5115_v9 = vld [vmem:[#allocation14 + $0x5c0] sm:$0xff]  ;;  %v5082_v62 = vld [vmem:[#allocation14 + $0x4b8] sm:$0xff] }
 0x587   :  { %v4907_v46 = vld [vmem:[#allocation1 + $0x4] ss:$9 sm:$0xff]  ;;  %v4916_v22 = vrot.slane %v4761_v31, 6 }
 0x588   :  { %4910 = vst.msk [vmem:[#allocation5 + $0x29] ss:$2 sm:$0xf] %vm8324_vm11, %v4907_v46  ;;  %v5098_v31 = vld [vmem:[#allocation14 + $0x538] sm:$0xff]  ;;  %v5065_v46 = vld [vmem:[#allocation14 + $0x430] sm:$0xff] }
 0x589   :  { %5390 = vst [vmem:[#allocation1] ss:$4 sm:$0xff] %v4924_v3  ;;  %v4919_v30 = vsel %vm4772_vm10, %v4916_v22, %v4917_v18  ;;  %v5114_v21 = vld [vmem:[#allocation14 + $0x5b8] sm:$0xff]  ;;  %v5081_v3 = vld [vmem:[#allocation14 + $0x4b0] sm:$0xff] }
 0x58a   :  { %v4667_v42 = vpop.permute.xlu0 %4666  ;;  %5392 = vst [vmem:[#allocation1 + $0x20] ss:$4 sm:$0xff] %v4925_v15  ;;  %v5097_v22 = vld [vmem:[#allocation14 + $0x530] sm:$0xff] }
 0x58b   :  { %v4696_v2 = vsel %vm4674_vm9, %v4667_v42, %v8440_v6  ;;  %v5113_v18 = vld [vmem:[#allocation14 + $0x5b0] sm:$0xff] }
 0x58c   :  { %v4759_v4 = vmax.f32 %v8311_v12, %v4696_v2  ;;  %v5105_v12 = vld [vmem:[#allocation14 + $0x570] sm:$0xff]  ;;  %v5064_v2 = vld [vmem:[#allocation14 + $0x428] sm:$0xff] }
 0x58e   :  { %v4918_v29 = vsel %vm4770_vm12, %v4759_v4, %v4915_v41  ;;  %v5080_v41 = vld [vmem:[#allocation14 + $0x4a8] sm:$0xff] }
 0x58f   :  { %v4920_v52 = vsel %vm2297_vm7, %v4918_v29, %v4919_v30  ;;  %v5112_v29 = vld [vmem:[#allocation14 + $0x5a8] sm:$0xff]  ;;  %v5079_v30 = vld [vmem:[#allocation14 + $0x4a0] sm:$0xff] }
 0x590   :  { %v5393_v33 = vld.sshfl [vmem:[#allocation1] sm:$0xff pattern:$0x73625140]  ;;  %v5394_v10 = vld.sshfl [vmem:[#allocation1 + $0x8] sm:$0xff pattern:$0x73625140] }
 0x591   :  { %5470 = vmatmul.f32.vlgmr.msrb.gmra.mxu0 %v5393_v33  ;;  %5490 = vmatmul.f32.vlgmr.msrb.gmra.mxu1 %v5394_v10  ;;  %v5395_v6 = vld.sshfl [vmem:[#allocation1 + $0x10] sm:$0xff pattern:$0x73625140]  ;;  %v5396_v49 = vld.sshfl [vmem:[#allocation1 + $0x18] sm:$0xff pattern:$0x73625140] }
 0x592   :  { %5510 = vmatmul.f32.vlgmr.msrb.gmra.mxu2 %v5395_v6  ;;  %5530 = vmatmul.f32.vlgmr.msrb.gmra.mxu3 %v5396_v49  ;;  %5401 = vst [vmem:[#allocation1] ss:$4 sm:$0xff] %v4926_v19  ;;  %v5397_v8 = vld.sshfl [vmem:[#allocation1 + $0x20] sm:$0xff pattern:$0x73625140]  ;;  %v5063_v19 = vld [vmem:[#allocation14 + $0x420] sm:$0xff] }
 0x593   :  { %5614 = vmatpush.msrb.mxu0 %v5074_v40  ;;  %5634 = vmatpush.msrb.mxu1 %v5090_v50  ;;  %4923 = vst.msk [vmem:[#allocation5 + $0x31] ss:$2 sm:$0xf] %vm8324_vm11, %v4920_v52  ;;  %v5398_v59 = vld.sshfl [vmem:[#allocation1 + $0x28] sm:$0xff pattern:$0x73625140] }
 0x594   :  { %5654 = vmatpush.msrb.mxu2 %v5106_v28  ;;  %5674 = vmatpush.msrb.mxu3 %v5122_v56  ;;  %v5399_v36 = vld.sshfl [vmem:[#allocation1 + $0x30] sm:$0xff pattern:$0x73625140]  ;;  %v5400_v54 = vld.sshfl [vmem:[#allocation1 + $0x38] sm:$0xff pattern:$0x73625140] }
 0x595   :  { %5615 = vmatpush.msrb.mxu0 %v5073_v11  ;;  %5635 = vmatpush.msrb.mxu1 %v5089_v26  ;;  %5402 = vst [vmem:[#allocation1 + $0x20] ss:$4 sm:$0xff] %v4927_v27  ;;  %v4929_v40 = vld [vmem:[#allocation5 + $0x28] sm:$0xff]  ;;  %v5095_v28 = vld [vmem:[#allocation14 + $0x520] sm:$0xff]  ;;  %v5062_v33 = vld [vmem:[#allocation14 + $0x418] sm:$0xff] }
 0x596   :  { %5655 = vmatpush.msrb.mxu2 %v5105_v12  ;;  %5675 = vmatpush.msrb.mxu3 %v5121_v7  ;;  %v5096_v50 = vld [vmem:[#allocation14 + $0x528] sm:$0xff]  ;;  %v5111_v56 = vld [vmem:[#allocation14 + $0x5a0] sm:$0xff]  ;;  %v5078_v10 = vld [vmem:[#allocation14 + $0x498] sm:$0xff] }
 0x597   :  { %5616 = vmatpush.msrb.mxu0 %v5072_v63  ;;  %5636 = vmatpush.msrb.mxu1 %v5088_v5  ;;  %v5094_v11 = vld [vmem:[#allocation14 + $0x518] sm:$0xff]  ;;  %v5061_v52 = vld [vmem:[#allocation14 + $0x410] sm:$0xff]  ;;  %v5060_v63 = vld [vmem:[#allocation14 + $0x408] sm:$0xff] }
 0x598   :  { %5656 = vmatpush.msrb.mxu2 %v5104_v32  ;;  %5676 = vmatpush.msrb.mxu3 %v5120_v16  ;;  %v5110_v26 = vld [vmem:[#allocation14 + $0x598] sm:$0xff]  ;;  %v5077_v6 = vld [vmem:[#allocation14 + $0x490] sm:$0xff]  ;;  %v5076_v5 = vld [vmem:[#allocation14 + $0x488] sm:$0xff] }
 0x599   :  { %5617 = vmatpush.msrb.mxu0 %v5071_v45  ;;  %5637 = vmatpush.msrb.mxu1 %v5087_v57  ;;  %v8495_v1 = vld.sshfl [vmem:[#allocation1] sm:$0xff pattern:$0x73625140]  ;;  %v8497_v61 = vld.sshfl [vmem:[#allocation1 + $0x8] sm:$0xff pattern:$0x73625140] }
 0x59a   :  { %5657 = vmatpush.msrb.mxu2 %v5103_v13  ;;  %5677 = vmatpush.msrb.mxu3 %v5119_v47  ;;  %v8499_v53 = vld.sshfl [vmem:[#allocation1 + $0x10] sm:$0xff pattern:$0x73625140]  ;;  %v8501_v43 = vld.sshfl [vmem:[#allocation1 + $0x18] sm:$0xff pattern:$0x73625140] }
 0x59b   :  { %5550 = vmatmul.f32.vlgmr.msra.gmra.mxu0 %v5397_v8  ;;  %5570 = vmatmul.f32.vlgmr.msra.gmra.mxu1 %v5398_v59  ;;  %5411 = vst [vmem:[#allocation1] ss:$4 sm:$0xff] %v4928_v60  ;;  %v5093_v49 = vld [vmem:[#allocation14 + $0x510] sm:$0xff]  ;;  %v5108_v32 = vld [vmem:[#allocation14 + $0x588] sm:$0xff]  ;;  %v5059_v16 = vld [vmem:[#allocation14 + $0x400] sm:$0xff] }
 0x59c   :  { %5590 = vmatmul.f32.vlgmr.msra.gmra.mxu2 %v5399_v36  ;;  %5610 = vmatmul.f32.vlgmr.msra.gmra.mxu3 %v5400_v54  ;;  %v8503_v23 = vld.sshfl [vmem:[#allocation1 + $0x20] sm:$0xff pattern:$0x73625140]  ;;  %v8505_v15 = vld.sshfl [vmem:[#allocation1 + $0x28] sm:$0xff pattern:$0x73625140] }
 0x59d   :  { %5618 = vmatpush.msrb.mxu0 %v5070_v48  ;;  %5638 = vmatpush.msrb.mxu1 %v5086_v25  ;;  %v8507_v42 = vld.sshfl [vmem:[#allocation1 + $0x30] sm:$0xff pattern:$0x73625140]  ;;  %v8509_v4 = vld.sshfl [vmem:[#allocation1 + $0x38] sm:$0xff pattern:$0x73625140] }
 0x59e   :  { %5658 = vmatpush.msrb.mxu2 %v5102_v44  ;;  %5678 = vmatpush.msrb.mxu3 %v5118_v24  ;;  %5412 = vst [vmem:[#allocation1 + $0x20] ss:$4 sm:$0xff] %v4929_v40  ;;  %v5109_v12 = vld [vmem:[#allocation14 + $0x590] sm:$0xff]  ;;  %v5092_v54 = vld [vmem:[#allocation14 + $0x508] sm:$0xff]  ;;  %v5075_v45 = vld [vmem:[#allocation14 + $0x480] sm:$0xff] }
 0x59f   :  { %5619 = vmatpush.msrb.mxu0 %v5069_v38  ;;  %5639 = vmatpush.msrb.mxu1 %v5085_v0  ;;  %v4930_v7 = vld [vmem:[#allocation5 + $0x30] sm:$0xff]  ;;  %v5091_v57 = vld [vmem:[#allocation14 + $0x500] sm:$0xff]  ;;  %v5138_v47 = vld [vmem:[#allocation14 + $0x678] sm:$0xff] }
 0x5a0   :  { %5659 = vmatpush.msrb.mxu2 %v5101_v20  ;;  %5679 = vmatpush.msrb.mxu3 %v5117_v55  ;;  %v5107_v13 = vld [vmem:[#allocation14 + $0x580] sm:$0xff]  ;;  %v5154_v48 = vld [vmem:[#allocation14 + $0x6f8] sm:$0xff]  ;;  %v5137_v60 = vld [vmem:[#allocation14 + $0x670] sm:$0xff] }
 0x5a1   :  { %5620 = vmatpush.msrb.mxu0 %v5068_v35  ;;  %5640 = vmatpush.msrb.mxu1 %v5084_v37  ;;  %v5170_v25 = vld [vmem:[#allocation14 + $0x778] sm:$0xff]  ;;  %v5153_v24 = vld [vmem:[#allocation14 + $0x6f0] sm:$0xff]  ;;  %v5136_v20 = vld [vmem:[#allocation14 + $0x668] sm:$0xff] }
 0x5a2   :  { %5660 = vmatpush.msrb.mxu2 %v5100_v17  ;;  %5680 = vmatpush.msrb.mxu3 %v5116_v34  ;;  %v8511_v8 = vld.sshfl [vmem:[#allocation1] sm:$0xff pattern:$0x73625140]  ;;  %v8513_v27 = vld.sshfl [vmem:[#allocation1 + $0x8] sm:$0xff pattern:$0x73625140] }
 0x5a3   :  { %5621 = vmatpush.msrb.mxu0 %v5067_v58  ;;  %5641 = vmatpush.msrb.mxu1 %v5083_v51  ;;  %v8515_v59 = vld.sshfl [vmem:[#allocation1 + $0x10] sm:$0xff pattern:$0x73625140]  ;;  %v8517_v36 = vld.sshfl [vmem:[#allocation1 + $0x18] sm:$0xff pattern:$0x73625140] }
 0x5a4   :  { %5661 = vmatpush.msrb.mxu2 %v5099_v39  ;;  %5681 = vmatpush.msrb.mxu3 %v5115_v9  ;;  %5421 = vst [vmem:[#allocation1] ss:$4 sm:$0xff] %v4930_v7  ;;  %v5186_v44 = vld [vmem:[#allocation14 + $0x7f8] sm:$0xff]  ;;  %v5169_v38 = vld [vmem:[#allocation14 + $0x770] sm:$0xff]  ;;  %v5152_v55 = vld [vmem:[#allocation14 + $0x6e8] sm:$0xff] }
 0x5a5   :  { %5622 = vmatpush.msrb.mxu0 %v5066_v14  ;;  %5642 = vmatpush.msrb.mxu1 %v5082_v62  ;;  %v5185_v0 = vld [vmem:[#allocation14 + $0x7f0] sm:$0xff]  ;;  %v5135_v35 = vld [vmem:[#allocation14 + $0x660] sm:$0xff]  ;;  %v5134_v17 = vld [vmem:[#allocation14 + $0x658] sm:$0xff] }
 0x5a6   :  { %5662 = vmatpush.msrb.mxu2 %v5098_v31  ;;  %5682 = vmatpush.msrb.mxu3 %v5114_v21  ;;  %v5183_v37 = vld [vmem:[#allocation14 + $0x7e0] sm:$0xff]  ;;  %v5150_v34 = vld [vmem:[#allocation14 + $0x6d8] sm:$0xff]  ;;  %v5133_v39 = vld [vmem:[#allocation14 + $0x650] sm:$0xff] }
 0x5a7   :  { %5623 = vmatpush.msrb.mxu0 %v5065_v46  ;;  %5643 = vmatpush.msrb.mxu1 %v5081_v3  ;;  %v5166_v58 = vld [vmem:[#allocation14 + $0x758] sm:$0xff]  ;;  %v5149_v9 = vld [vmem:[#allocation14 + $0x6d0] sm:$0xff]  ;;  %v5132_v31 = vld [vmem:[#allocation14 + $0x648] sm:$0xff] }
 0x5a8   :  { %5663 = vmatpush.msrb.mxu2 %v5097_v22  ;;  %5683 = vmatpush.msrb.mxu3 %v5113_v18  ;;  %v5182_v51 = vld [vmem:[#allocation14 + $0x7d8] sm:$0xff]  ;;  %v5165_v14 = vld [vmem:[#allocation14 + $0x750] sm:$0xff]  ;;  %v5148_v21 = vld [vmem:[#allocation14 + $0x6c8] sm:$0xff] }
 0x5a9   :  { %5624 = vmatpush.msrb.mxu0 %v5064_v2  ;;  %5644 = vmatpush.msrb.mxu1 %v5080_v41  ;;  %v5181_v62 = vld [vmem:[#allocation14 + $0x7d0] sm:$0xff]  ;;  %v5164_v46 = vld [vmem:[#allocation14 + $0x748] sm:$0xff]  ;;  %v5131_v22 = vld [vmem:[#allocation14 + $0x640] sm:$0xff] }
 0x5aa   :  { %5664 = vmatpush.msrb.mxu2 %v5096_v50  ;;  %5684 = vmatpush.msrb.mxu3 %v5112_v29  ;;  %v5180_v3 = vld [vmem:[#allocation14 + $0x7c8] sm:$0xff]  ;;  %v5147_v18 = vld [vmem:[#allocation14 + $0x6c0] sm:$0xff]  ;;  %v5130_v40 = vld [vmem:[#allocation14 + $0x638] sm:$0xff] }
 0x5ab   :  { %5625 = vmatpush.msrb.mxu0 %v5063_v19  ;;  %5645 = vmatpush.msrb.mxu1 %v5079_v30  ;;  %v5163_v2 = vld [vmem:[#allocation14 + $0x740] sm:$0xff]  ;;  %v5146_v50 = vld [vmem:[#allocation14 + $0x6b8] sm:$0xff]  ;;  %v5129_v30 = vld [vmem:[#allocation14 + $0x630] sm:$0xff] }
 0x5ac   :  { %5665 = vmatpush.msrb.mxu2 %v5095_v28  ;;  %5685 = vmatpush.msrb.mxu3 %v5111_v56  ;;  %v5179_v41 = vld [vmem:[#allocation14 + $0x7c0] sm:$0xff]  ;;  %v5162_v29 = vld [vmem:[#allocation14 + $0x738] sm:$0xff]  ;;  %v5145_v28 = vld [vmem:[#allocation14 + $0x6b0] sm:$0xff] }
 0x5ad   :  { %5626 = vmatpush.msrb.mxu0 %v5062_v33  ;;  %5646 = vmatpush.msrb.mxu1 %v5078_v10  ;;  %v5178_v19 = vld [vmem:[#allocation14 + $0x7b8] sm:$0xff]  ;;  %v5161_v56 = vld [vmem:[#allocation14 + $0x730] sm:$0xff]  ;;  %v5128_v10 = vld [vmem:[#allocation14 + $0x628] sm:$0xff] }
 0x5ae   :  { %5666 = vmatpush.msrb.mxu2 %v5094_v11  ;;  %5686 = vmatpush.msrb.mxu3 %v5110_v26  ;;  %v5177_v33 = vld [vmem:[#allocation14 + $0x7b0] sm:$0xff]  ;;  %v5144_v11 = vld [vmem:[#allocation14 + $0x6a8] sm:$0xff]  ;;  %v5175_v7 = vld [vmem:[#allocation14 + $0x7a0] sm:$0xff] }
 0x5af   :  { %5627 = vmatpush.msrb.mxu0 %v5061_v52  ;;  %5647 = vmatpush.msrb.mxu1 %v5077_v6  ;;  %v5160_v26 = vld [vmem:[#allocation14 + $0x728] sm:$0xff]  ;;  %v5127_v6 = vld [vmem:[#allocation14 + $0x620] sm:$0xff] }
 0x5b0   :  { %5667 = vmatpush.msrb.mxu2 %v5093_v49  ;;  %5687 = vmatpush.msrb.mxu3 %v5109_v12  ;;  %v5176_v52 = vld [vmem:[#allocation14 + $0x7a8] sm:$0xff]  ;;  %v5143_v49 = vld [vmem:[#allocation14 + $0x6a0] sm:$0xff] }
 0x5b1   :  { %5628 = vmatpush.msrb.mxu0 %v5060_v63  ;;  %5648 = vmatpush.msrb.mxu1 %v5076_v5  ;;  %v5159_v12 = vld [vmem:[#allocation14 + $0x720] sm:$0xff]  ;;  %v5126_v63 = vld [vmem:[#allocation14 + $0x618] sm:$0xff] }
 0x5b2   :  { %5668 = vmatpush.msrb.mxu2 %v5092_v54  ;;  %5688 = vmatpush.msrb.mxu3 %v5108_v32  ;;  %v5142_v5 = vld [vmem:[#allocation14 + $0x698] sm:$0xff] }
 0x5b3   :  { %5629 = vmatpush.msrb.mxu0 %v5059_v16  ;;  %5649 = vmatpush.msrb.mxu1 %v5075_v45  ;;  %v5158_v54 = vld [vmem:[#allocation14 + $0x718] sm:$0xff]  ;;  %v5125_v16 = vld [vmem:[#allocation14 + $0x610] sm:$0xff] }
 0x5b4   :  { %5669 = vmatpush.msrb.mxu2 %v5091_v57  ;;  %5689 = vmatpush.msrb.mxu3 %v5107_v13  ;;  %v5174_v32 = vld [vmem:[#allocation14 + $0x798] sm:$0xff]  ;;  %v5141_v45 = vld [vmem:[#allocation14 + $0x690] sm:$0xff] }
 0x5b5   :  { %5630 = vmatmul.f32.vlgmr.msrb.gmra.mxu0 %v8495_v1  ;;  %5650 = vmatmul.f32.vlgmr.msrb.gmra.mxu1 %v8497_v61  ;;  %v5168_v1 = vld [vmem:[#allocation14 + $0x768] sm:$0xff]  ;;  %v5157_v57 = vld [vmem:[#allocation14 + $0x710] sm:$0xff] }
 0x5b6   :  { %5670 = vmatmul.f32.vlgmr.msrb.gmra.mxu2 %v8499_v53  ;;  %5690 = vmatmul.f32.vlgmr.msrb.gmra.mxu3 %v8501_v43  ;;  %v5184_v61 = vld [vmem:[#allocation14 + $0x7e8] sm:$0xff]  ;;  %v5151_v53 = vld [vmem:[#allocation14 + $0x6e0] sm:$0xff]  ;;  %v5173_v13 = vld [vmem:[#allocation14 + $0x790] sm:$0xff] }
 0x5b7   :  { %5694 = vmatpush.msra.mxu0 %v5138_v47  ;;  %5714 = vmatpush.msra.mxu1 %v5154_v48  ;;  %v5167_v43 = vld [vmem:[#allocation14 + $0x760] sm:$0xff]  ;;  %v5124_v47 = vld [vmem:[#allocation14 + $0x608] sm:$0xff] }
 0x5b8   :  { %5734 = vmatpush.msra.mxu2 %v5170_v25  ;;  %5754 = vmatpush.msra.mxu3 %v5186_v44  ;;  %v5140_v48 = vld [vmem:[#allocation14 + $0x688] sm:$0xff] }
 0x5b9   :  { %5695 = vmatpush.msra.mxu0 %v5137_v60  ;;  %5715 = vmatpush.msra.mxu1 %v5153_v24  ;;  %v5156_v25 = vld [vmem:[#allocation14 + $0x708] sm:$0xff]  ;;  %v5123_v60 = vld [vmem:[#allocation14 + $0x600] sm:$0xff] }
 0x5ba   :  { %5735 = vmatpush.msra.mxu2 %v5169_v38  ;;  %5755 = vmatpush.msra.mxu3 %v5185_v0  ;;  %v5172_v44 = vld [vmem:[#allocation14 + $0x788] sm:$0xff]  ;;  %v5139_v24 = vld [vmem:[#allocation14 + $0x680] sm:$0xff] }
 0x5bb   :  { %5696 = vmatpush.msra.mxu0 %v5136_v20  ;;  %5716 = vmatpush.msra.mxu1 %v5152_v55  ;;  %v5155_v38 = vld [vmem:[#allocation14 + $0x700] sm:$0xff]  ;;  %v5202_v20 = vld [vmem:[#allocation14 + $0x878] sm:$0xff] }
 0x5bc   :  { %5736 = vmatpush.msra.mxu2 %v5168_v1  ;;  %5756 = vmatpush.msra.mxu3 %v5184_v61  ;;  %v5171_v0 = vld [vmem:[#allocation14 + $0x780] sm:$0xff]  ;;  %v5218_v55 = vld [vmem:[#allocation14 + $0x8f8] sm:$0xff] }
 0x5bd   :  { %5697 = vmatpush.msra.mxu0 %v5135_v35  ;;  %5717 = vmatpush.msra.mxu1 %v5151_v53  ;;  %v5234_v1 = vld [vmem:[#allocation14 + $0x978] sm:$0xff]  ;;  %v5201_v35 = vld [vmem:[#allocation14 + $0x870] sm:$0xff] }
 0x5be   :  { %5737 = vmatpush.msra.mxu2 %v5167_v43  ;;  %5757 = vmatpush.msra.mxu3 %v5183_v37  ;;  %v5250_v61 = vld [vmem:[#allocation14 + $0x9f8] sm:$0xff]  ;;  %v5217_v53 = vld [vmem:[#allocation14 + $0x8f0] sm:$0xff] }
 0x5bf   :  { %5698 = vmatpush.msra.mxu0 %v5134_v17  ;;  %5718 = vmatpush.msra.mxu1 %v5150_v34  ;;  %v5233_v43 = vld [vmem:[#allocation14 + $0x970] sm:$0xff]  ;;  %v5200_v17 = vld [vmem:[#allocation14 + $0x868] sm:$0xff] }
 0x5c0   :  { %5738 = vmatpush.msra.mxu2 %v5166_v58  ;;  %5758 = vmatpush.msra.mxu3 %v5182_v51  ;;  %v5249_v37 = vld [vmem:[#allocation14 + $0x9f0] sm:$0xff]  ;;  %v5216_v34 = vld [vmem:[#allocation14 + $0x8e8] sm:$0xff]  ;;  %v5199_v58 = vld [vmem:[#allocation14 + $0x860] sm:$0xff] }
 0x5c1   :  { %5699 = vmatpush.msra.mxu0 %v5133_v39  ;;  %5719 = vmatpush.msra.mxu1 %v5149_v9  ;;  %v5247_v51 = vld [vmem:[#allocation14 + $0x9e0] sm:$0xff]  ;;  %v5198_v39 = vld [vmem:[#allocation14 + $0x858] sm:$0xff] }
 0x5c2   :  { %5739 = vmatpush.msra.mxu2 %v5165_v14  ;;  %5759 = vmatpush.msra.mxu3 %v5181_v62  ;;  %v5214_v9 = vld [vmem:[#allocation14 + $0x8d8] sm:$0xff] }
 0x5c3   :  { %5700 = vmatpush.msra.mxu0 %v5132_v31  ;;  %5720 = vmatpush.msra.mxu1 %v5148_v21  ;;  %v5230_v14 = vld [vmem:[#allocation14 + $0x958] sm:$0xff]  ;;  %v5197_v31 = vld [vmem:[#allocation14 + $0x850] sm:$0xff] }
 0x5c4   :  { %5740 = vmatpush.msra.mxu2 %v5164_v46  ;;  %5760 = vmatpush.msra.mxu3 %v5180_v3  ;;  %v5246_v62 = vld [vmem:[#allocation14 + $0x9d8] sm:$0xff]  ;;  %v5213_v21 = vld [vmem:[#allocation14 + $0x8d0] sm:$0xff] }
 0x5c5   :  { %5701 = vmatpush.msra.mxu0 %v5131_v22  ;;  %5721 = vmatpush.msra.mxu1 %v5147_v18  ;;  %v5229_v46 = vld [vmem:[#allocation14 + $0x950] sm:$0xff]  ;;  %v5196_v22 = vld [vmem:[#allocation14 + $0x848] sm:$0xff] }
 0x5c6   :  { %5741 = vmatpush.msra.mxu2 %v5163_v2  ;;  %5761 = vmatpush.msra.mxu3 %v5179_v41  ;;  %v5245_v3 = vld [vmem:[#allocation14 + $0x9d0] sm:$0xff]  ;;  %v5212_v18 = vld [vmem:[#allocation14 + $0x8c8] sm:$0xff] }
 0x5c7   :  { %5702 = vmatpush.msra.mxu0 %v5130_v40  ;;  %5722 = vmatpush.msra.mxu1 %v5146_v50  ;;  %v5228_v2 = vld [vmem:[#allocation14 + $0x948] sm:$0xff]  ;;  %v5195_v40 = vld [vmem:[#allocation14 + $0x840] sm:$0xff] }
 0x5c8   :  { %5742 = vmatpush.msra.mxu2 %v5162_v29  ;;  %5762 = vmatpush.msra.mxu3 %v5178_v19  ;;  %v5244_v41 = vld [vmem:[#allocation14 + $0x9c8] sm:$0xff]  ;;  %v5211_v50 = vld [vmem:[#allocation14 + $0x8c0] sm:$0xff] }
 0x5c9   :  { %5703 = vmatpush.msra.mxu0 %v5129_v30  ;;  %5723 = vmatpush.msra.mxu1 %v5145_v28  ;;  %v5227_v29 = vld [vmem:[#allocation14 + $0x940] sm:$0xff]  ;;  %v5194_v30 = vld [vmem:[#allocation14 + $0x838] sm:$0xff] }
 0x5ca   :  { %5743 = vmatpush.msra.mxu2 %v5161_v56  ;;  %5763 = vmatpush.msra.mxu3 %v5177_v33  ;;  %v5243_v19 = vld [vmem:[#allocation14 + $0x9c0] sm:$0xff]  ;;  %v5210_v28 = vld [vmem:[#allocation14 + $0x8b8] sm:$0xff] }
 0x5cb   :  { %5704 = vmatpush.msra.mxu0 %v5128_v10  ;;  %5724 = vmatpush.msra.mxu1 %v5144_v11  ;;  %v5226_v56 = vld [vmem:[#allocation14 + $0x938] sm:$0xff]  ;;  %v5193_v10 = vld [vmem:[#allocation14 + $0x830] sm:$0xff] }
 0x5cc   :  { %5744 = vmatpush.msra.mxu2 %v5160_v26  ;;  %5764 = vmatpush.msra.mxu3 %v5176_v52  ;;  %v5242_v33 = vld [vmem:[#allocation14 + $0x9b8] sm:$0xff]  ;;  %v5209_v11 = vld [vmem:[#allocation14 + $0x8b0] sm:$0xff] }
 0x5cd   :  { %5705 = vmatpush.msra.mxu0 %v5127_v6  ;;  %5725 = vmatpush.msra.mxu1 %v5143_v49  ;;  %v5225_v26 = vld [vmem:[#allocation14 + $0x930] sm:$0xff]  ;;  %v5192_v6 = vld [vmem:[#allocation14 + $0x828] sm:$0xff] }
 0x5ce   :  { %5745 = vmatpush.msra.mxu2 %v5159_v12  ;;  %5765 = vmatpush.msra.mxu3 %v5175_v7  ;;  %v5241_v52 = vld [vmem:[#allocation14 + $0x9b0] sm:$0xff]  ;;  %v5208_v49 = vld [vmem:[#allocation14 + $0x8a8] sm:$0xff] }
 0x5cf   :  { %5706 = vmatpush.msra.mxu0 %v5126_v63  ;;  %5726 = vmatpush.msra.mxu1 %v5142_v5  ;;  %v5224_v12 = vld [vmem:[#allocation14 + $0x928] sm:$0xff]  ;;  %v5191_v63 = vld [vmem:[#allocation14 + $0x820] sm:$0xff] }
 0x5d0   :  { %5746 = vmatpush.msra.mxu2 %v5158_v54  ;;  %5766 = vmatpush.msra.mxu3 %v5174_v32  ;;  %v5240_v7 = vld [vmem:[#allocation14 + $0x9a8] sm:$0xff]  ;;  %v5207_v5 = vld [vmem:[#allocation14 + $0x8a0] sm:$0xff] }
 0x5d1   :  { %5707 = vmatpush.msra.mxu0 %v5125_v16  ;;  %5727 = vmatpush.msra.mxu1 %v5141_v45  ;;  %v5223_v54 = vld [vmem:[#allocation14 + $0x920] sm:$0xff]  ;;  %v5190_v16 = vld [vmem:[#allocation14 + $0x818] sm:$0xff] }
 0x5d2   :  { %5747 = vmatpush.msra.mxu2 %v5157_v57  ;;  %5767 = vmatpush.msra.mxu3 %v5173_v13  ;;  %v5239_v32 = vld [vmem:[#allocation14 + $0x9a0] sm:$0xff]  ;;  %v5206_v45 = vld [vmem:[#allocation14 + $0x898] sm:$0xff] }
 0x5d3   :  { %5708 = vmatpush.msra.mxu0 %v5124_v47  ;;  %5728 = vmatpush.msra.mxu1 %v5140_v48  ;;  %v5222_v57 = vld [vmem:[#allocation14 + $0x918] sm:$0xff]  ;;  %v5189_v47 = vld [vmem:[#allocation14 + $0x810] sm:$0xff] }
 0x5d4   :  { %5748 = vmatpush.msra.mxu2 %v5156_v25  ;;  %5768 = vmatpush.msra.mxu3 %v5172_v44  ;;  %v5238_v13 = vld [vmem:[#allocation14 + $0x998] sm:$0xff]  ;;  %v5205_v48 = vld [vmem:[#allocation14 + $0x890] sm:$0xff] }
 0x5d5   :  { %5709 = vmatpush.msra.mxu0 %v5123_v60  ;;  %5729 = vmatpush.msra.mxu1 %v5139_v24  ;;  %v5221_v25 = vld [vmem:[#allocation14 + $0x910] sm:$0xff]  ;;  %v5188_v60 = vld [vmem:[#allocation14 + $0x808] sm:$0xff] }
 0x5d6   :  { %5749 = vmatpush.msra.mxu2 %v5155_v38  ;;  %5769 = vmatpush.msra.mxu3 %v5171_v0  ;;  %v5237_v44 = vld [vmem:[#allocation14 + $0x990] sm:$0xff]  ;;  %v5204_v24 = vld [vmem:[#allocation14 + $0x888] sm:$0xff] }
 0x5d7   :  { %5710 = vmatmul.f32.vlgmr.msra.gmra.mxu0 %v8503_v23  ;;  %5730 = vmatmul.f32.vlgmr.msra.gmra.mxu1 %v8505_v15  ;;  %v5232_v23 = vld [vmem:[#allocation14 + $0x968] sm:$0xff] }
 0x5d8   :  { %5750 = vmatmul.f32.vlgmr.msra.gmra.mxu2 %v8507_v42  ;;  %5770 = vmatmul.f32.vlgmr.msra.gmra.mxu3 %v8509_v4  ;;  %v5248_v15 = vld [vmem:[#allocation14 + $0x9e8] sm:$0xff]  ;;  %v5215_v42 = vld [vmem:[#allocation14 + $0x8e0] sm:$0xff] }
 0x5d9   :  { %5774 = vmatpush.msrb.mxu0 %v5202_v20  ;;  %5794 = vmatpush.msrb.mxu1 %v5218_v55  ;;  %v5231_v4 = vld [vmem:[#allocation14 + $0x960] sm:$0xff]  ;;  %v5220_v38 = vld [vmem:[#allocation14 + $0x908] sm:$0xff] }
 0x5da   :  { %5814 = vmatpush.msrb.mxu2 %v5234_v1  ;;  %5834 = vmatpush.msrb.mxu3 %v5250_v61  ;;  %v5236_v0 = vld [vmem:[#allocation14 + $0x988] sm:$0xff]  ;;  %v5187_v20 = vld [vmem:[#allocation14 + $0x800] sm:$0xff] }
 0x5db   :  { %5775 = vmatpush.msrb.mxu0 %v5201_v35  ;;  %5795 = vmatpush.msrb.mxu1 %v5217_v53  ;;  %v5203_v55 = vld [vmem:[#allocation14 + $0x880] sm:$0xff]  ;;  %v5266_v35 = vld [vmem:[#allocation14 + $0xa78] sm:$0xff] }
 0x5dc   :  { %5815 = vmatpush.msrb.mxu2 %v5233_v43  ;;  %5835 = vmatpush.msrb.mxu3 %v5249_v37  ;;  %v5219_v1 = vld [vmem:[#allocation14 + $0x900] sm:$0xff]  ;;  %v5282_v53 = vld [vmem:[#allocation14 + $0xaf8] sm:$0xff] }
 0x5dd   :  { %5776 = vmatpush.msrb.mxu0 %v5200_v17  ;;  %5796 = vmatpush.msrb.mxu1 %v5216_v34  ;;  %v5235_v61 = vld [vmem:[#allocation14 + $0x980] sm:$0xff]  ;;  %v5298_v43 = vld [vmem:[#allocation14 + $0xb78] sm:$0xff]  ;;  %v5265_v17 = vld [vmem:[#allocation14 + $0xa70] sm:$0xff] }
 0x5de   :  { %5816 = vmatpush.msrb.mxu2 %v5232_v23  ;;  %5836 = vmatpush.msrb.mxu3 %v5248_v15  ;;  %v5314_v37 = vld [vmem:[#allocation14 + $0xbf8] sm:$0xff]  ;;  %v5281_v34 = vld [vmem:[#allocation14 + $0xaf0] sm:$0xff] }
 0x5df   :  { %5777 = vmatpush.msrb.mxu0 %v5199_v58  ;;  %5797 = vmatpush.msrb.mxu1 %v5215_v42  ;;  %v5297_v23 = vld [vmem:[#allocation14 + $0xb70] sm:$0xff]  ;;  %v5264_v58 = vld [vmem:[#allocation14 + $0xa68] sm:$0xff] }
 0x5e0   :  { %5817 = vmatpush.msrb.mxu2 %v5231_v4  ;;  %5837 = vmatpush.msrb.mxu3 %v5247_v51  ;;  %v5313_v15 = vld [vmem:[#allocation14 + $0xbf0] sm:$0xff]  ;;  %v5280_v42 = vld [vmem:[#allocation14 + $0xae8] sm:$0xff]  ;;  %v5263_v4 = vld [vmem:[#allocation14 + $0xa60] sm:$0xff] }
 0x5e1   :  { %5778 = vmatpush.msrb.mxu0 %v5198_v39  ;;  %5798 = vmatpush.msrb.mxu1 %v5214_v9  ;;  %v5311_v51 = vld [vmem:[#allocation14 + $0xbe0] sm:$0xff]  ;;  %v5262_v39 = vld [vmem:[#allocation14 + $0xa58] sm:$0xff] }
 0x5e2   :  { %5818 = vmatpush.msrb.mxu2 %v5230_v14  ;;  %5838 = vmatpush.msrb.mxu3 %v5246_v62  ;;  %v5278_v9 = vld [vmem:[#allocation14 + $0xad8] sm:$0xff] }
 0x5e3   :  { %5779 = vmatpush.msrb.mxu0 %v5197_v31  ;;  %5799 = vmatpush.msrb.mxu1 %v5213_v21  ;;  %v5294_v14 = vld [vmem:[#allocation14 + $0xb58] sm:$0xff]  ;;  %v5261_v31 = vld [vmem:[#allocation14 + $0xa50] sm:$0xff] }
 0x5e4   :  { %5819 = vmatpush.msrb.mxu2 %v5229_v46  ;;  %5839 = vmatpush.msrb.mxu3 %v5245_v3  ;;  %v5310_v62 = vld [vmem:[#allocation14 + $0xbd8] sm:$0xff]  ;;  %v5277_v21 = vld [vmem:[#allocation14 + $0xad0] sm:$0xff] }
 0x5e5   :  { %5780 = vmatpush.msrb.mxu0 %v5196_v22  ;;  %5800 = vmatpush.msrb.mxu1 %v5212_v18  ;;  %v5293_v46 = vld [vmem:[#allocation14 + $0xb50] sm:$0xff]  ;;  %v5260_v22 = vld [vmem:[#allocation14 + $0xa48] sm:$0xff] }
 0x5e6   :  { %5820 = vmatpush.msrb.mxu2 %v5228_v2  ;;  %5840 = vmatpush.msrb.mxu3 %v5244_v41  ;;  %v5309_v3 = vld [vmem:[#allocation14 + $0xbd0] sm:$0xff]  ;;  %v5276_v18 = vld [vmem:[#allocation14 + $0xac8] sm:$0xff] }
 0x5e7   :  { %5781 = vmatpush.msrb.mxu0 %v5195_v40  ;;  %5801 = vmatpush.msrb.mxu1 %v5211_v50  ;;  %v5292_v2 = vld [vmem:[#allocation14 + $0xb48] sm:$0xff]  ;;  %v5259_v40 = vld [vmem:[#allocation14 + $0xa40] sm:$0xff] }
 0x5e8   :  { %5821 = vmatpush.msrb.mxu2 %v5227_v29  ;;  %5841 = vmatpush.msrb.mxu3 %v5243_v19  ;;  %v5308_v41 = vld [vmem:[#allocation14 + $0xbc8] sm:$0xff]  ;;  %v5275_v50 = vld [vmem:[#allocation14 + $0xac0] sm:$0xff] }
 0x5e9   :  { %5782 = vmatpush.msrb.mxu0 %v5194_v30  ;;  %5802 = vmatpush.msrb.mxu1 %v5210_v28  ;;  %v5291_v29 = vld [vmem:[#allocation14 + $0xb40] sm:$0xff]  ;;  %v5258_v30 = vld [vmem:[#allocation14 + $0xa38] sm:$0xff] }
 0x5ea   :  { %5822 = vmatpush.msrb.mxu2 %v5226_v56  ;;  %5842 = vmatpush.msrb.mxu3 %v5242_v33  ;;  %v5307_v19 = vld [vmem:[#allocation14 + $0xbc0] sm:$0xff]  ;;  %v5274_v28 = vld [vmem:[#allocation14 + $0xab8] sm:$0xff] }
 0x5eb   :  { %5783 = vmatpush.msrb.mxu0 %v5193_v10  ;;  %5803 = vmatpush.msrb.mxu1 %v5209_v11  ;;  %v5290_v56 = vld [vmem:[#allocation14 + $0xb38] sm:$0xff]  ;;  %v5257_v10 = vld [vmem:[#allocation14 + $0xa30] sm:$0xff] }
 0x5ec   :  { %5823 = vmatpush.msrb.mxu2 %v5225_v26  ;;  %5843 = vmatpush.msrb.mxu3 %v5241_v52  ;;  %v5306_v33 = vld [vmem:[#allocation14 + $0xbb8] sm:$0xff]  ;;  %v5273_v11 = vld [vmem:[#allocation14 + $0xab0] sm:$0xff] }
 0x5ed   :  { %5784 = vmatpush.msrb.mxu0 %v5192_v6  ;;  %5804 = vmatpush.msrb.mxu1 %v5208_v49  ;;  %v5289_v26 = vld [vmem:[#allocation14 + $0xb30] sm:$0xff]  ;;  %v5256_v6 = vld [vmem:[#allocation14 + $0xa28] sm:$0xff] }
 0x5ee   :  { %5824 = vmatpush.msrb.mxu2 %v5224_v12  ;;  %5844 = vmatpush.msrb.mxu3 %v5240_v7  ;;  %v5305_v52 = vld [vmem:[#allocation14 + $0xbb0] sm:$0xff]  ;;  %v5272_v49 = vld [vmem:[#allocation14 + $0xaa8] sm:$0xff] }
 0x5ef   :  { %5785 = vmatpush.msrb.mxu0 %v5191_v63  ;;  %5805 = vmatpush.msrb.mxu1 %v5207_v5  ;;  %v5288_v12 = vld [vmem:[#allocation14 + $0xb28] sm:$0xff]  ;;  %v5255_v63 = vld [vmem:[#allocation14 + $0xa20] sm:$0xff] }
 0x5f0   :  { %5825 = vmatpush.msrb.mxu2 %v5223_v54  ;;  %5845 = vmatpush.msrb.mxu3 %v5239_v32  ;;  %v5304_v7 = vld [vmem:[#allocation14 + $0xba8] sm:$0xff]  ;;  %v5271_v5 = vld [vmem:[#allocation14 + $0xaa0] sm:$0xff] }
 0x5f1   :  { %5786 = vmatpush.msrb.mxu0 %v5190_v16  ;;  %5806 = vmatpush.msrb.mxu1 %v5206_v45  ;;  %v5287_v54 = vld [vmem:[#allocation14 + $0xb20] sm:$0xff]  ;;  %v5254_v16 = vld [vmem:[#allocation14 + $0xa18] sm:$0xff] }
 0x5f2   :  { %5826 = vmatpush.msrb.mxu2 %v5222_v57  ;;  %5846 = vmatpush.msrb.mxu3 %v5238_v13  ;;  %v5303_v32 = vld [vmem:[#allocation14 + $0xba0] sm:$0xff]  ;;  %v5270_v45 = vld [vmem:[#allocation14 + $0xa98] sm:$0xff] }
 0x5f3   :  { %5787 = vmatpush.msrb.mxu0 %v5189_v47  ;;  %5807 = vmatpush.msrb.mxu1 %v5205_v48  ;;  %v5286_v57 = vld [vmem:[#allocation14 + $0xb18] sm:$0xff]  ;;  %v5253_v47 = vld [vmem:[#allocation14 + $0xa10] sm:$0xff] }
 0x5f4   :  { %5827 = vmatpush.msrb.mxu2 %v5221_v25  ;;  %5847 = vmatpush.msrb.mxu3 %v5237_v44  ;;  %v5302_v13 = vld [vmem:[#allocation14 + $0xb98] sm:$0xff]  ;;  %v5269_v48 = vld [vmem:[#allocation14 + $0xa90] sm:$0xff] }
 0x5f5   :  { %5788 = vmatpush.msrb.mxu0 %v5188_v60  ;;  %5808 = vmatpush.msrb.mxu1 %v5204_v24  ;;  %v5285_v25 = vld [vmem:[#allocation14 + $0xb10] sm:$0xff]  ;;  %v5252_v60 = vld [vmem:[#allocation14 + $0xa08] sm:$0xff] }
 0x5f6   :  { %5828 = vmatpush.msrb.mxu2 %v5220_v38  ;;  %5848 = vmatpush.msrb.mxu3 %v5236_v0  ;;  %v5301_v44 = vld [vmem:[#allocation14 + $0xb90] sm:$0xff]  ;;  %v5268_v24 = vld [vmem:[#allocation14 + $0xa88] sm:$0xff] }
 0x5f7   :  { %5789 = vmatpush.msrb.mxu0 %v5187_v20  ;;  %5809 = vmatpush.msrb.mxu1 %v5203_v55  ;;  %v5284_v38 = vld [vmem:[#allocation14 + $0xb08] sm:$0xff]  ;;  %v5251_v20 = vld [vmem:[#allocation14 + $0xa00] sm:$0xff] }
 0x5f8   :  { %5829 = vmatpush.msrb.mxu2 %v5219_v1  ;;  %5849 = vmatpush.msrb.mxu3 %v5235_v61  ;;  %v5300_v0 = vld [vmem:[#allocation14 + $0xb88] sm:$0xff]  ;;  %v5267_v55 = vld [vmem:[#allocation14 + $0xa80] sm:$0xff] }
 0x5f9   :  { %5790 = vmatmul.f32.vlgmr.msrb.gmra.mxu0 %v8511_v8  ;;  %5810 = vmatmul.f32.vlgmr.msrb.gmra.mxu1 %v8513_v27  ;;  %v5296_v8 = vld [vmem:[#allocation14 + $0xb68] sm:$0xff]  ;;  %v5283_v1 = vld [vmem:[#allocation14 + $0xb00] sm:$0xff] }
 0x5fa   :  { %5830 = vmatmul.f32.vlgmr.msrb.gmra.mxu2 %v8515_v59  ;;  %5850 = vmatmul.f32.vlgmr.msrb.gmra.mxu3 %v8517_v36  ;;  %v5312_v27 = vld [vmem:[#allocation14 + $0xbe8] sm:$0xff]  ;;  %v5279_v59 = vld [vmem:[#allocation14 + $0xae0] sm:$0xff] }
 0x5fb   :  { %5854 = vmatpush.msra.mxu0 %v5266_v35  ;;  %5874 = vmatpush.msra.mxu1 %v5282_v53  ;;  %v5295_v36 = vld [vmem:[#allocation14 + $0xb60] sm:$0xff]  ;;  %v5417_v35 = vld.sshfl [vmem:[#allocation1 + $0x20] sm:$0xff pattern:$0x73625140] }
 0x5fc   :  { %5894 = vmatpush.msra.mxu2 %v5298_v43  ;;  %5914 = vmatpush.msra.mxu3 %v5314_v37  ;;  %v5299_v61 = vld [vmem:[#allocation14 + $0xb80] sm:$0xff]  ;;  %v5419_v43 = vld.sshfl [vmem:[#allocation1 + $0x30] sm:$0xff pattern:$0x73625140]  ;;  %v5330_v37 = vld [vmem:[#allocation14 + $0xc78] sm:$0xff] }
 0x5fd   :  { %5855 = vmatpush.msra.mxu0 %v5265_v17  ;;  %5875 = vmatpush.msra.mxu1 %v5281_v34  ;;  %v5418_v53 = vld.sshfl [vmem:[#allocation1 + $0x28] sm:$0xff pattern:$0x73625140]  ;;  %v5346_v17 = vld [vmem:[#allocation14 + $0xcf8] sm:$0xff] }
 0x5fe   :  { %5895 = vmatpush.msra.mxu2 %v5297_v23  ;;  %5915 = vmatpush.msra.mxu3 %v5313_v15  ;;  %v5420_v34 = vld.sshfl [vmem:[#allocation1 + $0x38] sm:$0xff pattern:$0x73625140]  ;;  %v5362_v23 = vld [vmem:[#allocation14 + $0xd78] sm:$0xff] }
 0x5ff   :  { %5856 = vmatpush.msra.mxu0 %v5264_v58  ;;  %5876 = vmatpush.msra.mxu1 %v5280_v42  ;;  %v5378_v15 = vld [vmem:[#allocation14 + $0xdf8] sm:$0xff]  ;;  %v5329_v58 = vld [vmem:[#allocation14 + $0xc70] sm:$0xff] }
 0x600   :  { %5896 = vmatpush.msra.mxu2 %v5296_v8  ;;  %5916 = vmatpush.msra.mxu3 %v5312_v27  ;;  %v5345_v42 = vld [vmem:[#allocation14 + $0xcf0] sm:$0xff] }
 0x601   :  { %5857 = vmatpush.msra.mxu0 %v5263_v4  ;;  %5877 = vmatpush.msra.mxu1 %v5279_v59  ;;  %v5361_v8 = vld [vmem:[#allocation14 + $0xd70] sm:$0xff]  ;;  %v5328_v4 = vld [vmem:[#allocation14 + $0xc68] sm:$0xff] }
 0x602   :  { %5897 = vmatpush.msra.mxu2 %v5295_v36  ;;  %5917 = vmatpush.msra.mxu3 %v5311_v51  ;;  %v5377_v27 = vld [vmem:[#allocation14 + $0xdf0] sm:$0xff]  ;;  %v5344_v59 = vld [vmem:[#allocation14 + $0xce8] sm:$0xff] }
 0x603   :  { %5858 = vmatpush.msra.mxu0 %v5262_v39  ;;  %5878 = vmatpush.msra.mxu1 %v5278_v9  ;;  %v5360_v36 = vld [vmem:[#allocation14 + $0xd68] sm:$0xff]  ;;  %v5327_v39 = vld [vmem:[#allocation14 + $0xc60] sm:$0xff] }
 0x604   :  { %5898 = vmatpush.msra.mxu2 %v5294_v14  ;;  %5918 = vmatpush.msra.mxu3 %v5310_v62  ;;  %v5376_v51 = vld [vmem:[#allocation14 + $0xde8] sm:$0xff]  ;;  %v5343_v9 = vld [vmem:[#allocation14 + $0xce0] sm:$0xff] }
 0x605   :  { %5859 = vmatpush.msra.mxu0 %v5261_v31  ;;  %5879 = vmatpush.msra.mxu1 %v5277_v21  ;;  %v5359_v14 = vld [vmem:[#allocation14 + $0xd60] sm:$0xff]  ;;  %v5326_v31 = vld [vmem:[#allocation14 + $0xc58] sm:$0xff] }
 0x606   :  { %5899 = vmatpush.msra.mxu2 %v5293_v46  ;;  %5919 = vmatpush.msra.mxu3 %v5309_v3  ;;  %v5375_v62 = vld [vmem:[#allocation14 + $0xde0] sm:$0xff]  ;;  %v5342_v21 = vld [vmem:[#allocation14 + $0xcd8] sm:$0xff] }
 0x607   :  { %5860 = vmatpush.msra.mxu0 %v5260_v22  ;;  %5880 = vmatpush.msra.mxu1 %v5276_v18  ;;  %v5358_v46 = vld [vmem:[#allocation14 + $0xd58] sm:$0xff]  ;;  %v5325_v22 = vld [vmem:[#allocation14 + $0xc50] sm:$0xff] }
 0x608   :  { %5900 = vmatpush.msra.mxu2 %v5292_v2  ;;  %5920 = vmatpush.msra.mxu3 %v5308_v41  ;;  %v5374_v3 = vld [vmem:[#allocation14 + $0xdd8] sm:$0xff]  ;;  %v5341_v18 = vld [vmem:[#allocation14 + $0xcd0] sm:$0xff] }
 0x609   :  { %5861 = vmatpush.msra.mxu0 %v5259_v40  ;;  %5881 = vmatpush.msra.mxu1 %v5275_v50  ;;  %v5357_v2 = vld [vmem:[#allocation14 + $0xd50] sm:$0xff]  ;;  %v5324_v40 = vld [vmem:[#allocation14 + $0xc48] sm:$0xff] }
 0x60a   :  { %5901 = vmatpush.msra.mxu2 %v5291_v29  ;;  %5921 = vmatpush.msra.mxu3 %v5307_v19  ;;  %v5373_v41 = vld [vmem:[#allocation14 + $0xdd0] sm:$0xff]  ;;  %v5340_v50 = vld [vmem:[#allocation14 + $0xcc8] sm:$0xff] }
 0x60b   :  { %5862 = vmatpush.msra.mxu0 %v5258_v30  ;;  %5882 = vmatpush.msra.mxu1 %v5274_v28  ;;  %v5356_v29 = vld [vmem:[#allocation14 + $0xd48] sm:$0xff]  ;;  %v5323_v30 = vld [vmem:[#allocation14 + $0xc40] sm:$0xff] }
 0x60c   :  { %5902 = vmatpush.msra.mxu2 %v5290_v56  ;;  %5922 = vmatpush.msra.mxu3 %v5306_v33  ;;  %v5372_v19 = vld [vmem:[#allocation14 + $0xdc8] sm:$0xff]  ;;  %v5339_v28 = vld [vmem:[#allocation14 + $0xcc0] sm:$0xff] }
 0x60d   :  { %5863 = vmatpush.msra.mxu0 %v5257_v10  ;;  %5883 = vmatpush.msra.mxu1 %v5273_v11  ;;  %v5355_v56 = vld [vmem:[#allocation14 + $0xd40] sm:$0xff]  ;;  %v5322_v10 = vld [vmem:[#allocation14 + $0xc38] sm:$0xff] }
 0x60e   :  { %5903 = vmatpush.msra.mxu2 %v5289_v26  ;;  %5923 = vmatpush.msra.mxu3 %v5305_v52  ;;  %v5371_v33 = vld [vmem:[#allocation14 + $0xdc0] sm:$0xff]  ;;  %v5338_v11 = vld [vmem:[#allocation14 + $0xcb8] sm:$0xff] }
 0x60f   :  { %5864 = vmatpush.msra.mxu0 %v5256_v6  ;;  %5884 = vmatpush.msra.mxu1 %v5272_v49  ;;  %v5354_v26 = vld [vmem:[#allocation14 + $0xd38] sm:$0xff]  ;;  %v5321_v6 = vld [vmem:[#allocation14 + $0xc30] sm:$0xff] }
 0x610   :  { %5904 = vmatpush.msra.mxu2 %v5288_v12  ;;  %5924 = vmatpush.msra.mxu3 %v5304_v7  ;;  %v5370_v52 = vld [vmem:[#allocation14 + $0xdb8] sm:$0xff]  ;;  %v5337_v49 = vld [vmem:[#allocation14 + $0xcb0] sm:$0xff] }
 0x611   :  { %5865 = vmatpush.msra.mxu0 %v5255_v63  ;;  %5885 = vmatpush.msra.mxu1 %v5271_v5  ;;  %v5353_v12 = vld [vmem:[#allocation14 + $0xd30] sm:$0xff]  ;;  %v5320_v63 = vld [vmem:[#allocation14 + $0xc28] sm:$0xff] }
 0x612   :  { %5905 = vmatpush.msra.mxu2 %v5287_v54  ;;  %5925 = vmatpush.msra.mxu3 %v5303_v32  ;;  %v5369_v7 = vld [vmem:[#allocation14 + $0xdb0] sm:$0xff]  ;;  %v5336_v5 = vld [vmem:[#allocation14 + $0xca8] sm:$0xff] }
 0x613   :  { %5866 = vmatpush.msra.mxu0 %v5254_v16  ;;  %5886 = vmatpush.msra.mxu1 %v5270_v45  ;;  %v5352_v54 = vld [vmem:[#allocation14 + $0xd28] sm:$0xff]  ;;  %v5319_v16 = vld [vmem:[#allocation14 + $0xc20] sm:$0xff] }
 0x614   :  { %5906 = vmatpush.msra.mxu2 %v5286_v57  ;;  %5926 = vmatpush.msra.mxu3 %v5302_v13  ;;  %v5368_v32 = vld [vmem:[#allocation14 + $0xda8] sm:$0xff]  ;;  %v5335_v45 = vld [vmem:[#allocation14 + $0xca0] sm:$0xff] }
 0x615   :  { %5867 = vmatpush.msra.mxu0 %v5253_v47  ;;  %5887 = vmatpush.msra.mxu1 %v5269_v48  ;;  %v5351_v57 = vld [vmem:[#allocation14 + $0xd20] sm:$0xff]  ;;  %v5318_v47 = vld [vmem:[#allocation14 + $0xc18] sm:$0xff] }
 0x616   :  { %5907 = vmatpush.msra.mxu2 %v5285_v25  ;;  %5927 = vmatpush.msra.mxu3 %v5301_v44  ;;  %v5367_v13 = vld [vmem:[#allocation14 + $0xda0] sm:$0xff]  ;;  %v5334_v48 = vld [vmem:[#allocation14 + $0xc98] sm:$0xff] }
 0x617   :  { %5868 = vmatpush.msra.mxu0 %v5252_v60  ;;  %5888 = vmatpush.msra.mxu1 %v5268_v24  ;;  %v5350_v25 = vld [vmem:[#allocation14 + $0xd18] sm:$0xff]  ;;  %v5317_v60 = vld [vmem:[#allocation14 + $0xc10] sm:$0xff] }
 0x618   :  { %5908 = vmatpush.msra.mxu2 %v5284_v38  ;;  %5928 = vmatpush.msra.mxu3 %v5300_v0  ;;  %v5366_v44 = vld [vmem:[#allocation14 + $0xd98] sm:$0xff]  ;;  %v5333_v24 = vld [vmem:[#allocation14 + $0xc90] sm:$0xff] }
 0x619   :  { %5869 = vmatpush.msra.mxu0 %v5251_v20  ;;  %5889 = vmatpush.msra.mxu1 %v5267_v55  ;;  %v5349_v38 = vld [vmem:[#allocation14 + $0xd10] sm:$0xff]  ;;  %v5316_v20 = vld [vmem:[#allocation14 + $0xc08] sm:$0xff] }
 0x61a   :  { %5909 = vmatpush.msra.mxu2 %v5283_v1  ;;  %5929 = vmatpush.msra.mxu3 %v5299_v61  ;;  %v5365_v0 = vld [vmem:[#allocation14 + $0xd90] sm:$0xff]  ;;  %v5332_v55 = vld [vmem:[#allocation14 + $0xc88] sm:$0xff] }
 0x61b   :  { %5870 = vmatmul.f32.vlgmr.msra.gmra.mxu0 %v5417_v35  ;;  %5890 = vmatmul.f32.vlgmr.msra.gmra.mxu1 %v5418_v53  ;;  %v5348_v1 = vld [vmem:[#allocation14 + $0xd08] sm:$0xff]  ;;  %v5315_v35 = vld [vmem:[#allocation14 + $0xc00] sm:$0xff] }
 0x61c   :  { %5910 = vmatmul.f32.vlgmr.msra.gmra.mxu2 %v5419_v43  ;;  %5930 = vmatmul.f32.vlgmr.msra.gmra.mxu3 %v5420_v34  ;;  %v5364_v61 = vld [vmem:[#allocation14 + $0xd88] sm:$0xff]  ;;  %v5331_v53 = vld [vmem:[#allocation14 + $0xc80] sm:$0xff] }
 0x61d   :  { %5934 = vmatpush.msrb.mxu0 %v5330_v37  ;;  %5954 = vmatpush.msrb.mxu1 %v5346_v17  ;;  %v5347_v43 = vld [vmem:[#allocation14 + $0xd00] sm:$0xff]  ;;  %v5422_v17 = vld.sshfl [vmem:[#allocation1] sm:$0xff pattern:$0x73625140] }
 0x61e   :  { %5974 = vmatpush.msrb.mxu2 %v5362_v23  ;;  %5994 = vmatpush.msrb.mxu3 %v5378_v15  ;;  %v5363_v37 = vld [vmem:[#allocation14 + $0xd80] sm:$0xff]  ;;  %v5424_v23 = vld.sshfl [vmem:[#allocation1 + $0x10] sm:$0xff pattern:$0x73625140] }
 0x61f   :  { %5935 = vmatpush.msrb.mxu0 %v5329_v58  ;;  %5955 = vmatpush.msrb.mxu1 %v5345_v42  ;;  %v5423_v34 = vld.sshfl [vmem:[#allocation1 + $0x8] sm:$0xff pattern:$0x73625140]  ;;  %v5425_v15 = vld.sshfl [vmem:[#allocation1 + $0x18] sm:$0xff pattern:$0x73625140]  ;;  %v5471_v42 = vpop.f32.mrf.mxu0 }
 0x620   :  { %5975 = vmatpush.msrb.mxu2 %v5361_v8  ;;  %5995 = vmatpush.msrb.mxu3 %v5377_v27  ;;  %v6057_v58 = vld [vmem:[#allocation15] ss:$0 sm:$0xff]  ;;  %v5491_v27 = vpop.f32.mrf.mxu1 }
 0x621   :  { %5936 = vmatpush.msrb.mxu0 %v5328_v4  ;;  %5956 = vmatpush.msrb.mxu1 %v5344_v59  ;;  %v5472_v8 = vadd.f32 %v6057_v58, %v5471_v42  ;;  %v5511_v4 = vpop.f32.mrf.mxu2 }
 0x622   :  { %5976 = vmatpush.msrb.mxu2 %v5360_v36  ;;  %5996 = vmatpush.msrb.mxu3 %v5376_v51  ;;  %v5531_v51 = vpop.f32.mrf.mxu3 }
 0x623   :  { %5937 = vmatpush.msrb.mxu0 %v5327_v39  ;;  %5957 = vmatpush.msrb.mxu1 %v5343_v9  ;;  %v5492_v59 = vadd.f32 %v5491_v27, %v5472_v8 }
 0x624   :  { %5977 = vmatpush.msrb.mxu2 %v5359_v14  ;;  %5997 = vmatpush.msrb.mxu3 %v5375_v62 }
 0x625   :  { %5938 = vmatpush.msrb.mxu0 %v5326_v31  ;;  %5958 = vmatpush.msrb.mxu1 %v5342_v21  ;;  %v5512_v36 = vadd.f32 %v5511_v4, %v5492_v59 }
 0x626   :  { %5978 = vmatpush.msrb.mxu2 %v5358_v46  ;;  %5998 = vmatpush.msrb.mxu3 %v5374_v3 }
 0x627   :  { %5939 = vmatpush.msrb.mxu0 %v5325_v22  ;;  %5959 = vmatpush.msrb.mxu1 %v5341_v18  ;;  %v5532_v39 = vadd.f32 %v5531_v51, %v5512_v36  ;;  %v5551_v9 = vpop.f32.mrf.mxu0 }
 0x628   :  { %5979 = vmatpush.msrb.mxu2 %v5357_v2  ;;  %5999 = vmatpush.msrb.mxu3 %v5373_v41  ;;  %v5571_v62 = vpop.f32.mrf.mxu1 }
 0x629   :  { %5940 = vmatpush.msrb.mxu0 %v5324_v40  ;;  %5960 = vmatpush.msrb.mxu1 %v5340_v50  ;;  %v5552_v14 = vadd.f32 %v5551_v9, %v5532_v39  ;;  %v5591_v21 = vpop.f32.mrf.mxu2 }
 0x62a   :  { %5980 = vmatpush.msrb.mxu2 %v5356_v29  ;;  %6000 = vmatpush.msrb.mxu3 %v5372_v19  ;;  %v5611_v3 = vpop.f32.mrf.mxu3 }
 0x62b   :  { %5941 = vmatpush.msrb.mxu0 %v5323_v30  ;;  %5961 = vmatpush.msrb.mxu1 %v5339_v28  ;;  %v5572_v31 = vadd.f32 %v5571_v62, %v5552_v14 }
 0x62c   :  { %5981 = vmatpush.msrb.mxu2 %v5355_v56  ;;  %6001 = vmatpush.msrb.mxu3 %v5371_v33 }
 0x62d   :  { %5942 = vmatpush.msrb.mxu0 %v5322_v10  ;;  %5962 = vmatpush.msrb.mxu1 %v5338_v11  ;;  %v5592_v46 = vadd.f32 %v5591_v21, %v5572_v31 }
 0x62e   :  { %5982 = vmatpush.msrb.mxu2 %v5354_v26  ;;  %6002 = vmatpush.msrb.mxu3 %v5370_v52 }
 0x62f   :  { %5943 = vmatpush.msrb.mxu0 %v5321_v6  ;;  %5963 = vmatpush.msrb.mxu1 %v5337_v49  ;;  %v5612_v18 = vadd.f32 %v5611_v3, %v5592_v46 }
 0x630   :  { %5983 = vmatpush.msrb.mxu2 %v5353_v12  ;;  %6003 = vmatpush.msrb.mxu3 %v5369_v7 }
 0x631   :  { %5944 = vmatpush.msrb.mxu0 %v5320_v63  ;;  %5964 = vmatpush.msrb.mxu1 %v5336_v5 }
 0x632   :  { %5984 = vmatpush.msrb.mxu2 %v5352_v54  ;;  %6004 = vmatpush.msrb.mxu3 %v5368_v32  ;;  %v5631_v22 = vpop.f32.mrf.mxu0  ;;  %v5651_v41 = vpop.f32.mrf.mxu1 }
 0x633   :  { %5945 = vmatpush.msrb.mxu0 %v5319_v16  ;;  %5965 = vmatpush.msrb.mxu1 %v5335_v45  ;;  %v5632_v2 = vadd.f32 %v5631_v22, %v5612_v18 }
 0x634   :  { %5985 = vmatpush.msrb.mxu2 %v5351_v57  ;;  %6005 = vmatpush.msrb.mxu3 %v5367_v13 }
 0x635   :  { %5946 = vmatpush.msrb.mxu0 %v5318_v47  ;;  %5966 = vmatpush.msrb.mxu1 %v5334_v48  ;;  %v5652_v50 = vadd.f32 %v5651_v41, %v5632_v2 }
 0x636   :  { %5986 = vmatpush.msrb.mxu2 %v5350_v25  ;;  %6006 = vmatpush.msrb.mxu3 %v5366_v44 }
 0x637   :  { %5947 = vmatpush.msrb.mxu0 %v5317_v60  ;;  %5967 = vmatpush.msrb.mxu1 %v5333_v24 }
 0x638   :  { %5987 = vmatpush.msrb.mxu2 %v5349_v38  ;;  %6007 = vmatpush.msrb.mxu3 %v5365_v0 }
 0x639   :  { %5948 = vmatpush.msrb.mxu0 %v5316_v20  ;;  %5968 = vmatpush.msrb.mxu1 %v5332_v55  ;;  %v5671_v40 = vpop.f32.mrf.mxu2  ;;  %v5691_v19 = vpop.f32.mrf.mxu3 }
 0x63a   :  { %5988 = vmatpush.msrb.mxu2 %v5348_v1  ;;  %6008 = vmatpush.msrb.mxu3 %v5364_v61  ;;  %v5672_v29 = vadd.f32 %v5671_v40, %v5652_v50 }
 0x63b   :  { %5949 = vmatpush.msrb.mxu0 %v5315_v35  ;;  %5969 = vmatpush.msrb.mxu1 %v5331_v53 }
 0x63c   :  { %5989 = vmatpush.msrb.mxu2 %v5347_v43  ;;  %6009 = vmatpush.msrb.mxu3 %v5363_v37  ;;  %v5692_v28 = vadd.f32 %v5691_v19, %v5672_v29 }
 0x63d   :  { %5950 = vmatmul.f32.vlgmr.msrb.gmra.mxu0 %v5422_v17  ;;  %5970 = vmatmul.f32.vlgmr.msrb.gmra.mxu1 %v5423_v34 }
 0x63e   :  { %5990 = vmatmul.f32.vlgmr.msrb.gmra.mxu2 %v5424_v23  ;;  %6010 = vmatmul.f32.vlgmr.msrb.gmra.mxu3 %v5425_v15 }
 0x654   :  { %v5711_v30 = vpop.f32.mrf.mxu0  ;;  %v5731_v33 = vpop.f32.mrf.mxu1 }
 0x655   :  { %v5712_v56 = vadd.f32 %v5711_v30, %v5692_v28 }
 0x657   :  { %v5732_v11 = vadd.f32 %v5731_v33, %v5712_v56 }
 0x65b   :  { %v5751_v10 = vpop.f32.mrf.mxu2  ;;  %v5771_v52 = vpop.f32.mrf.mxu3 }
 0x65c   :  { %v5752_v26 = vadd.f32 %v5751_v10, %v5732_v11 }
 0x65e   :  { %v5772_v49 = vadd.f32 %v5771_v52, %v5752_v26 }
 0x676   :  { %v5791_v6 = vpop.f32.mrf.mxu0  ;;  %v5811_v7 = vpop.f32.mrf.mxu1 }
 0x677   :  { %v5792_v12 = vadd.f32 %v5791_v6, %v5772_v49 }
 0x679   :  { %v5812_v5 = vadd.f32 %v5811_v7, %v5792_v12 }
 0x67d   :  { %v5831_v63 = vpop.f32.mrf.mxu2  ;;  %v5851_v32 = vpop.f32.mrf.mxu3 }
 0x67e   :  { %v5832_v54 = vadd.f32 %v5831_v63, %v5812_v5 }
 0x680   :  { %v5852_v45 = vadd.f32 %v5851_v32, %v5832_v54 }
 0x698   :  { %v5871_v16 = vpop.f32.mrf.mxu0  ;;  %v5891_v13 = vpop.f32.mrf.mxu1 }
 0x699   :  { %v5872_v57 = vadd.f32 %v5871_v16, %v5852_v45 }
 0x69b   :  { %v5892_v48 = vadd.f32 %v5891_v13, %v5872_v57 }
 0x69f   :  { %v5911_v47 = vpop.f32.mrf.mxu2  ;;  %v5931_v44 = vpop.f32.mrf.mxu3 }
 0x6a0   :  { %v5912_v25 = vadd.f32 %v5911_v47, %v5892_v48 }
 0x6a2   :  { %v5932_v60 = vadd.f32 %v5931_v44, %v5912_v25 }
 0x6ba   :  { %v5951_v24 = vpop.f32.mrf.mxu0  ;;  %v5971_v0 = vpop.f32.mrf.mxu1 }
 0x6bb   :  { %v5952_v38 = vadd.f32 %v5951_v24, %v5932_v60 }
 0x6bd   :  { %v5972_v20 = vadd.f32 %v5971_v0, %v5952_v38 }
 0x6c1   :  { %v5991_v55 = vpop.f32.mrf.mxu2  ;;  %v6011_v61 = vpop.f32.mrf.mxu3 }
 0x6c2   :  { %v5992_v1 = vadd.f32 %v5991_v55, %v5972_v20 }
 0x6c4   :  { %v6012_v35 = vadd.f32 %v6011_v61, %v5992_v1 }
 0x6c6   :  { %vm6038_vm13 = vcmp.lt.s32.totalorder %v6012_v35, 0  ;;  %v6039_v53 = vceil.f32 %v6012_v35  ;;  %v6040_v43 = vfloor.f32 %v6012_v35 }
 0x6c8   :  { %v6041_v37 = vsel %vm6038_vm13, %v6039_v53, %v6040_v43 }
 0x6c9   :  { %v6042_v17 = vcvt.f32.s32 %v6041_v37 }
 0x6cb   :  { %v6015_v34 = vshra.s32 %v6042_v17, 16 }
 0x6cd   :  { %v6016_v23 = vcvt.s32.f32 %v6015_v34 }
 0x6cf   :  { %6017 = vst [vmem:[#allocation17] sm:$0x3] %v6016_v23 }
 0x6d0   :  { %6028 = dma.vmem_to_hbm [thread:$0]  %s6024_s22, 32, %s6026_s24, [#allocation8]  }
 0x6d1   :  { %6268 = dma.done.wait [#allocation8], 32  }
 0x6d2   :  { %6269 = vsyncadd [#allocation8], 4294967264 }
 0x6d3   :  { %6033 = vsyncpa [#allocation7], 1 }
 0x6d4   :  { %6034 = vsyncpa [#allocation10], 1 }
 0x6d5   :  { %6035 = vsyncpa [#allocation13], 1 }
 0x6d6   :  { %6036 = vsyncpa [#allocation16], 1 }
 0x6d7   :  { %6037 = vsyncpa [#allocation8], 1 }

</bundles_post_ra>
